<compile_context>
chip_gen: v6e
topology: v6e:2x2x1
jax: 0.10.0
libtpu: 0.0.40
codegen_flags: <defaults>
</compile_context>

<pallas_src>
import functools

import jax
import jax.numpy as jnp
from jax.experimental import pallas as pl
from jax.experimental.pallas import tpu as pltpu


def _cdiv(a, b):
    return -(-a // b)


def _round_up(a, b):
    return _cdiv(a, b) * b


def _mse_temp_kernel(ys_ref, yt_ref, out_ref, acc_ref, *,
                     inv_scale, tile_rows, steps, total_rows, need_mask):
    p = pl.program_id(0)  # parallel partials (megacore-shardable)
    i = pl.program_id(1)  # reduction axis: row tiles handled by this partial

    @pl.when(i == 0)
    def _():
        acc_ref[...] = jnp.zeros_like(acc_ref)

    ys = ys_ref[...]
    yt = yt_ref[...]
    if ys.dtype != jnp.float32:  # static at trace time; keep math in f32 for bf16 inputs
        ys = ys.astype(jnp.float32)
        yt = yt.astype(jnp.float32)
    d = ys - yt
    sq = d * d

    if need_mask:
        # Ragged last tile and/or fully out-of-range (clamped) tiles: Pallas does not
        # guarantee zeros in block padding, so zero out rows past the end of the array.
        row_start = (p * steps + i) * tile_rows
        row_ids = row_start + jax.lax.broadcasted_iota(jnp.int32, sq.shape, 0)
        sq = jnp.where(row_ids < total_rows, sq, 0.0)

    # Fold the (tile_rows, N) tile into the (8, N) accumulator: leading-axis sum is a
    # pure sequence of vreg adds on the VPU (no XLU), fully hidden under the input DMA.
    acc_ref[...] += jnp.sum(sq.reshape(tile_rows // 8, 8, sq.shape[-1]), axis=0)

    @pl.when(i == pl.num_programs(1) - 1)
    def _():
        # single small cross-lane reduce + one fused scale: 1 / (T^2 * numel)
        out_ref[0, 0] = jnp.sum(acc_ref[...]) * jnp.float32(inv_scale)


def _vmem_limit_bytes():
    """Scoped-VMEM limit per generation: ~half of physical VMEM, in [32, 64] MiB."""
    cap = None
    try:
        cap = getattr(pltpu.get_tpu_info(), "vmem_capacity_bytes", None)
    except Exception:
        cap = None
    if not cap:
        cap = 64 * 1024 * 1024  # conservative default (v7x per-TC physical VMEM)
    return max(32 * 1024 * 1024, min(64 * 1024 * 1024, cap // 2))


def _pick_tiling(M, N, itemsize, budget_bytes, max_tile_rows):
    """Choose (num_partials P, steps per partial, tile_rows, total_row_tiles).

    Live VMEM ~= 2 inputs x 2 pipeline buffers x tile_rows x N x itemsize
                + 8 x N x 4 (fixed f32 accumulator scratch).
    """
    pack = {4: 8, 2: 16, 1: 32}.get(itemsize, 8)  # sublane packing -> row multiple
    per_row_bytes = N * (2 * 2 * itemsize)
    acc_bytes = 8 * N * 4
    fit_rows = max(pack, (budget_bytes - acc_bytes) // per_row_bytes)

    tile_rows = min(int(fit_rows), int(max_tile_rows), _round_up(M, pack))
    tile_rows = max(pack, (tile_rows // pack) * pack)  # multiple of pack (>= 8)

    total_tiles = _cdiv(M, tile_rows)
    # Always split across 2 partials when there is more than one tile, so v7x can shard
    # the row-tile space across both TensorCores; trailing extra tiles are masked.
    P = 2 if total_tiles >= 2 else 1
    steps = _cdiv(total_tiles, P)
    return P, steps, tile_rows, total_tiles


def mse_with_temperature(y_s, y_t, T, *, max_tile_rows=1024,
                         small_input_threshold_bytes=256 * 1024):
    assert y_s.shape == y_t.shape and y_s.ndim == 2
    M, N = y_s.shape
    itemsize = jnp.dtype(y_s.dtype).itemsize
    inv_t2 = 1.0 / (float(T) * float(T))

    # Tiny logits: fixed pallas_call/grid overhead dwarfs the HBM traffic; let XLA fuse.
    if M * N * itemsize <= small_input_threshold_bytes:
        d = y_s.astype(jnp.float32) - y_t.astype(jnp.float32)
        return jnp.mean(d * d) * jnp.float32(inv_t2)

    vmem_limit = _vmem_limit_bytes()
    budget = int(0.75 * vmem_limit)
    P, steps, tile_rows, total_tiles = _pick_tiling(M, N, itemsize, budget, max_tile_rows)
    need_mask = (P * steps * tile_rows) != M
    inv_scale = inv_t2 / float(M * N)

    kernel = functools.partial(
        _mse_temp_kernel,
        inv_scale=inv_scale, tile_rows=tile_rows, steps=steps,
        total_rows=M, need_mask=need_mask)

    if P * steps > total_tiles:
        # Clamp redundant trailing tiles onto the last valid tile (their contribution
        # is zeroed by the in-kernel row mask).
        in_map = lambda p, i: (jnp.minimum(p * steps + i, total_tiles - 1), 0)
    else:
        in_map = lambda p, i: (p * steps + i, 0)

    partials = pl.pallas_call(
        kernel,
        out_shape=jax.ShapeDtypeStruct((P, 1), jnp.float32),
        grid_spec=pltpu.PrefetchScalarGridSpec(
            num_scalar_prefetch=0,
            grid=(P, steps),
            in_specs=[
                pl.BlockSpec((tile_rows, N), in_map),
                pl.BlockSpec((tile_rows, N), in_map),
            ],
            out_specs=pl.BlockSpec(
                (1, 1), lambda p, i: (p, 0), memory_space=pltpu.SMEM
            ),
            scratch_shapes=[pltpu.VMEM((8, N), jnp.float32)],
        ),
        compiler_params=pltpu.CompilerParams(
            # p: independent partials (megacore-shardable); i: reduction into acc_ref
            dimension_semantics=("parallel", "arbitrary"),
            vmem_limit_bytes=vmem_limit,
        ),
        cost_estimate=pl.CostEstimate(
            flops=3 * M * N,
            transcendentals=0,
            bytes_accessed=2 * M * N * itemsize,
        ),
    )(y_s, y_t)

    # each partial is already scaled by 1/(T^2 * numel); summing them gives the mean
    return jnp.sum(partials)


def _ref(y_s, y_t, T):
    ys = y_s.astype(jnp.float32)
    yt = y_t.astype(jnp.float32)
    return jnp.mean(((ys / T) - (yt / T)) ** 2)


if __name__ == "__main__":
    key = jax.random.PRNGKey(0)
    T = 4.0

    # 1) main path: f32, one large block, no masking (batch=512, classes=1000)
    k1, k2, key = (*jax.random.split(key, 2), key)
    a = jax.random.normal(k1, (512, 1000), dtype=jnp.float32)
    b = jax.random.normal(k2, (512, 1000), dtype=jnp.float32)
    out = jax.block_until_ready(mse_with_temperature(a, b, T))
    assert jnp.allclose(out, _ref(a, b, T), rtol=1e-5, atol=1e-7), (out, _ref(a, b, T))

    # 2) ragged rows + 2-way parallel split + clamped trailing tile (M=260, N=257)
    k1, k2, key = (*jax.random.split(key, 2), key)
    a = jax.random.normal(k1, (260, 257), dtype=jnp.float32)
    b = jax.random.normal(k2, (260, 257), dtype=jnp.float32)
    out = jax.block_until_ready(mse_with_temperature(a, b, T, max_tile_rows=64))
    assert jnp.allclose(out, _ref(a, b, T), rtol=1e-5, atol=1e-7), (out, _ref(a, b, T))

    # 3) bf16 inputs, multi-step pipeline on both partials (M=256, N=640)
    k1, k2, key = (*jax.random.split(key, 2), key)
    a = jax.random.normal(k1, (256, 640), dtype=jnp.bfloat16)
    b = jax.random.normal(k2, (256, 640), dtype=jnp.bfloat16)
    out = jax.block_until_ready(mse_with_temperature(a, b, T, max_tile_rows=32))
    assert jnp.allclose(out, _ref(a, b, T), rtol=1e-4, atol=1e-6), (out, _ref(a, b, T))

    # 4) tiny logits take the plain-JAX fast path
    k1, k2, key = (*jax.random.split(key, 2), key)
    a = jax.random.normal(k1, (8, 32), dtype=jnp.float32)
    b = jax.random.normal(k2, (8, 32), dtype=jnp.float32)
    out = jax.block_until_ready(mse_with_temperature(a, b, T))
    assert jnp.allclose(out, _ref(a, b, T), rtol=1e-5, atol=1e-7), (out, _ref(a, b, T))

    print("KERNEL_OK")
</pallas_src>

<mosaic_0001>
module attributes {stable_mosaic.version = 11 : i64} {
  func.func @_mse_temp_kernel(%arg0: i32, %arg1: i32, %arg2: memref<512x1000xf32, #tpu.memory_space<vmem>>, %arg3: memref<512x1000xf32, #tpu.memory_space<vmem>>, %arg4: memref<1x1xf32, #tpu.memory_space<smem>>, %arg5: memref<8x1000xf32, #tpu.memory_space<vmem>>) attributes {dimension_semantics = [#tpu.dimension_semantics<parallel>, #tpu.dimension_semantics<arbitrary>], iteration_bounds = array<i64: 1, 1>, scalar_prefetch = 0 : i64, scratch_operands = 1 : i64, tpu.core_type = #tpu.core_type<tc>, window_params = [{transform_indices = @transform_0, window_bounds = array<i64: 512, 1000>}, {transform_indices = @transform_1, window_bounds = array<i64: 512, 1000>}, {transform_indices = @transform_2, window_bounds = array<i64: 1, 1>}]} {
    %c0_i32 = arith.constant 0 : i32
    %0 = arith.cmpi eq, %arg1, %c0_i32 : i32
    %1 = arith.extui %0 : i1 to i32
    %c0_i32_0 = arith.constant 0 : i32
    %2 = arith.cmpi ne, %1, %c0_i32_0 : i32
    scf.if %2 {
      %cst_10 = arith.constant 0.000000e+00 : f32
      %15 = vector.broadcast %cst_10 : f32 to vector<8x1000xf32>
      %c0_11 = arith.constant 0 : index
      %c0_12 = arith.constant 0 : index
      %16 = vector.load %arg5[%c0_11, %c0_12] : memref<8x1000xf32, #tpu.memory_space<vmem>>, vector<8x1000xf32>
      tpu.vector_store %arg5[%c0_11, %c0_12], %15 {strides = array<i32>} : memref<8x1000xf32, #tpu.memory_space<vmem>>, vector<8x1000xf32>,
    } else {
    }
    %c0 = arith.constant 0 : index
    %c0_1 = arith.constant 0 : index
    %3 = vector.load %arg2[%c0, %c0_1] : memref<512x1000xf32, #tpu.memory_space<vmem>>, vector<512x1000xf32>
    %c0_2 = arith.constant 0 : index
    %c0_3 = arith.constant 0 : index
    %4 = vector.load %arg3[%c0_2, %c0_3] : memref<512x1000xf32, #tpu.memory_space<vmem>>, vector<512x1000xf32>
    %5 = arith.subf %3, %4 : vector<512x1000xf32>
    %6 = arith.mulf %5, %5 : vector<512x1000xf32>
    %c0_4 = arith.constant 0 : index
    %c0_5 = arith.constant 0 : index
    %7 = vector.load %arg5[%c0_4, %c0_5] : memref<8x1000xf32, #tpu.memory_space<vmem>>, vector<8x1000xf32>
    %8 = vector.shape_cast %6 : vector<512x1000xf32> to vector<64x8x1000xf32>
    %cst = arith.constant dense<0.000000e+00> : vector<8x1000xf32>
    %9 = vector.multi_reduction <add>, %8, %cst [0] : vector<64x8x1000xf32> to vector<8x1000xf32>
    %10 = arith.addf %7, %9 : vector<8x1000xf32>
    %c0_6 = arith.constant 0 : index
    %c0_7 = arith.constant 0 : index
    %11 = vector.load %arg5[%c0_6, %c0_7] : memref<8x1000xf32, #tpu.memory_space<vmem>>, vector<8x1000xf32>
    tpu.vector_store %arg5[%c0_6, %c0_7], %10 {strides = array<i32>} : memref<8x1000xf32, #tpu.memory_space<vmem>>, vector<8x1000xf32>,
    %c0_i32_8 = arith.constant 0 : i32
    %12 = arith.cmpi eq, %arg1, %c0_i32_8 : i32
    %13 = arith.extui %12 : i1 to i32
    %c0_i32_9 = arith.constant 0 : i32
    %14 = arith.cmpi ne, %13, %c0_i32_9 : i32
    scf.if %14 {
      %c0_10 = arith.constant 0 : index
      %c0_11 = arith.constant 0 : index
      %15 = vector.load %arg5[%c0_10, %c0_11] : memref<8x1000xf32, #tpu.memory_space<vmem>>, vector<8x1000xf32>
      %16 = vector.shape_cast %15 : vector<8x1000xf32> to vector<1x8x1000xf32>
      %cst_12 = arith.constant dense<0.000000e+00> : vector<1xf32>
      %17 = vector.multi_reduction <add>, %16, %cst_12 [1, 2] : vector<1x8x1000xf32> to vector<1xf32>
      %18 = vector.shape_cast %17 : vector<1xf32> to vector<1x1x1xf32>
      %19 = vector.extract %18[0, 0, 0] : f32 from vector<1x1x1xf32>
      %cst_13 = arith.constant 1.22070318E-7 : f32
      %20 = arith.mulf %19, %cst_13 : f32
      %c0_14 = arith.constant 0 : index
      %c0_15 = arith.constant 0 : index
      %21 = memref.load %arg4[%c0_14, %c0_15] : memref<1x1xf32, #tpu.memory_space<smem>>
      memref.store %20, %arg4[%c0_14, %c0_15] : memref<1x1xf32, #tpu.memory_space<smem>>
    } else {
    }
    return
  }
  func.func @transform_0(%arg0: i32, %arg1: i32) -> (i32, i32) {
    %c1_i32 = arith.constant 1 : i32
    %0 = arith.muli %arg0, %c1_i32 : i32
    %1 = arith.addi %0, %arg1 : i32
    %c0_i32 = arith.constant 0 : i32
    %c0_i32_0 = arith.constant 0 : i32
    return %1, %c0_i32 : i32, i32
  }
  func.func @transform_1(%arg0: i32, %arg1: i32) -> (i32, i32) {
    %c1_i32 = arith.constant 1 : i32
    %0 = arith.muli %arg0, %c1_i32 : i32
    %1 = arith.addi %0, %arg1 : i32
    %c0_i32 = arith.constant 0 : i32
    %c0_i32_0 = arith.constant 0 : i32
    return %1, %c0_i32 : i32, i32
  }
  func.func @transform_2(%arg0: i32, %arg1: i32) -> (i32, i32) {
    %c0_i32 = arith.constant 0 : i32
    %c0_i32_0 = arith.constant 0 : i32
    return %arg0, %c0_i32 : i32, i32
  }
}

</mosaic_0001>

<bundles_post_ra>
// kernel: tpu_custom_call.1
= control target key start
LH: loop header
LB: loop body
LE: loop exit
PB: predicated region body
PF: predicated region fallthrough
CT: control target
= control target key end

     0   :  { %7 = vsyncpa [#allocation4], 0  ;;  %vm73_vm0 = vcmask 850944   ;;  %v2786_v0 = vmov 0.0   ;;  %s2787_s13 = smov [#allocation3]   ;;  %s9298_s0 = inlined_call_operand.vmem [shape: f32[512,1000], index: 0, kind: input, shape index: {}]   ;;  %s9299_s1 = inlined_call_operand.vmem [shape: f32[512,1000], index: 1, kind: input, shape index: {}]   ;;  %s9300_s2 = inlined_call_operand.hbm [shape: f32[1,1], index: 2, kind: output, shape index: {}]  }
   0x1   :  { %74 = vst.msk [vmem:[#allocation2 + $0x38] sm:$0xff] %vm73_vm0, %v2786_v0  ;;  %v75_v1 = vld [vmem:[%s9298_s0] sm:$0xff]  ;;  %v76_v2 = vld [vmem:[%s9298_s0 + $0x8] sm:$0xff]  ;;  %v77_v3 = vld [vmem:[%s9298_s0 + $0x10] sm:$0xff] }
   0x2   :  { %v78_v4 = vld [vmem:[%s9298_s0 + $0x18] sm:$0xff]  ;;  %v79_v5 = vld [vmem:[%s9298_s0 + $0x20] sm:$0xff]  ;;  %v80_v7 = vld [vmem:[%s9298_s0 + $0x28] sm:$0xff] }
   0x3   :  { %v587_v6 = vld [vmem:[%s9299_s1] sm:$0xff]  ;;  %v81_v8 = vld [vmem:[%s9298_s0 + $0x30] sm:$0xff]  ;;  %v82_v9 = vld [vmem:[%s9298_s0 + $0x38] sm:$0xff] }
   0x4   :  { %v83_v10 = vld [vmem:[%s9298_s0 + $0x40] sm:$0xff]  ;;  %v588_v11 = vld [vmem:[%s9299_s1 + $0x8] sm:$0xff]  ;;  %v589_v12 = vld [vmem:[%s9299_s1 + $0x10] sm:$0xff]  ;;  %v1099_v25 = vsub.f32 %v75_v1, %v587_v6 }
   0x5   :  { %v84_v13 = vld [vmem:[%s9298_s0 + $0x48] sm:$0xff]  ;;  %v85_v14 = vld [vmem:[%s9298_s0 + $0x50] sm:$0xff]  ;;  %v86_v15 = vld [vmem:[%s9298_s0 + $0x58] sm:$0xff]  ;;  %v1100_v32 = vsub.f32 %v76_v2, %v588_v11  ;;  %v1101_v39 = vsub.f32 %v77_v3, %v589_v12 }
   0x6   :  { %v590_v16 = vld [vmem:[%s9299_s1 + $0x18] sm:$0xff]  ;;  %v591_v17 = vld [vmem:[%s9299_s1 + $0x20] sm:$0xff]  ;;  %v592_v18 = vld [vmem:[%s9299_s1 + $0x28] sm:$0xff]  ;;  %v2962_v61 = vmul.f32 %v1099_v25, %v1099_v25 }
   0x7   :  { %v87_v19 = vld [vmem:[%s9298_s0 + $0x60] sm:$0xff]  ;;  %v88_v20 = vld [vmem:[%s9298_s0 + $0x68] sm:$0xff]  ;;  %v89_v21 = vld [vmem:[%s9298_s0 + $0x70] sm:$0xff]  ;;  %v1102_v40 = vsub.f32 %v78_v4, %v590_v16  ;;  %v1103_v41 = vsub.f32 %v79_v5, %v591_v17  ;;  %v2930_v48 = vsub.f32 %v80_v7, %v592_v18  ;;  %v2988_v7 = vmul.f32 %v1100_v32, %v1100_v32 }
   0x8   :  { %v593_v22 = vld [vmem:[%s9299_s1 + $0x30] sm:$0xff]  ;;  %v594_v23 = vld [vmem:[%s9299_s1 + $0x38] sm:$0xff]  ;;  %v595_v24 = vld [vmem:[%s9299_s1 + $0x40] sm:$0xff]  ;;  %9301 = vst [vmem:[#allocation6_spill] sm:$0xff] %v2962_v61  ;;  %v3014_v17 = vmul.f32 %v1101_v39, %v1101_v39 }
   0x9   :  { %v90_v26 = vld [vmem:[%s9298_s0 + $0x78] sm:$0xff]  ;;  %v91_v27 = vld [vmem:[%s9298_s0 + $0x80] sm:$0xff]  ;;  %v92_v28 = vld [vmem:[%s9298_s0 + $0x88] sm:$0xff]  ;;  %v2932_v49 = vsub.f32 %v81_v8, %v593_v22  ;;  %v2934_v50 = vsub.f32 %v82_v9, %v594_v23  ;;  %v2936_v51 = vsub.f32 %v83_v10, %v595_v24  ;;  %9302 = vst [vmem:[#allocation7_spill] sm:$0xff] %v2988_v7 }
   0xa   :  { %v596_v29 = vld [vmem:[%s9299_s1 + $0x48] sm:$0xff]  ;;  %v597_v30 = vld [vmem:[%s9299_s1 + $0x50] sm:$0xff]  ;;  %v598_v31 = vld [vmem:[%s9299_s1 + $0x58] sm:$0xff]  ;;  %9303 = vst [vmem:[#allocation8_spill] sm:$0xff] %v3014_v17 }
   0xb   :  { %v93_v33 = vld [vmem:[%s9298_s0 + $0x90] sm:$0xff]  ;;  %v94_v34 = vld [vmem:[%s9298_s0 + $0x98] sm:$0xff]  ;;  %v95_v35 = vld [vmem:[%s9298_s0 + $0xa0] sm:$0xff]  ;;  %v2956_v58 = vsub.f32 %v84_v13, %v596_v29  ;;  %v2958_v59 = vsub.f32 %v85_v14, %v597_v30  ;;  %v2960_v60 = vsub.f32 %v86_v15, %v598_v31 }
   0xc   :  { %v599_v36 = vld [vmem:[%s9299_s1 + $0x60] sm:$0xff]  ;;  %v600_v37 = vld [vmem:[%s9299_s1 + $0x68] sm:$0xff]  ;;  %v601_v38 = vld [vmem:[%s9299_s1 + $0x70] sm:$0xff] }
   0xd   :  { %v96_v42 = vld [vmem:[%s9298_s0 + $0xa8] sm:$0xff]  ;;  %v97_v43 = vld [vmem:[%s9298_s0 + $0xb0] sm:$0xff]  ;;  %v98_v44 = vld [vmem:[%s9298_s0 + $0xb8] sm:$0xff]  ;;  %v2982_v4 = vsub.f32 %v87_v19, %v599_v36  ;;  %v2984_v5 = vsub.f32 %v88_v20, %v600_v37  ;;  %v2986_v6 = vsub.f32 %v89_v21, %v601_v38  ;;  %v3066_v37 = vmul.f32 %v1103_v41, %v1103_v41 }
   0xe   :  { %v602_v45 = vld [vmem:[%s9299_s1 + $0x78] sm:$0xff]  ;;  %v603_v46 = vld [vmem:[%s9299_s1 + $0x80] sm:$0xff]  ;;  %v604_v47 = vld [vmem:[%s9299_s1 + $0x88] sm:$0xff]  ;;  %v3206_v17 = vmul.f32 %v2956_v58, %v2956_v58 }
   0xf   :  { %v99_v52 = vld [vmem:[%s9298_s0 + $0xc0] sm:$0xff]  ;;  %v100_v53 = vld [vmem:[%s9298_s0 + $0xc8] sm:$0xff]  ;;  %v101_v54 = vld [vmem:[%s9298_s0 + $0xd0] sm:$0xff]  ;;  %v3008_v14 = vsub.f32 %v90_v26, %v602_v45  ;;  %v3010_v15 = vsub.f32 %v91_v27, %v603_v46  ;;  %v3012_v16 = vsub.f32 %v92_v28, %v604_v47  ;;  %v3040_v27 = vmul.f32 %v1102_v40, %v1102_v40  ;;  %9305 = vst [vmem:[#allocation10_spill] sm:$0xff] %v3066_v37 }
  0x10   :  { %v605_v55 = vld [vmem:[%s9299_s1 + $0x90] sm:$0xff]  ;;  %v606_v56 = vld [vmem:[%s9299_s1 + $0x98] sm:$0xff]  ;;  %v607_v57 = vld [vmem:[%s9299_s1 + $0xa0] sm:$0xff]  ;;  %v3094_v47 = vmul.f32 %v2930_v48, %v2930_v48  ;;  %9311 = vst [vmem:[#allocation16_spill] sm:$0xff] %v3206_v17  ;;  %v3234_v17 = vmul.f32 %v2958_v59, %v2958_v59 }
  0x11   :  { %v102_v62 = vld [vmem:[%s9298_s0 + $0xd8] sm:$0xff]  ;;  %v103_v63 = vld [vmem:[%s9298_s0 + $0xe0] sm:$0xff]  ;;  %v104_v0 = vld [vmem:[%s9298_s0 + $0xe8] sm:$0xff]  ;;  %v3034_v24 = vsub.f32 %v93_v33, %v605_v55  ;;  %v3036_v25 = vsub.f32 %v94_v34, %v606_v56  ;;  %v3038_v26 = vsub.f32 %v95_v35, %v607_v57  ;;  %9304 = vst [vmem:[#allocation9_spill] sm:$0xff] %v3040_v27 }
  0x12   :  { %v608_v1 = vld [vmem:[%s9299_s1 + $0xa8] sm:$0xff]  ;;  %v609_v2 = vld [vmem:[%s9299_s1 + $0xb0] sm:$0xff]  ;;  %v610_v3 = vld [vmem:[%s9299_s1 + $0xb8] sm:$0xff]  ;;  %9306 = vst [vmem:[#allocation11_spill] sm:$0xff] %v3094_v47 }
  0x13   :  { %v105_v8 = vld [vmem:[%s9298_s0 + $0xf0] sm:$0xff]  ;;  %v106_v9 = vld [vmem:[%s9298_s0 + $0xf8] sm:$0xff]  ;;  %v107_v10 = vld [vmem:[%s9298_s0 + $0x100] sm:$0xff]  ;;  %v3060_v34 = vsub.f32 %v96_v42, %v608_v1  ;;  %v3062_v35 = vsub.f32 %v97_v43, %v609_v2  ;;  %v3064_v36 = vsub.f32 %v98_v44, %v610_v3  ;;  %v3122_v3 = vmul.f32 %v2932_v49, %v2932_v49  ;;  %9314 = vst [vmem:[#allocation19_spill] sm:$0xff] %v3234_v17 }
  0x14   :  { %v611_v11 = vld [vmem:[%s9299_s1 + $0xc0] sm:$0xff]  ;;  %v612_v12 = vld [vmem:[%s9299_s1 + $0xc8] sm:$0xff]  ;;  %v613_v13 = vld [vmem:[%s9299_s1 + $0xd0] sm:$0xff]  ;;  %v3262_v17 = vmul.f32 %v2960_v60, %v2960_v60 }
  0x15   :  { %v108_v18 = vld [vmem:[%s9298_s0 + $0x108] sm:$0xff]  ;;  %v109_v19 = vld [vmem:[%s9298_s0 + $0x110] sm:$0xff]  ;;  %v110_v20 = vld [vmem:[%s9298_s0 + $0x118] sm:$0xff]  ;;  %v3086_v44 = vsub.f32 %v99_v52, %v611_v11  ;;  %v3088_v45 = vsub.f32 %v100_v53, %v612_v12  ;;  %v3090_v46 = vsub.f32 %v101_v54, %v613_v13  ;;  %9307 = vst [vmem:[#allocation12_spill] sm:$0xff] %v3122_v3 }
  0x16   :  { %v614_v21 = vld [vmem:[%s9299_s1 + $0xd8] sm:$0xff]  ;;  %v615_v22 = vld [vmem:[%s9299_s1 + $0xe0] sm:$0xff]  ;;  %v616_v23 = vld [vmem:[%s9299_s1 + $0xe8] sm:$0xff]  ;;  %9317 = vst [vmem:[#allocation22_spill] sm:$0xff] %v3262_v17  ;;  %v3290_v17 = vmul.f32 %v2982_v4, %v2982_v4 }
  0x17   :  { %v111_v28 = vld [vmem:[%s9298_s0 + $0x120] sm:$0xff]  ;;  %v112_v29 = vld [vmem:[%s9298_s0 + $0x128] sm:$0xff]  ;;  %v113_v30 = vld [vmem:[%s9298_s0 + $0x130] sm:$0xff]  ;;  %v3114_v57 = vsub.f32 %v102_v62, %v614_v21  ;;  %v3116_v1 = vsub.f32 %v103_v63, %v615_v22  ;;  %v3118_v2 = vsub.f32 %v104_v0, %v616_v23  ;;  %v3150_v23 = vmul.f32 %v2934_v50, %v2934_v50 }
  0x18   :  { %v617_v31 = vld [vmem:[%s9299_s1 + $0xf0] sm:$0xff]  ;;  %v618_v32 = vld [vmem:[%s9299_s1 + $0xf8] sm:$0xff]  ;;  %v619_v33 = vld [vmem:[%s9299_s1 + $0x100] sm:$0xff]  ;;  %9320 = vst [vmem:[#allocation25_spill] sm:$0xff] %v3290_v17  ;;  %v3318_v17 = vmul.f32 %v2984_v5, %v2984_v5 }
  0x19   :  { %v114_v38 = vld [vmem:[%s9298_s0 + $0x138] sm:$0xff]  ;;  %v115_v39 = vld [vmem:[%s9298_s0 + $0x140] sm:$0xff]  ;;  %v116_v40 = vld [vmem:[%s9298_s0 + $0x148] sm:$0xff]  ;;  %v3142_v13 = vsub.f32 %v105_v8, %v617_v31  ;;  %v3144_v21 = vsub.f32 %v106_v9, %v618_v32  ;;  %v3146_v22 = vsub.f32 %v107_v10, %v619_v33  ;;  %9308 = vst [vmem:[#allocation13_spill] sm:$0xff] %v3150_v23  ;;  %v3178_v23 = vmul.f32 %v2936_v51, %v2936_v51 }
  0x1a   :  { %v620_v42 = vld [vmem:[%s9299_s1 + $0x108] sm:$0xff]  ;;  %v621_v41 = vld [vmem:[%s9299_s1 + $0x110] sm:$0xff]  ;;  %v622_v43 = vld [vmem:[%s9299_s1 + $0x118] sm:$0xff]  ;;  %9323 = vst [vmem:[#allocation28_spill] sm:$0xff] %v3318_v17  ;;  %v3346_v17 = vmul.f32 %v2986_v6, %v2986_v6 }
  0x1b   :  { %v117_v55 = vld [vmem:[%s9298_s0 + $0x150] sm:$0xff]  ;;  %v118_v56 = vld [vmem:[%s9298_s0 + $0x158] sm:$0xff]  ;;  %v119_v52 = vld [vmem:[%s9298_s0 + $0x160] sm:$0xff]  ;;  %v3170_v31 = vsub.f32 %v108_v18, %v620_v42  ;;  %v3172_v32 = vsub.f32 %v109_v19, %v621_v41  ;;  %v3174_v33 = vsub.f32 %v110_v20, %v622_v43  ;;  %9309 = vst [vmem:[#allocation14_spill] sm:$0xff] %v3178_v23 }
  0x1c   :  { %v623_v53 = vld [vmem:[%s9299_s1 + $0x120] sm:$0xff]  ;;  %v624_v48 = vld [vmem:[%s9299_s1 + $0x128] sm:$0xff]  ;;  %v625_v54 = vld [vmem:[%s9299_s1 + $0x130] sm:$0xff]  ;;  %9326 = vst [vmem:[#allocation31_spill] sm:$0xff] %v3346_v17  ;;  %v3374_v17 = vmul.f32 %v3008_v14, %v3008_v14 }
  0x1d   :  { %v120_v11 = vld [vmem:[%s9298_s0 + $0x168] sm:$0xff]  ;;  %v121_v12 = vld [vmem:[%s9298_s0 + $0x170] sm:$0xff]  ;;  %v122_v62 = vld [vmem:[%s9298_s0 + $0x178] sm:$0xff]  ;;  %v3198_v42 = vsub.f32 %v111_v28, %v623_v53  ;;  %v3200_v41 = vsub.f32 %v112_v29, %v624_v48  ;;  %v3202_v43 = vsub.f32 %v113_v30, %v625_v54 }
  0x1e   :  { %v626_v63 = vld [vmem:[%s9299_s1 + $0x138] sm:$0xff]  ;;  %v627_v49 = vld [vmem:[%s9299_s1 + $0x140] sm:$0xff]  ;;  %v628_v0 = vld [vmem:[%s9299_s1 + $0x148] sm:$0xff]  ;;  %9329 = vst [vmem:[#allocation34_spill] sm:$0xff] %v3374_v17  ;;  %v3402_v17 = vmul.f32 %v3010_v15, %v3010_v15 }
  0x1f   :  { %v123_v3 = vld [vmem:[%s9298_s0 + $0x180] sm:$0xff]  ;;  %v124_v47 = vld [vmem:[%s9298_s0 + $0x188] sm:$0xff]  ;;  %v125_v8 = vld [vmem:[%s9298_s0 + $0x190] sm:$0xff]  ;;  %9310 = vst [vmem:[#allocation15_spill] sm:$0xff] %v3202_v43  ;;  %v3226_v53 = vsub.f32 %v114_v38, %v626_v63  ;;  %v3228_v48 = vsub.f32 %v115_v39, %v627_v49  ;;  %v3230_v54 = vsub.f32 %v116_v40, %v628_v0 }
  0x20   :  { %v629_v9 = vld [vmem:[%s9299_s1 + $0x150] sm:$0xff]  ;;  %v630_v50 = vld [vmem:[%s9299_s1 + $0x158] sm:$0xff]  ;;  %v631_v10 = vld [vmem:[%s9299_s1 + $0x160] sm:$0xff]  ;;  %9332 = vst [vmem:[#allocation37_spill] sm:$0xff] %v3402_v17  ;;  %v3430_v17 = vmul.f32 %v3012_v16, %v3012_v16 }
  0x21   :  { %v126_v37 = vld [vmem:[%s9298_s0 + $0x198] sm:$0xff]  ;;  %v127_v27 = vld [vmem:[%s9298_s0 + $0x1a0] sm:$0xff]  ;;  %v128_v18 = vld [vmem:[%s9298_s0 + $0x1a8] sm:$0xff]  ;;  %9312 = vst [vmem:[#allocation17_spill] sm:$0xff] %v3228_v48  ;;  %v3254_v63 = vsub.f32 %v117_v55, %v629_v9  ;;  %v3256_v49 = vsub.f32 %v118_v56, %v630_v50  ;;  %v3258_v0 = vsub.f32 %v119_v52, %v631_v10 }
  0x22   :  { %v632_v19 = vld [vmem:[%s9299_s1 + $0x168] sm:$0xff]  ;;  %v633_v51 = vld [vmem:[%s9299_s1 + $0x170] sm:$0xff]  ;;  %v634_v20 = vld [vmem:[%s9299_s1 + $0x178] sm:$0xff]  ;;  %9313 = vst [vmem:[#allocation18_spill] sm:$0xff] %v3230_v54 }
  0x23   :  { %v129_v7 = vld [vmem:[%s9298_s0 + $0x1b0] sm:$0xff]  ;;  %v130_v23 = vld [vmem:[%s9298_s0 + $0x1b8] sm:$0xff]  ;;  %v131_v28 = vld [vmem:[%s9298_s0 + $0x1c0] sm:$0xff]  ;;  %9315 = vst [vmem:[#allocation20_spill] sm:$0xff] %v3256_v49  ;;  %v3282_v9 = vsub.f32 %v120_v11, %v632_v19  ;;  %v3284_v50 = vsub.f32 %v121_v12, %v633_v51  ;;  %v3286_v10 = vsub.f32 %v122_v62, %v634_v20 }
  0x24   :  { %v635_v29 = vld [vmem:[%s9299_s1 + $0x180] sm:$0xff]  ;;  %v636_v58 = vld [vmem:[%s9299_s1 + $0x188] sm:$0xff]  ;;  %v637_v30 = vld [vmem:[%s9299_s1 + $0x190] sm:$0xff]  ;;  %9316 = vst [vmem:[#allocation21_spill] sm:$0xff] %v3258_v0 }
  0x25   :  { %v132_v61 = vld [vmem:[%s9298_s0 + $0x1c8] sm:$0xff]  ;;  %v133_v43 = vld [vmem:[%s9298_s0 + $0x1d0] sm:$0xff]  ;;  %v134_v38 = vld [vmem:[%s9298_s0 + $0x1d8] sm:$0xff]  ;;  %9318 = vst [vmem:[#allocation23_spill] sm:$0xff] %v3284_v50  ;;  %v3310_v19 = vsub.f32 %v123_v3, %v635_v29  ;;  %v3312_v51 = vsub.f32 %v124_v47, %v636_v58  ;;  %v3314_v20 = vsub.f32 %v125_v8, %v637_v30 }
  0x26   :  { %v638_v39 = vld [vmem:[%s9299_s1 + $0x198] sm:$0xff]  ;;  %v639_v59 = vld [vmem:[%s9299_s1 + $0x1a0] sm:$0xff]  ;;  %v640_v40 = vld [vmem:[%s9299_s1 + $0x1a8] sm:$0xff]  ;;  %9319 = vst [vmem:[#allocation24_spill] sm:$0xff] %v3286_v10 }
  0x27   :  { %v135_v54 = vld [vmem:[%s9298_s0 + $0x1e0] sm:$0xff]  ;;  %v136_v48 = vld [vmem:[%s9298_s0 + $0x1e8] sm:$0xff]  ;;  %v137_v55 = vld [vmem:[%s9298_s0 + $0x1f0] sm:$0xff]  ;;  %9321 = vst [vmem:[#allocation26_spill] sm:$0xff] %v3312_v51  ;;  %v3338_v29 = vsub.f32 %v126_v37, %v638_v39  ;;  %v3340_v58 = vsub.f32 %v127_v27, %v639_v59  ;;  %v3342_v30 = vsub.f32 %v128_v18, %v640_v40 }
  0x28   :  { %v641_v56 = vld [vmem:[%s9299_s1 + $0x1b0] sm:$0xff]  ;;  %v642_v60 = vld [vmem:[%s9299_s1 + $0x1b8] sm:$0xff]  ;;  %v643_v52 = vld [vmem:[%s9299_s1 + $0x1c0] sm:$0xff]  ;;  %9322 = vst [vmem:[#allocation27_spill] sm:$0xff] %v3314_v20 }
  0x29   :  { %v138_v0 = vld [vmem:[%s9298_s0 + $0x1f8] sm:$0xff]  ;;  %v139_v49 = vld [vmem:[%s9298_s0 + $0x200] sm:$0xff]  ;;  %v140_v11 = vld [vmem:[%s9298_s0 + $0x208] sm:$0xff]  ;;  %9324 = vst [vmem:[#allocation29_spill] sm:$0xff] %v3340_v58  ;;  %v3366_v39 = vsub.f32 %v129_v7, %v641_v56  ;;  %v3368_v59 = vsub.f32 %v130_v23, %v642_v60  ;;  %v3370_v40 = vsub.f32 %v131_v28, %v643_v52 }
  0x2a   :  { %v644_v12 = vld [vmem:[%s9299_s1 + $0x1c8] sm:$0xff]  ;;  %v645_v4 = vld [vmem:[%s9299_s1 + $0x1d0] sm:$0xff]  ;;  %v646_v62 = vld [vmem:[%s9299_s1 + $0x1d8] sm:$0xff]  ;;  %9325 = vst [vmem:[#allocation30_spill] sm:$0xff] %v3342_v30 }
  0x2b   :  { %v141_v10 = vld [vmem:[%s9298_s0 + $0x210] sm:$0xff]  ;;  %v142_v50 = vld [vmem:[%s9298_s0 + $0x218] sm:$0xff]  ;;  %v143_v3 = vld [vmem:[%s9298_s0 + $0x220] sm:$0xff]  ;;  %9327 = vst [vmem:[#allocation32_spill] sm:$0xff] %v3368_v59  ;;  %v3394_v56 = vsub.f32 %v132_v61, %v644_v12  ;;  %v3396_v60 = vsub.f32 %v133_v43, %v645_v4  ;;  %v3398_v52 = vsub.f32 %v134_v38, %v646_v62 }
  0x2c   :  { %v647_v47 = vld [vmem:[%s9299_s1 + $0x1e0] sm:$0xff]  ;;  %v648_v5 = vld [vmem:[%s9299_s1 + $0x1e8] sm:$0xff]  ;;  %v649_v8 = vld [vmem:[%s9299_s1 + $0x1f0] sm:$0xff]  ;;  %9328 = vst [vmem:[#allocation33_spill] sm:$0xff] %v3370_v40 }
  0x2d   :  { %v144_v20 = vld [vmem:[%s9298_s0 + $0x228] sm:$0xff]  ;;  %v145_v51 = vld [vmem:[%s9298_s0 + $0x230] sm:$0xff]  ;;  %v146_v37 = vld [vmem:[%s9298_s0 + $0x238] sm:$0xff]  ;;  %9330 = vst [vmem:[#allocation35_spill] sm:$0xff] %v3396_v60  ;;  %v3422_v12 = vsub.f32 %v135_v54, %v647_v47  ;;  %v3424_v4 = vsub.f32 %v136_v48, %v648_v5  ;;  %v3426_v62 = vsub.f32 %v137_v55, %v649_v8 }
  0x2e   :  { %v650_v27 = vld [vmem:[%s9299_s1 + $0x1f8] sm:$0xff]  ;;  %v651_v6 = vld [vmem:[%s9299_s1 + $0x200] sm:$0xff]  ;;  %v652_v18 = vld [vmem:[%s9299_s1 + $0x208] sm:$0xff]  ;;  %9331 = vst [vmem:[#allocation36_spill] sm:$0xff] %v3398_v52 }
  0x2f   :  { %v147_v30 = vld [vmem:[%s9298_s0 + $0x240] sm:$0xff]  ;;  %v148_v58 = vld [vmem:[%s9298_s0 + $0x248] sm:$0xff]  ;;  %v149_v7 = vld [vmem:[%s9298_s0 + $0x250] sm:$0xff]  ;;  %9333 = vst [vmem:[#allocation38_spill] sm:$0xff] %v3424_v4  ;;  %v3450_v47 = vsub.f32 %v138_v0, %v650_v27  ;;  %v3452_v5 = vsub.f32 %v139_v49, %v651_v6  ;;  %v3454_v8 = vsub.f32 %v140_v11, %v652_v18 }
  0x30   :  { %v653_v23 = vld [vmem:[%s9299_s1 + $0x210] sm:$0xff]  ;;  %v654_v14 = vld [vmem:[%s9299_s1 + $0x218] sm:$0xff]  ;;  %v655_v28 = vld [vmem:[%s9299_s1 + $0x220] sm:$0xff]  ;;  %9334 = vst [vmem:[#allocation39_spill] sm:$0xff] %v3426_v62 }
  0x31   :  { %v150_v40 = vld [vmem:[%s9298_s0 + $0x258] sm:$0xff]  ;;  %v151_v59 = vld [vmem:[%s9298_s0 + $0x260] sm:$0xff]  ;;  %v152_v61 = vld [vmem:[%s9298_s0 + $0x268] sm:$0xff]  ;;  %9335 = vst [vmem:[#allocation40_spill] sm:$0xff] %v3430_v17  ;;  %v3458_v17 = vmul.f32 %v3034_v24, %v3034_v24  ;;  %v3478_v27 = vsub.f32 %v141_v10, %v653_v23  ;;  %v3480_v6 = vsub.f32 %v142_v50, %v654_v14  ;;  %v3482_v18 = vsub.f32 %v143_v3, %v655_v28 }
  0x32   :  { %v656_v43 = vld [vmem:[%s9299_s1 + $0x228] sm:$0xff]  ;;  %v657_v15 = vld [vmem:[%s9299_s1 + $0x230] sm:$0xff]  ;;  %v658_v38 = vld [vmem:[%s9299_s1 + $0x238] sm:$0xff]  ;;  %9336 = vst [vmem:[#allocation41_spill] sm:$0xff] %v3452_v5 }
  0x33   :  { %v153_v52 = vld [vmem:[%s9298_s0 + $0x270] sm:$0xff]  ;;  %v154_v60 = vld [vmem:[%s9298_s0 + $0x278] sm:$0xff]  ;;  %v155_v54 = vld [vmem:[%s9298_s0 + $0x280] sm:$0xff]  ;;  %9337 = vst [vmem:[#allocation42_spill] sm:$0xff] %v3454_v8  ;;  %v3506_v23 = vsub.f32 %v144_v20, %v656_v43  ;;  %v3508_v14 = vsub.f32 %v145_v51, %v657_v15  ;;  %v3510_v28 = vsub.f32 %v146_v37, %v658_v38 }
  0x34   :  { %v659_v48 = vld [vmem:[%s9299_s1 + $0x240] sm:$0xff]  ;;  %v660_v16 = vld [vmem:[%s9299_s1 + $0x248] sm:$0xff]  ;;  %v661_v55 = vld [vmem:[%s9299_s1 + $0x250] sm:$0xff]  ;;  %9338 = vst [vmem:[#allocation43_spill] sm:$0xff] %v3458_v17  ;;  %v3486_v17 = vmul.f32 %v3036_v25, %v3036_v25 }
  0x35   :  { %v156_v62 = vld [vmem:[%s9298_s0 + $0x288] sm:$0xff]  ;;  %v157_v4 = vld [vmem:[%s9298_s0 + $0x290] sm:$0xff]  ;;  %v158_v0 = vld [vmem:[%s9298_s0 + $0x298] sm:$0xff]  ;;  %9339 = vst [vmem:[#allocation44_spill] sm:$0xff] %v3480_v6  ;;  %v3534_v43 = vsub.f32 %v147_v30, %v659_v48  ;;  %v3536_v15 = vsub.f32 %v148_v58, %v660_v16  ;;  %v3538_v38 = vsub.f32 %v149_v7, %v661_v55 }
  0x36   :  { %v662_v49 = vld [vmem:[%s9299_s1 + $0x258] sm:$0xff]  ;;  %v663_v24 = vld [vmem:[%s9299_s1 + $0x260] sm:$0xff]  ;;  %v664_v11 = vld [vmem:[%s9299_s1 + $0x268] sm:$0xff]  ;;  %9340 = vst [vmem:[#allocation45_spill] sm:$0xff] %v3482_v18 }
  0x37   :  { %9341 = vst [vmem:[#allocation46_spill] sm:$0xff] %v3486_v17  ;;  %v159_v8 = vld [vmem:[%s9298_s0 + $0x2a0] sm:$0xff]  ;;  %v160_v5 = vld [vmem:[%s9298_s0 + $0x2a8] sm:$0xff]  ;;  %v161_v10 = vld [vmem:[%s9298_s0 + $0x2b0] sm:$0xff]  ;;  %v3514_v17 = vmul.f32 %v3038_v26, %v3038_v26  ;;  %v3562_v48 = vsub.f32 %v150_v40, %v662_v49  ;;  %v3564_v16 = vsub.f32 %v151_v59, %v663_v24  ;;  %v3566_v55 = vsub.f32 %v152_v61, %v664_v11 }
  0x38   :  { %v665_v50 = vld [vmem:[%s9299_s1 + $0x270] sm:$0xff]  ;;  %v666_v25 = vld [vmem:[%s9299_s1 + $0x278] sm:$0xff]  ;;  %v667_v3 = vld [vmem:[%s9299_s1 + $0x280] sm:$0xff]  ;;  %9342 = vst [vmem:[#allocation47_spill] sm:$0xff] %v3508_v14 }
  0x39   :  { %9343 = vst [vmem:[#allocation48_spill] sm:$0xff] %v3510_v28  ;;  %9344 = vst [vmem:[#allocation49_spill] sm:$0xff] %v3514_v17  ;;  %v162_v18 = vld [vmem:[%s9298_s0 + $0x2b8] sm:$0xff]  ;;  %v163_v6 = vld [vmem:[%s9298_s0 + $0x2c0] sm:$0xff]  ;;  %v3542_v17 = vmul.f32 %v3060_v34, %v3060_v34  ;;  %v3590_v49 = vsub.f32 %v153_v52, %v665_v50  ;;  %v3592_v24 = vsub.f32 %v154_v60, %v666_v25 }
  0x3a   :  { %v164_v20 = vld [vmem:[%s9298_s0 + $0x2c8] sm:$0xff]  ;;  %v669_v26 = vld [vmem:[%s9299_s1 + $0x290] sm:$0xff]  ;;  %v670_v37 = vld [vmem:[%s9299_s1 + $0x298] sm:$0xff]  ;;  %9345 = vst [vmem:[#allocation50_spill] sm:$0xff] %v3536_v15  ;;  %v3594_v11 = vsub.f32 %v155_v54, %v667_v3 }
  0x3b   :  { %v668_v51 = vld [vmem:[%s9299_s1 + $0x288] sm:$0xff]  ;;  %9346 = vst [vmem:[#allocation51_spill] sm:$0xff] %v3538_v38  ;;  %9347 = vst [vmem:[#allocation52_spill] sm:$0xff] %v3542_v17  ;;  %v165_v28 = vld [vmem:[%s9298_s0 + $0x2d0] sm:$0xff]  ;;  %v3570_v17 = vmul.f32 %v3062_v35, %v3062_v35  ;;  %v3620_v25 = vsub.f32 %v157_v4, %v669_v26  ;;  %v3622_v3 = vsub.f32 %v158_v0, %v670_v37 }
  0x3c   :  { %v166_v14 = vld [vmem:[%s9298_s0 + $0x2d8] sm:$0xff]  ;;  %v167_v30 = vld [vmem:[%s9298_s0 + $0x2e0] sm:$0xff]  ;;  %v672_v34 = vld [vmem:[%s9299_s1 + $0x2a8] sm:$0xff]  ;;  %9348 = vst [vmem:[#allocation53_spill] sm:$0xff] %v3564_v16  ;;  %v3618_v50 = vsub.f32 %v156_v62, %v668_v51 }
  0x3d   :  { %v671_v58 = vld [vmem:[%s9299_s1 + $0x2a0] sm:$0xff]  ;;  %v673_v7 = vld [vmem:[%s9299_s1 + $0x2b0] sm:$0xff]  ;;  %9349 = vst [vmem:[#allocation54_spill] sm:$0xff] %v3566_v55  ;;  %9350 = vst [vmem:[#allocation55_spill] sm:$0xff] %v3570_v17  ;;  %v3598_v17 = vmul.f32 %v3064_v36, %v3064_v36  ;;  %v3648_v26 = vsub.f32 %v160_v5, %v672_v34 }
  0x3e   :  { %v168_v38 = vld [vmem:[%s9298_s0 + $0x2e8] sm:$0xff]  ;;  %v169_v15 = vld [vmem:[%s9298_s0 + $0x2f0] sm:$0xff]  ;;  %v170_v40 = vld [vmem:[%s9298_s0 + $0x2f8] sm:$0xff]  ;;  %9351 = vst [vmem:[#allocation56_spill] sm:$0xff] %v3592_v24  ;;  %v3646_v51 = vsub.f32 %v159_v8, %v671_v58  ;;  %v3650_v37 = vsub.f32 %v161_v10, %v673_v7 }
  0x3f   :  { %v674_v59 = vld [vmem:[%s9299_s1 + $0x2b8] sm:$0xff]  ;;  %v675_v35 = vld [vmem:[%s9299_s1 + $0x2c0] sm:$0xff]  ;;  %v676_v61 = vld [vmem:[%s9299_s1 + $0x2c8] sm:$0xff]  ;;  %9352 = vst [vmem:[#allocation57_spill] sm:$0xff] %v3594_v11 }
  0x40   :  { %9353 = vst [vmem:[#allocation58_spill] sm:$0xff] %v3598_v17  ;;  %v171_v55 = vld [vmem:[%s9298_s0 + $0x300] sm:$0xff]  ;;  %v172_v16 = vld [vmem:[%s9298_s0 + $0x308] sm:$0xff]  ;;  %v173_v52 = vld [vmem:[%s9298_s0 + $0x310] sm:$0xff]  ;;  %v3626_v17 = vmul.f32 %v3086_v44, %v3086_v44  ;;  %v3674_v58 = vsub.f32 %v162_v18, %v674_v59  ;;  %v3676_v34 = vsub.f32 %v163_v6, %v675_v35  ;;  %v3678_v7 = vsub.f32 %v164_v20, %v676_v61 }
  0x41   :  { %v677_v60 = vld [vmem:[%s9299_s1 + $0x2d0] sm:$0xff]  ;;  %v678_v36 = vld [vmem:[%s9299_s1 + $0x2d8] sm:$0xff]  ;;  %v679_v54 = vld [vmem:[%s9299_s1 + $0x2e0] sm:$0xff]  ;;  %9354 = vst [vmem:[#allocation59_spill] sm:$0xff] %v3620_v25 }
  0x42   :  { %9355 = vst [vmem:[#allocation60_spill] sm:$0xff] %v3622_v3  ;;  %9356 = vst [vmem:[#allocation61_spill] sm:$0xff] %v3626_v17  ;;  %v174_v11 = vld [vmem:[%s9298_s0 + $0x318] sm:$0xff]  ;;  %v175_v24 = vld [vmem:[%s9298_s0 + $0x320] sm:$0xff]  ;;  %v3654_v17 = vmul.f32 %v3088_v45, %v3088_v45  ;;  %v3702_v59 = vsub.f32 %v165_v28, %v677_v60  ;;  %v3704_v35 = vsub.f32 %v166_v14, %v678_v36 }
  0x43   :  { %v176_v62 = vld [vmem:[%s9298_s0 + $0x328] sm:$0xff]  ;;  %v681_v44 = vld [vmem:[%s9299_s1 + $0x2f0] sm:$0xff]  ;;  %v682_v0 = vld [vmem:[%s9299_s1 + $0x2f8] sm:$0xff]  ;;  %9357 = vst [vmem:[#allocation62_spill] sm:$0xff] %v3648_v26  ;;  %v3706_v61 = vsub.f32 %v167_v30, %v679_v54 }
  0x44   :  { %v680_v4 = vld [vmem:[%s9299_s1 + $0x2e8] sm:$0xff]  ;;  %9358 = vst [vmem:[#allocation63_spill] sm:$0xff] %v3650_v37  ;;  %9359 = vst [vmem:[#allocation64_spill] sm:$0xff] %v3654_v17  ;;  %v177_v3 = vld [vmem:[%s9298_s0 + $0x330] sm:$0xff]  ;;  %v3682_v17 = vmul.f32 %v3090_v46, %v3090_v46  ;;  %v3732_v36 = vsub.f32 %v169_v15, %v681_v44  ;;  %v3734_v54 = vsub.f32 %v170_v40, %v682_v0 }
  0x45   :  { %v178_v25 = vld [vmem:[%s9298_s0 + $0x338] sm:$0xff]  ;;  %v179_v8 = vld [vmem:[%s9298_s0 + $0x340] sm:$0xff]  ;;  %v684_v45 = vld [vmem:[%s9299_s1 + $0x308] sm:$0xff]  ;;  %9360 = vst [vmem:[#allocation65_spill] sm:$0xff] %v3676_v34  ;;  %v3730_v60 = vsub.f32 %v168_v38, %v680_v4 }
  0x46   :  { %v683_v5 = vld [vmem:[%s9299_s1 + $0x300] sm:$0xff]  ;;  %v685_v10 = vld [vmem:[%s9299_s1 + $0x310] sm:$0xff]  ;;  %9361 = vst [vmem:[#allocation66_spill] sm:$0xff] %v3678_v7  ;;  %9362 = vst [vmem:[#allocation67_spill] sm:$0xff] %v3682_v17  ;;  %v3710_v17 = vmul.f32 %v3114_v57, %v3114_v57  ;;  %v3760_v44 = vsub.f32 %v172_v16, %v684_v45 }
  0x47   :  { %v180_v37 = vld [vmem:[%s9298_s0 + $0x348] sm:$0xff]  ;;  %v181_v26 = vld [vmem:[%s9298_s0 + $0x350] sm:$0xff]  ;;  %v182_v18 = vld [vmem:[%s9298_s0 + $0x358] sm:$0xff]  ;;  %9363 = vst [vmem:[#allocation68_spill] sm:$0xff] %v3704_v35  ;;  %v3758_v4 = vsub.f32 %v171_v55, %v683_v5  ;;  %v3762_v0 = vsub.f32 %v173_v52, %v685_v10 }
  0x48   :  { %v686_v6 = vld [vmem:[%s9299_s1 + $0x318] sm:$0xff]  ;;  %v687_v46 = vld [vmem:[%s9299_s1 + $0x320] sm:$0xff]  ;;  %v688_v20 = vld [vmem:[%s9299_s1 + $0x328] sm:$0xff]  ;;  %9364 = vst [vmem:[#allocation69_spill] sm:$0xff] %v3706_v61 }
  0x49   :  { %9365 = vst [vmem:[#allocation70_spill] sm:$0xff] %v3710_v17  ;;  %v183_v7 = vld [vmem:[%s9298_s0 + $0x360] sm:$0xff]  ;;  %v184_v34 = vld [vmem:[%s9298_s0 + $0x368] sm:$0xff]  ;;  %v185_v28 = vld [vmem:[%s9298_s0 + $0x370] sm:$0xff]  ;;  %v3738_v17 = vmul.f32 %v3116_v1, %v3116_v1  ;;  %v3786_v5 = vsub.f32 %v174_v11, %v686_v6  ;;  %v3788_v45 = vsub.f32 %v175_v24, %v687_v46  ;;  %v3790_v10 = vsub.f32 %v176_v62, %v688_v20 }
  0x4a   :  { %v689_v14 = vld [vmem:[%s9299_s1 + $0x330] sm:$0xff]  ;;  %v690_v57 = vld [vmem:[%s9299_s1 + $0x338] sm:$0xff]  ;;  %v691_v30 = vld [vmem:[%s9299_s1 + $0x340] sm:$0xff]  ;;  %9366 = vst [vmem:[#allocation71_spill] sm:$0xff] %v3732_v36 }
  0x4b   :  { %9367 = vst [vmem:[#allocation72_spill] sm:$0xff] %v3734_v54  ;;  %9368 = vst [vmem:[#allocation73_spill] sm:$0xff] %v3738_v17  ;;  %v186_v61 = vld [vmem:[%s9298_s0 + $0x378] sm:$0xff]  ;;  %v187_v35 = vld [vmem:[%s9298_s0 + $0x380] sm:$0xff]  ;;  %v3766_v17 = vmul.f32 %v3118_v2, %v3118_v2  ;;  %v3814_v6 = vsub.f32 %v177_v3, %v689_v14  ;;  %v3816_v46 = vsub.f32 %v178_v25, %v690_v57 }
  0x4c   :  { %v188_v38 = vld [vmem:[%s9298_s0 + $0x388] sm:$0xff]  ;;  %v693_v1 = vld [vmem:[%s9299_s1 + $0x350] sm:$0xff]  ;;  %v694_v40 = vld [vmem:[%s9299_s1 + $0x358] sm:$0xff]  ;;  %9369 = vst [vmem:[#allocation74_spill] sm:$0xff] %v3760_v44  ;;  %v3818_v20 = vsub.f32 %v179_v8, %v691_v30 }
  0x4d   :  { %v692_v15 = vld [vmem:[%s9299_s1 + $0x348] sm:$0xff]  ;;  %9370 = vst [vmem:[#allocation75_spill] sm:$0xff] %v3762_v0  ;;  %9371 = vst [vmem:[#allocation76_spill] sm:$0xff] %v3766_v17  ;;  %v189_v54 = vld [vmem:[%s9298_s0 + $0x390] sm:$0xff]  ;;  %v3794_v17 = vmul.f32 %v3142_v13, %v3142_v13  ;;  %v3844_v57 = vsub.f32 %v181_v26, %v693_v1  ;;  %v3846_v30 = vsub.f32 %v182_v18, %v694_v40 }
  0x4e   :  { %v190_v36 = vld [vmem:[%s9298_s0 + $0x398] sm:$0xff]  ;;  %v191_v55 = vld [vmem:[%s9298_s0 + $0x3a0] sm:$0xff]  ;;  %v696_v2 = vld [vmem:[%s9299_s1 + $0x368] sm:$0xff]  ;;  %9372 = vst [vmem:[#allocation77_spill] sm:$0xff] %v3788_v45  ;;  %v3842_v14 = vsub.f32 %v180_v37, %v692_v15 }
  0x4f   :  { %v695_v16 = vld [vmem:[%s9299_s1 + $0x360] sm:$0xff]  ;;  %v697_v52 = vld [vmem:[%s9299_s1 + $0x370] sm:$0xff]  ;;  %9373 = vst [vmem:[#allocation78_spill] sm:$0xff] %v3790_v10  ;;  %9374 = vst [vmem:[#allocation79_spill] sm:$0xff] %v3794_v17  ;;  %v3822_v17 = vmul.f32 %v3144_v21, %v3144_v21  ;;  %v3872_v1 = vsub.f32 %v184_v34, %v696_v2 }
  0x50   :  { %v192_v0 = vld [vmem:[%s9298_s0 + $0x3a8] sm:$0xff]  ;;  %v193_v44 = vld [vmem:[%s9298_s0 + $0x3b0] sm:$0xff]  ;;  %v194_v11 = vld [vmem:[%s9298_s0 + $0x3b8] sm:$0xff]  ;;  %9375 = vst [vmem:[#allocation80_spill] sm:$0xff] %v3816_v46  ;;  %v3870_v15 = vsub.f32 %v183_v7, %v695_v16  ;;  %v3874_v40 = vsub.f32 %v185_v28, %v697_v52 }
  0x51   :  { %v698_v24 = vld [vmem:[%s9299_s1 + $0x378] sm:$0xff]  ;;  %v699_v13 = vld [vmem:[%s9299_s1 + $0x380] sm:$0xff]  ;;  %v700_v62 = vld [vmem:[%s9299_s1 + $0x388] sm:$0xff]  ;;  %9376 = vst [vmem:[#allocation81_spill] sm:$0xff] %v3818_v20 }
  0x52   :  { %9377 = vst [vmem:[#allocation82_spill] sm:$0xff] %v3822_v17  ;;  %v195_v10 = vld [vmem:[%s9298_s0 + $0x3c0] sm:$0xff]  ;;  %v196_v45 = vld [vmem:[%s9298_s0 + $0x3c8] sm:$0xff]  ;;  %v197_v3 = vld [vmem:[%s9298_s0 + $0x3d0] sm:$0xff]  ;;  %v3850_v17 = vmul.f32 %v3146_v22, %v3146_v22  ;;  %v3898_v16 = vsub.f32 %v186_v61, %v698_v24  ;;  %v3900_v2 = vsub.f32 %v187_v35, %v699_v13  ;;  %v3902_v52 = vsub.f32 %v188_v38, %v700_v62 }
  0x53   :  { %v701_v25 = vld [vmem:[%s9299_s1 + $0x390] sm:$0xff]  ;;  %v702_v21 = vld [vmem:[%s9299_s1 + $0x398] sm:$0xff]  ;;  %v703_v8 = vld [vmem:[%s9299_s1 + $0x3a0] sm:$0xff]  ;;  %9378 = vst [vmem:[#allocation83_spill] sm:$0xff] %v3844_v57 }
  0x54   :  { %9379 = vst [vmem:[#allocation84_spill] sm:$0xff] %v3846_v30  ;;  %9380 = vst [vmem:[#allocation85_spill] sm:$0xff] %v3850_v17  ;;  %v198_v20 = vld [vmem:[%s9298_s0 + $0x3d8] sm:$0xff]  ;;  %v199_v46 = vld [vmem:[%s9298_s0 + $0x3e0] sm:$0xff]  ;;  %v3878_v17 = vmul.f32 %v3170_v31, %v3170_v31  ;;  %v3926_v24 = vsub.f32 %v189_v54, %v701_v25  ;;  %v3928_v13 = vsub.f32 %v190_v36, %v702_v21 }
  0x55   :  { %v200_v37 = vld [vmem:[%s9298_s0 + $0x3e8] sm:$0xff]  ;;  %v705_v22 = vld [vmem:[%s9299_s1 + $0x3b0] sm:$0xff]  ;;  %v706_v18 = vld [vmem:[%s9299_s1 + $0x3b8] sm:$0xff]  ;;  %9381 = vst [vmem:[#allocation86_spill] sm:$0xff] %v3872_v1  ;;  %v3930_v62 = vsub.f32 %v191_v55, %v703_v8 }
  0x56   :  { %v704_v26 = vld [vmem:[%s9299_s1 + $0x3a8] sm:$0xff]  ;;  %9382 = vst [vmem:[#allocation87_spill] sm:$0xff] %v3874_v40  ;;  %9383 = vst [vmem:[#allocation88_spill] sm:$0xff] %v3878_v17  ;;  %v201_v30 = vld [vmem:[%s9298_s0 + $0x3f0] sm:$0xff]  ;;  %v3906_v17 = vmul.f32 %v3172_v32, %v3172_v32  ;;  %v3956_v21 = vsub.f32 %v193_v44, %v705_v22  ;;  %v3958_v8 = vsub.f32 %v194_v11, %v706_v18 }
  0x57   :  { %v202_v57 = vld [vmem:[%s9298_s0 + $0x3f8] sm:$0xff]  ;;  %v203_v7 = vld [vmem:[%s9298_s0 + $0x400] sm:$0xff]  ;;  %v708_v31 = vld [vmem:[%s9299_s1 + $0x3c8] sm:$0xff]  ;;  %9384 = vst [vmem:[#allocation89_spill] sm:$0xff] %v3900_v2  ;;  %v3954_v25 = vsub.f32 %v192_v0, %v704_v26 }
  0x58   :  { %v707_v34 = vld [vmem:[%s9299_s1 + $0x3c0] sm:$0xff]  ;;  %v709_v28 = vld [vmem:[%s9299_s1 + $0x3d0] sm:$0xff]  ;;  %9385 = vst [vmem:[#allocation90_spill] sm:$0xff] %v3902_v52  ;;  %9386 = vst [vmem:[#allocation91_spill] sm:$0xff] %v3906_v17  ;;  %v3934_v17 = vmul.f32 %v3174_v33, %v3174_v33  ;;  %v3984_v22 = vsub.f32 %v196_v45, %v708_v31 }
  0x59   :  { %v204_v40 = vld [vmem:[%s9298_s0 + $0x408] sm:$0xff]  ;;  %v205_v1 = vld [vmem:[%s9298_s0 + $0x410] sm:$0xff]  ;;  %v206_v61 = vld [vmem:[%s9298_s0 + $0x418] sm:$0xff]  ;;  %9387 = vst [vmem:[#allocation92_spill] sm:$0xff] %v3928_v13  ;;  %v3982_v26 = vsub.f32 %v195_v10, %v707_v34  ;;  %v3986_v18 = vsub.f32 %v197_v3, %v709_v28 }
  0x5a   :  { %v710_v35 = vld [vmem:[%s9299_s1 + $0x3d8] sm:$0xff]  ;;  %v711_v32 = vld [vmem:[%s9299_s1 + $0x3e0] sm:$0xff]  ;;  %v712_v38 = vld [vmem:[%s9299_s1 + $0x3e8] sm:$0xff]  ;;  %9388 = vst [vmem:[#allocation93_spill] sm:$0xff] %v3930_v62 }
  0x5b   :  { %9389 = vst [vmem:[#allocation94_spill] sm:$0xff] %v3934_v17  ;;  %v207_v52 = vld [vmem:[%s9298_s0 + $0x420] sm:$0xff]  ;;  %v208_v2 = vld [vmem:[%s9298_s0 + $0x428] sm:$0xff]  ;;  %v209_v54 = vld [vmem:[%s9298_s0 + $0x430] sm:$0xff]  ;;  %v3962_v17 = vmul.f32 %v3198_v42, %v3198_v42  ;;  %v4010_v34 = vsub.f32 %v198_v20, %v710_v35  ;;  %v4012_v31 = vsub.f32 %v199_v46, %v711_v32  ;;  %v4014_v28 = vsub.f32 %v200_v37, %v712_v38 }
  0x5c   :  { %v713_v36 = vld [vmem:[%s9299_s1 + $0x3f0] sm:$0xff]  ;;  %v714_v33 = vld [vmem:[%s9299_s1 + $0x3f8] sm:$0xff]  ;;  %v715_v55 = vld [vmem:[%s9299_s1 + $0x400] sm:$0xff]  ;;  %9390 = vst [vmem:[#allocation95_spill] sm:$0xff] %v3956_v21 }
  0x5d   :  { %9391 = vst [vmem:[#allocation96_spill] sm:$0xff] %v3958_v8  ;;  %9392 = vst [vmem:[#allocation97_spill] sm:$0xff] %v3962_v17  ;;  %v210_v62 = vld [vmem:[%s9298_s0 + $0x438] sm:$0xff]  ;;  %v211_v13 = vld [vmem:[%s9298_s0 + $0x440] sm:$0xff]  ;;  %v3990_v17 = vmul.f32 %v3200_v41, %v3200_v41  ;;  %v4038_v35 = vsub.f32 %v201_v30, %v713_v36  ;;  %v4040_v32 = vsub.f32 %v202_v57, %v714_v33 }
  0x5e   :  { %v212_v0 = vld [vmem:[%s9298_s0 + $0x448] sm:$0xff]  ;;  %v717_v42 = vld [vmem:[%s9299_s1 + $0x410] sm:$0xff]  ;;  %v718_v11 = vld [vmem:[%s9299_s1 + $0x418] sm:$0xff]  ;;  %9393 = vst [vmem:[#allocation98_spill] sm:$0xff] %v3982_v26  ;;  %v4042_v38 = vsub.f32 %v203_v7, %v715_v55 }
  0x5f   :  { %v716_v44 = vld [vmem:[%s9299_s1 + $0x408] sm:$0xff]  ;;  %9394 = vst [vmem:[#allocation99_spill] sm:$0xff] %v3984_v22  ;;  %9395 = vst [vmem:[#allocation100_spill] sm:$0xff] %v3986_v18  ;;  %v213_v8 = vld [vmem:[%s9298_s0 + $0x450] sm:$0xff]  ;;  %v4068_v33 = vsub.f32 %v205_v1, %v717_v42  ;;  %v4070_v55 = vsub.f32 %v206_v61, %v718_v11 }
  0x60   :  { %9396 = vst [vmem:[#allocation101_spill] sm:$0xff] %v3990_v17  ;;  %v214_v21 = vld [vmem:[%s9298_s0 + $0x458] sm:$0xff]  ;;  %v215_v10 = vld [vmem:[%s9298_s0 + $0x460] sm:$0xff]  ;;  %v720_v41 = vld [vmem:[%s9299_s1 + $0x428] sm:$0xff]  ;;  %v4066_v36 = vsub.f32 %v204_v40, %v716_v44 }
  0x61   :  { %v719_v45 = vld [vmem:[%s9299_s1 + $0x420] sm:$0xff]  ;;  %v721_v3 = vld [vmem:[%s9299_s1 + $0x430] sm:$0xff]  ;;  %9397 = vst [vmem:[#allocation102_spill] sm:$0xff] %v4012_v31  ;;  %9398 = vst [vmem:[#allocation103_spill] sm:$0xff] %v4014_v28  ;;  %v4096_v11 = vsub.f32 %v208_v2, %v720_v41 }
  0x62   :  { %v9399_v17 = vld [vmem:[#allocation15_spill] sm:$0xff]  ;;  %v217_v26 = vld [vmem:[%s9298_s0 + $0x470] sm:$0xff]  ;;  %v218_v20 = vld [vmem:[%s9298_s0 + $0x478] sm:$0xff]  ;;  %9401 = vst [vmem:[#allocation104_spill] sm:$0xff] %v4038_v35  ;;  %v4094_v42 = vsub.f32 %v207_v52, %v719_v45 }
  0x63   :  { %v4018_v18 = vmul.f32 %v9399_v17, %v9399_v17  ;;  %v216_v22 = vld [vmem:[%s9298_s0 + $0x468] sm:$0xff]  ;;  %v722_v46 = vld [vmem:[%s9299_s1 + $0x438] sm:$0xff]  ;;  %v723_v17 = vld [vmem:[%s9299_s1 + $0x440] sm:$0xff]  ;;  %9402 = vst [vmem:[#allocation105_spill] sm:$0xff] %v4040_v32 }
  0x64   :  { %v724_v37 = vld [vmem:[%s9299_s1 + $0x448] sm:$0xff]  ;;  %9403 = vst [vmem:[#allocation106_spill] sm:$0xff] %v4042_v38  ;;  %v219_v28 = vld [vmem:[%s9298_s0 + $0x480] sm:$0xff]  ;;  %v221_v30 = vld [vmem:[%s9298_s0 + $0x490] sm:$0xff]  ;;  %v4122_v41 = vsub.f32 %v210_v62, %v722_v46 }
  0x65   :  { %9400 = vst [vmem:[#allocation15_spill] sm:$0xff] %v4018_v18  ;;  %v4046_v18 = vmul.f32 %v3226_v53, %v3226_v53  ;;  %v220_v31 = vld [vmem:[%s9298_s0 + $0x488] sm:$0xff]  ;;  %v725_v57 = vld [vmem:[%s9299_s1 + $0x450] sm:$0xff]  ;;  %v726_v53 = vld [vmem:[%s9299_s1 + $0x458] sm:$0xff] }
  0x66   :  { %v727_v7 = vld [vmem:[%s9299_s1 + $0x460] sm:$0xff]  ;;  %9405 = vst [vmem:[#allocation108_spill] sm:$0xff] %v4066_v36  ;;  %9406 = vst [vmem:[#allocation109_spill] sm:$0xff] %v4068_v33  ;;  %v222_v32 = vld [vmem:[%s9298_s0 + $0x498] sm:$0xff]  ;;  %v4150_v46 = vsub.f32 %v213_v8, %v725_v57 }
  0x67   :  { %9404 = vst [vmem:[#allocation107_spill] sm:$0xff] %v4046_v18  ;;  %9407 = vst [vmem:[#allocation110_spill] sm:$0xff] %v4070_v55  ;;  %v9408_v18 = vld [vmem:[#allocation17_spill] sm:$0xff]  ;;  %v223_v35 = vld [vmem:[%s9298_s0 + $0x4a0] sm:$0xff] }
  0x68   :  { %v4074_v38 = vmul.f32 %v9408_v18, %v9408_v18  ;;  %v224_v40 = vld [vmem:[%s9298_s0 + $0x4a8] sm:$0xff]  ;;  %v729_v61 = vld [vmem:[%s9299_s1 + $0x470] sm:$0xff]  ;;  %v730_v44 = vld [vmem:[%s9299_s1 + $0x478] sm:$0xff]  ;;  %9410 = vst [vmem:[#allocation111_spill] sm:$0xff] %v4096_v11  ;;  %v4098_v18 = vsub.f32 %v209_v54, %v721_v3  ;;  %v4124_v3 = vsub.f32 %v211_v13, %v723_v17  ;;  %v4152_v17 = vsub.f32 %v214_v21, %v726_v53 }
  0x69   :  { %v728_v1 = vld [vmem:[%s9299_s1 + $0x468] sm:$0xff]  ;;  %v225_v33 = vld [vmem:[%s9298_s0 + $0x4b0] sm:$0xff]  ;;  %v226_v36 = vld [vmem:[%s9298_s0 + $0x4b8] sm:$0xff]  ;;  %9414 = vst [vmem:[#allocation113_spill] sm:$0xff] %v4122_v41 }
  0x6a   :  { %9409 = vst [vmem:[#allocation17_spill] sm:$0xff] %v4074_v38  ;;  %9411 = vst [vmem:[#allocation112_spill] sm:$0xff] %v4098_v18  ;;  %v9412_v38 = vld [vmem:[#allocation18_spill] sm:$0xff]  ;;  %v732_v54 = vld [vmem:[%s9299_s1 + $0x488] sm:$0xff]  ;;  %v4178_v53 = vsub.f32 %v216_v22, %v728_v1 }
  0x6b   :  { %v4102_v55 = vmul.f32 %v9412_v38, %v9412_v38  ;;  %v227_v52 = vld [vmem:[%s9298_s0 + $0x4c0] sm:$0xff]  ;;  %v733_v45 = vld [vmem:[%s9299_s1 + $0x490] sm:$0xff]  ;;  %9415 = vst [vmem:[#allocation114_spill] sm:$0xff] %v4124_v3  ;;  %v4126_v38 = vsub.f32 %v212_v0, %v724_v37  ;;  %v228_v18 = vld [vmem:[%s9298_s0 + $0x4c8] sm:$0xff]  ;;  %v4154_v37 = vsub.f32 %v215_v10, %v727_v7  ;;  %v4180_v7 = vsub.f32 %v217_v26, %v729_v61 }
  0x6c   :  { %v731_v2 = vld [vmem:[%s9299_s1 + $0x480] sm:$0xff]  ;;  %v229_v11 = vld [vmem:[%s9298_s0 + $0x4d0] sm:$0xff]  ;;  %v230_v62 = vld [vmem:[%s9298_s0 + $0x4d8] sm:$0xff]  ;;  %9418 = vst [vmem:[#allocation117_spill] sm:$0xff] %v4150_v46 }
  0x6d   :  { %9413 = vst [vmem:[#allocation18_spill] sm:$0xff] %v4102_v55  ;;  %9416 = vst [vmem:[#allocation115_spill] sm:$0xff] %v4126_v38  ;;  %v4130_v55 = vmul.f32 %v3254_v63, %v3254_v63  ;;  %v734_v13 = vld [vmem:[%s9299_s1 + $0x498] sm:$0xff]  ;;  %v735_v63 = vld [vmem:[%s9299_s1 + $0x4a0] sm:$0xff]  ;;  %v4206_v61 = vsub.f32 %v219_v28, %v731_v2 }
  0x6e   :  { %v736_v0 = vld [vmem:[%s9299_s1 + $0x4a8] sm:$0xff]  ;;  %9419 = vst [vmem:[#allocation118_spill] sm:$0xff] %v4152_v17  ;;  %9420 = vst [vmem:[#allocation119_spill] sm:$0xff] %v4154_v37  ;;  %v231_v3 = vld [vmem:[%s9298_s0 + $0x4e0] sm:$0xff]  ;;  %v4234_v2 = vsub.f32 %v222_v32, %v734_v13 }
  0x6f   :  { %9417 = vst [vmem:[#allocation116_spill] sm:$0xff] %v4130_v55  ;;  %v9421_v55 = vld [vmem:[#allocation20_spill] sm:$0xff]  ;;  %v232_v41 = vld [vmem:[%s9298_s0 + $0x4e8] sm:$0xff]  ;;  %v738_v10 = vld [vmem:[%s9299_s1 + $0x4b8] sm:$0xff] }
  0x70   :  { %v4158_v38 = vmul.f32 %v9421_v55, %v9421_v55  ;;  %v233_v8 = vld [vmem:[%s9298_s0 + $0x4f0] sm:$0xff]  ;;  %v739_v57 = vld [vmem:[%s9299_s1 + $0x4c0] sm:$0xff]  ;;  %9423 = vst [vmem:[#allocation120_spill] sm:$0xff] %v4180_v7  ;;  %v4182_v55 = vsub.f32 %v218_v20, %v730_v44  ;;  %v234_v17 = vld [vmem:[%s9298_s0 + $0x4f8] sm:$0xff]  ;;  %v4208_v44 = vsub.f32 %v220_v31, %v732_v54  ;;  %v4236_v54 = vsub.f32 %v223_v35, %v735_v63 }
  0x71   :  { %v737_v21 = vld [vmem:[%s9299_s1 + $0x4b0] sm:$0xff]  ;;  %v235_v46 = vld [vmem:[%s9298_s0 + $0x500] sm:$0xff]  ;;  %v236_v22 = vld [vmem:[%s9298_s0 + $0x508] sm:$0xff]  ;;  %9427 = vst [vmem:[#allocation122_spill] sm:$0xff] %v4206_v61 }
  0x72   :  { %9422 = vst [vmem:[#allocation20_spill] sm:$0xff] %v4158_v38  ;;  %9424 = vst [vmem:[#allocation121_spill] sm:$0xff] %v4182_v55  ;;  %v9425_v38 = vld [vmem:[#allocation21_spill] sm:$0xff]  ;;  %v740_v26 = vld [vmem:[%s9299_s1 + $0x4c8] sm:$0xff]  ;;  %v4262_v63 = vsub.f32 %v225_v33, %v737_v21 }
  0x73   :  { %v4186_v37 = vmul.f32 %v9425_v38, %v9425_v38  ;;  %v741_v20 = vld [vmem:[%s9299_s1 + $0x4d0] sm:$0xff]  ;;  %v742_v1 = vld [vmem:[%s9299_s1 + $0x4d8] sm:$0xff]  ;;  %9428 = vst [vmem:[#allocation123_spill] sm:$0xff] %v4208_v44  ;;  %v4210_v38 = vsub.f32 %v221_v30, %v733_v45  ;;  %v239_v28 = vld [vmem:[%s9298_s0 + $0x520] sm:$0xff]  ;;  %v4238_v45 = vsub.f32 %v224_v40, %v736_v0  ;;  %v4264_v0 = vsub.f32 %v226_v36, %v738_v10 }
  0x74   :  { %v237_v55 = vld [vmem:[%s9298_s0 + $0x510] sm:$0xff]  ;;  %v238_v7 = vld [vmem:[%s9298_s0 + $0x518] sm:$0xff]  ;;  %v743_v31 = vld [vmem:[%s9299_s1 + $0x4e0] sm:$0xff]  ;;  %9431 = vst [vmem:[#allocation126_spill] sm:$0xff] %v4234_v2  ;;  %v4290_v10 = vsub.f32 %v228_v18, %v740_v26 }
  0x75   :  { %9426 = vst [vmem:[#allocation21_spill] sm:$0xff] %v4186_v37  ;;  %9429 = vst [vmem:[#allocation124_spill] sm:$0xff] %v4210_v38  ;;  %v4214_v37 = vmul.f32 %v3282_v9, %v3282_v9  ;;  %v744_v9 = vld [vmem:[%s9299_s1 + $0x4e8] sm:$0xff]  ;;  %v745_v30 = vld [vmem:[%s9299_s1 + $0x4f0] sm:$0xff]  ;;  %v4318_v26 = vsub.f32 %v231_v3, %v743_v31 }
  0x76   :  { %9432 = vst [vmem:[#allocation127_spill] sm:$0xff] %v4236_v54  ;;  %9433 = vst [vmem:[#allocation128_spill] sm:$0xff] %v4238_v45  ;;  %v240_v44 = vld [vmem:[%s9298_s0 + $0x528] sm:$0xff]  ;;  %v241_v61 = vld [vmem:[%s9298_s0 + $0x530] sm:$0xff] }
  0x77   :  { %9430 = vst [vmem:[#allocation125_spill] sm:$0xff] %v4214_v37  ;;  %v9434_v37 = vld [vmem:[#allocation23_spill] sm:$0xff]  ;;  %v242_v32 = vld [vmem:[%s9298_s0 + $0x538] sm:$0xff]  ;;  %v747_v40 = vld [vmem:[%s9299_s1 + $0x500] sm:$0xff] }
  0x78   :  { %v4242_v38 = vmul.f32 %v9434_v37, %v9434_v37  ;;  %v746_v35 = vld [vmem:[%s9299_s1 + $0x4f8] sm:$0xff]  ;;  %v748_v13 = vld [vmem:[%s9299_s1 + $0x508] sm:$0xff]  ;;  %9436 = vst [vmem:[#allocation129_spill] sm:$0xff] %v4264_v0  ;;  %v4266_v37 = vsub.f32 %v227_v52, %v739_v57  ;;  %v243_v54 = vld [vmem:[%s9298_s0 + $0x540] sm:$0xff]  ;;  %v4292_v57 = vsub.f32 %v229_v11, %v741_v20  ;;  %v4320_v20 = vsub.f32 %v232_v41, %v744_v9 }
  0x79   :  { %v244_v2 = vld [vmem:[%s9298_s0 + $0x548] sm:$0xff]  ;;  %v245_v33 = vld [vmem:[%s9298_s0 + $0x550] sm:$0xff]  ;;  %v750_v52 = vld [vmem:[%s9299_s1 + $0x518] sm:$0xff]  ;;  %9440 = vst [vmem:[#allocation131_spill] sm:$0xff] %v4290_v10  ;;  %v4346_v9 = vsub.f32 %v234_v17, %v746_v35 }
  0x7a   :  { %9435 = vst [vmem:[#allocation23_spill] sm:$0xff] %v4242_v38  ;;  %9437 = vst [vmem:[#allocation130_spill] sm:$0xff] %v4266_v37  ;;  %v9438_v38 = vld [vmem:[#allocation24_spill] sm:$0xff]  ;;  %v751_v21 = vld [vmem:[%s9299_s1 + $0x520] sm:$0xff] }
  0x7b   :  { %v4270_v45 = vmul.f32 %v9438_v38, %v9438_v38  ;;  %v749_v36 = vld [vmem:[%s9299_s1 + $0x510] sm:$0xff]  ;;  %9441 = vst [vmem:[#allocation132_spill] sm:$0xff] %v4292_v57  ;;  %v4294_v38 = vsub.f32 %v230_v62, %v742_v1  ;;  %v246_v37 = vld [vmem:[%s9298_s0 + $0x558] sm:$0xff]  ;;  %v247_v0 = vld [vmem:[%s9298_s0 + $0x560] sm:$0xff]  ;;  %v4322_v1 = vsub.f32 %v233_v8, %v745_v30  ;;  %v4348_v30 = vsub.f32 %v235_v46, %v747_v40 }
  0x7c   :  { %v248_v18 = vld [vmem:[%s9298_s0 + $0x568] sm:$0xff]  ;;  %v754_v62 = vld [vmem:[%s9299_s1 + $0x538] sm:$0xff]  ;;  %9444 = vst [vmem:[#allocation135_spill] sm:$0xff] %v4318_v26  ;;  %9445 = vst [vmem:[#allocation136_spill] sm:$0xff] %v4320_v20  ;;  %v4374_v40 = vsub.f32 %v237_v55, %v749_v36 }
  0x7d   :  { %9439 = vst [vmem:[#allocation24_spill] sm:$0xff] %v4270_v45  ;;  %9442 = vst [vmem:[#allocation133_spill] sm:$0xff] %v4294_v38  ;;  %v4298_v45 = vmul.f32 %v3310_v19, %v3310_v19  ;;  %v752_v11 = vld [vmem:[%s9299_s1 + $0x528] sm:$0xff]  ;;  %v753_v19 = vld [vmem:[%s9299_s1 + $0x530] sm:$0xff] }
  0x7e   :  { %9446 = vst [vmem:[#allocation137_spill] sm:$0xff] %v4322_v1  ;;  %v249_v57 = vld [vmem:[%s9298_s0 + $0x570] sm:$0xff]  ;;  %v250_v10 = vld [vmem:[%s9298_s0 + $0x578] sm:$0xff]  ;;  %v251_v3 = vld [vmem:[%s9298_s0 + $0x580] sm:$0xff]  ;;  %v4402_v36 = vsub.f32 %v240_v44, %v752_v11 }
  0x7f   :  { %9443 = vst [vmem:[#allocation134_spill] sm:$0xff] %v4298_v45  ;;  %v9447_v45 = vld [vmem:[#allocation26_spill] sm:$0xff]  ;;  %v756_v8 = vld [vmem:[%s9299_s1 + $0x548] sm:$0xff]  ;;  %v757_v31 = vld [vmem:[%s9299_s1 + $0x550] sm:$0xff] }
  0x80   :  { %v4326_v38 = vmul.f32 %v9447_v45, %v9447_v45  ;;  %v755_v41 = vld [vmem:[%s9299_s1 + $0x540] sm:$0xff]  ;;  %9449 = vst [vmem:[#allocation138_spill] sm:$0xff] %v4348_v30  ;;  %v4350_v45 = vsub.f32 %v236_v22, %v748_v13  ;;  %v252_v20 = vld [vmem:[%s9298_s0 + $0x588] sm:$0xff]  ;;  %v253_v26 = vld [vmem:[%s9298_s0 + $0x590] sm:$0xff]  ;;  %v4376_v13 = vsub.f32 %v238_v7, %v750_v52  ;;  %v4404_v52 = vsub.f32 %v241_v61, %v753_v19 }
  0x81   :  { %v254_v17 = vld [vmem:[%s9298_s0 + $0x598] sm:$0xff]  ;;  %v759_v22 = vld [vmem:[%s9299_s1 + $0x560] sm:$0xff]  ;;  %v760_v35 = vld [vmem:[%s9299_s1 + $0x568] sm:$0xff]  ;;  %9453 = vst [vmem:[#allocation140_spill] sm:$0xff] %v4374_v40  ;;  %v4430_v19 = vsub.f32 %v243_v54, %v755_v41 }
  0x82   :  { %9448 = vst [vmem:[#allocation26_spill] sm:$0xff] %v4326_v38  ;;  %9450 = vst [vmem:[#allocation139_spill] sm:$0xff] %v4350_v45  ;;  %v9451_v38 = vld [vmem:[#allocation27_spill] sm:$0xff]  ;;  %v758_v46 = vld [vmem:[%s9299_s1 + $0x558] sm:$0xff] }
  0x83   :  { %v4354_v1 = vmul.f32 %v9451_v38, %v9451_v38  ;;  %9454 = vst [vmem:[#allocation141_spill] sm:$0xff] %v4376_v13  ;;  %v4378_v38 = vsub.f32 %v239_v28, %v751_v21  ;;  %v255_v45 = vld [vmem:[%s9298_s0 + $0x5a0] sm:$0xff]  ;;  %v256_v30 = vld [vmem:[%s9298_s0 + $0x5a8] sm:$0xff]  ;;  %v257_v55 = vld [vmem:[%s9298_s0 + $0x5b0] sm:$0xff]  ;;  %v4406_v21 = vsub.f32 %v242_v32, %v754_v62  ;;  %v4432_v62 = vsub.f32 %v244_v2, %v756_v8 }
  0x84   :  { %v761_v7 = vld [vmem:[%s9299_s1 + $0x570] sm:$0xff]  ;;  %v763_v28 = vld [vmem:[%s9299_s1 + $0x580] sm:$0xff]  ;;  %9457 = vst [vmem:[#allocation144_spill] sm:$0xff] %v4402_v36  ;;  %9458 = vst [vmem:[#allocation145_spill] sm:$0xff] %v4404_v52  ;;  %v4458_v8 = vsub.f32 %v246_v37, %v758_v46 }
  0x85   :  { %9452 = vst [vmem:[#allocation27_spill] sm:$0xff] %v4354_v1  ;;  %9455 = vst [vmem:[#allocation142_spill] sm:$0xff] %v4378_v38  ;;  %v4382_v1 = vmul.f32 %v3338_v29, %v3338_v29  ;;  %v762_v29 = vld [vmem:[%s9299_s1 + $0x578] sm:$0xff]  ;;  %v259_v40 = vld [vmem:[%s9298_s0 + $0x5c0] sm:$0xff]  ;;  %v4486_v46 = vsub.f32 %v249_v57, %v761_v7 }
  0x86   :  { %9459 = vst [vmem:[#allocation146_spill] sm:$0xff] %v4406_v21  ;;  %v258_v13 = vld [vmem:[%s9298_s0 + $0x5b8] sm:$0xff]  ;;  %v260_v44 = vld [vmem:[%s9298_s0 + $0x5c8] sm:$0xff]  ;;  %v765_v32 = vld [vmem:[%s9299_s1 + $0x590] sm:$0xff] }
  0x87   :  { %9456 = vst [vmem:[#allocation143_spill] sm:$0xff] %v4382_v1  ;;  %v9460_v1 = vld [vmem:[#allocation29_spill] sm:$0xff]  ;;  %v764_v61 = vld [vmem:[%s9299_s1 + $0x588] sm:$0xff]  ;;  %9462 = vst [vmem:[#allocation147_spill] sm:$0xff] %v4432_v62 }
  0x88   :  { %v4410_v38 = vmul.f32 %v9460_v1, %v9460_v1  ;;  %v766_v11 = vld [vmem:[%s9299_s1 + $0x598] sm:$0xff]  ;;  %v4434_v1 = vsub.f32 %v245_v33, %v757_v31  ;;  %v261_v52 = vld [vmem:[%s9298_s0 + $0x5d0] sm:$0xff]  ;;  %v263_v54 = vld [vmem:[%s9298_s0 + $0x5e0] sm:$0xff]  ;;  %9466 = vst [vmem:[#allocation149_spill] sm:$0xff] %v4458_v8  ;;  %v4460_v31 = vsub.f32 %v247_v0, %v759_v22  ;;  %v4488_v22 = vsub.f32 %v250_v10, %v762_v29 }
  0x89   :  { %v262_v36 = vld [vmem:[%s9298_s0 + $0x5d8] sm:$0xff]  ;;  %v767_v2 = vld [vmem:[%s9299_s1 + $0x5a0] sm:$0xff]  ;;  %v768_v33 = vld [vmem:[%s9299_s1 + $0x5a8] sm:$0xff]  ;;  %9470 = vst [vmem:[#allocation153_spill] sm:$0xff] %v4486_v46  ;;  %v4514_v29 = vsub.f32 %v252_v20, %v764_v61 }
  0x8a   :  { %9461 = vst [vmem:[#allocation29_spill] sm:$0xff] %v4410_v38  ;;  %9463 = vst [vmem:[#allocation148_spill] sm:$0xff] %v4434_v1  ;;  %v9464_v38 = vld [vmem:[#allocation30_spill] sm:$0xff]  ;;  %v769_v41 = vld [vmem:[%s9299_s1 + $0x5b0] sm:$0xff] }
  0x8b   :  { %v4438_v21 = vmul.f32 %v9464_v38, %v9464_v38  ;;  %9467 = vst [vmem:[#allocation150_spill] sm:$0xff] %v4460_v31  ;;  %v4462_v38 = vsub.f32 %v248_v18, %v760_v35  ;;  %v264_v1 = vld [vmem:[%s9298_s0 + $0x5e8] sm:$0xff]  ;;  %v265_v62 = vld [vmem:[%s9298_s0 + $0x5f0] sm:$0xff]  ;;  %v266_v37 = vld [vmem:[%s9298_s0 + $0x5f8] sm:$0xff]  ;;  %v4490_v35 = vsub.f32 %v251_v3, %v763_v28  ;;  %v4516_v28 = vsub.f32 %v253_v26, %v765_v32 }
  0x8c   :  { %v770_v0 = vld [vmem:[%s9299_s1 + $0x5b8] sm:$0xff]  ;;  %v772_v18 = vld [vmem:[%s9299_s1 + $0x5c8] sm:$0xff]  ;;  %9471 = vst [vmem:[#allocation154_spill] sm:$0xff] %v4488_v22  ;;  %v267_v31 = vld [vmem:[%s9298_s0 + $0x600] sm:$0xff]  ;;  %v4542_v32 = vsub.f32 %v255_v45, %v767_v2 }
  0x8d   :  { %9465 = vst [vmem:[#allocation30_spill] sm:$0xff] %v4438_v21  ;;  %9468 = vst [vmem:[#allocation151_spill] sm:$0xff] %v4462_v38  ;;  %v4466_v21 = vmul.f32 %v3366_v39, %v3366_v39  ;;  %v771_v39 = vld [vmem:[%s9299_s1 + $0x5c0] sm:$0xff]  ;;  %v268_v8 = vld [vmem:[%s9298_s0 + $0x608] sm:$0xff]  ;;  %v4570_v2 = vsub.f32 %v258_v13, %v770_v0 }
  0x8e   :  { %9472 = vst [vmem:[#allocation155_spill] sm:$0xff] %v4490_v35  ;;  %v269_v57 = vld [vmem:[%s9298_s0 + $0x610] sm:$0xff]  ;;  %v774_v3 = vld [vmem:[%s9299_s1 + $0x5d8] sm:$0xff]  ;;  %v775_v7 = vld [vmem:[%s9299_s1 + $0x5e0] sm:$0xff] }
  0x8f   :  { %9469 = vst [vmem:[#allocation152_spill] sm:$0xff] %v4466_v21  ;;  %v9473_v21 = vld [vmem:[#allocation32_spill] sm:$0xff]  ;;  %9475 = vst [vmem:[#allocation156_spill] sm:$0xff] %v4516_v28  ;;  %v270_v22 = vld [vmem:[%s9298_s0 + $0x618] sm:$0xff] }
  0x90   :  { %v4494_v38 = vmul.f32 %v9473_v21, %v9473_v21  ;;  %v773_v10 = vld [vmem:[%s9299_s1 + $0x5d0] sm:$0xff]  ;;  %v4518_v21 = vsub.f32 %v254_v17, %v766_v11  ;;  %v271_v46 = vld [vmem:[%s9298_s0 + $0x620] sm:$0xff]  ;;  %v272_v20 = vld [vmem:[%s9298_s0 + $0x628] sm:$0xff]  ;;  %9479 = vst [vmem:[#allocation158_spill] sm:$0xff] %v4542_v32  ;;  %v4544_v11 = vsub.f32 %v256_v30, %v768_v33  ;;  %v4572_v33 = vsub.f32 %v259_v40, %v771_v39 }
  0x91   :  { %v776_v26 = vld [vmem:[%s9299_s1 + $0x5e8] sm:$0xff]  ;;  %v777_v17 = vld [vmem:[%s9299_s1 + $0x5f0] sm:$0xff]  ;;  %v778_v61 = vld [vmem:[%s9299_s1 + $0x5f8] sm:$0xff]  ;;  %9483 = vst [vmem:[#allocation162_spill] sm:$0xff] %v4570_v2  ;;  %v4598_v39 = vsub.f32 %v261_v52, %v773_v10 }
  0x92   :  { %9474 = vst [vmem:[#allocation32_spill] sm:$0xff] %v4494_v38  ;;  %9476 = vst [vmem:[#allocation157_spill] sm:$0xff] %v4518_v21  ;;  %v9477_v38 = vld [vmem:[#allocation33_spill] sm:$0xff]  ;;  %v273_v21 = vld [vmem:[%s9298_s0 + $0x630] sm:$0xff] }
  0x93   :  { %v4522_v35 = vmul.f32 %v9477_v38, %v9477_v38  ;;  %9480 = vst [vmem:[#allocation159_spill] sm:$0xff] %v4544_v11  ;;  %v4546_v38 = vsub.f32 %v257_v55, %v769_v41  ;;  %v274_v28 = vld [vmem:[%s9298_s0 + $0x638] sm:$0xff]  ;;  %v275_v45 = vld [vmem:[%s9298_s0 + $0x640] sm:$0xff]  ;;  %v781_v55 = vld [vmem:[%s9299_s1 + $0x610] sm:$0xff]  ;;  %v4574_v41 = vsub.f32 %v260_v44, %v772_v18  ;;  %v4600_v18 = vsub.f32 %v262_v36, %v774_v3 }
  0x94   :  { %v779_v30 = vld [vmem:[%s9299_s1 + $0x600] sm:$0xff]  ;;  %9484 = vst [vmem:[#allocation163_spill] sm:$0xff] %v4572_v33  ;;  %v276_v11 = vld [vmem:[%s9298_s0 + $0x648] sm:$0xff]  ;;  %v277_v32 = vld [vmem:[%s9298_s0 + $0x650] sm:$0xff]  ;;  %v4626_v3 = vsub.f32 %v264_v1, %v776_v26 }
  0x95   :  { %9478 = vst [vmem:[#allocation33_spill] sm:$0xff] %v4522_v35  ;;  %9481 = vst [vmem:[#allocation160_spill] sm:$0xff] %v4546_v38  ;;  %v4550_v35 = vmul.f32 %v3394_v56, %v3394_v56  ;;  %v780_v56 = vld [vmem:[%s9299_s1 + $0x608] sm:$0xff]  ;;  %v278_v13 = vld [vmem:[%s9298_s0 + $0x658] sm:$0xff]  ;;  %v4654_v26 = vsub.f32 %v267_v31, %v779_v30 }
  0x96   :  { %9485 = vst [vmem:[#allocation164_spill] sm:$0xff] %v4574_v41  ;;  %v782_v40 = vld [vmem:[%s9299_s1 + $0x618] sm:$0xff]  ;;  %v783_v44 = vld [vmem:[%s9299_s1 + $0x620] sm:$0xff]  ;;  %v784_v0 = vld [vmem:[%s9299_s1 + $0x628] sm:$0xff] }
  0x97   :  { %9482 = vst [vmem:[#allocation161_spill] sm:$0xff] %v4550_v35  ;;  %v9486_v35 = vld [vmem:[#allocation35_spill] sm:$0xff]  ;;  %9488 = vst [vmem:[#allocation165_spill] sm:$0xff] %v4600_v18  ;;  %v279_v33 = vld [vmem:[%s9298_s0 + $0x660] sm:$0xff] }
  0x98   :  { %v4578_v38 = vmul.f32 %v9486_v35, %v9486_v35  ;;  %v4602_v35 = vsub.f32 %v263_v54, %v775_v7  ;;  %v280_v2 = vld [vmem:[%s9298_s0 + $0x668] sm:$0xff]  ;;  %v281_v52 = vld [vmem:[%s9298_s0 + $0x670] sm:$0xff]  ;;  %v786_v54 = vld [vmem:[%s9299_s1 + $0x638] sm:$0xff]  ;;  %9492 = vst [vmem:[#allocation167_spill] sm:$0xff] %v4626_v3  ;;  %v4628_v7 = vsub.f32 %v265_v62, %v777_v17  ;;  %v4656_v17 = vsub.f32 %v268_v8, %v780_v56 }
  0x99   :  { %v785_v36 = vld [vmem:[%s9299_s1 + $0x630] sm:$0xff]  ;;  %v787_v10 = vld [vmem:[%s9299_s1 + $0x640] sm:$0xff]  ;;  %v284_v1 = vld [vmem:[%s9298_s0 + $0x688] sm:$0xff]  ;;  %9496 = vst [vmem:[#allocation171_spill] sm:$0xff] %v4654_v26  ;;  %v4682_v56 = vsub.f32 %v270_v22, %v782_v40 }
  0x9a   :  { %9487 = vst [vmem:[#allocation35_spill] sm:$0xff] %v4578_v38  ;;  %9489 = vst [vmem:[#allocation166_spill] sm:$0xff] %v4602_v35  ;;  %v9490_v38 = vld [vmem:[#allocation36_spill] sm:$0xff]  ;;  %v282_v35 = vld [vmem:[%s9298_s0 + $0x678] sm:$0xff] }
  0x9b   :  { %v4606_v41 = vmul.f32 %v9490_v38, %v9490_v38  ;;  %9493 = vst [vmem:[#allocation168_spill] sm:$0xff] %v4628_v7  ;;  %v4630_v38 = vsub.f32 %v266_v37, %v778_v61  ;;  %v283_v18 = vld [vmem:[%s9298_s0 + $0x680] sm:$0xff]  ;;  %v788_v62 = vld [vmem:[%s9299_s1 + $0x648] sm:$0xff]  ;;  %v790_v37 = vld [vmem:[%s9299_s1 + $0x658] sm:$0xff]  ;;  %v4658_v61 = vsub.f32 %v269_v57, %v781_v55  ;;  %v4684_v55 = vsub.f32 %v271_v46, %v783_v44 }
  0x9c   :  { %9497 = vst [vmem:[#allocation172_spill] sm:$0xff] %v4656_v17  ;;  %v285_v7 = vld [vmem:[%s9298_s0 + $0x690] sm:$0xff]  ;;  %v286_v3 = vld [vmem:[%s9298_s0 + $0x698] sm:$0xff]  ;;  %v287_v31 = vld [vmem:[%s9298_s0 + $0x6a0] sm:$0xff]  ;;  %v4710_v44 = vsub.f32 %v273_v21, %v785_v36  ;;  %v4738_v36 = vsub.f32 %v276_v11, %v788_v62 }
  0x9d   :  { %9491 = vst [vmem:[#allocation36_spill] sm:$0xff] %v4606_v41  ;;  %9494 = vst [vmem:[#allocation169_spill] sm:$0xff] %v4630_v38  ;;  %v4634_v41 = vmul.f32 %v3422_v12, %v3422_v12  ;;  %v789_v12 = vld [vmem:[%s9299_s1 + $0x650] sm:$0xff]  ;;  %v791_v8 = vld [vmem:[%s9299_s1 + $0x660] sm:$0xff] }
  0x9e   :  { %9498 = vst [vmem:[#allocation173_spill] sm:$0xff] %v4658_v61  ;;  %v792_v57 = vld [vmem:[%s9299_s1 + $0x668] sm:$0xff]  ;;  %v793_v30 = vld [vmem:[%s9299_s1 + $0x670] sm:$0xff]  ;;  %9501 = vst [vmem:[#allocation174_spill] sm:$0xff] %v4684_v55 }
  0x9f   :  { %9495 = vst [vmem:[#allocation170_spill] sm:$0xff] %v4634_v41  ;;  %v9499_v41 = vld [vmem:[#allocation38_spill] sm:$0xff]  ;;  %v288_v17 = vld [vmem:[%s9298_s0 + $0x6a8] sm:$0xff]  ;;  %v289_v26 = vld [vmem:[%s9298_s0 + $0x6b0] sm:$0xff] }
  0xa0   :  { %v4662_v38 = vmul.f32 %v9499_v41, %v9499_v41  ;;  %v4686_v41 = vsub.f32 %v272_v20, %v784_v0  ;;  %v290_v22 = vld [vmem:[%s9298_s0 + $0x6b8] sm:$0xff]  ;;  %v795_v20 = vld [vmem:[%s9299_s1 + $0x680] sm:$0xff]  ;;  %v796_v40 = vld [vmem:[%s9299_s1 + $0x688] sm:$0xff]  ;;  %9505 = vst [vmem:[#allocation176_spill] sm:$0xff] %v4710_v44  ;;  %v4712_v0 = vsub.f32 %v274_v28, %v786_v54  ;;  %v4740_v54 = vsub.f32 %v277_v32, %v789_v12 }
  0xa1   :  { %v794_v46 = vld [vmem:[%s9299_s1 + $0x678] sm:$0xff]  ;;  %v292_v55 = vld [vmem:[%s9298_s0 + $0x6c8] sm:$0xff]  ;;  %v293_v21 = vld [vmem:[%s9298_s0 + $0x6d0] sm:$0xff]  ;;  %9509 = vst [vmem:[#allocation180_spill] sm:$0xff] %v4738_v36  ;;  %v4766_v12 = vsub.f32 %v279_v33, %v791_v8 }
  0xa2   :  { %9500 = vst [vmem:[#allocation38_spill] sm:$0xff] %v4662_v38  ;;  %9502 = vst [vmem:[#allocation175_spill] sm:$0xff] %v4686_v41  ;;  %v9503_v38 = vld [vmem:[#allocation39_spill] sm:$0xff]  ;;  %v291_v41 = vld [vmem:[%s9298_s0 + $0x6c0] sm:$0xff] }
  0xa3   :  { %v4690_v61 = vmul.f32 %v9503_v38, %v9503_v38  ;;  %9506 = vst [vmem:[#allocation177_spill] sm:$0xff] %v4712_v0  ;;  %v4714_v38 = vsub.f32 %v275_v45, %v787_v10  ;;  %v797_v28 = vld [vmem:[%s9299_s1 + $0x690] sm:$0xff]  ;;  %v799_v45 = vld [vmem:[%s9299_s1 + $0x6a0] sm:$0xff]  ;;  %9510 = vst [vmem:[#allocation181_spill] sm:$0xff] %v4740_v54  ;;  %v4742_v10 = vsub.f32 %v278_v13, %v790_v37 }
  0xa4   :  { %v294_v0 = vld [vmem:[%s9298_s0 + $0x6d8] sm:$0xff]  ;;  %v295_v44 = vld [vmem:[%s9298_s0 + $0x6e0] sm:$0xff]  ;;  %v296_v11 = vld [vmem:[%s9298_s0 + $0x6e8] sm:$0xff]  ;;  %v4768_v37 = vsub.f32 %v280_v2, %v792_v57  ;;  %v4794_v57 = vsub.f32 %v282_v35, %v794_v46  ;;  %v4822_v46 = vsub.f32 %v285_v7, %v797_v28 }
  0xa5   :  { %9504 = vst [vmem:[#allocation39_spill] sm:$0xff] %v4690_v61  ;;  %9507 = vst [vmem:[#allocation178_spill] sm:$0xff] %v4714_v38  ;;  %v4718_v61 = vmul.f32 %v3450_v47, %v3450_v47  ;;  %v798_v47 = vld [vmem:[%s9299_s1 + $0x698] sm:$0xff]  ;;  %v800_v32 = vld [vmem:[%s9299_s1 + $0x6a8] sm:$0xff] }
  0xa6   :  { %9511 = vst [vmem:[#allocation182_spill] sm:$0xff] %v4742_v10  ;;  %v801_v13 = vld [vmem:[%s9299_s1 + $0x6b0] sm:$0xff]  ;;  %v802_v62 = vld [vmem:[%s9299_s1 + $0x6b8] sm:$0xff]  ;;  %9514 = vst [vmem:[#allocation183_spill] sm:$0xff] %v4768_v37 }
  0xa7   :  { %9508 = vst [vmem:[#allocation179_spill] sm:$0xff] %v4718_v61  ;;  %v9512_v61 = vld [vmem:[#allocation41_spill] sm:$0xff]  ;;  %v297_v54 = vld [vmem:[%s9298_s0 + $0x6f0] sm:$0xff]  ;;  %v299_v33 = vld [vmem:[%s9298_s0 + $0x700] sm:$0xff] }
  0xa8   :  { %v4746_v38 = vmul.f32 %v9512_v61, %v9512_v61  ;;  %v4770_v61 = vsub.f32 %v281_v52, %v793_v30  ;;  %v298_v36 = vld [vmem:[%s9298_s0 + $0x6f8] sm:$0xff]  ;;  %v803_v2 = vld [vmem:[%s9299_s1 + $0x6c0] sm:$0xff]  ;;  %v804_v52 = vld [vmem:[%s9299_s1 + $0x6c8] sm:$0xff]  ;;  %9518 = vst [vmem:[#allocation185_spill] sm:$0xff] %v4794_v57  ;;  %v4796_v30 = vsub.f32 %v283_v18, %v795_v20  ;;  %v4824_v20 = vsub.f32 %v286_v3, %v798_v47 }
  0xa9   :  { %v805_v8 = vld [vmem:[%s9299_s1 + $0x6d0] sm:$0xff]  ;;  %v302_v35 = vld [vmem:[%s9298_s0 + $0x718] sm:$0xff]  ;;  %9522 = vst [vmem:[#allocation189_spill] sm:$0xff] %v4822_v46  ;;  %v304_v57 = vld [vmem:[%s9298_s0 + $0x728] sm:$0xff]  ;;  %v4850_v47 = vsub.f32 %v288_v17, %v800_v32 }
  0xaa   :  { %9513 = vst [vmem:[#allocation41_spill] sm:$0xff] %v4746_v38  ;;  %9515 = vst [vmem:[#allocation184_spill] sm:$0xff] %v4770_v61  ;;  %v9516_v38 = vld [vmem:[#allocation42_spill] sm:$0xff]  ;;  %v300_v61 = vld [vmem:[%s9298_s0 + $0x708] sm:$0xff] }
  0xab   :  { %v4774_v10 = vmul.f32 %v9516_v38, %v9516_v38  ;;  %9519 = vst [vmem:[#allocation186_spill] sm:$0xff] %v4796_v30  ;;  %v4798_v38 = vsub.f32 %v284_v1, %v796_v40  ;;  %v301_v37 = vld [vmem:[%s9298_s0 + $0x710] sm:$0xff]  ;;  %v806_v18 = vld [vmem:[%s9299_s1 + $0x6d8] sm:$0xff]  ;;  %v808_v1 = vld [vmem:[%s9299_s1 + $0x6e8] sm:$0xff]  ;;  %v4826_v40 = vsub.f32 %v287_v31, %v799_v45  ;;  %v4852_v45 = vsub.f32 %v289_v26, %v801_v13 }
  0xac   :  { %9523 = vst [vmem:[#allocation190_spill] sm:$0xff] %v4824_v20  ;;  %v303_v30 = vld [vmem:[%s9298_s0 + $0x720] sm:$0xff]  ;;  %v305_v7 = vld [vmem:[%s9298_s0 + $0x730] sm:$0xff]  ;;  %v810_v31 = vld [vmem:[%s9299_s1 + $0x6f8] sm:$0xff]  ;;  %v4878_v13 = vsub.f32 %v291_v41, %v803_v2  ;;  %v4906_v2 = vsub.f32 %v294_v0, %v806_v18 }
  0xad   :  { %9517 = vst [vmem:[#allocation42_spill] sm:$0xff] %v4774_v10  ;;  %9520 = vst [vmem:[#allocation187_spill] sm:$0xff] %v4798_v38  ;;  %v4802_v10 = vmul.f32 %v3478_v27, %v3478_v27  ;;  %v807_v27 = vld [vmem:[%s9299_s1 + $0x6e0] sm:$0xff]  ;;  %v809_v3 = vld [vmem:[%s9299_s1 + $0x6f0] sm:$0xff] }
  0xae   :  { %9524 = vst [vmem:[#allocation191_spill] sm:$0xff] %v4826_v40  ;;  %v811_v28 = vld [vmem:[%s9299_s1 + $0x700] sm:$0xff]  ;;  %9527 = vst [vmem:[#allocation192_spill] sm:$0xff] %v4852_v45  ;;  %v306_v20 = vld [vmem:[%s9298_s0 + $0x738] sm:$0xff] }
  0xaf   :  { %9521 = vst [vmem:[#allocation188_spill] sm:$0xff] %v4802_v10  ;;  %v9525_v10 = vld [vmem:[#allocation44_spill] sm:$0xff]  ;;  %v307_v46 = vld [vmem:[%s9298_s0 + $0x740] sm:$0xff]  ;;  %v308_v17 = vld [vmem:[%s9298_s0 + $0x748] sm:$0xff] }
  0xb0   :  { %v4830_v38 = vmul.f32 %v9525_v10, %v9525_v10  ;;  %v4854_v10 = vsub.f32 %v290_v22, %v802_v62  ;;  %v812_v26 = vld [vmem:[%s9299_s1 + $0x708] sm:$0xff]  ;;  %v813_v22 = vld [vmem:[%s9299_s1 + $0x710] sm:$0xff]  ;;  %v814_v32 = vld [vmem:[%s9299_s1 + $0x718] sm:$0xff]  ;;  %9531 = vst [vmem:[#allocation194_spill] sm:$0xff] %v4878_v13  ;;  %v4880_v62 = vsub.f32 %v292_v55, %v804_v52  ;;  %v4908_v52 = vsub.f32 %v295_v44, %v807_v27 }
  0xb1   :  { %v310_v45 = vld [vmem:[%s9298_s0 + $0x758] sm:$0xff]  ;;  %v311_v41 = vld [vmem:[%s9298_s0 + $0x760] sm:$0xff]  ;;  %9535 = vst [vmem:[#allocation198_spill] sm:$0xff] %v4906_v2  ;;  %v313_v13 = vld [vmem:[%s9298_s0 + $0x770] sm:$0xff]  ;;  %v4934_v27 = vsub.f32 %v297_v54, %v809_v3 }
  0xb2   :  { %9526 = vst [vmem:[#allocation44_spill] sm:$0xff] %v4830_v38  ;;  %9528 = vst [vmem:[#allocation193_spill] sm:$0xff] %v4854_v10  ;;  %v9529_v38 = vld [vmem:[#allocation45_spill] sm:$0xff]  ;;  %v309_v10 = vld [vmem:[%s9298_s0 + $0x750] sm:$0xff] }
  0xb3   :  { %v4858_v40 = vmul.f32 %v9529_v38, %v9529_v38  ;;  %9532 = vst [vmem:[#allocation195_spill] sm:$0xff] %v4880_v62  ;;  %v4882_v38 = vsub.f32 %v293_v21, %v805_v8  ;;  %v815_v55 = vld [vmem:[%s9299_s1 + $0x720] sm:$0xff]  ;;  %v817_v21 = vld [vmem:[%s9299_s1 + $0x730] sm:$0xff]  ;;  %9536 = vst [vmem:[#allocation199_spill] sm:$0xff] %v4908_v52  ;;  %v4910_v8 = vsub.f32 %v296_v11, %v808_v1 }
  0xb4   :  { %v312_v62 = vld [vmem:[%s9298_s0 + $0x768] sm:$0xff]  ;;  %v314_v0 = vld [vmem:[%s9298_s0 + $0x778] sm:$0xff]  ;;  %v819_v11 = vld [vmem:[%s9299_s1 + $0x740] sm:$0xff]  ;;  %v4936_v1 = vsub.f32 %v298_v36, %v810_v31  ;;  %v4962_v31 = vsub.f32 %v300_v61, %v812_v26  ;;  %v4990_v26 = vsub.f32 %v303_v30, %v815_v55 }
  0xb5   :  { %9530 = vst [vmem:[#allocation45_spill] sm:$0xff] %v4858_v40  ;;  %9533 = vst [vmem:[#allocation196_spill] sm:$0xff] %v4882_v38  ;;  %v4886_v40 = vmul.f32 %v3506_v23, %v3506_v23  ;;  %v816_v23 = vld [vmem:[%s9299_s1 + $0x728] sm:$0xff]  ;;  %v818_v44 = vld [vmem:[%s9299_s1 + $0x738] sm:$0xff] }
  0xb6   :  { %9537 = vst [vmem:[#allocation200_spill] sm:$0xff] %v4910_v8  ;;  %v820_v18 = vld [vmem:[%s9299_s1 + $0x748] sm:$0xff]  ;;  %9540 = vst [vmem:[#allocation201_spill] sm:$0xff] %v4936_v1  ;;  %v315_v52 = vld [vmem:[%s9298_s0 + $0x780] sm:$0xff] }
  0xb7   :  { %9534 = vst [vmem:[#allocation197_spill] sm:$0xff] %v4886_v40  ;;  %v9538_v40 = vld [vmem:[#allocation47_spill] sm:$0xff]  ;;  %v317_v54 = vld [vmem:[%s9298_s0 + $0x790] sm:$0xff]  ;;  %v823_v3 = vld [vmem:[%s9299_s1 + $0x760] sm:$0xff] }
  0xb8   :  { %v4914_v38 = vmul.f32 %v9538_v40, %v9538_v40  ;;  %v4938_v40 = vsub.f32 %v299_v33, %v811_v28  ;;  %v316_v2 = vld [vmem:[%s9298_s0 + $0x788] sm:$0xff]  ;;  %v821_v36 = vld [vmem:[%s9299_s1 + $0x750] sm:$0xff]  ;;  %v822_v33 = vld [vmem:[%s9299_s1 + $0x758] sm:$0xff]  ;;  %9544 = vst [vmem:[#allocation203_spill] sm:$0xff] %v4962_v31  ;;  %v4964_v28 = vsub.f32 %v301_v37, %v813_v22  ;;  %v4992_v22 = vsub.f32 %v304_v57, %v816_v23 }
  0xb9   :  { %v319_v1 = vld [vmem:[%s9298_s0 + $0x7a0] sm:$0xff]  ;;  %v320_v61 = vld [vmem:[%s9298_s0 + $0x7a8] sm:$0xff]  ;;  %9548 = vst [vmem:[#allocation207_spill] sm:$0xff] %v4990_v26  ;;  %v322_v31 = vld [vmem:[%s9298_s0 + $0x7b8] sm:$0xff]  ;;  %v5018_v23 = vsub.f32 %v306_v20, %v818_v44 }
  0xba   :  { %9539 = vst [vmem:[#allocation47_spill] sm:$0xff] %v4914_v38  ;;  %9541 = vst [vmem:[#allocation202_spill] sm:$0xff] %v4938_v40  ;;  %v9542_v38 = vld [vmem:[#allocation48_spill] sm:$0xff]  ;;  %v318_v40 = vld [vmem:[%s9298_s0 + $0x798] sm:$0xff] }
  0xbb   :  { %v4942_v8 = vmul.f32 %v9542_v38, %v9542_v38  ;;  %9545 = vst [vmem:[#allocation204_spill] sm:$0xff] %v4964_v28  ;;  %v4966_v38 = vsub.f32 %v302_v35, %v814_v32  ;;  %v824_v37 = vld [vmem:[%s9299_s1 + $0x768] sm:$0xff]  ;;  %v826_v35 = vld [vmem:[%s9299_s1 + $0x778] sm:$0xff]  ;;  %9549 = vst [vmem:[#allocation208_spill] sm:$0xff] %v4992_v22  ;;  %v4994_v32 = vsub.f32 %v305_v7, %v817_v21 }
  0xbc   :  { %v321_v28 = vld [vmem:[%s9298_s0 + $0x7b0] sm:$0xff]  ;;  %v323_v30 = vld [vmem:[%s9298_s0 + $0x7c0] sm:$0xff]  ;;  %v828_v7 = vld [vmem:[%s9299_s1 + $0x788] sm:$0xff]  ;;  %v5020_v21 = vsub.f32 %v307_v46, %v819_v11  ;;  %v5046_v11 = vsub.f32 %v309_v10, %v821_v36  ;;  %v5074_v36 = vsub.f32 %v312_v62, %v824_v37 }
  0xbd   :  { %9543 = vst [vmem:[#allocation48_spill] sm:$0xff] %v4942_v8  ;;  %9546 = vst [vmem:[#allocation205_spill] sm:$0xff] %v4966_v38  ;;  %v4970_v8 = vmul.f32 %v3534_v43, %v3534_v43  ;;  %v825_v43 = vld [vmem:[%s9299_s1 + $0x770] sm:$0xff]  ;;  %v827_v57 = vld [vmem:[%s9299_s1 + $0x780] sm:$0xff] }
  0xbe   :  { %9550 = vst [vmem:[#allocation209_spill] sm:$0xff] %v4994_v32  ;;  %v829_v55 = vld [vmem:[%s9299_s1 + $0x790] sm:$0xff]  ;;  %9553 = vst [vmem:[#allocation210_spill] sm:$0xff] %v5020_v21  ;;  %v324_v22 = vld [vmem:[%s9298_s0 + $0x7c8] sm:$0xff] }
  0xbf   :  { %9547 = vst [vmem:[#allocation206_spill] sm:$0xff] %v4970_v8  ;;  %v9551_v8 = vld [vmem:[#allocation50_spill] sm:$0xff]  ;;  %v325_v26 = vld [vmem:[%s9298_s0 + $0x7d0] sm:$0xff]  ;;  %v326_v20 = vld [vmem:[%s9298_s0 + $0x7d8] sm:$0xff] }
  0xc0   :  { %v4998_v38 = vmul.f32 %v9551_v8, %v9551_v8  ;;  %v5022_v8 = vsub.f32 %v308_v17, %v820_v18  ;;  %v830_v46 = vld [vmem:[%s9299_s1 + $0x798] sm:$0xff]  ;;  %v831_v17 = vld [vmem:[%s9299_s1 + $0x7a0] sm:$0xff]  ;;  %v832_v44 = vld [vmem:[%s9299_s1 + $0x7a8] sm:$0xff]  ;;  %9557 = vst [vmem:[#allocation212_spill] sm:$0xff] %v5046_v11  ;;  %v5048_v18 = vsub.f32 %v310_v45, %v822_v33  ;;  %v5076_v33 = vsub.f32 %v313_v13, %v825_v43 }
  0xc1   :  { %v328_v21 = vld [vmem:[%s9298_s0 + $0x7e8] sm:$0xff]  ;;  %v329_v10 = vld [vmem:[%s9298_s0 + $0x7f0] sm:$0xff]  ;;  %9561 = vst [vmem:[#allocation216_spill] sm:$0xff] %v5074_v36  ;;  %v331_v11 = vld [vmem:[%s9298_s0 + $0x800] sm:$0xff]  ;;  %v5102_v43 = vsub.f32 %v315_v52, %v827_v57 }
  0xc2   :  { %9552 = vst [vmem:[#allocation50_spill] sm:$0xff] %v4998_v38  ;;  %9554 = vst [vmem:[#allocation211_spill] sm:$0xff] %v5022_v8  ;;  %v9555_v38 = vld [vmem:[#allocation51_spill] sm:$0xff]  ;;  %v327_v8 = vld [vmem:[%s9298_s0 + $0x7e0] sm:$0xff] }
  0xc3   :  { %v5026_v32 = vmul.f32 %v9555_v38, %v9555_v38  ;;  %9558 = vst [vmem:[#allocation213_spill] sm:$0xff] %v5048_v18  ;;  %v5050_v38 = vsub.f32 %v311_v41, %v823_v3  ;;  %v833_v45 = vld [vmem:[%s9299_s1 + $0x7b0] sm:$0xff]  ;;  %v835_v41 = vld [vmem:[%s9299_s1 + $0x7c0] sm:$0xff]  ;;  %9562 = vst [vmem:[#allocation217_spill] sm:$0xff] %v5076_v33  ;;  %v5078_v3 = vsub.f32 %v314_v0, %v826_v35 }
  0xc4   :  { %v330_v18 = vld [vmem:[%s9298_s0 + $0x7f8] sm:$0xff]  ;;  %v332_v62 = vld [vmem:[%s9298_s0 + $0x808] sm:$0xff]  ;;  %v837_v0 = vld [vmem:[%s9299_s1 + $0x7d0] sm:$0xff]  ;;  %v5104_v35 = vsub.f32 %v316_v2, %v828_v7  ;;  %v5130_v7 = vsub.f32 %v318_v40, %v830_v46  ;;  %v5158_v46 = vsub.f32 %v321_v28, %v833_v45 }
  0xc5   :  { %9556 = vst [vmem:[#allocation51_spill] sm:$0xff] %v5026_v32  ;;  %9559 = vst [vmem:[#allocation214_spill] sm:$0xff] %v5050_v38  ;;  %v5054_v32 = vmul.f32 %v3562_v48, %v3562_v48  ;;  %v834_v48 = vld [vmem:[%s9299_s1 + $0x7b8] sm:$0xff]  ;;  %v836_v13 = vld [vmem:[%s9299_s1 + $0x7c8] sm:$0xff] }
  0xc6   :  { %9563 = vst [vmem:[#allocation218_spill] sm:$0xff] %v5078_v3  ;;  %v838_v37 = vld [vmem:[%s9299_s1 + $0x7d8] sm:$0xff]  ;;  %9566 = vst [vmem:[#allocation219_spill] sm:$0xff] %v5104_v35  ;;  %v333_v33 = vld [vmem:[%s9298_s0 + $0x810] sm:$0xff] }
  0xc7   :  { %9560 = vst [vmem:[#allocation215_spill] sm:$0xff] %v5054_v32  ;;  %v9564_v32 = vld [vmem:[#allocation53_spill] sm:$0xff]  ;;  %v335_v52 = vld [vmem:[%s9298_s0 + $0x820] sm:$0xff]  ;;  %v841_v57 = vld [vmem:[%s9299_s1 + $0x7f0] sm:$0xff] }
  0xc8   :  { %v5082_v38 = vmul.f32 %v9564_v32, %v9564_v32  ;;  %v5106_v32 = vsub.f32 %v317_v54, %v829_v55  ;;  %v334_v36 = vld [vmem:[%s9298_s0 + $0x818] sm:$0xff]  ;;  %v839_v2 = vld [vmem:[%s9299_s1 + $0x7e0] sm:$0xff]  ;;  %v840_v54 = vld [vmem:[%s9299_s1 + $0x7e8] sm:$0xff]  ;;  %9570 = vst [vmem:[#allocation221_spill] sm:$0xff] %v5130_v7  ;;  %v5132_v55 = vsub.f32 %v319_v1, %v831_v17  ;;  %v5160_v17 = vsub.f32 %v322_v31, %v834_v48 }
  0xc9   :  { %v337_v35 = vld [vmem:[%s9298_s0 + $0x830] sm:$0xff]  ;;  %v338_v40 = vld [vmem:[%s9298_s0 + $0x838] sm:$0xff]  ;;  %9574 = vst [vmem:[#allocation225_spill] sm:$0xff] %v5158_v46  ;;  %v340_v7 = vld [vmem:[%s9298_s0 + $0x848] sm:$0xff]  ;;  %v5186_v48 = vsub.f32 %v324_v22, %v836_v13 }
  0xca   :  { %9565 = vst [vmem:[#allocation53_spill] sm:$0xff] %v5082_v38  ;;  %9567 = vst [vmem:[#allocation220_spill] sm:$0xff] %v5106_v32  ;;  %v9568_v38 = vld [vmem:[#allocation54_spill] sm:$0xff]  ;;  %v336_v32 = vld [vmem:[%s9298_s0 + $0x828] sm:$0xff] }
  0xcb   :  { %v5110_v3 = vmul.f32 %v9568_v38, %v9568_v38  ;;  %9571 = vst [vmem:[#allocation222_spill] sm:$0xff] %v5132_v55  ;;  %v5134_v38 = vsub.f32 %v320_v61, %v832_v44  ;;  %v842_v1 = vld [vmem:[%s9299_s1 + $0x7f8] sm:$0xff]  ;;  %v844_v61 = vld [vmem:[%s9299_s1 + $0x808] sm:$0xff]  ;;  %9575 = vst [vmem:[#allocation226_spill] sm:$0xff] %v5160_v17  ;;  %v5162_v44 = vsub.f32 %v323_v30, %v835_v41 }
  0xcc   :  { %v339_v55 = vld [vmem:[%s9298_s0 + $0x840] sm:$0xff]  ;;  %v341_v28 = vld [vmem:[%s9298_s0 + $0x850] sm:$0xff]  ;;  %v846_v30 = vld [vmem:[%s9299_s1 + $0x818] sm:$0xff]  ;;  %v5188_v41 = vsub.f32 %v325_v26, %v837_v0  ;;  %v5214_v0 = vsub.f32 %v327_v8, %v839_v2  ;;  %v5242_v2 = vsub.f32 %v330_v18, %v842_v1 }
  0xcd   :  { %9569 = vst [vmem:[#allocation54_spill] sm:$0xff] %v5110_v3  ;;  %9572 = vst [vmem:[#allocation223_spill] sm:$0xff] %v5134_v38  ;;  %v5138_v3 = vmul.f32 %v3590_v49, %v3590_v49  ;;  %v843_v49 = vld [vmem:[%s9299_s1 + $0x800] sm:$0xff]  ;;  %v845_v31 = vld [vmem:[%s9299_s1 + $0x810] sm:$0xff] }
  0xce   :  { %9576 = vst [vmem:[#allocation227_spill] sm:$0xff] %v5162_v44  ;;  %v847_v45 = vld [vmem:[%s9299_s1 + $0x820] sm:$0xff]  ;;  %9579 = vst [vmem:[#allocation228_spill] sm:$0xff] %v5188_v41  ;;  %v342_v17 = vld [vmem:[%s9298_s0 + $0x858] sm:$0xff] }
  0xcf   :  { %9573 = vst [vmem:[#allocation224_spill] sm:$0xff] %v5138_v3  ;;  %v9577_v3 = vld [vmem:[#allocation56_spill] sm:$0xff]  ;;  %v343_v46 = vld [vmem:[%s9298_s0 + $0x860] sm:$0xff]  ;;  %v344_v22 = vld [vmem:[%s9298_s0 + $0x868] sm:$0xff] }
  0xd0   :  { %v5166_v38 = vmul.f32 %v9577_v3, %v9577_v3  ;;  %v5190_v3 = vsub.f32 %v326_v20, %v838_v37  ;;  %v848_v26 = vld [vmem:[%s9299_s1 + $0x828] sm:$0xff]  ;;  %v849_v20 = vld [vmem:[%s9299_s1 + $0x830] sm:$0xff]  ;;  %v850_v13 = vld [vmem:[%s9299_s1 + $0x838] sm:$0xff]  ;;  %9583 = vst [vmem:[#allocation230_spill] sm:$0xff] %v5214_v0  ;;  %v5216_v37 = vsub.f32 %v328_v21, %v840_v54  ;;  %v5244_v54 = vsub.f32 %v331_v11, %v843_v49 }
  0xd1   :  { %v346_v41 = vld [vmem:[%s9298_s0 + $0x878] sm:$0xff]  ;;  %v347_v8 = vld [vmem:[%s9298_s0 + $0x880] sm:$0xff]  ;;  %9587 = vst [vmem:[#allocation234_spill] sm:$0xff] %v5242_v2  ;;  %v349_v0 = vld [vmem:[%s9298_s0 + $0x890] sm:$0xff]  ;;  %v5270_v49 = vsub.f32 %v333_v33, %v845_v31 }
  0xd2   :  { %9578 = vst [vmem:[#allocation56_spill] sm:$0xff] %v5166_v38  ;;  %9580 = vst [vmem:[#allocation229_spill] sm:$0xff] %v5190_v3  ;;  %v9581_v38 = vld [vmem:[#allocation57_spill] sm:$0xff]  ;;  %v345_v3 = vld [vmem:[%s9298_s0 + $0x870] sm:$0xff] }
  0xd3   :  { %v5194_v44 = vmul.f32 %v9581_v38, %v9581_v38  ;;  %9584 = vst [vmem:[#allocation231_spill] sm:$0xff] %v5216_v37  ;;  %v5218_v38 = vsub.f32 %v329_v10, %v841_v57  ;;  %v851_v21 = vld [vmem:[%s9299_s1 + $0x840] sm:$0xff]  ;;  %v853_v10 = vld [vmem:[%s9299_s1 + $0x850] sm:$0xff]  ;;  %9588 = vst [vmem:[#allocation235_spill] sm:$0xff] %v5244_v54  ;;  %v5246_v57 = vsub.f32 %v332_v62, %v844_v61 }
  0xd4   :  { %v348_v37 = vld [vmem:[%s9298_s0 + $0x888] sm:$0xff]  ;;  %v350_v18 = vld [vmem:[%s9298_s0 + $0x898] sm:$0xff]  ;;  %v855_v62 = vld [vmem:[%s9299_s1 + $0x860] sm:$0xff]  ;;  %v5272_v61 = vsub.f32 %v334_v36, %v846_v30  ;;  %v5298_v30 = vsub.f32 %v336_v32, %v848_v26  ;;  %v5326_v26 = vsub.f32 %v339_v55, %v851_v21 }
  0xd5   :  { %9582 = vst [vmem:[#allocation57_spill] sm:$0xff] %v5194_v44  ;;  %9585 = vst [vmem:[#allocation232_spill] sm:$0xff] %v5218_v38  ;;  %v5222_v44 = vmul.f32 %v3618_v50, %v3618_v50  ;;  %v852_v50 = vld [vmem:[%s9299_s1 + $0x848] sm:$0xff]  ;;  %v854_v11 = vld [vmem:[%s9299_s1 + $0x858] sm:$0xff] }
  0xd6   :  { %9589 = vst [vmem:[#allocation236_spill] sm:$0xff] %v5246_v57  ;;  %v856_v1 = vld [vmem:[%s9299_s1 + $0x868] sm:$0xff]  ;;  %9592 = vst [vmem:[#allocation237_spill] sm:$0xff] %v5272_v61  ;;  %v351_v54 = vld [vmem:[%s9298_s0 + $0x8a0] sm:$0xff] }
  0xd7   :  { %9586 = vst [vmem:[#allocation233_spill] sm:$0xff] %v5222_v44  ;;  %v9590_v44 = vld [vmem:[#allocation59_spill] sm:$0xff]  ;;  %v353_v33 = vld [vmem:[%s9298_s0 + $0x8b0] sm:$0xff]  ;;  %v859_v31 = vld [vmem:[%s9299_s1 + $0x880] sm:$0xff] }
  0xd8   :  { %v5250_v38 = vmul.f32 %v9590_v44, %v9590_v44  ;;  %v5274_v44 = vsub.f32 %v335_v52, %v847_v45  ;;  %v352_v2 = vld [vmem:[%s9298_s0 + $0x8a8] sm:$0xff]  ;;  %v857_v36 = vld [vmem:[%s9299_s1 + $0x870] sm:$0xff]  ;;  %v858_v52 = vld [vmem:[%s9299_s1 + $0x878] sm:$0xff]  ;;  %9596 = vst [vmem:[#allocation239_spill] sm:$0xff] %v5298_v30  ;;  %v5300_v45 = vsub.f32 %v337_v35, %v849_v20  ;;  %v5328_v20 = vsub.f32 %v340_v7, %v852_v50 }
  0xd9   :  { %v355_v61 = vld [vmem:[%s9298_s0 + $0x8c0] sm:$0xff]  ;;  %v356_v32 = vld [vmem:[%s9298_s0 + $0x8c8] sm:$0xff]  ;;  %9600 = vst [vmem:[#allocation243_spill] sm:$0xff] %v5326_v26  ;;  %v358_v30 = vld [vmem:[%s9298_s0 + $0x8d8] sm:$0xff]  ;;  %v5354_v50 = vsub.f32 %v342_v17, %v854_v11 }
  0xda   :  { %9591 = vst [vmem:[#allocation59_spill] sm:$0xff] %v5250_v38  ;;  %9593 = vst [vmem:[#allocation238_spill] sm:$0xff] %v5274_v44  ;;  %v9594_v38 = vld [vmem:[#allocation60_spill] sm:$0xff]  ;;  %v354_v44 = vld [vmem:[%s9298_s0 + $0x8b8] sm:$0xff] }
  0xdb   :  { %v5278_v57 = vmul.f32 %v9594_v38, %v9594_v38  ;;  %9597 = vst [vmem:[#allocation240_spill] sm:$0xff] %v5300_v45  ;;  %v5302_v38 = vsub.f32 %v338_v40, %v850_v13  ;;  %v860_v35 = vld [vmem:[%s9299_s1 + $0x888] sm:$0xff]  ;;  %v862_v40 = vld [vmem:[%s9299_s1 + $0x898] sm:$0xff]  ;;  %9601 = vst [vmem:[#allocation244_spill] sm:$0xff] %v5328_v20  ;;  %v5330_v13 = vsub.f32 %v341_v28, %v853_v10 }
  0xdc   :  { %v357_v45 = vld [vmem:[%s9298_s0 + $0x8d0] sm:$0xff]  ;;  %v359_v55 = vld [vmem:[%s9298_s0 + $0x8e0] sm:$0xff]  ;;  %v864_v28 = vld [vmem:[%s9299_s1 + $0x8a8] sm:$0xff]  ;;  %v5356_v10 = vsub.f32 %v343_v46, %v855_v62  ;;  %v5382_v62 = vsub.f32 %v345_v3, %v857_v36  ;;  %v5410_v36 = vsub.f32 %v348_v37, %v860_v35 }
  0xdd   :  { %9595 = vst [vmem:[#allocation60_spill] sm:$0xff] %v5278_v57  ;;  %9598 = vst [vmem:[#allocation241_spill] sm:$0xff] %v5302_v38  ;;  %v5306_v57 = vmul.f32 %v3646_v51, %v3646_v51  ;;  %v861_v51 = vld [vmem:[%s9299_s1 + $0x890] sm:$0xff]  ;;  %v863_v7 = vld [vmem:[%s9299_s1 + $0x8a0] sm:$0xff] }
  0xde   :  { %9602 = vst [vmem:[#allocation245_spill] sm:$0xff] %v5330_v13  ;;  %v865_v21 = vld [vmem:[%s9299_s1 + $0x8b0] sm:$0xff]  ;;  %9605 = vst [vmem:[#allocation246_spill] sm:$0xff] %v5356_v10  ;;  %v360_v20 = vld [vmem:[%s9298_s0 + $0x8e8] sm:$0xff] }
  0xdf   :  { %9599 = vst [vmem:[#allocation242_spill] sm:$0xff] %v5306_v57  ;;  %v9603_v57 = vld [vmem:[#allocation62_spill] sm:$0xff]  ;;  %v361_v26 = vld [vmem:[%s9298_s0 + $0x8f0] sm:$0xff]  ;;  %v362_v17 = vld [vmem:[%s9298_s0 + $0x8f8] sm:$0xff] }
  0xe0   :  { %v5334_v38 = vmul.f32 %v9603_v57, %v9603_v57  ;;  %v5358_v57 = vsub.f32 %v344_v22, %v856_v1  ;;  %v866_v46 = vld [vmem:[%s9299_s1 + $0x8b8] sm:$0xff]  ;;  %v867_v22 = vld [vmem:[%s9299_s1 + $0x8c0] sm:$0xff]  ;;  %v868_v11 = vld [vmem:[%s9299_s1 + $0x8c8] sm:$0xff]  ;;  %9609 = vst [vmem:[#allocation248_spill] sm:$0xff] %v5382_v62  ;;  %v5384_v1 = vsub.f32 %v346_v41, %v858_v52  ;;  %v5412_v52 = vsub.f32 %v349_v0, %v861_v51 }
  0xe1   :  { %v364_v10 = vld [vmem:[%s9298_s0 + $0x908] sm:$0xff]  ;;  %v365_v3 = vld [vmem:[%s9298_s0 + $0x910] sm:$0xff]  ;;  %9613 = vst [vmem:[#allocation252_spill] sm:$0xff] %v5410_v36  ;;  %v367_v62 = vld [vmem:[%s9298_s0 + $0x920] sm:$0xff]  ;;  %v5438_v51 = vsub.f32 %v351_v54, %v863_v7 }
  0xe2   :  { %9604 = vst [vmem:[#allocation62_spill] sm:$0xff] %v5334_v38  ;;  %9606 = vst [vmem:[#allocation247_spill] sm:$0xff] %v5358_v57  ;;  %v9607_v38 = vld [vmem:[#allocation63_spill] sm:$0xff]  ;;  %v363_v57 = vld [vmem:[%s9298_s0 + $0x900] sm:$0xff] }
  0xe3   :  { %v5362_v13 = vmul.f32 %v9607_v38, %v9607_v38  ;;  %9610 = vst [vmem:[#allocation249_spill] sm:$0xff] %v5384_v1  ;;  %v5386_v38 = vsub.f32 %v347_v8, %v859_v31  ;;  %v869_v41 = vld [vmem:[%s9299_s1 + $0x8d0] sm:$0xff]  ;;  %v871_v8 = vld [vmem:[%s9299_s1 + $0x8e0] sm:$0xff]  ;;  %9614 = vst [vmem:[#allocation253_spill] sm:$0xff] %v5412_v52  ;;  %v5414_v31 = vsub.f32 %v350_v18, %v862_v40 }
  0xe4   :  { %v366_v1 = vld [vmem:[%s9298_s0 + $0x918] sm:$0xff]  ;;  %v368_v37 = vld [vmem:[%s9298_s0 + $0x928] sm:$0xff]  ;;  %v873_v18 = vld [vmem:[%s9299_s1 + $0x8f0] sm:$0xff]  ;;  %v5440_v40 = vsub.f32 %v352_v2, %v864_v28  ;;  %v5466_v28 = vsub.f32 %v354_v44, %v866_v46  ;;  %v5494_v46 = vsub.f32 %v357_v45, %v869_v41 }
  0xe5   :  { %9608 = vst [vmem:[#allocation63_spill] sm:$0xff] %v5362_v13  ;;  %9611 = vst [vmem:[#allocation250_spill] sm:$0xff] %v5386_v38  ;;  %v5390_v13 = vmul.f32 %v3674_v58, %v3674_v58  ;;  %v870_v58 = vld [vmem:[%s9299_s1 + $0x8d8] sm:$0xff]  ;;  %v872_v0 = vld [vmem:[%s9299_s1 + $0x8e8] sm:$0xff] }
  0xe6   :  { %9615 = vst [vmem:[#allocation254_spill] sm:$0xff] %v5414_v31  ;;  %v874_v35 = vld [vmem:[%s9299_s1 + $0x8f8] sm:$0xff]  ;;  %9618 = vst [vmem:[#allocation255_spill] sm:$0xff] %v5440_v40  ;;  %v369_v52 = vld [vmem:[%s9298_s0 + $0x930] sm:$0xff] }
  0xe7   :  { %9612 = vst [vmem:[#allocation251_spill] sm:$0xff] %v5390_v13  ;;  %v9616_v13 = vld [vmem:[#allocation65_spill] sm:$0xff]  ;;  %v371_v54 = vld [vmem:[%s9298_s0 + $0x940] sm:$0xff]  ;;  %v877_v7 = vld [vmem:[%s9299_s1 + $0x910] sm:$0xff] }
  0xe8   :  { %v5418_v38 = vmul.f32 %v9616_v13, %v9616_v13  ;;  %v5442_v13 = vsub.f32 %v353_v33, %v865_v21  ;;  %v370_v36 = vld [vmem:[%s9298_s0 + $0x938] sm:$0xff]  ;;  %v875_v2 = vld [vmem:[%s9299_s1 + $0x900] sm:$0xff]  ;;  %v876_v33 = vld [vmem:[%s9299_s1 + $0x908] sm:$0xff]  ;;  %9622 = vst [vmem:[#allocation257_spill] sm:$0xff] %v5466_v28  ;;  %v5468_v21 = vsub.f32 %v355_v61, %v867_v22  ;;  %v5496_v22 = vsub.f32 %v358_v30, %v870_v58 }
  0xe9   :  { %v373_v40 = vld [vmem:[%s9298_s0 + $0x950] sm:$0xff]  ;;  %v374_v44 = vld [vmem:[%s9298_s0 + $0x958] sm:$0xff]  ;;  %9626 = vst [vmem:[#allocation261_spill] sm:$0xff] %v5494_v46  ;;  %v376_v28 = vld [vmem:[%s9298_s0 + $0x968] sm:$0xff]  ;;  %v5522_v58 = vsub.f32 %v360_v20, %v872_v0 }
  0xea   :  { %9617 = vst [vmem:[#allocation65_spill] sm:$0xff] %v5418_v38  ;;  %9619 = vst [vmem:[#allocation256_spill] sm:$0xff] %v5442_v13  ;;  %v9620_v38 = vld [vmem:[#allocation66_spill] sm:$0xff]  ;;  %v372_v13 = vld [vmem:[%s9298_s0 + $0x948] sm:$0xff] }
  0xeb   :  { %v5446_v31 = vmul.f32 %v9620_v38, %v9620_v38  ;;  %9623 = vst [vmem:[#allocation258_spill] sm:$0xff] %v5468_v21  ;;  %v5470_v38 = vsub.f32 %v356_v32, %v868_v11  ;;  %v878_v61 = vld [vmem:[%s9299_s1 + $0x918] sm:$0xff]  ;;  %v880_v32 = vld [vmem:[%s9299_s1 + $0x928] sm:$0xff]  ;;  %9627 = vst [vmem:[#allocation262_spill] sm:$0xff] %v5496_v22  ;;  %v5498_v11 = vsub.f32 %v359_v55, %v871_v8 }
  0xec   :  { %v375_v21 = vld [vmem:[%s9298_s0 + $0x960] sm:$0xff]  ;;  %v377_v45 = vld [vmem:[%s9298_s0 + $0x970] sm:$0xff]  ;;  %v882_v55 = vld [vmem:[%s9299_s1 + $0x938] sm:$0xff]  ;;  %v5524_v8 = vsub.f32 %v361_v26, %v873_v18  ;;  %v5550_v18 = vsub.f32 %v363_v57, %v875_v2  ;;  %v5578_v2 = vsub.f32 %v366_v1, %v878_v61 }
  0xed   :  { %9621 = vst [vmem:[#allocation66_spill] sm:$0xff] %v5446_v31  ;;  %9624 = vst [vmem:[#allocation259_spill] sm:$0xff] %v5470_v38  ;;  %v5474_v31 = vmul.f32 %v3702_v59, %v3702_v59  ;;  %v879_v59 = vld [vmem:[%s9299_s1 + $0x920] sm:$0xff]  ;;  %v881_v30 = vld [vmem:[%s9299_s1 + $0x930] sm:$0xff] }
  0xee   :  { %9628 = vst [vmem:[#allocation263_spill] sm:$0xff] %v5498_v11  ;;  %v883_v41 = vld [vmem:[%s9299_s1 + $0x940] sm:$0xff]  ;;  %9631 = vst [vmem:[#allocation264_spill] sm:$0xff] %v5524_v8  ;;  %v378_v22 = vld [vmem:[%s9298_s0 + $0x978] sm:$0xff] }
  0xef   :  { %9625 = vst [vmem:[#allocation260_spill] sm:$0xff] %v5474_v31  ;;  %v9629_v31 = vld [vmem:[#allocation68_spill] sm:$0xff]  ;;  %v379_v46 = vld [vmem:[%s9298_s0 + $0x980] sm:$0xff]  ;;  %v380_v20 = vld [vmem:[%s9298_s0 + $0x988] sm:$0xff] }
  0xf0   :  { %v5502_v38 = vmul.f32 %v9629_v31, %v9629_v31  ;;  %v5526_v31 = vsub.f32 %v362_v17, %v874_v35  ;;  %v884_v26 = vld [vmem:[%s9299_s1 + $0x948] sm:$0xff]  ;;  %v885_v17 = vld [vmem:[%s9299_s1 + $0x950] sm:$0xff]  ;;  %v886_v0 = vld [vmem:[%s9299_s1 + $0x958] sm:$0xff]  ;;  %9635 = vst [vmem:[#allocation266_spill] sm:$0xff] %v5550_v18  ;;  %v5552_v35 = vsub.f32 %v364_v10, %v876_v33  ;;  %v5580_v33 = vsub.f32 %v367_v62, %v879_v59 }
  0xf1   :  { %v382_v8 = vld [vmem:[%s9298_s0 + $0x998] sm:$0xff]  ;;  %v383_v57 = vld [vmem:[%s9298_s0 + $0x9a0] sm:$0xff]  ;;  %9639 = vst [vmem:[#allocation270_spill] sm:$0xff] %v5578_v2  ;;  %v385_v18 = vld [vmem:[%s9298_s0 + $0x9b0] sm:$0xff]  ;;  %v5606_v59 = vsub.f32 %v369_v52, %v881_v30 }
  0xf2   :  { %9630 = vst [vmem:[#allocation68_spill] sm:$0xff] %v5502_v38  ;;  %9632 = vst [vmem:[#allocation265_spill] sm:$0xff] %v5526_v31  ;;  %v9633_v38 = vld [vmem:[#allocation69_spill] sm:$0xff]  ;;  %v381_v31 = vld [vmem:[%s9298_s0 + $0x990] sm:$0xff] }
  0xf3   :  { %v5530_v11 = vmul.f32 %v9633_v38, %v9633_v38  ;;  %9636 = vst [vmem:[#allocation267_spill] sm:$0xff] %v5552_v35  ;;  %v5554_v38 = vsub.f32 %v365_v3, %v877_v7  ;;  %v887_v10 = vld [vmem:[%s9299_s1 + $0x960] sm:$0xff]  ;;  %v889_v3 = vld [vmem:[%s9299_s1 + $0x970] sm:$0xff]  ;;  %9640 = vst [vmem:[#allocation271_spill] sm:$0xff] %v5580_v33  ;;  %v5582_v7 = vsub.f32 %v368_v37, %v880_v32 }
  0xf4   :  { %v384_v35 = vld [vmem:[%s9298_s0 + $0x9a8] sm:$0xff]  ;;  %v386_v1 = vld [vmem:[%s9298_s0 + $0x9b8] sm:$0xff]  ;;  %v891_v37 = vld [vmem:[%s9299_s1 + $0x980] sm:$0xff]  ;;  %v5608_v32 = vsub.f32 %v370_v36, %v882_v55  ;;  %v5634_v55 = vsub.f32 %v372_v13, %v884_v26  ;;  %v5662_v26 = vsub.f32 %v375_v21, %v887_v10 }
  0xf5   :  { %9634 = vst [vmem:[#allocation69_spill] sm:$0xff] %v5530_v11  ;;  %9637 = vst [vmem:[#allocation268_spill] sm:$0xff] %v5554_v38  ;;  %v5558_v11 = vmul.f32 %v3730_v60, %v3730_v60  ;;  %v888_v60 = vld [vmem:[%s9299_s1 + $0x968] sm:$0xff]  ;;  %v890_v62 = vld [vmem:[%s9299_s1 + $0x978] sm:$0xff] }
  0xf6   :  { %9641 = vst [vmem:[#allocation272_spill] sm:$0xff] %v5582_v7  ;;  %v892_v61 = vld [vmem:[%s9299_s1 + $0x988] sm:$0xff]  ;;  %9644 = vst [vmem:[#allocation273_spill] sm:$0xff] %v5608_v32  ;;  %v387_v33 = vld [vmem:[%s9298_s0 + $0x9c0] sm:$0xff]  ;;  %v5687_v10 = vsub.f32 %v378_v22, %v890_v62 }
  0xf7   :  { %9638 = vst [vmem:[#allocation269_spill] sm:$0xff] %v5558_v11  ;;  %v9642_v11 = vld [vmem:[#allocation71_spill] sm:$0xff]  ;;  %v389_v52 = vld [vmem:[%s9298_s0 + $0x9d0] sm:$0xff]  ;;  %v895_v30 = vld [vmem:[%s9299_s1 + $0x9a0] sm:$0xff] }
  0xf8   :  { %v5586_v38 = vmul.f32 %v9642_v11, %v9642_v11  ;;  %v5610_v11 = vsub.f32 %v371_v54, %v883_v41  ;;  %v388_v2 = vld [vmem:[%s9298_s0 + $0x9c8] sm:$0xff]  ;;  %v893_v36 = vld [vmem:[%s9299_s1 + $0x990] sm:$0xff]  ;;  %v894_v54 = vld [vmem:[%s9299_s1 + $0x998] sm:$0xff]  ;;  %9648 = vst [vmem:[#allocation275_spill] sm:$0xff] %v5634_v55  ;;  %v5636_v41 = vsub.f32 %v373_v40, %v885_v17  ;;  %v5664_v17 = vsub.f32 %v376_v28, %v888_v60 }
  0xf9   :  { %v391_v32 = vld [vmem:[%s9298_s0 + $0x9e0] sm:$0xff]  ;;  %v392_v13 = vld [vmem:[%s9298_s0 + $0x9e8] sm:$0xff]  ;;  %9656 = vst [vmem:[#allocation281_spill] sm:$0xff] %v5687_v10  ;;  %v5689_v60 = vsub.f32 %v379_v46, %v891_v37  ;;  %v398_v22 = vld [vmem:[%s9298_s0 + $0xa18] sm:$0xff]  ;;  %v5715_v37 = vsub.f32 %v381_v31, %v893_v36  ;;  %v5723_v10 = vmul.f32 %v3786_v5, %v3786_v5 }
  0xfa   :  { %9643 = vst [vmem:[#allocation71_spill] sm:$0xff] %v5586_v38  ;;  %9645 = vst [vmem:[#allocation274_spill] sm:$0xff] %v5610_v11  ;;  %v9646_v38 = vld [vmem:[#allocation72_spill] sm:$0xff]  ;;  %v390_v11 = vld [vmem:[%s9298_s0 + $0x9d8] sm:$0xff] }
  0xfb   :  { %v5614_v7 = vmul.f32 %v9646_v38, %v9646_v38  ;;  %9649 = vst [vmem:[#allocation276_spill] sm:$0xff] %v5636_v41  ;;  %v5638_v38 = vsub.f32 %v374_v44, %v886_v0  ;;  %v896_v40 = vld [vmem:[%s9299_s1 + $0x9a8] sm:$0xff]  ;;  %v898_v44 = vld [vmem:[%s9299_s1 + $0x9b8] sm:$0xff]  ;;  %9652 = vst [vmem:[#allocation279_spill] sm:$0xff] %v5664_v17  ;;  %v5666_v0 = vsub.f32 %v377_v45, %v889_v3 }
  0xfc   :  { %v393_v41 = vld [vmem:[%s9298_s0 + $0x9f0] sm:$0xff]  ;;  %v395_v55 = vld [vmem:[%s9298_s0 + $0xa00] sm:$0xff]  ;;  %v900_v28 = vld [vmem:[%s9299_s1 + $0x9c8] sm:$0xff]  ;;  %v5691_v3 = vsub.f32 %v380_v20, %v892_v61  ;;  %v5717_v61 = vsub.f32 %v382_v8, %v894_v54  ;;  %9662 = vst [vmem:[#allocation285_spill] sm:$0xff] %v5723_v10  ;;  %v5744_v54 = vsub.f32 %v386_v1, %v898_v44 }
  0xfd   :  { %9647 = vst [vmem:[#allocation72_spill] sm:$0xff] %v5614_v7  ;;  %9650 = vst [vmem:[#allocation277_spill] sm:$0xff] %v5638_v38  ;;  %v5642_v7 = vmul.f32 %v3758_v4, %v3758_v4  ;;  %v897_v4 = vld [vmem:[%s9299_s1 + $0x9b0] sm:$0xff]  ;;  %v899_v21 = vld [vmem:[%s9299_s1 + $0x9c0] sm:$0xff]  ;;  %v5770_v44 = vsub.f32 %v388_v2, %v900_v28 }
  0xfe   :  { %9653 = vst [vmem:[#allocation280_spill] sm:$0xff] %v5666_v0  ;;  %v901_v45 = vld [vmem:[%s9299_s1 + $0x9d0] sm:$0xff]  ;;  %9657 = vst [vmem:[#allocation282_spill] sm:$0xff] %v5691_v3  ;;  %v396_v0 = vld [vmem:[%s9298_s0 + $0xa08] sm:$0xff]  ;;  %v5742_v36 = vsub.f32 %v385_v18, %v897_v4  ;;  %v5768_v4 = vsub.f32 %v387_v33, %v899_v21 }
  0xff   :  { %9651 = vst [vmem:[#allocation278_spill] sm:$0xff] %v5642_v7  ;;  %v9654_v7 = vld [vmem:[#allocation74_spill] sm:$0xff]  ;;  %v397_v17 = vld [vmem:[%s9298_s0 + $0xa10] sm:$0xff]  ;;  %v902_v46 = vld [vmem:[%s9299_s1 + $0x9d8] sm:$0xff] }
 0x100   :  { %v5670_v38 = vmul.f32 %v9654_v7, %v9654_v7  ;;  %v9658_v7 = vld [vmem:[#allocation75_spill] sm:$0xff]  ;;  %v903_v20 = vld [vmem:[%s9299_s1 + $0x9e0] sm:$0xff]  ;;  %9660 = vst [vmem:[#allocation283_spill] sm:$0xff] %v5717_v61  ;;  %v401_v31 = vld [vmem:[%s9298_s0 + $0xa30] sm:$0xff]  ;;  %v5796_v28 = vsub.f32 %v390_v11, %v902_v46 }
 0x101   :  { %v904_v62 = vld [vmem:[%s9299_s1 + $0x9e8] sm:$0xff]  ;;  %v905_v8 = vld [vmem:[%s9299_s1 + $0x9f0] sm:$0xff]  ;;  %v907_v5 = vld [vmem:[%s9299_s1 + $0xa00] sm:$0xff]  ;;  %9664 = vst [vmem:[#allocation287_spill] sm:$0xff] %v5742_v36 }
 0x102   :  { %9655 = vst [vmem:[#allocation74_spill] sm:$0xff] %v5670_v38  ;;  %v5695_v38 = vmul.f32 %v9658_v7, %v9658_v7  ;;  %v5719_v7 = vsub.f32 %v383_v57, %v895_v30  ;;  %v400_v3 = vld [vmem:[%s9298_s0 + $0xa28] sm:$0xff]  ;;  %v5740_v57 = vsub.f32 %v384_v35, %v896_v40  ;;  %9665 = vst [vmem:[#allocation288_spill] sm:$0xff] %v5744_v54  ;;  %v9666_v30 = vld [vmem:[#allocation77_spill] sm:$0xff] }
 0x103   :  { %v5748_v10 = vmul.f32 %v9666_v30, %v9666_v30  ;;  %v404_v61 = vld [vmem:[%s9298_s0 + $0xa48] sm:$0xff]  ;;  %v405_v35 = vld [vmem:[%s9298_s0 + $0xa50] sm:$0xff]  ;;  %v910_v40 = vld [vmem:[%s9299_s1 + $0xa18] sm:$0xff]  ;;  %9668 = vst [vmem:[#allocation289_spill] sm:$0xff] %v5768_v4  ;;  %v5772_v30 = vsub.f32 %v389_v52, %v901_v45  ;;  %v5798_v45 = vsub.f32 %v391_v32, %v903_v20  ;;  %v5824_v46 = vsub.f32 %v393_v41, %v905_v8 }
 0x104   :  { %9659 = vst [vmem:[#allocation75_spill] sm:$0xff] %v5695_v38  ;;  %9661 = vst [vmem:[#allocation284_spill] sm:$0xff] %v5719_v7  ;;  %v399_v38 = vld [vmem:[%s9298_s0 + $0xa20] sm:$0xff]  ;;  %v908_v18 = vld [vmem:[%s9299_s1 + $0xa08] sm:$0xff]  ;;  %v5826_v20 = vsub.f32 %v395_v55, %v907_v5 }
 0x105   :  { %9663 = vst [vmem:[#allocation286_spill] sm:$0xff] %v5740_v57  ;;  %9667 = vst [vmem:[#allocation77_spill] sm:$0xff] %v5748_v10  ;;  %v403_v7 = vld [vmem:[%s9298_s0 + $0xa40] sm:$0xff]  ;;  %v909_v1 = vld [vmem:[%s9299_s1 + $0xa10] sm:$0xff] }
 0x106   :  { %9669 = vst [vmem:[#allocation290_spill] sm:$0xff] %v5770_v44  ;;  %9670 = vst [vmem:[#allocation291_spill] sm:$0xff] %v5772_v30  ;;  %v9671_v54 = vld [vmem:[#allocation78_spill] sm:$0xff]  ;;  %v406_v36 = vld [vmem:[%s9298_s0 + $0xa58] sm:$0xff] }
 0x107   :  { %v5776_v10 = vmul.f32 %v9671_v54, %v9671_v54  ;;  %v407_v57 = vld [vmem:[%s9298_s0 + $0xa60] sm:$0xff]  ;;  %v408_v33 = vld [vmem:[%s9298_s0 + $0xa68] sm:$0xff]  ;;  %v913_v21 = vld [vmem:[%s9299_s1 + $0xa30] sm:$0xff]  ;;  %9673 = vst [vmem:[#allocation292_spill] sm:$0xff] %v5796_v28  ;;  %v5800_v54 = vsub.f32 %v392_v13, %v904_v62 }
 0x108   :  { %v911_v2 = vld [vmem:[%s9299_s1 + $0xa20] sm:$0xff]  ;;  %v912_v52 = vld [vmem:[%s9299_s1 + $0xa28] sm:$0xff]  ;;  %9674 = vst [vmem:[#allocation293_spill] sm:$0xff] %v5798_v45  ;;  %v409_v30 = vld [vmem:[%s9298_s0 + $0xa70] sm:$0xff] }
 0x109   :  { %9672 = vst [vmem:[#allocation78_spill] sm:$0xff] %v5776_v10  ;;  %9675 = vst [vmem:[#allocation294_spill] sm:$0xff] %v5800_v54  ;;  %v5804_v10 = vmul.f32 %v3814_v6, %v3814_v6  ;;  %v411_v44 = vld [vmem:[%s9298_s0 + $0xa80] sm:$0xff]  ;;  %v412_v11 = vld [vmem:[%s9298_s0 + $0xa88] sm:$0xff] }
 0x10a   :  { %v915_v32 = vld [vmem:[%s9299_s1 + $0xa40] sm:$0xff]  ;;  %v916_v6 = vld [vmem:[%s9299_s1 + $0xa48] sm:$0xff]  ;;  %v917_v13 = vld [vmem:[%s9299_s1 + $0xa50] sm:$0xff]  ;;  %9677 = vst [vmem:[#allocation296_spill] sm:$0xff] %v5824_v46 }
 0x10b   :  { %9676 = vst [vmem:[#allocation295_spill] sm:$0xff] %v5804_v10  ;;  %9678 = vst [vmem:[#allocation297_spill] sm:$0xff] %v5826_v20  ;;  %v9679_v62 = vld [vmem:[#allocation80_spill] sm:$0xff]  ;;  %v9681_v54 = vld [vmem:[#allocation81_spill] sm:$0xff] }
 0x10c   :  { %v5830_v10 = vmul.f32 %v9679_v62, %v9679_v62  ;;  %v5834_v45 = vmul.f32 %v9681_v54, %v9681_v54  ;;  %v413_v28 = vld [vmem:[%s9298_s0 + $0xa90] sm:$0xff]  ;;  %v414_v4 = vld [vmem:[%s9298_s0 + $0xa98] sm:$0xff]  ;;  %v415_v55 = vld [vmem:[%s9298_s0 + $0xaa0] sm:$0xff]  ;;  %v5854_v54 = vsub.f32 %v396_v0, %v908_v18  ;;  %v5856_v62 = vsub.f32 %v397_v17, %v909_v1 }
 0x10d   :  { %v918_v41 = vld [vmem:[%s9299_s1 + $0xa58] sm:$0xff]  ;;  %v919_v8 = vld [vmem:[%s9299_s1 + $0xa60] sm:$0xff]  ;;  %v920_v5 = vld [vmem:[%s9299_s1 + $0xa68] sm:$0xff]  ;;  %v5882_v18 = vsub.f32 %v399_v38, %v911_v2  ;;  %v5884_v1 = vsub.f32 %v400_v3, %v912_v52  ;;  %v5910_v52 = vsub.f32 %v403_v7, %v915_v32 }
 0x10e   :  { %9680 = vst [vmem:[#allocation80_spill] sm:$0xff] %v5830_v10  ;;  %9682 = vst [vmem:[#allocation81_spill] sm:$0xff] %v5834_v45  ;;  %v5858_v10 = vsub.f32 %v398_v22, %v910_v40  ;;  %v5862_v45 = vmul.f32 %v3842_v14, %v3842_v14  ;;  %v416_v20 = vld [vmem:[%s9298_s0 + $0xaa8] sm:$0xff]  ;;  %v417_v46 = vld [vmem:[%s9298_s0 + $0xab0] sm:$0xff]  ;;  %v5886_v40 = vsub.f32 %v401_v31, %v913_v21 }
 0x10f   :  { %9683 = vst [vmem:[#allocation298_spill] sm:$0xff] %v5854_v54  ;;  %9684 = vst [vmem:[#allocation299_spill] sm:$0xff] %v5856_v62  ;;  %v419_v0 = vld [vmem:[%s9298_s0 + $0xac0] sm:$0xff]  ;;  %v921_v17 = vld [vmem:[%s9299_s1 + $0xa70] sm:$0xff]  ;;  %v5912_v21 = vsub.f32 %v404_v61, %v916_v6  ;;  %v5938_v32 = vsub.f32 %v406_v36, %v918_v41  ;;  %v5940_v6 = vsub.f32 %v407_v57, %v919_v8 }
 0x110   :  { %9685 = vst [vmem:[#allocation300_spill] sm:$0xff] %v5858_v10  ;;  %9686 = vst [vmem:[#allocation301_spill] sm:$0xff] %v5862_v45  ;;  %v923_v14 = vld [vmem:[%s9299_s1 + $0xa80] sm:$0xff]  ;;  %v924_v22 = vld [vmem:[%s9299_s1 + $0xa88] sm:$0xff] }
 0x111   :  { %9687 = vst [vmem:[#allocation302_spill] sm:$0xff] %v5882_v18  ;;  %9688 = vst [vmem:[#allocation303_spill] sm:$0xff] %v5884_v1  ;;  %v9690_v45 = vld [vmem:[#allocation83_spill] sm:$0xff]  ;;  %v421_v54 = vld [vmem:[%s9298_s0 + $0xad0] sm:$0xff]  ;;  %v5965_v41 = vsub.f32 %v411_v44, %v923_v14  ;;  %v5967_v8 = vsub.f32 %v412_v11, %v924_v22 }
 0x112   :  { %9689 = vst [vmem:[#allocation304_spill] sm:$0xff] %v5886_v40  ;;  %v5890_v10 = vmul.f32 %v9690_v45, %v9690_v45  ;;  %v420_v62 = vld [vmem:[%s9298_s0 + $0xac8] sm:$0xff]  ;;  %v422_v38 = vld [vmem:[%s9298_s0 + $0xad8] sm:$0xff]  ;;  %v925_v3 = vld [vmem:[%s9299_s1 + $0xa90] sm:$0xff]  ;;  %v5914_v45 = vsub.f32 %v405_v35, %v917_v13  ;;  %v5942_v13 = vsub.f32 %v408_v33, %v920_v5  ;;  %v5963_v33 = vsub.f32 %v409_v30, %v921_v17 }
 0x113   :  { %v926_v31 = vld [vmem:[%s9299_s1 + $0xa98] sm:$0xff]  ;;  %v927_v2 = vld [vmem:[%s9299_s1 + $0xaa0] sm:$0xff]  ;;  %9692 = vst [vmem:[#allocation305_spill] sm:$0xff] %v5912_v21  ;;  %v424_v18 = vld [vmem:[%s9298_s0 + $0xae8] sm:$0xff]  ;;  %v5991_v14 = vsub.f32 %v413_v28, %v925_v3 }
 0x114   :  { %9691 = vst [vmem:[#allocation83_spill] sm:$0xff] %v5890_v10  ;;  %9693 = vst [vmem:[#allocation306_spill] sm:$0xff] %v5914_v45  ;;  %v9694_v10 = vld [vmem:[#allocation84_spill] sm:$0xff]  ;;  %v423_v1 = vld [vmem:[%s9298_s0 + $0xae0] sm:$0xff]  ;;  %v5993_v22 = vsub.f32 %v414_v4, %v926_v31 }
 0x115   :  { %v5918_v40 = vmul.f32 %v9694_v10, %v9694_v10  ;;  %v425_v7 = vld [vmem:[%s9298_s0 + $0xaf0] sm:$0xff]  ;;  %v928_v61 = vld [vmem:[%s9299_s1 + $0xaa8] sm:$0xff]  ;;  %v931_v35 = vld [vmem:[%s9299_s1 + $0xac0] sm:$0xff]  ;;  %9696 = vst [vmem:[#allocation307_spill] sm:$0xff] %v5940_v6 }
 0x116   :  { %v929_v10 = vld [vmem:[%s9299_s1 + $0xab0] sm:$0xff]  ;;  %9697 = vst [vmem:[#allocation308_spill] sm:$0xff] %v5942_v13  ;;  %v427_v45 = vld [vmem:[%s9298_s0 + $0xb00] sm:$0xff]  ;;  %v428_v21 = vld [vmem:[%s9298_s0 + $0xb08] sm:$0xff]  ;;  %v6020_v31 = vsub.f32 %v419_v0, %v931_v35 }
 0x117   :  { %9695 = vst [vmem:[#allocation84_spill] sm:$0xff] %v5918_v40  ;;  %v5946_v40 = vmul.f32 %v3870_v15, %v3870_v15  ;;  %v932_v36 = vld [vmem:[%s9299_s1 + $0xac8] sm:$0xff]  ;;  %v933_v57 = vld [vmem:[%s9299_s1 + $0xad0] sm:$0xff]  ;;  %v934_v15 = vld [vmem:[%s9299_s1 + $0xad8] sm:$0xff]  ;;  %v6018_v3 = vsub.f32 %v417_v46, %v929_v10 }
 0x118   :  { %9699 = vst [vmem:[#allocation310_spill] sm:$0xff] %v5963_v33  ;;  %9700 = vst [vmem:[#allocation311_spill] sm:$0xff] %v5965_v41  ;;  %v9702_v5 = vld [vmem:[#allocation86_spill] sm:$0xff]  ;;  %v429_v13 = vld [vmem:[%s9298_s0 + $0xb10] sm:$0xff]  ;;  %v6046_v10 = vsub.f32 %v421_v54, %v933_v57  ;;  %v6048_v35 = vsub.f32 %v422_v38, %v934_v15 }
 0x119   :  { %9698 = vst [vmem:[#allocation309_spill] sm:$0xff] %v5946_v40  ;;  %9701 = vst [vmem:[#allocation312_spill] sm:$0xff] %v5967_v8  ;;  %v5971_v40 = vmul.f32 %v9702_v5, %v9702_v5  ;;  %v430_v6 = vld [vmem:[%s9298_s0 + $0xb18] sm:$0xff]  ;;  %v431_v30 = vld [vmem:[%s9298_s0 + $0xb20] sm:$0xff]  ;;  %v5995_v5 = vsub.f32 %v415_v55, %v927_v2  ;;  %v6024_v2 = vmul.f32 %v3898_v16, %v3898_v16 }
 0x11a   :  { %v935_v44 = vld [vmem:[%s9299_s1 + $0xae0] sm:$0xff]  ;;  %v936_v11 = vld [vmem:[%s9299_s1 + $0xae8] sm:$0xff]  ;;  %v937_v17 = vld [vmem:[%s9299_s1 + $0xaf0] sm:$0xff]  ;;  %9704 = vst [vmem:[#allocation313_spill] sm:$0xff] %v5993_v22 }
 0x11b   :  { %9703 = vst [vmem:[#allocation86_spill] sm:$0xff] %v5971_v40  ;;  %9705 = vst [vmem:[#allocation314_spill] sm:$0xff] %v5995_v5  ;;  %v9706_v40 = vld [vmem:[#allocation87_spill] sm:$0xff]  ;;  %v433_v33 = vld [vmem:[%s9298_s0 + $0xb30] sm:$0xff]  ;;  %v6072_v57 = vsub.f32 %v423_v1, %v935_v44  ;;  %v6074_v15 = vsub.f32 %v424_v18, %v936_v11 }
 0x11c   :  { %v5999_v8 = vmul.f32 %v9706_v40, %v9706_v40  ;;  %v432_v41 = vld [vmem:[%s9298_s0 + $0xb28] sm:$0xff]  ;;  %v435_v28 = vld [vmem:[%s9298_s0 + $0xb40] sm:$0xff]  ;;  %v6016_v40 = vsub.f32 %v416_v20, %v928_v61  ;;  %9709 = vst [vmem:[#allocation316_spill] sm:$0xff] %v6018_v3  ;;  %9710 = vst [vmem:[#allocation317_spill] sm:$0xff] %v6020_v31  ;;  %v6044_v61 = vsub.f32 %v420_v62, %v932_v36 }
 0x11d   :  { %v939_v4 = vld [vmem:[%s9299_s1 + $0xb00] sm:$0xff]  ;;  %v940_v55 = vld [vmem:[%s9299_s1 + $0xb08] sm:$0xff]  ;;  %9711 = vst [vmem:[#allocation318_spill] sm:$0xff] %v6024_v2  ;;  %v437_v5 = vld [vmem:[%s9298_s0 + $0xb50] sm:$0xff] }
 0x11e   :  { %9707 = vst [vmem:[#allocation87_spill] sm:$0xff] %v5999_v8  ;;  %9708 = vst [vmem:[#allocation315_spill] sm:$0xff] %v6016_v40  ;;  %v436_v8 = vld [vmem:[%s9298_s0 + $0xb48] sm:$0xff]  ;;  %v438_v20 = vld [vmem:[%s9298_s0 + $0xb58] sm:$0xff]  ;;  %v6100_v11 = vsub.f32 %v427_v45, %v939_v4 }
 0x11f   :  { %v941_v46 = vld [vmem:[%s9299_s1 + $0xb10] sm:$0xff]  ;;  %v942_v16 = vld [vmem:[%s9299_s1 + $0xb18] sm:$0xff]  ;;  %v943_v0 = vld [vmem:[%s9299_s1 + $0xb20] sm:$0xff]  ;;  %9712 = vst [vmem:[#allocation319_spill] sm:$0xff] %v6044_v61 }
 0x120   :  { %9713 = vst [vmem:[#allocation320_spill] sm:$0xff] %v6046_v10  ;;  %9714 = vst [vmem:[#allocation321_spill] sm:$0xff] %v6048_v35  ;;  %v9715_v2 = vld [vmem:[#allocation89_spill] sm:$0xff]  ;;  %v439_v3 = vld [vmem:[%s9298_s0 + $0xb60] sm:$0xff] }
 0x121   :  { %v6052_v31 = vmul.f32 %v9715_v2, %v9715_v2  ;;  %v440_v40 = vld [vmem:[%s9298_s0 + $0xb68] sm:$0xff]  ;;  %v441_v62 = vld [vmem:[%s9298_s0 + $0xb70] sm:$0xff]  ;;  %v947_v36 = vld [vmem:[%s9299_s1 + $0xb40] sm:$0xff]  ;;  %9717 = vst [vmem:[#allocation322_spill] sm:$0xff] %v6072_v57  ;;  %v6076_v2 = vsub.f32 %v425_v7, %v937_v17  ;;  %v6102_v17 = vsub.f32 %v428_v21, %v940_v55  ;;  %v6130_v55 = vsub.f32 %v429_v13, %v941_v46 }
 0x122   :  { %v944_v54 = vld [vmem:[%s9299_s1 + $0xb28] sm:$0xff]  ;;  %v945_v38 = vld [vmem:[%s9299_s1 + $0xb30] sm:$0xff]  ;;  %9718 = vst [vmem:[#allocation323_spill] sm:$0xff] %v6074_v15  ;;  %v443_v10 = vld [vmem:[%s9298_s0 + $0xb80] sm:$0xff] }
 0x123   :  { %9716 = vst [vmem:[#allocation89_spill] sm:$0xff] %v6052_v31  ;;  %9719 = vst [vmem:[#allocation324_spill] sm:$0xff] %v6076_v2  ;;  %v9720_v31 = vld [vmem:[#allocation90_spill] sm:$0xff]  ;;  %v444_v61 = vld [vmem:[%s9298_s0 + $0xb88] sm:$0xff] }
 0x124   :  { %v6080_v35 = vmul.f32 %v9720_v31, %v9720_v31  ;;  %v445_v1 = vld [vmem:[%s9298_s0 + $0xb90] sm:$0xff]  ;;  %v948_v18 = vld [vmem:[%s9299_s1 + $0xb48] sm:$0xff]  ;;  %v950_v44 = vld [vmem:[%s9299_s1 + $0xb58] sm:$0xff]  ;;  %9722 = vst [vmem:[#allocation325_spill] sm:$0xff] %v6100_v11  ;;  %v6106_v31 = vmul.f32 %v3926_v24, %v3926_v24 }
 0x125   :  { %v949_v7 = vld [vmem:[%s9299_s1 + $0xb50] sm:$0xff]  ;;  %9723 = vst [vmem:[#allocation326_spill] sm:$0xff] %v6102_v17  ;;  %v446_v15 = vld [vmem:[%s9298_s0 + $0xb98] sm:$0xff]  ;;  %v447_v57 = vld [vmem:[%s9298_s0 + $0xba0] sm:$0xff] }
 0x126   :  { %9721 = vst [vmem:[#allocation90_spill] sm:$0xff] %v6080_v35  ;;  %9724 = vst [vmem:[#allocation327_spill] sm:$0xff] %v6106_v31  ;;  %v9725_v35 = vld [vmem:[#allocation92_spill] sm:$0xff]  ;;  %v448_v21 = vld [vmem:[%s9298_s0 + $0xba8] sm:$0xff] }
 0x127   :  { %v6110_v2 = vmul.f32 %v9725_v35, %v9725_v35  ;;  %v951_v24 = vld [vmem:[%s9299_s1 + $0xb60] sm:$0xff]  ;;  %v952_v45 = vld [vmem:[%s9299_s1 + $0xb68] sm:$0xff]  ;;  %v953_v4 = vld [vmem:[%s9299_s1 + $0xb70] sm:$0xff]  ;;  %v6132_v35 = vsub.f32 %v430_v6, %v942_v16  ;;  %v6158_v16 = vsub.f32 %v432_v41, %v944_v54  ;;  %v6186_v54 = vsub.f32 %v436_v8, %v948_v18 }
 0x128   :  { %v9729_v31 = vld [vmem:[#allocation93_spill] sm:$0xff]  ;;  %v449_v11 = vld [vmem:[%s9298_s0 + $0xbb0] sm:$0xff]  ;;  %v451_v22 = vld [vmem:[%s9298_s0 + $0xbc0] sm:$0xff]  ;;  %v6211_v18 = vsub.f32 %v439_v3, %v951_v24 }
 0x129   :  { %9726 = vst [vmem:[#allocation92_spill] sm:$0xff] %v6110_v2  ;;  %9727 = vst [vmem:[#allocation328_spill] sm:$0xff] %v6132_v35  ;;  %v6134_v2 = vsub.f32 %v431_v30, %v943_v0  ;;  %v6138_v17 = vmul.f32 %v9729_v31, %v9729_v31  ;;  %v452_v13 = vld [vmem:[%s9298_s0 + $0xbc8] sm:$0xff]  ;;  %v955_v6 = vld [vmem:[%s9299_s1 + $0xb80] sm:$0xff]  ;;  %v6160_v0 = vsub.f32 %v433_v33, %v945_v38 }
 0x12a   :  { %v956_v30 = vld [vmem:[%s9299_s1 + $0xb88] sm:$0xff]  ;;  %v957_v46 = vld [vmem:[%s9299_s1 + $0xb90] sm:$0xff]  ;;  %9731 = vst [vmem:[#allocation330_spill] sm:$0xff] %v6158_v16  ;;  %v6162_v31 = vsub.f32 %v435_v28, %v947_v36  ;;  %v454_v35 = vld [vmem:[%s9298_s0 + $0xbd8] sm:$0xff]  ;;  %v6188_v38 = vsub.f32 %v437_v5, %v949_v7  ;;  %v6190_v36 = vsub.f32 %v438_v20, %v950_v44  ;;  %v6213_v7 = vsub.f32 %v440_v40, %v952_v45 }
 0x12b   :  { %9728 = vst [vmem:[#allocation329_spill] sm:$0xff] %v6134_v2  ;;  %9730 = vst [vmem:[#allocation93_spill] sm:$0xff] %v6138_v17  ;;  %v6166_v17 = vmul.f32 %v3954_v25, %v3954_v25  ;;  %v453_v2 = vld [vmem:[%s9298_s0 + $0xbd0] sm:$0xff]  ;;  %v455_v41 = vld [vmem:[%s9298_s0 + $0xbe0] sm:$0xff]  ;;  %v6215_v44 = vsub.f32 %v441_v62, %v953_v4  ;;  %v6239_v45 = vsub.f32 %v443_v10, %v955_v6 }
 0x12c   :  { %9732 = vst [vmem:[#allocation331_spill] sm:$0xff] %v6160_v0  ;;  %9733 = vst [vmem:[#allocation332_spill] sm:$0xff] %v6162_v31  ;;  %v958_v33 = vld [vmem:[%s9299_s1 + $0xb98] sm:$0xff]  ;;  %v959_v25 = vld [vmem:[%s9299_s1 + $0xba0] sm:$0xff]  ;;  %v6241_v4 = vsub.f32 %v444_v61, %v956_v30 }
 0x12d   :  { %9734 = vst [vmem:[#allocation333_spill] sm:$0xff] %v6166_v17  ;;  %v960_v28 = vld [vmem:[%s9299_s1 + $0xba8] sm:$0xff]  ;;  %9735 = vst [vmem:[#allocation334_spill] sm:$0xff] %v6188_v38  ;;  %v457_v16 = vld [vmem:[%s9298_s0 + $0xbf0] sm:$0xff]  ;;  %v6264_v6 = vsub.f32 %v446_v15, %v958_v33  ;;  %v6266_v30 = vsub.f32 %v447_v57, %v959_v25 }
 0x12e   :  { %9736 = vst [vmem:[#allocation335_spill] sm:$0xff] %v6190_v36  ;;  %v9737_v17 = vld [vmem:[#allocation95_spill] sm:$0xff]  ;;  %v961_v8 = vld [vmem:[%s9299_s1 + $0xbb0] sm:$0xff]  ;;  %v963_v5 = vld [vmem:[%s9299_s1 + $0xbc0] sm:$0xff] }
 0x12f   :  { %v6194_v31 = vmul.f32 %v9737_v17, %v9737_v17  ;;  %v456_v0 = vld [vmem:[%s9298_s0 + $0xbe8] sm:$0xff]  ;;  %9739 = vst [vmem:[#allocation336_spill] sm:$0xff] %v6211_v18  ;;  %9740 = vst [vmem:[#allocation337_spill] sm:$0xff] %v6213_v7  ;;  %v9742_v17 = vld [vmem:[#allocation96_spill] sm:$0xff]  ;;  %v6292_v25 = vsub.f32 %v449_v11, %v961_v8 }
 0x130   :  { %v964_v20 = vld [vmem:[%s9299_s1 + $0xbc8] sm:$0xff]  ;;  %9741 = vst [vmem:[#allocation338_spill] sm:$0xff] %v6215_v44  ;;  %v459_v36 = vld [vmem:[%s9298_s0 + $0xc00] sm:$0xff]  ;;  %v461_v3 = vld [vmem:[%s9298_s0 + $0xc10] sm:$0xff] }
 0x131   :  { %9738 = vst [vmem:[#allocation95_spill] sm:$0xff] %v6194_v31  ;;  %v6219_v31 = vmul.f32 %v9742_v17, %v9742_v17  ;;  %v460_v38 = vld [vmem:[%s9298_s0 + $0xc08] sm:$0xff]  ;;  %v965_v40 = vld [vmem:[%s9299_s1 + $0xbd0] sm:$0xff]  ;;  %v966_v62 = vld [vmem:[%s9299_s1 + $0xbd8] sm:$0xff]  ;;  %v6243_v17 = vsub.f32 %v445_v1, %v957_v46  ;;  %v6268_v46 = vsub.f32 %v448_v21, %v960_v28  ;;  %v6294_v28 = vsub.f32 %v451_v22, %v963_v5 }
 0x132   :  { %v967_v24 = vld [vmem:[%s9299_s1 + $0xbe0] sm:$0xff]  ;;  %9744 = vst [vmem:[#allocation339_spill] sm:$0xff] %v6239_v45  ;;  %9745 = vst [vmem:[#allocation340_spill] sm:$0xff] %v6241_v4  ;;  %v462_v7 = vld [vmem:[%s9298_s0 + $0xc18] sm:$0xff]  ;;  %v6320_v5 = vsub.f32 %v453_v2, %v965_v40 }
 0x133   :  { %9743 = vst [vmem:[#allocation96_spill] sm:$0xff] %v6219_v31  ;;  %9746 = vst [vmem:[#allocation341_spill] sm:$0xff] %v6243_v17  ;;  %v9747_v31 = vld [vmem:[#allocation98_spill] sm:$0xff]  ;;  %v464_v10 = vld [vmem:[%s9298_s0 + $0xc28] sm:$0xff] }
 0x134   :  { %v6247_v44 = vmul.f32 %v9747_v31, %v9747_v31  ;;  %v463_v18 = vld [vmem:[%s9298_s0 + $0xc20] sm:$0xff]  ;;  %v968_v61 = vld [vmem:[%s9299_s1 + $0xbe8] sm:$0xff]  ;;  %v969_v1 = vld [vmem:[%s9299_s1 + $0xbf0] sm:$0xff]  ;;  %9749 = vst [vmem:[#allocation342_spill] sm:$0xff] %v6264_v6 }
 0x135   :  { %9750 = vst [vmem:[#allocation343_spill] sm:$0xff] %v6266_v30  ;;  %9751 = vst [vmem:[#allocation344_spill] sm:$0xff] %v6268_v46  ;;  %v9752_v31 = vld [vmem:[#allocation99_spill] sm:$0xff]  ;;  %v465_v17 = vld [vmem:[%s9298_s0 + $0xc30] sm:$0xff]  ;;  %v6348_v40 = vsub.f32 %v456_v0, %v968_v61 }
 0x136   :  { %9748 = vst [vmem:[#allocation98_spill] sm:$0xff] %v6247_v44  ;;  %v6272_v44 = vmul.f32 %v9752_v31, %v9752_v31  ;;  %v467_v4 = vld [vmem:[%s9298_s0 + $0xc40] sm:$0xff]  ;;  %v468_v15 = vld [vmem:[%s9298_s0 + $0xc48] sm:$0xff]  ;;  %v973_v33 = vld [vmem:[%s9299_s1 + $0xc10] sm:$0xff]  ;;  %v6296_v31 = vsub.f32 %v452_v13, %v964_v20  ;;  %v6322_v20 = vsub.f32 %v454_v35, %v966_v62  ;;  %v6350_v62 = vsub.f32 %v457_v16, %v969_v1 }
 0x137   :  { %v971_v57 = vld [vmem:[%s9299_s1 + $0xc00] sm:$0xff]  ;;  %v972_v21 = vld [vmem:[%s9299_s1 + $0xc08] sm:$0xff]  ;;  %9754 = vst [vmem:[#allocation345_spill] sm:$0xff] %v6292_v25  ;;  %9755 = vst [vmem:[#allocation346_spill] sm:$0xff] %v6294_v28 }
 0x138   :  { %9753 = vst [vmem:[#allocation99_spill] sm:$0xff] %v6272_v44  ;;  %9756 = vst [vmem:[#allocation347_spill] sm:$0xff] %v6296_v31  ;;  %v9757_v44 = vld [vmem:[#allocation100_spill] sm:$0xff]  ;;  %v470_v6 = vld [vmem:[%s9298_s0 + $0xc58] sm:$0xff] }
 0x139   :  { %v6300_v46 = vmul.f32 %v9757_v44, %v9757_v44  ;;  %v469_v30 = vld [vmem:[%s9298_s0 + $0xc50] sm:$0xff]  ;;  %v471_v11 = vld [vmem:[%s9298_s0 + $0xc60] sm:$0xff]  ;;  %v974_v22 = vld [vmem:[%s9299_s1 + $0xc18] sm:$0xff]  ;;  %9759 = vst [vmem:[#allocation348_spill] sm:$0xff] %v6320_v5  ;;  %v6324_v44 = vsub.f32 %v455_v41, %v967_v24 }
 0x13a   :  { %v975_v13 = vld [vmem:[%s9299_s1 + $0xc20] sm:$0xff]  ;;  %v976_v8 = vld [vmem:[%s9299_s1 + $0xc28] sm:$0xff]  ;;  %9760 = vst [vmem:[#allocation349_spill] sm:$0xff] %v6322_v20  ;;  %v473_v28 = vld [vmem:[%s9298_s0 + $0xc70] sm:$0xff] }
 0x13b   :  { %9758 = vst [vmem:[#allocation100_spill] sm:$0xff] %v6300_v46  ;;  %9761 = vst [vmem:[#allocation350_spill] sm:$0xff] %v6324_v44  ;;  %v6328_v46 = vmul.f32 %v4010_v34, %v4010_v34  ;;  %v472_v31 = vld [vmem:[%s9298_s0 + $0xc68] sm:$0xff]  ;;  %v475_v2 = vld [vmem:[%s9298_s0 + $0xc80] sm:$0xff] }
 0x13c   :  { %v977_v35 = vld [vmem:[%s9299_s1 + $0xc30] sm:$0xff]  ;;  %v979_v34 = vld [vmem:[%s9299_s1 + $0xc40] sm:$0xff]  ;;  %v980_v41 = vld [vmem:[%s9299_s1 + $0xc48] sm:$0xff]  ;;  %9763 = vst [vmem:[#allocation352_spill] sm:$0xff] %v6348_v40 }
 0x13d   :  { %9762 = vst [vmem:[#allocation351_spill] sm:$0xff] %v6328_v46  ;;  %9764 = vst [vmem:[#allocation353_spill] sm:$0xff] %v6350_v62  ;;  %v9765_v24 = vld [vmem:[#allocation102_spill] sm:$0xff]  ;;  %v9767_v44 = vld [vmem:[#allocation103_spill] sm:$0xff] }
 0x13e   :  { %v6354_v46 = vmul.f32 %v9765_v24, %v9765_v24  ;;  %v6358_v20 = vmul.f32 %v9767_v44, %v9767_v44  ;;  %v476_v5 = vld [vmem:[%s9298_s0 + $0xc88] sm:$0xff]  ;;  %v477_v25 = vld [vmem:[%s9298_s0 + $0xc90] sm:$0xff]  ;;  %v478_v16 = vld [vmem:[%s9298_s0 + $0xc98] sm:$0xff]  ;;  %v6378_v44 = vsub.f32 %v459_v36, %v971_v57  ;;  %v6380_v24 = vsub.f32 %v460_v38, %v972_v21 }
 0x13f   :  { %v981_v0 = vld [vmem:[%s9299_s1 + $0xc50] sm:$0xff]  ;;  %v982_v61 = vld [vmem:[%s9299_s1 + $0xc58] sm:$0xff]  ;;  %v983_v1 = vld [vmem:[%s9299_s1 + $0xc60] sm:$0xff]  ;;  %v6406_v57 = vsub.f32 %v462_v7, %v974_v22  ;;  %v6408_v21 = vsub.f32 %v463_v18, %v975_v13  ;;  %v6434_v13 = vsub.f32 %v465_v17, %v977_v35 }
 0x140   :  { %9766 = vst [vmem:[#allocation102_spill] sm:$0xff] %v6354_v46  ;;  %9768 = vst [vmem:[#allocation103_spill] sm:$0xff] %v6358_v20  ;;  %v6382_v20 = vsub.f32 %v461_v3, %v973_v33  ;;  %v9772_v46 = vld [vmem:[#allocation104_spill] sm:$0xff]  ;;  %v479_v40 = vld [vmem:[%s9298_s0 + $0xca0] sm:$0xff]  ;;  %v6410_v33 = vsub.f32 %v464_v10, %v976_v8  ;;  %v6436_v8 = vsub.f32 %v467_v4, %v979_v34 }
 0x141   :  { %9769 = vst [vmem:[#allocation354_spill] sm:$0xff] %v6378_v44  ;;  %9770 = vst [vmem:[#allocation355_spill] sm:$0xff] %v6380_v24  ;;  %v6386_v62 = vmul.f32 %v9772_v46, %v9772_v46  ;;  %v480_v45 = vld [vmem:[%s9298_s0 + $0xca8] sm:$0xff]  ;;  %v481_v36 = vld [vmem:[%s9298_s0 + $0xcb0] sm:$0xff]  ;;  %v6462_v35 = vsub.f32 %v469_v30, %v981_v0  ;;  %v6464_v34 = vsub.f32 %v470_v6, %v982_v61 }
 0x142   :  { %9771 = vst [vmem:[#allocation356_spill] sm:$0xff] %v6382_v20  ;;  %v984_v38 = vld [vmem:[%s9299_s1 + $0xc68] sm:$0xff]  ;;  %v985_v3 = vld [vmem:[%s9299_s1 + $0xc70] sm:$0xff]  ;;  %v987_v46 = vld [vmem:[%s9299_s1 + $0xc80] sm:$0xff] }
 0x143   :  { %9773 = vst [vmem:[#allocation104_spill] sm:$0xff] %v6386_v62  ;;  %9774 = vst [vmem:[#allocation357_spill] sm:$0xff] %v6406_v57  ;;  %v9777_v62 = vld [vmem:[#allocation105_spill] sm:$0xff]  ;;  %v483_v24 = vld [vmem:[%s9298_s0 + $0xcc0] sm:$0xff]  ;;  %v6487_v0 = vsub.f32 %v472_v31, %v984_v38  ;;  %v6489_v61 = vsub.f32 %v473_v28, %v985_v3 }
 0x144   :  { %9775 = vst [vmem:[#allocation358_spill] sm:$0xff] %v6408_v21  ;;  %9776 = vst [vmem:[#allocation359_spill] sm:$0xff] %v6410_v33  ;;  %v6414_v20 = vmul.f32 %v9777_v62, %v9777_v62  ;;  %v484_v44 = vld [vmem:[%s9298_s0 + $0xcc8] sm:$0xff]  ;;  %v485_v7 = vld [vmem:[%s9298_s0 + $0xcd0] sm:$0xff]  ;;  %v6438_v62 = vsub.f32 %v468_v15, %v980_v41  ;;  %v6466_v41 = vsub.f32 %v471_v11, %v983_v1 }
 0x145   :  { %v988_v18 = vld [vmem:[%s9299_s1 + $0xc88] sm:$0xff]  ;;  %v989_v10 = vld [vmem:[%s9299_s1 + $0xc90] sm:$0xff]  ;;  %v990_v22 = vld [vmem:[%s9299_s1 + $0xc98] sm:$0xff]  ;;  %9779 = vst [vmem:[#allocation360_spill] sm:$0xff] %v6434_v13  ;;  %v6491_v1 = vsub.f32 %v475_v2, %v987_v46 }
 0x146   :  { %9778 = vst [vmem:[#allocation105_spill] sm:$0xff] %v6414_v20  ;;  %9780 = vst [vmem:[#allocation361_spill] sm:$0xff] %v6436_v8  ;;  %v9782_v20 = vld [vmem:[#allocation106_spill] sm:$0xff]  ;;  %v486_v21 = vld [vmem:[%s9298_s0 + $0xcd8] sm:$0xff]  ;;  %v6515_v3 = vsub.f32 %v476_v5, %v988_v18  ;;  %v6517_v46 = vsub.f32 %v477_v25, %v989_v10 }
 0x147   :  { %9781 = vst [vmem:[#allocation362_spill] sm:$0xff] %v6438_v62  ;;  %v6442_v33 = vmul.f32 %v9782_v20, %v9782_v20  ;;  %v487_v57 = vld [vmem:[%s9298_s0 + $0xce0] sm:$0xff]  ;;  %v488_v17 = vld [vmem:[%s9298_s0 + $0xce8] sm:$0xff]  ;;  %v993_v20 = vld [vmem:[%s9299_s1 + $0xcb0] sm:$0xff] }
 0x148   :  { %v991_v4 = vld [vmem:[%s9299_s1 + $0xca0] sm:$0xff]  ;;  %v992_v15 = vld [vmem:[%s9299_s1 + $0xca8] sm:$0xff]  ;;  %9784 = vst [vmem:[#allocation363_spill] sm:$0xff] %v6464_v34  ;;  %9785 = vst [vmem:[#allocation364_spill] sm:$0xff] %v6466_v41 }
 0x149   :  { %9783 = vst [vmem:[#allocation106_spill] sm:$0xff] %v6442_v33  ;;  %v9786_v33 = vld [vmem:[#allocation108_spill] sm:$0xff]  ;;  %v491_v13 = vld [vmem:[%s9298_s0 + $0xd00] sm:$0xff]  ;;  %v996_v6 = vld [vmem:[%s9299_s1 + $0xcc8] sm:$0xff]  ;;  %v6540_v18 = vsub.f32 %v479_v40, %v991_v4  ;;  %v6542_v10 = vsub.f32 %v480_v45, %v992_v15 }
 0x14a   :  { %v6470_v62 = vmul.f32 %v9786_v33, %v9786_v33  ;;  %v489_v8 = vld [vmem:[%s9298_s0 + $0xcf0] sm:$0xff]  ;;  %v995_v30 = vld [vmem:[%s9299_s1 + $0xcc0] sm:$0xff]  ;;  %9788 = vst [vmem:[#allocation365_spill] sm:$0xff] %v6487_v0  ;;  %9789 = vst [vmem:[#allocation366_spill] sm:$0xff] %v6489_v61  ;;  %v6570_v15 = vsub.f32 %v484_v44, %v996_v6 }
 0x14b   :  { %v997_v11 = vld [vmem:[%s9299_s1 + $0xcd0] sm:$0xff]  ;;  %9790 = vst [vmem:[#allocation367_spill] sm:$0xff] %v6491_v1  ;;  %v9791_v33 = vld [vmem:[#allocation109_spill] sm:$0xff]  ;;  %v492_v41 = vld [vmem:[%s9298_s0 + $0xd08] sm:$0xff]  ;;  %v6568_v4 = vsub.f32 %v483_v24, %v995_v30 }
 0x14c   :  { %9787 = vst [vmem:[#allocation108_spill] sm:$0xff] %v6470_v62  ;;  %v6495_v62 = vmul.f32 %v9791_v33, %v9791_v33  ;;  %v493_v34 = vld [vmem:[%s9298_s0 + $0xd10] sm:$0xff]  ;;  %v494_v31 = vld [vmem:[%s9298_s0 + $0xd18] sm:$0xff]  ;;  %v999_v2 = vld [vmem:[%s9299_s1 + $0xce0] sm:$0xff]  ;;  %v6519_v33 = vsub.f32 %v478_v16, %v990_v22  ;;  %v6544_v22 = vsub.f32 %v481_v36, %v993_v20  ;;  %v6572_v20 = vsub.f32 %v485_v7, %v997_v11 }
 0x14d   :  { %v998_v28 = vld [vmem:[%s9299_s1 + $0xcd8] sm:$0xff]  ;;  %v1000_v38 = vld [vmem:[%s9299_s1 + $0xce8] sm:$0xff]  ;;  %9793 = vst [vmem:[#allocation368_spill] sm:$0xff] %v6515_v3  ;;  %9794 = vst [vmem:[#allocation369_spill] sm:$0xff] %v6517_v46  ;;  %v6598_v11 = vsub.f32 %v487_v57, %v999_v2 }
 0x14e   :  { %9792 = vst [vmem:[#allocation109_spill] sm:$0xff] %v6495_v62  ;;  %9795 = vst [vmem:[#allocation370_spill] sm:$0xff] %v6519_v33  ;;  %v9796_v62 = vld [vmem:[#allocation110_spill] sm:$0xff]  ;;  %v496_v0 = vld [vmem:[%s9298_s0 + $0xd28] sm:$0xff]  ;;  %v6596_v6 = vsub.f32 %v486_v21, %v998_v28 }
 0x14f   :  { %v6523_v1 = vmul.f32 %v9796_v62, %v9796_v62  ;;  %v495_v61 = vld [vmem:[%s9298_s0 + $0xd20] sm:$0xff]  ;;  %v497_v5 = vld [vmem:[%s9298_s0 + $0xd30] sm:$0xff]  ;;  %9798 = vst [vmem:[#allocation371_spill] sm:$0xff] %v6540_v18  ;;  %9799 = vst [vmem:[#allocation372_spill] sm:$0xff] %v6542_v10  ;;  %v6548_v62 = vmul.f32 %v4094_v42, %v4094_v42 }
 0x150   :  { %v1001_v25 = vld [vmem:[%s9299_s1 + $0xcf0] sm:$0xff]  ;;  %v1003_v16 = vld [vmem:[%s9299_s1 + $0xd00] sm:$0xff]  ;;  %9800 = vst [vmem:[#allocation373_spill] sm:$0xff] %v6544_v22  ;;  %v500_v33 = vld [vmem:[%s9298_s0 + $0xd48] sm:$0xff] }
 0x151   :  { %9797 = vst [vmem:[#allocation110_spill] sm:$0xff] %v6523_v1  ;;  %9801 = vst [vmem:[#allocation374_spill] sm:$0xff] %v6548_v62  ;;  %v499_v1 = vld [vmem:[%s9298_s0 + $0xd40] sm:$0xff]  ;;  %v501_v40 = vld [vmem:[%s9298_s0 + $0xd50] sm:$0xff]  ;;  %v6624_v2 = vsub.f32 %v489_v8, %v1001_v25 }
 0x152   :  { %v1004_v45 = vld [vmem:[%s9299_s1 + $0xd08] sm:$0xff]  ;;  %v1005_v42 = vld [vmem:[%s9299_s1 + $0xd10] sm:$0xff]  ;;  %v1006_v36 = vld [vmem:[%s9299_s1 + $0xd18] sm:$0xff]  ;;  %9802 = vst [vmem:[#allocation375_spill] sm:$0xff] %v6568_v4 }
 0x153   :  { %9803 = vst [vmem:[#allocation376_spill] sm:$0xff] %v6570_v15  ;;  %9804 = vst [vmem:[#allocation377_spill] sm:$0xff] %v6572_v20  ;;  %v9805_v62 = vld [vmem:[#allocation111_spill] sm:$0xff]  ;;  %v502_v10 = vld [vmem:[%s9298_s0 + $0xd58] sm:$0xff] }
 0x154   :  { %v6576_v22 = vmul.f32 %v9805_v62, %v9805_v62  ;;  %v503_v18 = vld [vmem:[%s9298_s0 + $0xd60] sm:$0xff]  ;;  %v504_v24 = vld [vmem:[%s9298_s0 + $0xd68] sm:$0xff]  ;;  %v1009_v30 = vld [vmem:[%s9299_s1 + $0xd30] sm:$0xff]  ;;  %9807 = vst [vmem:[#allocation378_spill] sm:$0xff] %v6596_v6  ;;  %v6600_v62 = vsub.f32 %v488_v17, %v1000_v38  ;;  %v6626_v38 = vsub.f32 %v491_v13, %v1003_v16 }
 0x155   :  { %v1007_v44 = vld [vmem:[%s9299_s1 + $0xd20] sm:$0xff]  ;;  %v1008_v7 = vld [vmem:[%s9299_s1 + $0xd28] sm:$0xff]  ;;  %9808 = vst [vmem:[#allocation379_spill] sm:$0xff] %v6598_v11  ;;  %v505_v15 = vld [vmem:[%s9298_s0 + $0xd70] sm:$0xff] }
 0x156   :  { %9806 = vst [vmem:[#allocation111_spill] sm:$0xff] %v6576_v22  ;;  %9809 = vst [vmem:[#allocation380_spill] sm:$0xff] %v6600_v62  ;;  %v9810_v22 = vld [vmem:[#allocation112_spill] sm:$0xff]  ;;  %v507_v4 = vld [vmem:[%s9298_s0 + $0xd80] sm:$0xff] }
 0x157   :  { %v6604_v20 = vmul.f32 %v9810_v22, %v9810_v22  ;;  %v508_v21 = vld [vmem:[%s9298_s0 + $0xd88] sm:$0xff]  ;;  %v1011_v57 = vld [vmem:[%s9299_s1 + $0xd40] sm:$0xff]  ;;  %v1013_v28 = vld [vmem:[%s9299_s1 + $0xd50] sm:$0xff]  ;;  %9812 = vst [vmem:[#allocation381_spill] sm:$0xff] %v6624_v2 }
 0x158   :  { %v1012_v17 = vld [vmem:[%s9299_s1 + $0xd48] sm:$0xff]  ;;  %9813 = vst [vmem:[#allocation382_spill] sm:$0xff] %v6626_v38  ;;  %v9814_v22 = vld [vmem:[#allocation113_spill] sm:$0xff]  ;;  %v9816_v62 = vld [vmem:[#allocation114_spill] sm:$0xff] }
 0x159   :  { %9811 = vst [vmem:[#allocation112_spill] sm:$0xff] %v6604_v20  ;;  %v6630_v20 = vmul.f32 %v9814_v22, %v9814_v22  ;;  %v6634_v11 = vmul.f32 %v9816_v62, %v9816_v62  ;;  %v509_v6 = vld [vmem:[%s9298_s0 + $0xd90] sm:$0xff]  ;;  %v510_v46 = vld [vmem:[%s9298_s0 + $0xd98] sm:$0xff]  ;;  %v511_v13 = vld [vmem:[%s9298_s0 + $0xda0] sm:$0xff]  ;;  %v6654_v62 = vsub.f32 %v492_v41, %v1004_v45  ;;  %v6656_v22 = vsub.f32 %v493_v34, %v1005_v42 }
 0x15a   :  { %v1014_v8 = vld [vmem:[%s9299_s1 + $0xd58] sm:$0xff]  ;;  %v1015_v25 = vld [vmem:[%s9299_s1 + $0xd60] sm:$0xff]  ;;  %v1016_v16 = vld [vmem:[%s9299_s1 + $0xd68] sm:$0xff]  ;;  %v6682_v42 = vsub.f32 %v495_v61, %v1007_v44 }
 0x15b   :  { %9815 = vst [vmem:[#allocation113_spill] sm:$0xff] %v6630_v20  ;;  %9817 = vst [vmem:[#allocation114_spill] sm:$0xff] %v6634_v11  ;;  %v6658_v20 = vsub.f32 %v494_v31, %v1006_v36  ;;  %v9821_v11 = vld [vmem:[#allocation115_spill] sm:$0xff]  ;;  %v513_v3 = vld [vmem:[%s9298_s0 + $0xdb0] sm:$0xff]  ;;  %v6684_v36 = vsub.f32 %v496_v0, %v1008_v7  ;;  %v6710_v7 = vsub.f32 %v499_v1, %v1011_v57 }
 0x15c   :  { %9818 = vst [vmem:[#allocation383_spill] sm:$0xff] %v6654_v62  ;;  %9819 = vst [vmem:[#allocation384_spill] sm:$0xff] %v6656_v22  ;;  %v6662_v38 = vmul.f32 %v9821_v11, %v9821_v11  ;;  %v512_v2 = vld [vmem:[%s9298_s0 + $0xda8] sm:$0xff]  ;;  %v515_v41 = vld [vmem:[%s9298_s0 + $0xdc0] sm:$0xff]  ;;  %v6686_v11 = vsub.f32 %v497_v5, %v1009_v30  ;;  %v6712_v30 = vsub.f32 %v500_v33, %v1012_v17 }
 0x15d   :  { %9820 = vst [vmem:[#allocation385_spill] sm:$0xff] %v6658_v20  ;;  %v1017_v34 = vld [vmem:[%s9299_s1 + $0xd70] sm:$0xff]  ;;  %v1019_v31 = vld [vmem:[%s9299_s1 + $0xd80] sm:$0xff]  ;;  %v1020_v45 = vld [vmem:[%s9299_s1 + $0xd88] sm:$0xff]  ;;  %v6738_v57 = vsub.f32 %v502_v10, %v1014_v8  ;;  %v6740_v17 = vsub.f32 %v503_v18, %v1015_v25 }
 0x15e   :  { %9822 = vst [vmem:[#allocation115_spill] sm:$0xff] %v6662_v38  ;;  %9823 = vst [vmem:[#allocation386_spill] sm:$0xff] %v6682_v42  ;;  %v9826_v38 = vld [vmem:[#allocation117_spill] sm:$0xff]  ;;  %v516_v22 = vld [vmem:[%s9298_s0 + $0xdc8] sm:$0xff]  ;;  %v6763_v8 = vsub.f32 %v505_v15, %v1017_v34  ;;  %v6765_v25 = vsub.f32 %v507_v4, %v1019_v31 }
 0x15f   :  { %9824 = vst [vmem:[#allocation387_spill] sm:$0xff] %v6684_v36  ;;  %9825 = vst [vmem:[#allocation388_spill] sm:$0xff] %v6686_v11  ;;  %v6690_v20 = vmul.f32 %v9826_v38, %v9826_v38  ;;  %v517_v62 = vld [vmem:[%s9298_s0 + $0xdd0] sm:$0xff]  ;;  %v518_v61 = vld [vmem:[%s9298_s0 + $0xdd8] sm:$0xff]  ;;  %v6714_v38 = vsub.f32 %v501_v40, %v1013_v28  ;;  %v6742_v28 = vsub.f32 %v504_v24, %v1016_v16 }
 0x160   :  { %v1021_v0 = vld [vmem:[%s9299_s1 + $0xd90] sm:$0xff]  ;;  %v1022_v5 = vld [vmem:[%s9299_s1 + $0xd98] sm:$0xff]  ;;  %v1023_v44 = vld [vmem:[%s9299_s1 + $0xda0] sm:$0xff]  ;;  %9828 = vst [vmem:[#allocation389_spill] sm:$0xff] %v6710_v7  ;;  %v6767_v16 = vsub.f32 %v508_v21, %v1020_v45 }
 0x161   :  { %9827 = vst [vmem:[#allocation117_spill] sm:$0xff] %v6690_v20  ;;  %9829 = vst [vmem:[#allocation390_spill] sm:$0xff] %v6712_v30  ;;  %v9831_v20 = vld [vmem:[#allocation118_spill] sm:$0xff]  ;;  %v520_v42 = vld [vmem:[%s9298_s0 + $0xde8] sm:$0xff]  ;;  %v6791_v34 = vsub.f32 %v509_v6, %v1021_v0  ;;  %v6793_v31 = vsub.f32 %v510_v46, %v1022_v5  ;;  %v6795_v45 = vsub.f32 %v511_v13, %v1023_v44 }
 0x162   :  { %9830 = vst [vmem:[#allocation391_spill] sm:$0xff] %v6714_v38  ;;  %v6718_v11 = vmul.f32 %v9831_v20, %v9831_v20  ;;  %v519_v36 = vld [vmem:[%s9298_s0 + $0xde0] sm:$0xff]  ;;  %v521_v1 = vld [vmem:[%s9298_s0 + $0xdf0] sm:$0xff]  ;;  %v1024_v33 = vld [vmem:[%s9299_s1 + $0xda8] sm:$0xff] }
 0x163   :  { %v1025_v40 = vld [vmem:[%s9299_s1 + $0xdb0] sm:$0xff]  ;;  %v1027_v20 = vld [vmem:[%s9299_s1 + $0xdc0] sm:$0xff]  ;;  %9833 = vst [vmem:[#allocation392_spill] sm:$0xff] %v6740_v17  ;;  %9834 = vst [vmem:[#allocation393_spill] sm:$0xff] %v6742_v28  ;;  %v6816_v0 = vsub.f32 %v512_v2, %v1024_v33 }
 0x164   :  { %9832 = vst [vmem:[#allocation118_spill] sm:$0xff] %v6718_v11  ;;  %v9835_v11 = vld [vmem:[#allocation119_spill] sm:$0xff]  ;;  %v523_v30 = vld [vmem:[%s9298_s0 + $0xe00] sm:$0xff]  ;;  %v1029_v18 = vld [vmem:[%s9299_s1 + $0xdd0] sm:$0xff]  ;;  %v6818_v5 = vsub.f32 %v513_v3, %v1025_v40  ;;  %v6820_v44 = vsub.f32 %v515_v41, %v1027_v20 }
 0x165   :  { %v6746_v38 = vmul.f32 %v9835_v11, %v9835_v11  ;;  %v524_v7 = vld [vmem:[%s9298_s0 + $0xe08] sm:$0xff]  ;;  %v1030_v24 = vld [vmem:[%s9299_s1 + $0xdd8] sm:$0xff]  ;;  %9837 = vst [vmem:[#allocation394_spill] sm:$0xff] %v6763_v8  ;;  %9838 = vst [vmem:[#allocation395_spill] sm:$0xff] %v6765_v25  ;;  %v6771_v11 = vmul.f32 %v4178_v53, %v4178_v53  ;;  %v6846_v20 = vsub.f32 %v517_v62, %v1029_v18 }
 0x166   :  { %v1028_v10 = vld [vmem:[%s9299_s1 + $0xdc8] sm:$0xff]  ;;  %9839 = vst [vmem:[#allocation396_spill] sm:$0xff] %v6767_v16  ;;  %v526_v28 = vld [vmem:[%s9298_s0 + $0xe18] sm:$0xff]  ;;  %v527_v15 = vld [vmem:[%s9298_s0 + $0xe20] sm:$0xff] }
 0x167   :  { %9836 = vst [vmem:[#allocation119_spill] sm:$0xff] %v6746_v38  ;;  %9840 = vst [vmem:[#allocation397_spill] sm:$0xff] %v6771_v11  ;;  %v525_v38 = vld [vmem:[%s9298_s0 + $0xe10] sm:$0xff]  ;;  %v1031_v4 = vld [vmem:[%s9299_s1 + $0xde0] sm:$0xff]  ;;  %v6844_v40 = vsub.f32 %v516_v22, %v1028_v10 }
 0x168   :  { %v1032_v53 = vld [vmem:[%s9299_s1 + $0xde8] sm:$0xff]  ;;  %v1033_v21 = vld [vmem:[%s9299_s1 + $0xdf0] sm:$0xff]  ;;  %9841 = vst [vmem:[#allocation398_spill] sm:$0xff] %v6791_v34  ;;  %9842 = vst [vmem:[#allocation399_spill] sm:$0xff] %v6793_v31  ;;  %v6872_v18 = vsub.f32 %v519_v36, %v1031_v4 }
 0x169   :  { %9843 = vst [vmem:[#allocation400_spill] sm:$0xff] %v6795_v45  ;;  %v9844_v11 = vld [vmem:[#allocation120_spill] sm:$0xff]  ;;  %v528_v25 = vld [vmem:[%s9298_s0 + $0xe28] sm:$0xff]  ;;  %v531_v6 = vld [vmem:[%s9298_s0 + $0xe40] sm:$0xff] }
 0x16a   :  { %v6799_v16 = vmul.f32 %v9844_v11, %v9844_v11  ;;  %v529_v8 = vld [vmem:[%s9298_s0 + $0xe30] sm:$0xff]  ;;  %v1035_v46 = vld [vmem:[%s9299_s1 + $0xe00] sm:$0xff]  ;;  %v1036_v13 = vld [vmem:[%s9299_s1 + $0xe08] sm:$0xff]  ;;  %9846 = vst [vmem:[#allocation401_spill] sm:$0xff] %v6816_v0 }
 0x16b   :  { %9847 = vst [vmem:[#allocation402_spill] sm:$0xff] %v6818_v5  ;;  %9848 = vst [vmem:[#allocation403_spill] sm:$0xff] %v6820_v44  ;;  %v9849_v11 = vld [vmem:[#allocation121_spill] sm:$0xff]  ;;  %v532_v45 = vld [vmem:[%s9298_s0 + $0xe48] sm:$0xff] }
 0x16c   :  { %9845 = vst [vmem:[#allocation120_spill] sm:$0xff] %v6799_v16  ;;  %v6824_v16 = vmul.f32 %v9849_v11, %v9849_v11  ;;  %v533_v31 = vld [vmem:[%s9298_s0 + $0xe50] sm:$0xff]  ;;  %v534_v2 = vld [vmem:[%s9298_s0 + $0xe58] sm:$0xff]  ;;  %v1039_v33 = vld [vmem:[%s9299_s1 + $0xe20] sm:$0xff]  ;;  %v6848_v11 = vsub.f32 %v518_v61, %v1030_v24  ;;  %v6874_v24 = vsub.f32 %v520_v42, %v1032_v53  ;;  %v6900_v53 = vsub.f32 %v523_v30, %v1035_v46 }
 0x16d   :  { %v1037_v3 = vld [vmem:[%s9299_s1 + $0xe10] sm:$0xff]  ;;  %v1038_v41 = vld [vmem:[%s9299_s1 + $0xe18] sm:$0xff]  ;;  %9851 = vst [vmem:[#allocation404_spill] sm:$0xff] %v6844_v40  ;;  %9852 = vst [vmem:[#allocation405_spill] sm:$0xff] %v6846_v20 }
 0x16e   :  { %9850 = vst [vmem:[#allocation121_spill] sm:$0xff] %v6824_v16  ;;  %9853 = vst [vmem:[#allocation406_spill] sm:$0xff] %v6848_v11  ;;  %v9854_v16 = vld [vmem:[#allocation122_spill] sm:$0xff]  ;;  %v536_v0 = vld [vmem:[%s9298_s0 + $0xe68] sm:$0xff] }
 0x16f   :  { %v6852_v44 = vmul.f32 %v9854_v16, %v9854_v16  ;;  %v535_v5 = vld [vmem:[%s9298_s0 + $0xe60] sm:$0xff]  ;;  %v537_v22 = vld [vmem:[%s9298_s0 + $0xe70] sm:$0xff]  ;;  %v1040_v62 = vld [vmem:[%s9299_s1 + $0xe28] sm:$0xff]  ;;  %9856 = vst [vmem:[#allocation407_spill] sm:$0xff] %v6872_v18  ;;  %v6876_v16 = vsub.f32 %v521_v1, %v1033_v21  ;;  %v6902_v21 = vsub.f32 %v524_v7, %v1036_v13 }
 0x170   :  { %v1041_v61 = vld [vmem:[%s9299_s1 + $0xe30] sm:$0xff]  ;;  %v1043_v10 = vld [vmem:[%s9299_s1 + $0xe40] sm:$0xff]  ;;  %9857 = vst [vmem:[#allocation408_spill] sm:$0xff] %v6874_v24  ;;  %v540_v40 = vld [vmem:[%s9298_s0 + $0xe88] sm:$0xff] }
 0x171   :  { %9855 = vst [vmem:[#allocation122_spill] sm:$0xff] %v6852_v44  ;;  %9858 = vst [vmem:[#allocation409_spill] sm:$0xff] %v6876_v16  ;;  %v9859_v44 = vld [vmem:[#allocation123_spill] sm:$0xff]  ;;  %v539_v20 = vld [vmem:[%s9298_s0 + $0xe80] sm:$0xff] }
 0x172   :  { %v6880_v11 = vmul.f32 %v9859_v44, %v9859_v44  ;;  %v541_v36 = vld [vmem:[%s9298_s0 + $0xe90] sm:$0xff]  ;;  %v1044_v42 = vld [vmem:[%s9299_s1 + $0xe48] sm:$0xff]  ;;  %v1046_v4 = vld [vmem:[%s9299_s1 + $0xe58] sm:$0xff]  ;;  %9861 = vst [vmem:[#allocation410_spill] sm:$0xff] %v6900_v53 }
 0x173   :  { %v1045_v1 = vld [vmem:[%s9299_s1 + $0xe50] sm:$0xff]  ;;  %9862 = vst [vmem:[#allocation411_spill] sm:$0xff] %v6902_v21  ;;  %v9865_v16 = vld [vmem:[#allocation126_spill] sm:$0xff]  ;;  %v542_v18 = vld [vmem:[%s9298_s0 + $0xe98] sm:$0xff] }
 0x174   :  { %9860 = vst [vmem:[#allocation123_spill] sm:$0xff] %v6880_v11  ;;  %v9863_v44 = vld [vmem:[#allocation124_spill] sm:$0xff]  ;;  %v6910_v24 = vmul.f32 %v9865_v16, %v9865_v16  ;;  %v543_v34 = vld [vmem:[%s9298_s0 + $0xea0] sm:$0xff]  ;;  %v544_v7 = vld [vmem:[%s9298_s0 + $0xea8] sm:$0xff]  ;;  %v6930_v16 = vsub.f32 %v525_v38, %v1037_v3 }
 0x175   :  { %v6906_v11 = vmul.f32 %v9863_v44, %v9863_v44  ;;  %v1047_v30 = vld [vmem:[%s9299_s1 + $0xe60] sm:$0xff]  ;;  %v1048_v46 = vld [vmem:[%s9299_s1 + $0xe68] sm:$0xff]  ;;  %v1049_v13 = vld [vmem:[%s9299_s1 + $0xe70] sm:$0xff]  ;;  %v6932_v44 = vsub.f32 %v526_v28, %v1038_v41  ;;  %v6958_v41 = vsub.f32 %v528_v25, %v1040_v62 }
 0x176   :  { %9866 = vst [vmem:[#allocation126_spill] sm:$0xff] %v6910_v24  ;;  %9867 = vst [vmem:[#allocation412_spill] sm:$0xff] %v6930_v16  ;;  %v6934_v24 = vsub.f32 %v527_v15, %v1039_v33  ;;  %v545_v53 = vld [vmem:[%s9298_s0 + $0xeb0] sm:$0xff]  ;;  %v547_v17 = vld [vmem:[%s9298_s0 + $0xec0] sm:$0xff]  ;;  %v6960_v33 = vsub.f32 %v529_v8, %v1041_v61  ;;  %v6986_v61 = vsub.f32 %v532_v45, %v1044_v42 }
 0x177   :  { %9864 = vst [vmem:[#allocation124_spill] sm:$0xff] %v6906_v11  ;;  %9868 = vst [vmem:[#allocation413_spill] sm:$0xff] %v6932_v44  ;;  %v9870_v11 = vld [vmem:[#allocation127_spill] sm:$0xff]  ;;  %v1051_v28 = vld [vmem:[%s9299_s1 + $0xe80] sm:$0xff]  ;;  %v7013_v42 = vsub.f32 %v536_v0, %v1048_v46 }
 0x178   :  { %9869 = vst [vmem:[#allocation414_spill] sm:$0xff] %v6934_v24  ;;  %v6938_v21 = vmul.f32 %v9870_v11, %v9870_v11  ;;  %v548_v38 = vld [vmem:[%s9298_s0 + $0xec8] sm:$0xff]  ;;  %v1053_v3 = vld [vmem:[%s9299_s1 + $0xe90] sm:$0xff]  ;;  %9872 = vst [vmem:[#allocation415_spill] sm:$0xff] %v6960_v33  ;;  %v6962_v11 = vsub.f32 %v531_v6, %v1043_v10  ;;  %v6988_v10 = vsub.f32 %v533_v31, %v1045_v1 }
 0x179   :  { %v1052_v15 = vld [vmem:[%s9299_s1 + $0xe88] sm:$0xff]  ;;  %v549_v44 = vld [vmem:[%s9298_s0 + $0xed0] sm:$0xff]  ;;  %v550_v16 = vld [vmem:[%s9298_s0 + $0xed8] sm:$0xff]  ;;  %9876 = vst [vmem:[#allocation417_spill] sm:$0xff] %v6986_v61  ;;  %v7015_v1 = vsub.f32 %v537_v22, %v1049_v13  ;;  %v7039_v46 = vsub.f32 %v539_v20, %v1051_v28 }
 0x17a   :  { %9871 = vst [vmem:[#allocation127_spill] sm:$0xff] %v6938_v21  ;;  %9873 = vst [vmem:[#allocation416_spill] sm:$0xff] %v6962_v11  ;;  %v9874_v21 = vld [vmem:[#allocation128_spill] sm:$0xff]  ;;  %v551_v25 = vld [vmem:[%s9298_s0 + $0xee0] sm:$0xff]  ;;  %v7041_v13 = vsub.f32 %v540_v40, %v1052_v15 }
 0x17b   :  { %v6966_v24 = vmul.f32 %v9874_v21, %v9874_v21  ;;  %v1054_v8 = vld [vmem:[%s9299_s1 + $0xe98] sm:$0xff]  ;;  %v1055_v6 = vld [vmem:[%s9299_s1 + $0xea0] sm:$0xff]  ;;  %v1056_v62 = vld [vmem:[%s9299_s1 + $0xea8] sm:$0xff]  ;;  %9877 = vst [vmem:[#allocation418_spill] sm:$0xff] %v6988_v10  ;;  %v6990_v21 = vsub.f32 %v534_v2, %v1046_v4  ;;  %v7011_v2 = vsub.f32 %v535_v5, %v1047_v30 }
 0x17c   :  { %v552_v11 = vld [vmem:[%s9298_s0 + $0xee8] sm:$0xff]  ;;  %v553_v33 = vld [vmem:[%s9298_s0 + $0xef0] sm:$0xff]  ;;  %v1059_v31 = vld [vmem:[%s9299_s1 + $0xec0] sm:$0xff]  ;;  %9881 = vst [vmem:[#allocation422_spill] sm:$0xff] %v7013_v42  ;;  %v7066_v28 = vsub.f32 %v543_v34, %v1055_v6  ;;  %v7068_v15 = vsub.f32 %v544_v7, %v1056_v62 }
 0x17d   :  { %9875 = vst [vmem:[#allocation128_spill] sm:$0xff] %v6966_v24  ;;  %9878 = vst [vmem:[#allocation419_spill] sm:$0xff] %v6990_v21  ;;  %v6994_v24 = vmul.f32 %v4262_v63, %v4262_v63  ;;  %v1057_v45 = vld [vmem:[%s9299_s1 + $0xeb0] sm:$0xff]  ;;  %v1060_v63 = vld [vmem:[%s9299_s1 + $0xec8] sm:$0xff]  ;;  %v7094_v62 = vsub.f32 %v547_v17, %v1059_v31 }
 0x17e   :  { %9880 = vst [vmem:[#allocation421_spill] sm:$0xff] %v7011_v2  ;;  %9882 = vst [vmem:[#allocation423_spill] sm:$0xff] %v7015_v1  ;;  %v9883_v4 = vld [vmem:[#allocation129_spill] sm:$0xff]  ;;  %v555_v21 = vld [vmem:[%s9298_s0 + $0xf00] sm:$0xff]  ;;  %v7092_v6 = vsub.f32 %v545_v53, %v1057_v45 }
 0x17f   :  { %9879 = vst [vmem:[#allocation420_spill] sm:$0xff] %v6994_v24  ;;  %v7019_v24 = vmul.f32 %v9883_v4, %v9883_v4  ;;  %v556_v10 = vld [vmem:[%s9298_s0 + $0xf08] sm:$0xff]  ;;  %v557_v5 = vld [vmem:[%s9298_s0 + $0xf10] sm:$0xff]  ;;  %v1062_v22 = vld [vmem:[%s9299_s1 + $0xed8] sm:$0xff]  ;;  %v7043_v4 = vsub.f32 %v541_v36, %v1053_v3  ;;  %v7064_v36 = vsub.f32 %v542_v18, %v1054_v8 }
 0x180   :  { %v1061_v0 = vld [vmem:[%s9299_s1 + $0xed0] sm:$0xff]  ;;  %v1063_v30 = vld [vmem:[%s9299_s1 + $0xee0] sm:$0xff]  ;;  %9885 = vst [vmem:[#allocation424_spill] sm:$0xff] %v7039_v46  ;;  %9886 = vst [vmem:[#allocation425_spill] sm:$0xff] %v7041_v13 }
 0x181   :  { %9884 = vst [vmem:[#allocation129_spill] sm:$0xff] %v7019_v24  ;;  %9887 = vst [vmem:[#allocation426_spill] sm:$0xff] %v7043_v4  ;;  %v9888_v24 = vld [vmem:[#allocation130_spill] sm:$0xff]  ;;  %v558_v42 = vld [vmem:[%s9298_s0 + $0xf18] sm:$0xff]  ;;  %v7120_v31 = vsub.f32 %v549_v44, %v1061_v0 }
 0x182   :  { %v7047_v1 = vmul.f32 %v9888_v24, %v9888_v24  ;;  %v559_v2 = vld [vmem:[%s9298_s0 + $0xf20] sm:$0xff]  ;;  %v560_v20 = vld [vmem:[%s9298_s0 + $0xf28] sm:$0xff]  ;;  %v1065_v24 = vld [vmem:[%s9299_s1 + $0xef0] sm:$0xff]  ;;  %9890 = vst [vmem:[#allocation427_spill] sm:$0xff] %v7064_v36 }
 0x183   :  { %v1064_v40 = vld [vmem:[%s9299_s1 + $0xee8] sm:$0xff]  ;;  %9891 = vst [vmem:[#allocation428_spill] sm:$0xff] %v7066_v28  ;;  %9892 = vst [vmem:[#allocation429_spill] sm:$0xff] %v7068_v15  ;;  %v561_v4 = vld [vmem:[%s9298_s0 + $0xf30] sm:$0xff] }
 0x184   :  { %9889 = vst [vmem:[#allocation130_spill] sm:$0xff] %v7047_v1  ;;  %v9893_v3 = vld [vmem:[#allocation131_spill] sm:$0xff]  ;;  %v563_v13 = vld [vmem:[%s9298_s0 + $0xf40] sm:$0xff]  ;;  %v1069_v8 = vld [vmem:[%s9299_s1 + $0xf10] sm:$0xff] }
 0x185   :  { %v7072_v1 = vmul.f32 %v9893_v3, %v9893_v3  ;;  %v564_v18 = vld [vmem:[%s9298_s0 + $0xf48] sm:$0xff]  ;;  %v1067_v34 = vld [vmem:[%s9299_s1 + $0xf00] sm:$0xff]  ;;  %9895 = vst [vmem:[#allocation430_spill] sm:$0xff] %v7092_v6  ;;  %9896 = vst [vmem:[#allocation431_spill] sm:$0xff] %v7094_v62  ;;  %v7096_v3 = vsub.f32 %v548_v38, %v1060_v63  ;;  %v7122_v63 = vsub.f32 %v550_v16, %v1062_v22 }
 0x186   :  { %v1068_v7 = vld [vmem:[%s9299_s1 + $0xf08] sm:$0xff]  ;;  %v565_v28 = vld [vmem:[%s9298_s0 + $0xf50] sm:$0xff]  ;;  %v566_v36 = vld [vmem:[%s9298_s0 + $0xf58] sm:$0xff]  ;;  %9900 = vst [vmem:[#allocation433_spill] sm:$0xff] %v7120_v31  ;;  %v7148_v22 = vsub.f32 %v552_v11, %v1064_v40 }
 0x187   :  { %9894 = vst [vmem:[#allocation131_spill] sm:$0xff] %v7072_v1  ;;  %9897 = vst [vmem:[#allocation432_spill] sm:$0xff] %v7096_v3  ;;  %v9898_v1 = vld [vmem:[#allocation132_spill] sm:$0xff]  ;;  %v567_v53 = vld [vmem:[%s9298_s0 + $0xf60] sm:$0xff] }
 0x188   :  { %v7100_v15 = vmul.f32 %v9898_v1, %v9898_v1  ;;  %v1070_v17 = vld [vmem:[%s9299_s1 + $0xf18] sm:$0xff]  ;;  %v1071_v38 = vld [vmem:[%s9299_s1 + $0xf20] sm:$0xff]  ;;  %v1072_v45 = vld [vmem:[%s9299_s1 + $0xf28] sm:$0xff]  ;;  %9901 = vst [vmem:[#allocation434_spill] sm:$0xff] %v7122_v63  ;;  %v7124_v1 = vsub.f32 %v551_v25, %v1063_v30  ;;  %v7150_v30 = vsub.f32 %v553_v33, %v1065_v24 }
 0x189   :  { %v568_v62 = vld [vmem:[%s9298_s0 + $0xf68] sm:$0xff]  ;;  %v569_v6 = vld [vmem:[%s9298_s0 + $0xf70] sm:$0xff]  ;;  %v571_v44 = vld [vmem:[%s9298_s0 + $0xf80] sm:$0xff]  ;;  %9905 = vst [vmem:[#allocation436_spill] sm:$0xff] %v7148_v22 }
 0x18a   :  { %9899 = vst [vmem:[#allocation132_spill] sm:$0xff] %v7100_v15  ;;  %9902 = vst [vmem:[#allocation435_spill] sm:$0xff] %v7124_v1  ;;  %v9903_v15 = vld [vmem:[#allocation133_spill] sm:$0xff]  ;;  %v1073_v16 = vld [vmem:[%s9299_s1 + $0xf30] sm:$0xff] }
 0x18b   :  { %v7128_v3 = vmul.f32 %v9903_v15, %v9903_v15  ;;  %v1075_v25 = vld [vmem:[%s9299_s1 + $0xf40] sm:$0xff]  ;;  %v1076_v0 = vld [vmem:[%s9299_s1 + $0xf48] sm:$0xff]  ;;  %9906 = vst [vmem:[#allocation437_spill] sm:$0xff] %v7150_v30  ;;  %v9909_v1 = vld [vmem:[#allocation136_spill] sm:$0xff] }
 0x18c   :  { %v9907_v15 = vld [vmem:[#allocation135_spill] sm:$0xff]  ;;  %v7158_v63 = vmul.f32 %v9909_v1, %v9909_v1  ;;  %v573_v46 = vld [vmem:[%s9298_s0 + $0xf90] sm:$0xff]  ;;  %v574_v33 = vld [vmem:[%s9298_s0 + $0xf98] sm:$0xff]  ;;  %v7178_v1 = vsub.f32 %v555_v21, %v1067_v34 }
 0x18d   :  { %9904 = vst [vmem:[#allocation133_spill] sm:$0xff] %v7128_v3  ;;  %v7154_v3 = vmul.f32 %v9907_v15, %v9907_v15  ;;  %v572_v31 = vld [vmem:[%s9298_s0 + $0xf88] sm:$0xff]  ;;  %v1077_v11 = vld [vmem:[%s9299_s1 + $0xf50] sm:$0xff]  ;;  %v1078_v40 = vld [vmem:[%s9299_s1 + $0xf58] sm:$0xff]  ;;  %v7180_v15 = vsub.f32 %v556_v10, %v1068_v7  ;;  %v7206_v7 = vsub.f32 %v558_v42, %v1070_v17  ;;  %v7234_v17 = vsub.f32 %v561_v4, %v1073_v16 }
 0x18e   :  { %9910 = vst [vmem:[#allocation136_spill] sm:$0xff] %v7158_v63  ;;  %v1079_v24 = vld [vmem:[%s9299_s1 + $0xf60] sm:$0xff]  ;;  %v7182_v63 = vsub.f32 %v557_v5, %v1069_v8  ;;  %v576_v61 = vld [vmem:[%s9298_s0 + $0xfa8] sm:$0xff]  ;;  %v577_v21 = vld [vmem:[%s9298_s0 + $0xfb0] sm:$0xff]  ;;  %v7208_v8 = vsub.f32 %v559_v2, %v1071_v38  ;;  %v7236_v38 = vsub.f32 %v563_v13, %v1075_v25  ;;  %v7262_v25 = vsub.f32 %v565_v28, %v1077_v11 }
 0x18f   :  { %9908 = vst [vmem:[#allocation135_spill] sm:$0xff] %v7154_v3  ;;  %9911 = vst [vmem:[#allocation438_spill] sm:$0xff] %v7180_v15  ;;  %v9913_v3 = vld [vmem:[#allocation137_spill] sm:$0xff]  ;;  %v575_v22 = vld [vmem:[%s9298_s0 + $0xfa0] sm:$0xff] }
 0x190   :  { %9912 = vst [vmem:[#allocation439_spill] sm:$0xff] %v7182_v63  ;;  %v7186_v30 = vmul.f32 %v9913_v3, %v9913_v3  ;;  %v1080_v10 = vld [vmem:[%s9299_s1 + $0xf68] sm:$0xff]  ;;  %v1081_v5 = vld [vmem:[%s9299_s1 + $0xf70] sm:$0xff]  ;;  %v1083_v34 = vld [vmem:[%s9299_s1 + $0xf80] sm:$0xff]  ;;  %v7210_v3 = vsub.f32 %v560_v20, %v1072_v45  ;;  %v7238_v45 = vsub.f32 %v564_v18, %v1076_v0  ;;  %v7264_v0 = vsub.f32 %v566_v36, %v1078_v40 }
 0x191   :  { %9915 = vst [vmem:[#allocation440_spill] sm:$0xff] %v7206_v7  ;;  %9916 = vst [vmem:[#allocation441_spill] sm:$0xff] %v7208_v8  ;;  %v579_v63 = vld [vmem:[%s9298_s0 + $0xfc0] sm:$0xff]  ;;  %v580_v15 = vld [vmem:[%s9298_s0 + $0xfc8] sm:$0xff]  ;;  %v7281_v36 = vsub.f32 %v568_v62, %v1080_v10  ;;  %v7285_v11 = vsub.f32 %v571_v44, %v1083_v34 }
 0x192   :  { %9914 = vst [vmem:[#allocation137_spill] sm:$0xff] %v7186_v30  ;;  %9917 = vst [vmem:[#allocation442_spill] sm:$0xff] %v7210_v3  ;;  %v7214_v30 = vmul.f32 %v4346_v9, %v4346_v9  ;;  %v581_v42 = vld [vmem:[%s9298_s0 + $0xfd0] sm:$0xff]  ;;  %v1084_v2 = vld [vmem:[%s9299_s1 + $0xf88] sm:$0xff] }
 0x193   :  { %v1085_v9 = vld [vmem:[%s9299_s1 + $0xf90] sm:$0xff]  ;;  %v1086_v20 = vld [vmem:[%s9299_s1 + $0xf98] sm:$0xff]  ;;  %9919 = vst [vmem:[#allocation444_spill] sm:$0xff] %v7234_v17  ;;  %9920 = vst [vmem:[#allocation445_spill] sm:$0xff] %v7236_v38 }
 0x194   :  { %9918 = vst [vmem:[#allocation443_spill] sm:$0xff] %v7214_v30  ;;  %9921 = vst [vmem:[#allocation446_spill] sm:$0xff] %v7238_v45  ;;  %v9922_v30 = vld [vmem:[#allocation138_spill] sm:$0xff]  ;;  %v582_v8 = vld [vmem:[%s9298_s0 + $0xfd8] sm:$0xff]  ;;  %v7302_v44 = vsub.f32 %v573_v46, %v1085_v9  ;;  %v7304_v10 = vsub.f32 %v574_v33, %v1086_v20 }
 0x195   :  { %v7242_v3 = vmul.f32 %v9922_v30, %v9922_v30  ;;  %v583_v7 = vld [vmem:[%s9298_s0 + $0xfe0] sm:$0xff]  ;;  %v584_v4 = vld [vmem:[%s9298_s0 + $0xfe8] sm:$0xff]  ;;  %v1089_v16 = vld [vmem:[%s9299_s1 + $0xfb0] sm:$0xff]  ;;  %v7266_v30 = vsub.f32 %v567_v53, %v1079_v24  ;;  %v7283_v53 = vsub.f32 %v569_v6, %v1081_v5  ;;  %9928 = vst [vmem:[#allocation449_spill] sm:$0xff] %v7285_v11  ;;  %v7300_v6 = vsub.f32 %v572_v31, %v1084_v2 }
 0x196   :  { %v1087_v13 = vld [vmem:[%s9299_s1 + $0xfa0] sm:$0xff]  ;;  %v1088_v18 = vld [vmem:[%s9299_s1 + $0xfa8] sm:$0xff]  ;;  %v1093_v28 = vld [vmem:[%s9299_s1 + $0xfd0] sm:$0xff]  ;;  %9931 = vst [vmem:[#allocation450_spill] sm:$0xff] %v7302_v44  ;;  %v7320_v46 = vsub.f32 %v577_v21, %v1089_v16 }
 0x197   :  { %9923 = vst [vmem:[#allocation138_spill] sm:$0xff] %v7242_v3  ;;  %9924 = vst [vmem:[#allocation447_spill] sm:$0xff] %v7266_v30  ;;  %v9925_v3 = vld [vmem:[#allocation139_spill] sm:$0xff]  ;;  %v1091_v38 = vld [vmem:[%s9299_s1 + $0xfc0] sm:$0xff]  ;;  %v7318_v31 = vsub.f32 %v576_v61, %v1088_v18 }
 0x198   :  { %v7270_v45 = vmul.f32 %v9925_v3, %v9925_v3  ;;  %v1092_v17 = vld [vmem:[%s9299_s1 + $0xfc8] sm:$0xff]  ;;  %9926 = vst [vmem:[#allocation139_spill] sm:$0xff] %v7281_v36  ;;  %9927 = vst [vmem:[#allocation448_spill] sm:$0xff] %v7283_v53  ;;  %v9929_v40 = vld [vmem:[#allocation140_spill] sm:$0xff]  ;;  %v7316_v53 = vsub.f32 %v575_v22, %v1087_v13  ;;  %v7326_v9 = vsub.f32 %v579_v63, %v1091_v38 }
 0x199   :  { %v7289_v24 = vmul.f32 %v9929_v40, %v9929_v40  ;;  %v1094_v3 = vld [vmem:[%s9299_s1 + $0xfd8] sm:$0xff]  ;;  %v1095_v30 = vld [vmem:[%s9299_s1 + $0xfe0] sm:$0xff]  ;;  %v1096_v62 = vld [vmem:[%s9299_s1 + $0xfe8] sm:$0xff]  ;;  %9930 = vst [vmem:[#allocation140_spill] sm:$0xff] %v7300_v6  ;;  %v7328_v20 = vsub.f32 %v580_v15, %v1092_v17  ;;  %v7354_v17 = vmul.f32 %v4430_v19, %v4430_v19 }
 0x19a   :  { %9932 = vst [vmem:[#allocation451_spill] sm:$0xff] %v7304_v10  ;;  %v9933_v5 = vld [vmem:[#allocation141_spill] sm:$0xff]  ;;  %v585_v40 = vld [vmem:[%s9298_s0 + $0xff0] sm:$0xff]  ;;  %9935 = vst [vmem:[#allocation452_spill] sm:$0xff] %v7318_v31  ;;  %v7336_v22 = vsub.f32 %v582_v8, %v1094_v3  ;;  %v7338_v61 = vsub.f32 %v583_v7, %v1095_v30  ;;  %v7340_v21 = vsub.f32 %v584_v4, %v1096_v62 }
 0x19b   :  { %v7308_v34 = vmul.f32 %v9933_v5, %v9933_v5  ;;  %v1097_v11 = vld [vmem:[%s9299_s1 + $0xff0] sm:$0xff]  ;;  %9934 = vst [vmem:[#allocation141_spill] sm:$0xff] %v7316_v53  ;;  %9936 = vst [vmem:[#allocation453_spill] sm:$0xff] %v7320_v46  ;;  %v9937_v33 = vld [vmem:[#allocation142_spill] sm:$0xff]  ;;  %v7330_v5 = vsub.f32 %v581_v42, %v1093_v28 }
 0x19c   :  { %v7324_v2 = vmul.f32 %v9937_v33, %v9937_v33  ;;  %9938 = vst [vmem:[#allocation142_spill] sm:$0xff] %v7326_v9  ;;  %9939 = vst [vmem:[#allocation454_spill] sm:$0xff] %v7328_v20  ;;  %v9941_v10 = vld [vmem:[#allocation144_spill] sm:$0xff]  ;;  %v9945_v13 = vld [vmem:[#allocation145_spill] sm:$0xff]  ;;  %v7346_v63 = vsub.f32 %v585_v40, %v1097_v11 }
 0x19d   :  { %9940 = vst [vmem:[#allocation455_spill] sm:$0xff] %v7330_v5  ;;  %v7334_v44 = vmul.f32 %v9941_v10, %v9941_v10  ;;  %9942 = vst [vmem:[#allocation144_spill] sm:$0xff] %v7336_v22  ;;  %v7344_v18 = vmul.f32 %v9945_v13, %v9945_v13  ;;  %v9947_v15 = vld [vmem:[#allocation146_spill] sm:$0xff]  ;;  %v9949_v8 = vld [vmem:[#allocation147_spill] sm:$0xff] }
 0x19e   :  { %9943 = vst [vmem:[#allocation456_spill] sm:$0xff] %v7338_v61  ;;  %9944 = vst [vmem:[#allocation457_spill] sm:$0xff] %v7340_v21  ;;  %v7350_v42 = vmul.f32 %v9947_v15, %v9947_v15  ;;  %v7358_v7 = vmul.f32 %v9949_v8, %v9949_v8  ;;  %v9950_v38 = vld [vmem:[#allocation148_spill] sm:$0xff]  ;;  %v9951_v16 = vld [vmem:[#allocation149_spill] sm:$0xff]  ;;  %v7390_v8 = vmul.f32 %v4514_v29, %v4514_v29 }
 0x19f   :  { %9946 = vst [vmem:[#allocation145_spill] sm:$0xff] %v7346_v63  ;;  %v7362_v4 = vmul.f32 %v9950_v38, %v9950_v38  ;;  %v7366_v30 = vmul.f32 %v9951_v16, %v9951_v16  ;;  %v9952_v28 = vld [vmem:[#allocation150_spill] sm:$0xff]  ;;  %v9953_v3 = vld [vmem:[#allocation151_spill] sm:$0xff]  ;;  %v9954_v62 = vld [vmem:[#allocation153_spill] sm:$0xff] }
 0x1a0   :  { %9948 = vst [vmem:[#allocation146_spill] sm:$0xff] %v7350_v42  ;;  %v7370_v11 = vmul.f32 %v9952_v28, %v9952_v28  ;;  %v7374_v19 = vmul.f32 %v9953_v3, %v9953_v3  ;;  %v7378_v10 = vmul.f32 %v9954_v62, %v9954_v62  ;;  %v9955_v40 = vld [vmem:[#allocation154_spill] sm:$0xff]  ;;  %v9957_v13 = vld [vmem:[#allocation155_spill] sm:$0xff]  ;;  %v9958_v38 = vld [vmem:[#allocation156_spill] sm:$0xff] }
 0x1a1   :  { %v7382_v33 = vmul.f32 %v9955_v40, %v9955_v40  ;;  %v7386_v15 = vmul.f32 %v9957_v13, %v9957_v13  ;;  %v7394_v16 = vmul.f32 %v9958_v38, %v9958_v38  ;;  %v9959_v28 = vld [vmem:[#allocation157_spill] sm:$0xff]  ;;  %v9960_v62 = vld [vmem:[#allocation158_spill] sm:$0xff]  ;;  %v9961_v63 = vld [vmem:[#allocation159_spill] sm:$0xff] }
 0x1a2   :  { %v7398_v3 = vmul.f32 %v9959_v28, %v9959_v28  ;;  %v7402_v40 = vmul.f32 %v9960_v62, %v9960_v62  ;;  %v7406_v13 = vmul.f32 %v9961_v63, %v9961_v63  ;;  %v9962_v21 = vld [vmem:[#allocation160_spill] sm:$0xff]  ;;  %v9963_v61 = vld [vmem:[#allocation162_spill] sm:$0xff]  ;;  %v9965_v22 = vld [vmem:[#allocation163_spill] sm:$0xff]  ;;  %v7426_v63 = vmul.f32 %v4598_v39, %v4598_v39 }
 0x1a3   :  { %9956 = vst [vmem:[#allocation147_spill] sm:$0xff] %v7382_v33  ;;  %v7410_v29 = vmul.f32 %v9962_v21, %v9962_v21  ;;  %v7414_v38 = vmul.f32 %v9963_v61, %v9963_v61  ;;  %v7418_v28 = vmul.f32 %v9965_v22, %v9965_v22  ;;  %v9966_v5 = vld [vmem:[#allocation164_spill] sm:$0xff]  ;;  %v9967_v20 = vld [vmem:[#allocation165_spill] sm:$0xff]  ;;  %v9968_v9 = vld [vmem:[#allocation166_spill] sm:$0xff] }
 0x1a4   :  { %v7422_v62 = vmul.f32 %v9966_v5, %v9966_v5  ;;  %v7430_v21 = vmul.f32 %v9967_v20, %v9967_v20  ;;  %v7434_v61 = vmul.f32 %v9968_v9, %v9968_v9  ;;  %v9969_v46 = vld [vmem:[#allocation167_spill] sm:$0xff]  ;;  %v9970_v31 = vld [vmem:[#allocation168_spill] sm:$0xff]  ;;  %v9972_v53 = vld [vmem:[#allocation169_spill] sm:$0xff] }
 0x1a5   :  { %9964 = vst [vmem:[#allocation148_spill] sm:$0xff] %v7414_v38  ;;  %v7438_v22 = vmul.f32 %v9969_v46, %v9969_v46  ;;  %v7442_v5 = vmul.f32 %v9970_v31, %v9970_v31  ;;  %v7446_v39 = vmul.f32 %v9972_v53, %v9972_v53  ;;  %v9974_v6 = vld [vmem:[#allocation171_spill] sm:$0xff]  ;;  %v9975_v36 = vld [vmem:[#allocation172_spill] sm:$0xff]  ;;  %v9976_v38 = vld [vmem:[#allocation173_spill] sm:$0xff]  ;;  %v7462_v31 = vmul.f32 %v4682_v56, %v4682_v56 }
 0x1a6   :  { %v7450_v20 = vmul.f32 %v9974_v6, %v9974_v6  ;;  %v7454_v9 = vmul.f32 %v9975_v36, %v9975_v36  ;;  %v7458_v46 = vmul.f32 %v9976_v38, %v9976_v38  ;;  %v9979_v33 = vld [vmem:[#allocation174_spill] sm:$0xff]  ;;  %v9983_v42 = vld [vmem:[#allocation176_spill] sm:$0xff] }
 0x1a7   :  { %9971 = vst [vmem:[#allocation149_spill] sm:$0xff] %v7442_v5  ;;  %9973 = vst [vmem:[#allocation150_spill] sm:$0xff] %v7446_v39  ;;  %v7466_v53 = vmul.f32 %v9979_v33, %v9979_v33  ;;  %v9981_v39 = vld [vmem:[#allocation175_spill] sm:$0xff]  ;;  %v7474_v36 = vmul.f32 %v9983_v42, %v9983_v42  ;;  %v9985_v5 = vld [vmem:[#allocation177_spill] sm:$0xff] }
 0x1a8   :  { %9977 = vst [vmem:[#allocation151_spill] sm:$0xff] %v7458_v46  ;;  %9978 = vst [vmem:[#allocation153_spill] sm:$0xff] %v7462_v31  ;;  %v7470_v6 = vmul.f32 %v9981_v39, %v9981_v39  ;;  %v7478_v38 = vmul.f32 %v9985_v5, %v9985_v5  ;;  %v9987_v46 = vld [vmem:[#allocation178_spill] sm:$0xff]  ;;  %v9988_v31 = vld [vmem:[#allocation180_spill] sm:$0xff]  ;;  %v7498_v5 = vmul.f32 %v4766_v12, %v4766_v12 }
 0x1a9   :  { %9980 = vst [vmem:[#allocation154_spill] sm:$0xff] %v7466_v53  ;;  %9984 = vst [vmem:[#allocation156_spill] sm:$0xff] %v7474_v36  ;;  %v7482_v56 = vmul.f32 %v9987_v46, %v9987_v46  ;;  %v7486_v33 = vmul.f32 %v9988_v31, %v9988_v31  ;;  %v9990_v53 = vld [vmem:[#allocation181_spill] sm:$0xff]  ;;  %v9997_v36 = vld [vmem:[#allocation184_spill] sm:$0xff] }
 0x1aa   :  { %9982 = vst [vmem:[#allocation155_spill] sm:$0xff] %v7470_v6  ;;  %9986 = vst [vmem:[#allocation157_spill] sm:$0xff] %v7478_v38  ;;  %v7490_v39 = vmul.f32 %v9990_v53, %v9990_v53  ;;  %v9992_v6 = vld [vmem:[#allocation182_spill] sm:$0xff]  ;;  %v9995_v38 = vld [vmem:[#allocation183_spill] sm:$0xff]  ;;  %v7506_v31 = vmul.f32 %v9997_v36, %v9997_v36 }
 0x1ab   :  { %9989 = vst [vmem:[#allocation158_spill] sm:$0xff] %v7486_v33  ;;  %v7494_v42 = vmul.f32 %v9992_v6, %v9992_v6  ;;  %9994 = vst [vmem:[#allocation162_spill] sm:$0xff] %v7498_v5  ;;  %v7502_v46 = vmul.f32 %v9995_v38, %v9995_v38  ;;  %v9999_v33 = vld [vmem:[#allocation185_spill] sm:$0xff] }
 0x1ac   :  { %9991 = vst [vmem:[#allocation159_spill] sm:$0xff] %v7490_v39  ;;  %9998 = vst [vmem:[#allocation164_spill] sm:$0xff] %v7506_v31  ;;  %v7510_v53 = vmul.f32 %v9999_v33, %v9999_v33  ;;  %v10001_v39 = vld [vmem:[#allocation186_spill] sm:$0xff]  ;;  %v10004_v5 = vld [vmem:[#allocation189_spill] sm:$0xff] }
 0x1ad   :  { %9993 = vst [vmem:[#allocation160_spill] sm:$0xff] %v7494_v42  ;;  %9996 = vst [vmem:[#allocation163_spill] sm:$0xff] %v7502_v46  ;;  %v7514_v6 = vmul.f32 %v10001_v39, %v10001_v39  ;;  %v10002_v42 = vld [vmem:[#allocation187_spill] sm:$0xff]  ;;  %v7522_v38 = vmul.f32 %v10004_v5, %v10004_v5  ;;  %v10006_v46 = vld [vmem:[#allocation190_spill] sm:$0xff]  ;;  %v7534_v39 = vmul.f32 %v4850_v47, %v4850_v47 }
 0x1ae   :  { %10000 = vst [vmem:[#allocation165_spill] sm:$0xff] %v7510_v53  ;;  %v7518_v12 = vmul.f32 %v10002_v42, %v10002_v42  ;;  %v7526_v36 = vmul.f32 %v10006_v46, %v10006_v46  ;;  %v10008_v31 = vld [vmem:[#allocation191_spill] sm:$0xff]  ;;  %v10011_v53 = vld [vmem:[#allocation192_spill] sm:$0xff] }
 0x1af   :  { %10005 = vst [vmem:[#allocation167_spill] sm:$0xff] %v7522_v38  ;;  %v7530_v33 = vmul.f32 %v10008_v31, %v10008_v31  ;;  %10010 = vst [vmem:[#allocation171_spill] sm:$0xff] %v7534_v39  ;;  %v7538_v42 = vmul.f32 %v10011_v53, %v10011_v53  ;;  %v10015_v38 = vld [vmem:[#allocation194_spill] sm:$0xff] }
 0x1b0   :  { %10003 = vst [vmem:[#allocation166_spill] sm:$0xff] %v7518_v12  ;;  %10007 = vst [vmem:[#allocation168_spill] sm:$0xff] %v7526_v36  ;;  %v10013_v12 = vld [vmem:[#allocation193_spill] sm:$0xff]  ;;  %v7546_v46 = vmul.f32 %v10015_v38, %v10015_v38  ;;  %v10016_v36 = vld [vmem:[#allocation195_spill] sm:$0xff] }
 0x1b1   :  { %10009 = vst [vmem:[#allocation169_spill] sm:$0xff] %v7530_v33  ;;  %10012 = vst [vmem:[#allocation172_spill] sm:$0xff] %v7538_v42  ;;  %v7542_v5 = vmul.f32 %v10013_v12, %v10013_v12  ;;  %v7550_v31 = vmul.f32 %v10016_v36, %v10016_v36  ;;  %v10018_v33 = vld [vmem:[#allocation196_spill] sm:$0xff]  ;;  %v10020_v39 = vld [vmem:[#allocation198_spill] sm:$0xff]  ;;  %v7570_v36 = vmul.f32 %v4934_v27, %v4934_v27 }
 0x1b2   :  { %v7554_v47 = vmul.f32 %v10018_v33, %v10018_v33  ;;  %v7558_v53 = vmul.f32 %v10020_v39, %v10020_v39  ;;  %v10022_v42 = vld [vmem:[#allocation199_spill] sm:$0xff] }
 0x1b3   :  { %10014 = vst [vmem:[#allocation173_spill] sm:$0xff] %v7542_v5  ;;  %10017 = vst [vmem:[#allocation174_spill] sm:$0xff] %v7550_v31  ;;  %v7562_v12 = vmul.f32 %v10022_v42, %v10022_v42  ;;  %v10024_v5 = vld [vmem:[#allocation200_spill] sm:$0xff]  ;;  %v10027_v31 = vld [vmem:[#allocation201_spill] sm:$0xff] }
 0x1b4   :  { %10019 = vst [vmem:[#allocation175_spill] sm:$0xff] %v7554_v47  ;;  %10021 = vst [vmem:[#allocation176_spill] sm:$0xff] %v7558_v53  ;;  %v7566_v38 = vmul.f32 %v10024_v5, %v10024_v5  ;;  %v7574_v33 = vmul.f32 %v10027_v31, %v10027_v31  ;;  %v10029_v47 = vld [vmem:[#allocation202_spill] sm:$0xff]  ;;  %v10031_v53 = vld [vmem:[#allocation203_spill] sm:$0xff] }
 0x1b5   :  { %10023 = vst [vmem:[#allocation177_spill] sm:$0xff] %v7562_v12  ;;  %10026 = vst [vmem:[#allocation180_spill] sm:$0xff] %v7570_v36  ;;  %v7578_v39 = vmul.f32 %v10029_v47, %v10029_v47  ;;  %v7582_v42 = vmul.f32 %v10031_v53, %v10031_v53  ;;  %v10032_v12 = vld [vmem:[#allocation204_spill] sm:$0xff]  ;;  %v10036_v36 = vld [vmem:[#allocation207_spill] sm:$0xff] }
 0x1b6   :  { %10025 = vst [vmem:[#allocation178_spill] sm:$0xff] %v7566_v38  ;;  %10028 = vst [vmem:[#allocation181_spill] sm:$0xff] %v7574_v33  ;;  %v7586_v5 = vmul.f32 %v10032_v12, %v10032_v12  ;;  %v10034_v38 = vld [vmem:[#allocation205_spill] sm:$0xff]  ;;  %v7594_v31 = vmul.f32 %v10036_v36, %v10036_v36  ;;  %v10038_v33 = vld [vmem:[#allocation208_spill] sm:$0xff]  ;;  %v7606_v12 = vmul.f32 %v5018_v23, %v5018_v23 }
 0x1b7   :  { %10030 = vst [vmem:[#allocation182_spill] sm:$0xff] %v7578_v39  ;;  %v7590_v27 = vmul.f32 %v10034_v38, %v10034_v38  ;;  %v7598_v47 = vmul.f32 %v10038_v33, %v10038_v33  ;;  %v10040_v39 = vld [vmem:[#allocation209_spill] sm:$0xff] }
 0x1b8   :  { %10033 = vst [vmem:[#allocation183_spill] sm:$0xff] %v7586_v5  ;;  %10037 = vst [vmem:[#allocation185_spill] sm:$0xff] %v7594_v31  ;;  %v7602_v53 = vmul.f32 %v10040_v39, %v10040_v39  ;;  %v10043_v5 = vld [vmem:[#allocation210_spill] sm:$0xff]  ;;  %v10047_v31 = vld [vmem:[#allocation212_spill] sm:$0xff] }
 0x1b9   :  { %10035 = vst [vmem:[#allocation184_spill] sm:$0xff] %v7590_v27  ;;  %10039 = vst [vmem:[#allocation186_spill] sm:$0xff] %v7598_v47  ;;  %v7610_v38 = vmul.f32 %v10043_v5, %v10043_v5  ;;  %v10045_v27 = vld [vmem:[#allocation211_spill] sm:$0xff]  ;;  %v7618_v33 = vmul.f32 %v10047_v31, %v10047_v31  ;;  %v10048_v47 = vld [vmem:[#allocation213_spill] sm:$0xff] }
 0x1ba   :  { %10041 = vst [vmem:[#allocation187_spill] sm:$0xff] %v7602_v53  ;;  %10042 = vst [vmem:[#allocation189_spill] sm:$0xff] %v7606_v12  ;;  %v7614_v36 = vmul.f32 %v10045_v27, %v10045_v27  ;;  %v7622_v39 = vmul.f32 %v10048_v47, %v10048_v47  ;;  %v10050_v53 = vld [vmem:[#allocation214_spill] sm:$0xff]  ;;  %v10052_v12 = vld [vmem:[#allocation216_spill] sm:$0xff]  ;;  %v7642_v47 = vmul.f32 %v5102_v43, %v5102_v43 }
 0x1bb   :  { %10044 = vst [vmem:[#allocation190_spill] sm:$0xff] %v7610_v38  ;;  %v7626_v23 = vmul.f32 %v10050_v53, %v10050_v53  ;;  %v7630_v5 = vmul.f32 %v10052_v12, %v10052_v12  ;;  %v10054_v38 = vld [vmem:[#allocation217_spill] sm:$0xff] }
 0x1bc   :  { %10046 = vst [vmem:[#allocation191_spill] sm:$0xff] %v7614_v36  ;;  %10049 = vst [vmem:[#allocation192_spill] sm:$0xff] %v7622_v39  ;;  %v7634_v27 = vmul.f32 %v10054_v38, %v10054_v38  ;;  %v10056_v36 = vld [vmem:[#allocation218_spill] sm:$0xff]  ;;  %v10059_v39 = vld [vmem:[#allocation219_spill] sm:$0xff] }
 0x1bd   :  { %10051 = vst [vmem:[#allocation193_spill] sm:$0xff] %v7626_v23  ;;  %10053 = vst [vmem:[#allocation194_spill] sm:$0xff] %v7630_v5  ;;  %v7638_v31 = vmul.f32 %v10056_v36, %v10056_v36  ;;  %v7646_v53 = vmul.f32 %v10059_v39, %v10059_v39  ;;  %v10061_v23 = vld [vmem:[#allocation220_spill] sm:$0xff]  ;;  %v10063_v5 = vld [vmem:[#allocation221_spill] sm:$0xff] }
 0x1be   :  { %10055 = vst [vmem:[#allocation195_spill] sm:$0xff] %v7634_v27  ;;  %10058 = vst [vmem:[#allocation198_spill] sm:$0xff] %v7642_v47  ;;  %v7650_v12 = vmul.f32 %v10061_v23, %v10061_v23  ;;  %v7654_v38 = vmul.f32 %v10063_v5, %v10063_v5  ;;  %v10064_v27 = vld [vmem:[#allocation222_spill] sm:$0xff]  ;;  %v10068_v47 = vld [vmem:[#allocation225_spill] sm:$0xff] }
 0x1bf   :  { %10057 = vst [vmem:[#allocation196_spill] sm:$0xff] %v7638_v31  ;;  %10060 = vst [vmem:[#allocation199_spill] sm:$0xff] %v7646_v53  ;;  %v7658_v36 = vmul.f32 %v10064_v27, %v10064_v27  ;;  %v10066_v31 = vld [vmem:[#allocation223_spill] sm:$0xff]  ;;  %v7666_v39 = vmul.f32 %v10068_v47, %v10068_v47  ;;  %v10070_v53 = vld [vmem:[#allocation226_spill] sm:$0xff]  ;;  %v7678_v27 = vmul.f32 %v5186_v48, %v5186_v48 }
 0x1c0   :  { %10062 = vst [vmem:[#allocation200_spill] sm:$0xff] %v7650_v12  ;;  %v7662_v43 = vmul.f32 %v10066_v31, %v10066_v31  ;;  %v7670_v23 = vmul.f32 %v10070_v53, %v10070_v53  ;;  %v10072_v12 = vld [vmem:[#allocation227_spill] sm:$0xff] }
 0x1c1   :  { %10065 = vst [vmem:[#allocation201_spill] sm:$0xff] %v7658_v36  ;;  %10069 = vst [vmem:[#allocation203_spill] sm:$0xff] %v7666_v39  ;;  %v7674_v5 = vmul.f32 %v10072_v12, %v10072_v12  ;;  %v10075_v36 = vld [vmem:[#allocation228_spill] sm:$0xff]  ;;  %v10079_v39 = vld [vmem:[#allocation230_spill] sm:$0xff] }
 0x1c2   :  { %10067 = vst [vmem:[#allocation202_spill] sm:$0xff] %v7662_v43  ;;  %10071 = vst [vmem:[#allocation204_spill] sm:$0xff] %v7670_v23  ;;  %v7682_v31 = vmul.f32 %v10075_v36, %v10075_v36  ;;  %v10077_v43 = vld [vmem:[#allocation229_spill] sm:$0xff]  ;;  %v7690_v53 = vmul.f32 %v10079_v39, %v10079_v39  ;;  %v10081_v23 = vld [vmem:[#allocation231_spill] sm:$0xff] }
 0x1c3   :  { %10073 = vst [vmem:[#allocation205_spill] sm:$0xff] %v7674_v5  ;;  %10074 = vst [vmem:[#allocation207_spill] sm:$0xff] %v7678_v27  ;;  %v7686_v47 = vmul.f32 %v10077_v43, %v10077_v43  ;;  %v7694_v12 = vmul.f32 %v10081_v23, %v10081_v23  ;;  %v10083_v5 = vld [vmem:[#allocation232_spill] sm:$0xff]  ;;  %v10085_v27 = vld [vmem:[#allocation234_spill] sm:$0xff]  ;;  %v7714_v23 = vmul.f32 %v5270_v49, %v5270_v49 }
 0x1c4   :  { %10076 = vst [vmem:[#allocation208_spill] sm:$0xff] %v7682_v31  ;;  %10080 = vst [vmem:[#allocation210_spill] sm:$0xff] %v7690_v53  ;;  %v7698_v48 = vmul.f32 %v10083_v5, %v10083_v5  ;;  %v7702_v36 = vmul.f32 %v10085_v27, %v10085_v27  ;;  %v10087_v31 = vld [vmem:[#allocation235_spill] sm:$0xff] }
 0x1c5   :  { %10078 = vst [vmem:[#allocation209_spill] sm:$0xff] %v7686_v47  ;;  %10082 = vst [vmem:[#allocation211_spill] sm:$0xff] %v7694_v12  ;;  %v7706_v43 = vmul.f32 %v10087_v31, %v10087_v31  ;;  %v10089_v47 = vld [vmem:[#allocation236_spill] sm:$0xff]  ;;  %v10092_v12 = vld [vmem:[#allocation237_spill] sm:$0xff] }
 0x1c6   :  { %10084 = vst [vmem:[#allocation212_spill] sm:$0xff] %v7698_v48  ;;  %10086 = vst [vmem:[#allocation213_spill] sm:$0xff] %v7702_v36  ;;  %v7710_v39 = vmul.f32 %v10089_v47, %v10089_v47  ;;  %v7718_v5 = vmul.f32 %v10092_v12, %v10092_v12  ;;  %v10094_v48 = vld [vmem:[#allocation238_spill] sm:$0xff]  ;;  %v10096_v36 = vld [vmem:[#allocation239_spill] sm:$0xff] }
 0x1c7   :  { %10088 = vst [vmem:[#allocation214_spill] sm:$0xff] %v7706_v43  ;;  %10091 = vst [vmem:[#allocation217_spill] sm:$0xff] %v7714_v23  ;;  %v7722_v27 = vmul.f32 %v10094_v48, %v10094_v48  ;;  %v7726_v31 = vmul.f32 %v10096_v36, %v10096_v36  ;;  %v10098_v43 = vld [vmem:[#allocation240_spill] sm:$0xff]  ;;  %v10102_v23 = vld [vmem:[#allocation243_spill] sm:$0xff] }
 0x1c8   :  { %10090 = vst [vmem:[#allocation216_spill] sm:$0xff] %v7710_v39  ;;  %10093 = vst [vmem:[#allocation218_spill] sm:$0xff] %v7718_v5  ;;  %v7730_v47 = vmul.f32 %v10098_v43, %v10098_v43  ;;  %v10100_v39 = vld [vmem:[#allocation241_spill] sm:$0xff]  ;;  %v7738_v12 = vmul.f32 %v10102_v23, %v10102_v23  ;;  %v10104_v5 = vld [vmem:[#allocation244_spill] sm:$0xff]  ;;  %v7750_v43 = vmul.f32 %v5354_v50, %v5354_v50 }
 0x1c9   :  { %10095 = vst [vmem:[#allocation219_spill] sm:$0xff] %v7722_v27  ;;  %10097 = vst [vmem:[#allocation220_spill] sm:$0xff] %v7726_v31  ;;  %v7734_v49 = vmul.f32 %v10100_v39, %v10100_v39  ;;  %v7742_v48 = vmul.f32 %v10104_v5, %v10104_v5  ;;  %v10106_v27 = vld [vmem:[#allocation245_spill] sm:$0xff] }
 0x1ca   :  { %10099 = vst [vmem:[#allocation221_spill] sm:$0xff] %v7730_v47  ;;  %10103 = vst [vmem:[#allocation223_spill] sm:$0xff] %v7738_v12  ;;  %v7746_v36 = vmul.f32 %v10106_v27, %v10106_v27  ;;  %v10109_v47 = vld [vmem:[#allocation246_spill] sm:$0xff]  ;;  %v10113_v12 = vld [vmem:[#allocation248_spill] sm:$0xff] }
 0x1cb   :  { %10101 = vst [vmem:[#allocation222_spill] sm:$0xff] %v7734_v49  ;;  %10105 = vst [vmem:[#allocation225_spill] sm:$0xff] %v7742_v48  ;;  %v7754_v39 = vmul.f32 %v10109_v47, %v10109_v47  ;;  %v10111_v49 = vld [vmem:[#allocation247_spill] sm:$0xff]  ;;  %v7762_v5 = vmul.f32 %v10113_v12, %v10113_v12  ;;  %v10115_v48 = vld [vmem:[#allocation249_spill] sm:$0xff] }
 0x1cc   :  { %10107 = vst [vmem:[#allocation226_spill] sm:$0xff] %v7746_v36  ;;  %10108 = vst [vmem:[#allocation227_spill] sm:$0xff] %v7750_v43  ;;  %v7758_v23 = vmul.f32 %v10111_v49, %v10111_v49  ;;  %v7766_v27 = vmul.f32 %v10115_v48, %v10115_v48  ;;  %v10117_v36 = vld [vmem:[#allocation250_spill] sm:$0xff]  ;;  %v10119_v43 = vld [vmem:[#allocation252_spill] sm:$0xff]  ;;  %v7786_v48 = vmul.f32 %v5438_v51, %v5438_v51 }
 0x1cd   :  { %10110 = vst [vmem:[#allocation228_spill] sm:$0xff] %v7754_v39  ;;  %10114 = vst [vmem:[#allocation230_spill] sm:$0xff] %v7762_v5  ;;  %v7770_v50 = vmul.f32 %v10117_v36, %v10117_v36  ;;  %v7774_v47 = vmul.f32 %v10119_v43, %v10119_v43  ;;  %v10121_v39 = vld [vmem:[#allocation253_spill] sm:$0xff]  ;;  %v10128_v5 = vld [vmem:[#allocation256_spill] sm:$0xff] }
 0x1ce   :  { %10112 = vst [vmem:[#allocation229_spill] sm:$0xff] %v7758_v23  ;;  %10116 = vst [vmem:[#allocation231_spill] sm:$0xff] %v7766_v27  ;;  %v7778_v49 = vmul.f32 %v10121_v39, %v10121_v39  ;;  %v10123_v23 = vld [vmem:[#allocation254_spill] sm:$0xff]  ;;  %v10126_v27 = vld [vmem:[#allocation255_spill] sm:$0xff]  ;;  %v7794_v43 = vmul.f32 %v10128_v5, %v10128_v5 }
 0x1cf   :  { %10118 = vst [vmem:[#allocation232_spill] sm:$0xff] %v7770_v50  ;;  %10120 = vst [vmem:[#allocation234_spill] sm:$0xff] %v7774_v47  ;;  %v7782_v12 = vmul.f32 %v10123_v23, %v10123_v23  ;;  %v7790_v36 = vmul.f32 %v10126_v27, %v10126_v27  ;;  %v10130_v47 = vld [vmem:[#allocation257_spill] sm:$0xff] }
 0x1d0   :  { %10122 = vst [vmem:[#allocation235_spill] sm:$0xff] %v7778_v49  ;;  %10125 = vst [vmem:[#allocation237_spill] sm:$0xff] %v7786_v48  ;;  %v7798_v39 = vmul.f32 %v10130_v47, %v10130_v47  ;;  %v10132_v49 = vld [vmem:[#allocation258_spill] sm:$0xff]  ;;  %v10136_v48 = vld [vmem:[#allocation261_spill] sm:$0xff] }
 0x1d1   :  { %10124 = vst [vmem:[#allocation236_spill] sm:$0xff] %v7782_v12  ;;  %10127 = vst [vmem:[#allocation238_spill] sm:$0xff] %v7790_v36  ;;  %v7802_v23 = vmul.f32 %v10132_v49, %v10132_v49  ;;  %v10134_v12 = vld [vmem:[#allocation259_spill] sm:$0xff]  ;;  %v7810_v27 = vmul.f32 %v10136_v48, %v10136_v48  ;;  %v10138_v36 = vld [vmem:[#allocation262_spill] sm:$0xff]  ;;  %v7822_v49 = vmul.f32 %v5522_v58, %v5522_v58 }
 0x1d2   :  { %10129 = vst [vmem:[#allocation239_spill] sm:$0xff] %v7794_v43  ;;  %10131 = vst [vmem:[#allocation240_spill] sm:$0xff] %v7798_v39  ;;  %v7806_v51 = vmul.f32 %v10134_v12, %v10134_v12  ;;  %v7814_v5 = vmul.f32 %v10138_v36, %v10138_v36  ;;  %v10140_v43 = vld [vmem:[#allocation263_spill] sm:$0xff]  ;;  %v10143_v39 = vld [vmem:[#allocation264_spill] sm:$0xff] }
 0x1d3   :  { %10133 = vst [vmem:[#allocation241_spill] sm:$0xff] %v7802_v23  ;;  %10137 = vst [vmem:[#allocation244_spill] sm:$0xff] %v7810_v27  ;;  %v7818_v47 = vmul.f32 %v10140_v43, %v10140_v43  ;;  %v7826_v12 = vmul.f32 %v10143_v39, %v10143_v39  ;;  %v10147_v27 = vld [vmem:[#allocation266_spill] sm:$0xff] }
 0x1d4   :  { %10135 = vst [vmem:[#allocation243_spill] sm:$0xff] %v7806_v51  ;;  %10139 = vst [vmem:[#allocation245_spill] sm:$0xff] %v7814_v5  ;;  %v10145_v51 = vld [vmem:[#allocation265_spill] sm:$0xff]  ;;  %v7834_v36 = vmul.f32 %v10147_v27, %v10147_v27  ;;  %v10149_v5 = vld [vmem:[#allocation267_spill] sm:$0xff] }
 0x1d5   :  { %10141 = vst [vmem:[#allocation246_spill] sm:$0xff] %v7818_v47  ;;  %10142 = vst [vmem:[#allocation247_spill] sm:$0xff] %v7822_v49  ;;  %v7830_v48 = vmul.f32 %v10145_v51, %v10145_v51  ;;  %v7838_v43 = vmul.f32 %v10149_v5, %v10149_v5  ;;  %v10151_v47 = vld [vmem:[#allocation268_spill] sm:$0xff]  ;;  %v10153_v49 = vld [vmem:[#allocation270_spill] sm:$0xff]  ;;  %v7858_v5 = vmul.f32 %v5606_v59, %v5606_v59 }
 0x1d6   :  { %10144 = vst [vmem:[#allocation248_spill] sm:$0xff] %v7826_v12  ;;  %10148 = vst [vmem:[#allocation250_spill] sm:$0xff] %v7834_v36  ;;  %v7842_v58 = vmul.f32 %v10151_v47, %v10151_v47  ;;  %v7846_v39 = vmul.f32 %v10153_v49, %v10153_v49  ;;  %v10155_v12 = vld [vmem:[#allocation271_spill] sm:$0xff]  ;;  %v10513_v36 = vld [vmem:[#allocation61_spill] sm:$0xff] }
 0x1d7   :  { %10146 = vst [vmem:[#allocation249_spill] sm:$0xff] %v7830_v48  ;;  %10150 = vst [vmem:[#allocation252_spill] sm:$0xff] %v7838_v43  ;;  %v7850_v51 = vmul.f32 %v10155_v12, %v10155_v12  ;;  %v10157_v48 = vld [vmem:[#allocation272_spill] sm:$0xff]  ;;  %v10160_v43 = vld [vmem:[#allocation273_spill] sm:$0xff] }
 0x1d8   :  { %10152 = vst [vmem:[#allocation253_spill] sm:$0xff] %v7842_v58  ;;  %10154 = vst [vmem:[#allocation254_spill] sm:$0xff] %v7846_v39  ;;  %v7854_v27 = vmul.f32 %v10157_v48, %v10157_v48  ;;  %v7862_v47 = vmul.f32 %v10160_v43, %v10160_v43  ;;  %v10162_v58 = vld [vmem:[#allocation274_spill] sm:$0xff]  ;;  %v10164_v39 = vld [vmem:[#allocation275_spill] sm:$0xff]  ;;  %v7882_v43 = vmul.f32 %v5662_v26, %v5662_v26 }
 0x1d9   :  { %10156 = vst [vmem:[#allocation255_spill] sm:$0xff] %v7850_v51  ;;  %10159 = vst [vmem:[#allocation257_spill] sm:$0xff] %v7858_v5  ;;  %v7866_v49 = vmul.f32 %v10162_v58, %v10162_v58  ;;  %v7870_v12 = vmul.f32 %v10164_v39, %v10164_v39  ;;  %v10166_v51 = vld [vmem:[#allocation276_spill] sm:$0xff]  ;;  %v7902_v26 = vmul.f32 %v5715_v37, %v5715_v37 }
 0x1da   :  { %10158 = vst [vmem:[#allocation256_spill] sm:$0xff] %v7854_v27  ;;  %10161 = vst [vmem:[#allocation258_spill] sm:$0xff] %v7862_v47  ;;  %v7874_v48 = vmul.f32 %v10166_v51, %v10166_v51  ;;  %v10168_v27 = vld [vmem:[#allocation277_spill] sm:$0xff]  ;;  %v10171_v47 = vld [vmem:[#allocation279_spill] sm:$0xff]  ;;  %v7894_v51 = vmul.f32 %v5689_v60, %v5689_v60 }
 0x1db   :  { %10163 = vst [vmem:[#allocation259_spill] sm:$0xff] %v7866_v49  ;;  %10165 = vst [vmem:[#allocation261_spill] sm:$0xff] %v7870_v12  ;;  %v7878_v59 = vmul.f32 %v10168_v27, %v10168_v27  ;;  %v7886_v58 = vmul.f32 %v10171_v47, %v10171_v47  ;;  %v10173_v5 = vld [vmem:[#allocation280_spill] sm:$0xff]  ;;  %v10510_v12 = vld [vmem:[#allocation46_spill] sm:$0xff] }
 0x1dc   :  { %10167 = vst [vmem:[#allocation262_spill] sm:$0xff] %v7874_v48  ;;  %10170 = vst [vmem:[#allocation264_spill] sm:$0xff] %v7882_v43  ;;  %v7890_v39 = vmul.f32 %v10173_v5, %v10173_v5  ;;  %v10176_v48 = vld [vmem:[#allocation282_spill] sm:$0xff]  ;;  %v10179_v43 = vld [vmem:[#allocation283_spill] sm:$0xff] }
 0x1dd   :  { %10169 = vst [vmem:[#allocation263_spill] sm:$0xff] %v7878_v59  ;;  %10172 = vst [vmem:[#allocation265_spill] sm:$0xff] %v7886_v58  ;;  %v7898_v27 = vmul.f32 %v10176_v48, %v10176_v48  ;;  %v7906_v47 = vmul.f32 %v10179_v43, %v10179_v43  ;;  %v10181_v58 = vld [vmem:[#allocation284_spill] sm:$0xff] }
 0x1de   :  { %10174 = vst [vmem:[#allocation266_spill] sm:$0xff] %v7890_v39  ;;  %10175 = vst [vmem:[#allocation267_spill] sm:$0xff] %v7894_v51  ;;  %v7910_v5 = vmul.f32 %v10181_v58, %v10181_v58  ;;  %v10183_v39 = vld [vmem:[#allocation286_spill] sm:$0xff]  ;;  %v10185_v51 = vld [vmem:[#allocation287_spill] sm:$0xff] }
 0x1df   :  { %10177 = vst [vmem:[#allocation268_spill] sm:$0xff] %v7898_v27  ;;  %10178 = vst [vmem:[#allocation270_spill] sm:$0xff] %v7902_v26  ;;  %v7914_v60 = vmul.f32 %v10183_v39, %v10183_v39  ;;  %v7918_v48 = vmul.f32 %v10185_v51, %v10185_v51  ;;  %v10187_v27 = vld [vmem:[#allocation289_spill] sm:$0xff]  ;;  %v10189_v26 = vld [vmem:[#allocation290_spill] sm:$0xff] }
 0x1e0   :  { %10180 = vst [vmem:[#allocation271_spill] sm:$0xff] %v7906_v47  ;;  %10182 = vst [vmem:[#allocation272_spill] sm:$0xff] %v7910_v5  ;;  %v7922_v37 = vmul.f32 %v10187_v27, %v10187_v27  ;;  %v7926_v43 = vmul.f32 %v10189_v26, %v10189_v26  ;;  %v10191_v47 = vld [vmem:[#allocation291_spill] sm:$0xff]  ;;  %v10193_v5 = vld [vmem:[#allocation292_spill] sm:$0xff] }
 0x1e1   :  { %10184 = vst [vmem:[#allocation273_spill] sm:$0xff] %v7914_v60  ;;  %10186 = vst [vmem:[#allocation274_spill] sm:$0xff] %v7918_v48  ;;  %v7930_v58 = vmul.f32 %v10191_v47, %v10191_v47  ;;  %v7934_v39 = vmul.f32 %v10193_v5, %v10193_v5  ;;  %v10195_v60 = vld [vmem:[#allocation293_spill] sm:$0xff]  ;;  %v10197_v48 = vld [vmem:[#allocation294_spill] sm:$0xff] }
 0x1e2   :  { %10188 = vst [vmem:[#allocation275_spill] sm:$0xff] %v7922_v37  ;;  %10190 = vst [vmem:[#allocation276_spill] sm:$0xff] %v7926_v43  ;;  %v7938_v51 = vmul.f32 %v10195_v60, %v10195_v60  ;;  %v7942_v27 = vmul.f32 %v10197_v48, %v10197_v48  ;;  %v10199_v37 = vld [vmem:[#allocation296_spill] sm:$0xff]  ;;  %v10201_v43 = vld [vmem:[#allocation297_spill] sm:$0xff] }
 0x1e3   :  { %10192 = vst [vmem:[#allocation277_spill] sm:$0xff] %v7930_v58  ;;  %10194 = vst [vmem:[#allocation279_spill] sm:$0xff] %v7934_v39  ;;  %v7946_v26 = vmul.f32 %v10199_v37, %v10199_v37  ;;  %v7950_v47 = vmul.f32 %v10201_v43, %v10201_v43  ;;  %v10203_v58 = vld [vmem:[#allocation298_spill] sm:$0xff]  ;;  %v10205_v39 = vld [vmem:[#allocation299_spill] sm:$0xff] }
 0x1e4   :  { %10196 = vst [vmem:[#allocation280_spill] sm:$0xff] %v7938_v51  ;;  %10198 = vst [vmem:[#allocation282_spill] sm:$0xff] %v7942_v27  ;;  %v7954_v5 = vmul.f32 %v10203_v58, %v10203_v58  ;;  %v7958_v60 = vmul.f32 %v10205_v39, %v10205_v39  ;;  %v10207_v51 = vld [vmem:[#allocation300_spill] sm:$0xff]  ;;  %v10209_v27 = vld [vmem:[#allocation302_spill] sm:$0xff]  ;;  %v7978_v39 = vmul.f32 %v5910_v52, %v5910_v52 }
 0x1e5   :  { %10200 = vst [vmem:[#allocation283_spill] sm:$0xff] %v7946_v26  ;;  %10202 = vst [vmem:[#allocation284_spill] sm:$0xff] %v7950_v47  ;;  %v7962_v48 = vmul.f32 %v10207_v51, %v10207_v51  ;;  %v7966_v37 = vmul.f32 %v10209_v27, %v10209_v27  ;;  %v10211_v26 = vld [vmem:[#allocation303_spill] sm:$0xff]  ;;  %v10213_v47 = vld [vmem:[#allocation304_spill] sm:$0xff] }
 0x1e6   :  { %10204 = vst [vmem:[#allocation286_spill] sm:$0xff] %v7954_v5  ;;  %10206 = vst [vmem:[#allocation287_spill] sm:$0xff] %v7958_v60  ;;  %v7970_v43 = vmul.f32 %v10211_v26, %v10211_v26  ;;  %v7974_v58 = vmul.f32 %v10213_v47, %v10213_v47  ;;  %v10216_v60 = vld [vmem:[#allocation305_spill] sm:$0xff]  ;;  %v7990_v26 = vmul.f32 %v5938_v32, %v5938_v32 }
 0x1e7   :  { %10208 = vst [vmem:[#allocation289_spill] sm:$0xff] %v7962_v48  ;;  %10210 = vst [vmem:[#allocation290_spill] sm:$0xff] %v7966_v37  ;;  %v7982_v51 = vmul.f32 %v10216_v60, %v10216_v60  ;;  %v10218_v48 = vld [vmem:[#allocation306_spill] sm:$0xff]  ;;  %v10505_v37 = vld [vmem:[#allocation40_spill] sm:$0xff] }
 0x1e8   :  { %10212 = vst [vmem:[#allocation291_spill] sm:$0xff] %v7970_v43  ;;  %10214 = vst [vmem:[#allocation292_spill] sm:$0xff] %v7974_v58  ;;  %v7986_v27 = vmul.f32 %v10218_v48, %v10218_v48  ;;  %v10221_v43 = vld [vmem:[#allocation307_spill] sm:$0xff]  ;;  %v10223_v58 = vld [vmem:[#allocation308_spill] sm:$0xff] }
 0x1e9   :  { %10215 = vst [vmem:[#allocation293_spill] sm:$0xff] %v7978_v39  ;;  %10217 = vst [vmem:[#allocation294_spill] sm:$0xff] %v7982_v51  ;;  %v7994_v47 = vmul.f32 %v10221_v43, %v10221_v43  ;;  %v7998_v52 = vmul.f32 %v10223_v58, %v10223_v58  ;;  %v10225_v39 = vld [vmem:[#allocation310_spill] sm:$0xff]  ;;  %v10227_v51 = vld [vmem:[#allocation311_spill] sm:$0xff]  ;;  %v8014_v43 = vmul.f32 %v5991_v14, %v5991_v14 }
 0x1ea   :  { %10219 = vst [vmem:[#allocation296_spill] sm:$0xff] %v7986_v27  ;;  %10220 = vst [vmem:[#allocation297_spill] sm:$0xff] %v7990_v26  ;;  %v8002_v60 = vmul.f32 %v10225_v39, %v10225_v39  ;;  %v8006_v48 = vmul.f32 %v10227_v51, %v10227_v51  ;;  %v10229_v27 = vld [vmem:[#allocation312_spill] sm:$0xff] }
 0x1eb   :  { %10222 = vst [vmem:[#allocation298_spill] sm:$0xff] %v7994_v47  ;;  %10224 = vst [vmem:[#allocation299_spill] sm:$0xff] %v7998_v52  ;;  %v8010_v32 = vmul.f32 %v10229_v27, %v10229_v27  ;;  %v10232_v47 = vld [vmem:[#allocation313_spill] sm:$0xff]  ;;  %v10234_v52 = vld [vmem:[#allocation314_spill] sm:$0xff] }
 0x1ec   :  { %10226 = vst [vmem:[#allocation300_spill] sm:$0xff] %v8002_v60  ;;  %10228 = vst [vmem:[#allocation302_spill] sm:$0xff] %v8006_v48  ;;  %v8018_v58 = vmul.f32 %v10232_v47, %v10232_v47  ;;  %v8022_v39 = vmul.f32 %v10234_v52, %v10234_v52  ;;  %v10236_v60 = vld [vmem:[#allocation315_spill] sm:$0xff]  ;;  %v10238_v48 = vld [vmem:[#allocation316_spill] sm:$0xff] }
 0x1ed   :  { %10230 = vst [vmem:[#allocation303_spill] sm:$0xff] %v8010_v32  ;;  %10231 = vst [vmem:[#allocation304_spill] sm:$0xff] %v8014_v43  ;;  %v8026_v51 = vmul.f32 %v10236_v60, %v10236_v60  ;;  %v8030_v27 = vmul.f32 %v10238_v48, %v10238_v48  ;;  %v10240_v32 = vld [vmem:[#allocation317_spill] sm:$0xff]  ;;  %v10242_v43 = vld [vmem:[#allocation319_spill] sm:$0xff] }
 0x1ee   :  { %10233 = vst [vmem:[#allocation305_spill] sm:$0xff] %v8018_v58  ;;  %10235 = vst [vmem:[#allocation306_spill] sm:$0xff] %v8022_v39  ;;  %v8034_v14 = vmul.f32 %v10240_v32, %v10240_v32  ;;  %v8038_v47 = vmul.f32 %v10242_v43, %v10242_v43  ;;  %v10244_v58 = vld [vmem:[#allocation320_spill] sm:$0xff]  ;;  %v10246_v39 = vld [vmem:[#allocation321_spill] sm:$0xff] }
 0x1ef   :  { %10237 = vst [vmem:[#allocation307_spill] sm:$0xff] %v8026_v51  ;;  %10239 = vst [vmem:[#allocation308_spill] sm:$0xff] %v8030_v27  ;;  %v8042_v52 = vmul.f32 %v10244_v58, %v10244_v58  ;;  %v8046_v60 = vmul.f32 %v10246_v39, %v10246_v39  ;;  %v10248_v51 = vld [vmem:[#allocation322_spill] sm:$0xff]  ;;  %v10250_v27 = vld [vmem:[#allocation323_spill] sm:$0xff] }
 0x1f0   :  { %10241 = vst [vmem:[#allocation310_spill] sm:$0xff] %v8034_v14  ;;  %10243 = vst [vmem:[#allocation311_spill] sm:$0xff] %v8038_v47  ;;  %v8050_v48 = vmul.f32 %v10248_v51, %v10248_v51  ;;  %v8054_v32 = vmul.f32 %v10250_v27, %v10250_v27  ;;  %v10252_v14 = vld [vmem:[#allocation324_spill] sm:$0xff]  ;;  %v10254_v47 = vld [vmem:[#allocation325_spill] sm:$0xff]  ;;  %v8070_v51 = vmul.f32 %v6130_v55, %v6130_v55 }
 0x1f1   :  { %10245 = vst [vmem:[#allocation312_spill] sm:$0xff] %v8042_v52  ;;  %10247 = vst [vmem:[#allocation313_spill] sm:$0xff] %v8046_v60  ;;  %v8058_v43 = vmul.f32 %v10252_v14, %v10252_v14  ;;  %v8062_v58 = vmul.f32 %v10254_v47, %v10254_v47  ;;  %v10256_v52 = vld [vmem:[#allocation326_spill] sm:$0xff]  ;;  %v10503_v60 = vld [vmem:[#allocation28_spill] sm:$0xff] }
 0x1f2   :  { %10249 = vst [vmem:[#allocation314_spill] sm:$0xff] %v8050_v48  ;;  %10251 = vst [vmem:[#allocation315_spill] sm:$0xff] %v8054_v32  ;;  %v8066_v39 = vmul.f32 %v10256_v52, %v10256_v52  ;;  %v10259_v48 = vld [vmem:[#allocation328_spill] sm:$0xff]  ;;  %v10261_v32 = vld [vmem:[#allocation329_spill] sm:$0xff] }
 0x1f3   :  { %10253 = vst [vmem:[#allocation316_spill] sm:$0xff] %v8058_v43  ;;  %10255 = vst [vmem:[#allocation317_spill] sm:$0xff] %v8062_v58  ;;  %v8074_v27 = vmul.f32 %v10259_v48, %v10259_v48  ;;  %v8078_v14 = vmul.f32 %v10261_v32, %v10261_v32  ;;  %v10263_v43 = vld [vmem:[#allocation330_spill] sm:$0xff]  ;;  %v10265_v58 = vld [vmem:[#allocation331_spill] sm:$0xff]  ;;  %v8094_v48 = vmul.f32 %v6186_v54, %v6186_v54 }
 0x1f4   :  { %10257 = vst [vmem:[#allocation319_spill] sm:$0xff] %v8066_v39  ;;  %10258 = vst [vmem:[#allocation320_spill] sm:$0xff] %v8070_v51  ;;  %v8082_v47 = vmul.f32 %v10263_v43, %v10263_v43  ;;  %v8086_v52 = vmul.f32 %v10265_v58, %v10265_v58  ;;  %v10267_v39 = vld [vmem:[#allocation332_spill] sm:$0xff]  ;;  %v10501_v51 = vld [vmem:[#allocation25_spill] sm:$0xff] }
 0x1f5   :  { %10260 = vst [vmem:[#allocation321_spill] sm:$0xff] %v8074_v27  ;;  %10262 = vst [vmem:[#allocation322_spill] sm:$0xff] %v8078_v14  ;;  %v8090_v55 = vmul.f32 %v10267_v39, %v10267_v39  ;;  %v10270_v27 = vld [vmem:[#allocation334_spill] sm:$0xff]  ;;  %v10272_v14 = vld [vmem:[#allocation335_spill] sm:$0xff] }
 0x1f6   :  { %10264 = vst [vmem:[#allocation323_spill] sm:$0xff] %v8082_v47  ;;  %10266 = vst [vmem:[#allocation324_spill] sm:$0xff] %v8086_v52  ;;  %v8098_v32 = vmul.f32 %v10270_v27, %v10270_v27  ;;  %v8102_v43 = vmul.f32 %v10272_v14, %v10272_v14  ;;  %v10274_v47 = vld [vmem:[#allocation336_spill] sm:$0xff]  ;;  %v10276_v52 = vld [vmem:[#allocation337_spill] sm:$0xff] }
 0x1f7   :  { %10268 = vst [vmem:[#allocation325_spill] sm:$0xff] %v8090_v55  ;;  %10269 = vst [vmem:[#allocation326_spill] sm:$0xff] %v8094_v48  ;;  %v8106_v58 = vmul.f32 %v10274_v47, %v10274_v47  ;;  %v8110_v39 = vmul.f32 %v10276_v52, %v10276_v52  ;;  %v10278_v55 = vld [vmem:[#allocation338_spill] sm:$0xff]  ;;  %v10280_v48 = vld [vmem:[#allocation339_spill] sm:$0xff] }
 0x1f8   :  { %10271 = vst [vmem:[#allocation328_spill] sm:$0xff] %v8098_v32  ;;  %10273 = vst [vmem:[#allocation329_spill] sm:$0xff] %v8102_v43  ;;  %v8114_v54 = vmul.f32 %v10278_v55, %v10278_v55  ;;  %v8118_v27 = vmul.f32 %v10280_v48, %v10280_v48  ;;  %v10282_v32 = vld [vmem:[#allocation340_spill] sm:$0xff]  ;;  %v10284_v43 = vld [vmem:[#allocation341_spill] sm:$0xff] }
 0x1f9   :  { %10275 = vst [vmem:[#allocation330_spill] sm:$0xff] %v8106_v58  ;;  %10277 = vst [vmem:[#allocation331_spill] sm:$0xff] %v8110_v39  ;;  %v8122_v14 = vmul.f32 %v10282_v32, %v10282_v32  ;;  %v8126_v47 = vmul.f32 %v10284_v43, %v10284_v43  ;;  %v10286_v58 = vld [vmem:[#allocation342_spill] sm:$0xff]  ;;  %v10288_v39 = vld [vmem:[#allocation343_spill] sm:$0xff] }
 0x1fa   :  { %10279 = vst [vmem:[#allocation332_spill] sm:$0xff] %v8114_v54  ;;  %10281 = vst [vmem:[#allocation334_spill] sm:$0xff] %v8118_v27  ;;  %v8130_v52 = vmul.f32 %v10286_v58, %v10286_v58  ;;  %v8134_v55 = vmul.f32 %v10288_v39, %v10288_v39  ;;  %v10290_v54 = vld [vmem:[#allocation344_spill] sm:$0xff]  ;;  %v10292_v27 = vld [vmem:[#allocation345_spill] sm:$0xff] }
 0x1fb   :  { %10283 = vst [vmem:[#allocation335_spill] sm:$0xff] %v8122_v14  ;;  %10285 = vst [vmem:[#allocation336_spill] sm:$0xff] %v8126_v47  ;;  %v8138_v48 = vmul.f32 %v10290_v54, %v10290_v54  ;;  %v8142_v32 = vmul.f32 %v10292_v27, %v10292_v27  ;;  %v10294_v14 = vld [vmem:[#allocation346_spill] sm:$0xff]  ;;  %v10296_v47 = vld [vmem:[#allocation347_spill] sm:$0xff] }
 0x1fc   :  { %10287 = vst [vmem:[#allocation337_spill] sm:$0xff] %v8130_v52  ;;  %10289 = vst [vmem:[#allocation338_spill] sm:$0xff] %v8134_v55  ;;  %v8146_v43 = vmul.f32 %v10294_v14, %v10294_v14  ;;  %v8150_v58 = vmul.f32 %v10296_v47, %v10296_v47  ;;  %v10298_v52 = vld [vmem:[#allocation348_spill] sm:$0xff]  ;;  %v10300_v55 = vld [vmem:[#allocation349_spill] sm:$0xff] }
 0x1fd   :  { %10291 = vst [vmem:[#allocation339_spill] sm:$0xff] %v8138_v48  ;;  %10293 = vst [vmem:[#allocation340_spill] sm:$0xff] %v8142_v32  ;;  %v8154_v39 = vmul.f32 %v10298_v52, %v10298_v52  ;;  %v8158_v54 = vmul.f32 %v10300_v55, %v10300_v55  ;;  %v10302_v48 = vld [vmem:[#allocation350_spill] sm:$0xff]  ;;  %v10304_v32 = vld [vmem:[#allocation352_spill] sm:$0xff] }
 0x1fe   :  { %10295 = vst [vmem:[#allocation341_spill] sm:$0xff] %v8146_v43  ;;  %10297 = vst [vmem:[#allocation342_spill] sm:$0xff] %v8150_v58  ;;  %v8162_v27 = vmul.f32 %v10302_v48, %v10302_v48  ;;  %v8166_v14 = vmul.f32 %v10304_v32, %v10304_v32  ;;  %v10306_v43 = vld [vmem:[#allocation353_spill] sm:$0xff]  ;;  %v10308_v58 = vld [vmem:[#allocation354_spill] sm:$0xff] }
 0x1ff   :  { %10299 = vst [vmem:[#allocation343_spill] sm:$0xff] %v8154_v39  ;;  %10301 = vst [vmem:[#allocation344_spill] sm:$0xff] %v8158_v54  ;;  %v8170_v47 = vmul.f32 %v10306_v43, %v10306_v43  ;;  %v8174_v52 = vmul.f32 %v10308_v58, %v10308_v58  ;;  %v10310_v39 = vld [vmem:[#allocation355_spill] sm:$0xff]  ;;  %v10312_v54 = vld [vmem:[#allocation356_spill] sm:$0xff] }
 0x200   :  { %10303 = vst [vmem:[#allocation345_spill] sm:$0xff] %v8162_v27  ;;  %10305 = vst [vmem:[#allocation346_spill] sm:$0xff] %v8166_v14  ;;  %v8178_v55 = vmul.f32 %v10310_v39, %v10310_v39  ;;  %v8182_v48 = vmul.f32 %v10312_v54, %v10312_v54  ;;  %v10314_v27 = vld [vmem:[#allocation357_spill] sm:$0xff]  ;;  %v10316_v14 = vld [vmem:[#allocation358_spill] sm:$0xff] }
 0x201   :  { %10307 = vst [vmem:[#allocation347_spill] sm:$0xff] %v8170_v47  ;;  %10309 = vst [vmem:[#allocation348_spill] sm:$0xff] %v8174_v52  ;;  %v8186_v32 = vmul.f32 %v10314_v27, %v10314_v27  ;;  %v8190_v43 = vmul.f32 %v10316_v14, %v10316_v14  ;;  %v10318_v47 = vld [vmem:[#allocation359_spill] sm:$0xff]  ;;  %v10320_v52 = vld [vmem:[#allocation360_spill] sm:$0xff]  ;;  %v8210_v14 = vmul.f32 %v6462_v35, %v6462_v35 }
 0x202   :  { %10311 = vst [vmem:[#allocation349_spill] sm:$0xff] %v8178_v55  ;;  %10313 = vst [vmem:[#allocation350_spill] sm:$0xff] %v8182_v48  ;;  %v8194_v58 = vmul.f32 %v10318_v47, %v10318_v47  ;;  %v8198_v39 = vmul.f32 %v10320_v52, %v10320_v52  ;;  %v10322_v55 = vld [vmem:[#allocation361_spill] sm:$0xff]  ;;  %v10324_v48 = vld [vmem:[#allocation362_spill] sm:$0xff] }
 0x203   :  { %10315 = vst [vmem:[#allocation352_spill] sm:$0xff] %v8186_v32  ;;  %10317 = vst [vmem:[#allocation353_spill] sm:$0xff] %v8190_v43  ;;  %v8202_v54 = vmul.f32 %v10322_v55, %v10322_v55  ;;  %v8206_v27 = vmul.f32 %v10324_v48, %v10324_v48  ;;  %v10327_v43 = vld [vmem:[#allocation363_spill] sm:$0xff]  ;;  %v10500_v32 = vld [vmem:[#allocation10_spill] sm:$0xff] }
 0x204   :  { %10319 = vst [vmem:[#allocation354_spill] sm:$0xff] %v8194_v58  ;;  %10321 = vst [vmem:[#allocation355_spill] sm:$0xff] %v8198_v39  ;;  %v8214_v47 = vmul.f32 %v10327_v43, %v10327_v43  ;;  %v10329_v58 = vld [vmem:[#allocation364_spill] sm:$0xff]  ;;  %v10331_v39 = vld [vmem:[#allocation365_spill] sm:$0xff] }
 0x205   :  { %10323 = vst [vmem:[#allocation356_spill] sm:$0xff] %v8202_v54  ;;  %10325 = vst [vmem:[#allocation357_spill] sm:$0xff] %v8206_v27  ;;  %v8218_v52 = vmul.f32 %v10329_v58, %v10329_v58  ;;  %v8222_v55 = vmul.f32 %v10331_v39, %v10331_v39  ;;  %v10333_v54 = vld [vmem:[#allocation366_spill] sm:$0xff]  ;;  %v10335_v27 = vld [vmem:[#allocation367_spill] sm:$0xff] }
 0x206   :  { %10326 = vst [vmem:[#allocation358_spill] sm:$0xff] %v8210_v14  ;;  %10328 = vst [vmem:[#allocation359_spill] sm:$0xff] %v8214_v47  ;;  %v8226_v48 = vmul.f32 %v10333_v54, %v10333_v54  ;;  %v8230_v35 = vmul.f32 %v10335_v27, %v10335_v27  ;;  %v10337_v14 = vld [vmem:[#allocation368_spill] sm:$0xff]  ;;  %v10339_v47 = vld [vmem:[#allocation369_spill] sm:$0xff] }
 0x207   :  { %10330 = vst [vmem:[#allocation360_spill] sm:$0xff] %v8218_v52  ;;  %10332 = vst [vmem:[#allocation361_spill] sm:$0xff] %v8222_v55  ;;  %v8234_v43 = vmul.f32 %v10337_v14, %v10337_v14  ;;  %v8238_v58 = vmul.f32 %v10339_v47, %v10339_v47  ;;  %v10341_v52 = vld [vmem:[#allocation370_spill] sm:$0xff]  ;;  %v10343_v55 = vld [vmem:[#allocation371_spill] sm:$0xff] }
 0x208   :  { %10334 = vst [vmem:[#allocation362_spill] sm:$0xff] %v8226_v48  ;;  %10336 = vst [vmem:[#allocation363_spill] sm:$0xff] %v8230_v35  ;;  %v8242_v39 = vmul.f32 %v10341_v52, %v10341_v52  ;;  %v8246_v54 = vmul.f32 %v10343_v55, %v10343_v55  ;;  %v10345_v48 = vld [vmem:[#allocation372_spill] sm:$0xff]  ;;  %v10347_v35 = vld [vmem:[#allocation373_spill] sm:$0xff] }
 0x209   :  { %10338 = vst [vmem:[#allocation364_spill] sm:$0xff] %v8234_v43  ;;  %10340 = vst [vmem:[#allocation365_spill] sm:$0xff] %v8238_v58  ;;  %v8250_v27 = vmul.f32 %v10345_v48, %v10345_v48  ;;  %v8254_v14 = vmul.f32 %v10347_v35, %v10347_v35  ;;  %v10349_v43 = vld [vmem:[#allocation375_spill] sm:$0xff]  ;;  %v10351_v58 = vld [vmem:[#allocation376_spill] sm:$0xff] }
 0x20a   :  { %10342 = vst [vmem:[#allocation366_spill] sm:$0xff] %v8242_v39  ;;  %10344 = vst [vmem:[#allocation367_spill] sm:$0xff] %v8246_v54  ;;  %v8258_v47 = vmul.f32 %v10349_v43, %v10349_v43  ;;  %v8262_v52 = vmul.f32 %v10351_v58, %v10351_v58  ;;  %v10353_v39 = vld [vmem:[#allocation377_spill] sm:$0xff]  ;;  %v10355_v54 = vld [vmem:[#allocation378_spill] sm:$0xff] }
 0x20b   :  { %10346 = vst [vmem:[#allocation368_spill] sm:$0xff] %v8250_v27  ;;  %10348 = vst [vmem:[#allocation369_spill] sm:$0xff] %v8254_v14  ;;  %v8266_v55 = vmul.f32 %v10353_v39, %v10353_v39  ;;  %v8270_v48 = vmul.f32 %v10355_v54, %v10355_v54  ;;  %v10357_v27 = vld [vmem:[#allocation379_spill] sm:$0xff]  ;;  %v10359_v14 = vld [vmem:[#allocation380_spill] sm:$0xff] }
 0x20c   :  { %10350 = vst [vmem:[#allocation370_spill] sm:$0xff] %v8258_v47  ;;  %10352 = vst [vmem:[#allocation371_spill] sm:$0xff] %v8262_v52  ;;  %v8274_v35 = vmul.f32 %v10357_v27, %v10357_v27  ;;  %v8278_v43 = vmul.f32 %v10359_v14, %v10359_v14  ;;  %v10361_v47 = vld [vmem:[#allocation381_spill] sm:$0xff]  ;;  %v10363_v52 = vld [vmem:[#allocation382_spill] sm:$0xff] }
 0x20d   :  { %10354 = vst [vmem:[#allocation372_spill] sm:$0xff] %v8266_v55  ;;  %10356 = vst [vmem:[#allocation373_spill] sm:$0xff] %v8270_v48  ;;  %v8282_v58 = vmul.f32 %v10361_v47, %v10361_v47  ;;  %v8286_v39 = vmul.f32 %v10363_v52, %v10363_v52  ;;  %v10365_v55 = vld [vmem:[#allocation383_spill] sm:$0xff]  ;;  %v10367_v48 = vld [vmem:[#allocation384_spill] sm:$0xff] }
 0x20e   :  { %10358 = vst [vmem:[#allocation375_spill] sm:$0xff] %v8274_v35  ;;  %10360 = vst [vmem:[#allocation376_spill] sm:$0xff] %v8278_v43  ;;  %v8290_v54 = vmul.f32 %v10365_v55, %v10365_v55  ;;  %v8294_v27 = vmul.f32 %v10367_v48, %v10367_v48  ;;  %v10369_v35 = vld [vmem:[#allocation385_spill] sm:$0xff]  ;;  %v10371_v43 = vld [vmem:[#allocation386_spill] sm:$0xff] }
 0x20f   :  { %10362 = vst [vmem:[#allocation377_spill] sm:$0xff] %v8282_v58  ;;  %10364 = vst [vmem:[#allocation378_spill] sm:$0xff] %v8286_v39  ;;  %v8298_v14 = vmul.f32 %v10369_v35, %v10369_v35  ;;  %v8302_v47 = vmul.f32 %v10371_v43, %v10371_v43  ;;  %v10373_v58 = vld [vmem:[#allocation387_spill] sm:$0xff]  ;;  %v10375_v39 = vld [vmem:[#allocation388_spill] sm:$0xff] }
 0x210   :  { %10366 = vst [vmem:[#allocation379_spill] sm:$0xff] %v8290_v54  ;;  %10368 = vst [vmem:[#allocation380_spill] sm:$0xff] %v8294_v27  ;;  %v8306_v52 = vmul.f32 %v10373_v58, %v10373_v58  ;;  %v8310_v55 = vmul.f32 %v10375_v39, %v10375_v39  ;;  %v10377_v54 = vld [vmem:[#allocation389_spill] sm:$0xff]  ;;  %v10379_v27 = vld [vmem:[#allocation390_spill] sm:$0xff]  ;;  %v8326_v58 = vmul.f32 %v6738_v57, %v6738_v57 }
 0x211   :  { %10370 = vst [vmem:[#allocation381_spill] sm:$0xff] %v8298_v14  ;;  %10372 = vst [vmem:[#allocation382_spill] sm:$0xff] %v8302_v47  ;;  %v8314_v48 = vmul.f32 %v10377_v54, %v10377_v54  ;;  %v8318_v35 = vmul.f32 %v10379_v27, %v10379_v27  ;;  %v10381_v14 = vld [vmem:[#allocation391_spill] sm:$0xff]  ;;  %v10498_v47 = vld [vmem:[#allocation9_spill] sm:$0xff] }
 0x212   :  { %10374 = vst [vmem:[#allocation383_spill] sm:$0xff] %v8306_v52  ;;  %10376 = vst [vmem:[#allocation384_spill] sm:$0xff] %v8310_v55  ;;  %v8322_v43 = vmul.f32 %v10381_v14, %v10381_v14  ;;  %v10384_v52 = vld [vmem:[#allocation392_spill] sm:$0xff]  ;;  %v10386_v55 = vld [vmem:[#allocation393_spill] sm:$0xff] }
 0x213   :  { %10378 = vst [vmem:[#allocation385_spill] sm:$0xff] %v8314_v48  ;;  %10380 = vst [vmem:[#allocation386_spill] sm:$0xff] %v8318_v35  ;;  %v8330_v39 = vmul.f32 %v10384_v52, %v10384_v52  ;;  %v8334_v54 = vmul.f32 %v10386_v55, %v10386_v55  ;;  %v10388_v48 = vld [vmem:[#allocation394_spill] sm:$0xff]  ;;  %v10390_v35 = vld [vmem:[#allocation395_spill] sm:$0xff] }
 0x214   :  { %10382 = vst [vmem:[#allocation387_spill] sm:$0xff] %v8322_v43  ;;  %10383 = vst [vmem:[#allocation388_spill] sm:$0xff] %v8326_v58  ;;  %v8338_v27 = vmul.f32 %v10388_v48, %v10388_v48  ;;  %v8342_v14 = vmul.f32 %v10390_v35, %v10390_v35  ;;  %v10392_v43 = vld [vmem:[#allocation396_spill] sm:$0xff]  ;;  %v10394_v58 = vld [vmem:[#allocation398_spill] sm:$0xff] }
 0x215   :  { %10385 = vst [vmem:[#allocation389_spill] sm:$0xff] %v8330_v39  ;;  %10387 = vst [vmem:[#allocation390_spill] sm:$0xff] %v8334_v54  ;;  %v8346_v57 = vmul.f32 %v10392_v43, %v10392_v43  ;;  %v8350_v52 = vmul.f32 %v10394_v58, %v10394_v58  ;;  %v10396_v39 = vld [vmem:[#allocation399_spill] sm:$0xff]  ;;  %v10398_v54 = vld [vmem:[#allocation400_spill] sm:$0xff] }
 0x216   :  { %10389 = vst [vmem:[#allocation391_spill] sm:$0xff] %v8338_v27  ;;  %10391 = vst [vmem:[#allocation392_spill] sm:$0xff] %v8342_v14  ;;  %v8354_v55 = vmul.f32 %v10396_v39, %v10396_v39  ;;  %v8358_v48 = vmul.f32 %v10398_v54, %v10398_v54  ;;  %v10400_v27 = vld [vmem:[#allocation401_spill] sm:$0xff]  ;;  %v10402_v14 = vld [vmem:[#allocation402_spill] sm:$0xff] }
 0x217   :  { %10393 = vst [vmem:[#allocation393_spill] sm:$0xff] %v8346_v57  ;;  %10395 = vst [vmem:[#allocation394_spill] sm:$0xff] %v8350_v52  ;;  %v8362_v35 = vmul.f32 %v10400_v27, %v10400_v27  ;;  %v8366_v43 = vmul.f32 %v10402_v14, %v10402_v14  ;;  %v10404_v57 = vld [vmem:[#allocation403_spill] sm:$0xff]  ;;  %v10406_v52 = vld [vmem:[#allocation404_spill] sm:$0xff] }
 0x218   :  { %10397 = vst [vmem:[#allocation395_spill] sm:$0xff] %v8354_v55  ;;  %10399 = vst [vmem:[#allocation396_spill] sm:$0xff] %v8358_v48  ;;  %v8370_v58 = vmul.f32 %v10404_v57, %v10404_v57  ;;  %v8374_v39 = vmul.f32 %v10406_v52, %v10406_v52  ;;  %v10408_v55 = vld [vmem:[#allocation405_spill] sm:$0xff]  ;;  %v10410_v48 = vld [vmem:[#allocation406_spill] sm:$0xff] }
 0x219   :  { %10401 = vst [vmem:[#allocation398_spill] sm:$0xff] %v8362_v35  ;;  %10403 = vst [vmem:[#allocation399_spill] sm:$0xff] %v8366_v43  ;;  %v8378_v54 = vmul.f32 %v10408_v55, %v10408_v55  ;;  %v8382_v27 = vmul.f32 %v10410_v48, %v10410_v48  ;;  %v10412_v35 = vld [vmem:[#allocation407_spill] sm:$0xff]  ;;  %v10414_v43 = vld [vmem:[#allocation408_spill] sm:$0xff] }
 0x21a   :  { %10405 = vst [vmem:[#allocation400_spill] sm:$0xff] %v8370_v58  ;;  %10407 = vst [vmem:[#allocation401_spill] sm:$0xff] %v8374_v39  ;;  %v8386_v14 = vmul.f32 %v10412_v35, %v10412_v35  ;;  %v8390_v57 = vmul.f32 %v10414_v43, %v10414_v43  ;;  %v10416_v58 = vld [vmem:[#allocation409_spill] sm:$0xff]  ;;  %v10418_v39 = vld [vmem:[#allocation410_spill] sm:$0xff] }
 0x21b   :  { %10409 = vst [vmem:[#allocation402_spill] sm:$0xff] %v8378_v54  ;;  %10411 = vst [vmem:[#allocation403_spill] sm:$0xff] %v8382_v27  ;;  %v8394_v52 = vmul.f32 %v10416_v58, %v10416_v58  ;;  %v8398_v55 = vmul.f32 %v10418_v39, %v10418_v39  ;;  %v10420_v54 = vld [vmem:[#allocation411_spill] sm:$0xff]  ;;  %v10422_v27 = vld [vmem:[#allocation412_spill] sm:$0xff]  ;;  %v8418_v39 = vmul.f32 %v6958_v41, %v6958_v41 }
 0x21c   :  { %10413 = vst [vmem:[#allocation404_spill] sm:$0xff] %v8386_v14  ;;  %10415 = vst [vmem:[#allocation405_spill] sm:$0xff] %v8390_v57  ;;  %v8402_v48 = vmul.f32 %v10420_v54, %v10420_v54  ;;  %v8406_v35 = vmul.f32 %v10422_v27, %v10422_v27  ;;  %v10424_v14 = vld [vmem:[#allocation413_spill] sm:$0xff]  ;;  %v10426_v57 = vld [vmem:[#allocation414_spill] sm:$0xff] }
 0x21d   :  { %10417 = vst [vmem:[#allocation406_spill] sm:$0xff] %v8394_v52  ;;  %10419 = vst [vmem:[#allocation407_spill] sm:$0xff] %v8398_v55  ;;  %v8410_v43 = vmul.f32 %v10424_v14, %v10424_v14  ;;  %v8414_v58 = vmul.f32 %v10426_v57, %v10426_v57  ;;  %v10429_v52 = vld [vmem:[#allocation415_spill] sm:$0xff] }
 0x21e   :  { %10421 = vst [vmem:[#allocation408_spill] sm:$0xff] %v8402_v48  ;;  %10423 = vst [vmem:[#allocation409_spill] sm:$0xff] %v8406_v35  ;;  %v8422_v54 = vmul.f32 %v10429_v52, %v10429_v52  ;;  %v10431_v48 = vld [vmem:[#allocation416_spill] sm:$0xff]  ;;  %v10433_v35 = vld [vmem:[#allocation417_spill] sm:$0xff] }
 0x21f   :  { %10425 = vst [vmem:[#allocation410_spill] sm:$0xff] %v8410_v43  ;;  %10427 = vst [vmem:[#allocation411_spill] sm:$0xff] %v8414_v58  ;;  %v8426_v27 = vmul.f32 %v10431_v48, %v10431_v48  ;;  %v8430_v14 = vmul.f32 %v10433_v35, %v10433_v35  ;;  %v10435_v43 = vld [vmem:[#allocation418_spill] sm:$0xff]  ;;  %v10437_v58 = vld [vmem:[#allocation419_spill] sm:$0xff] }
 0x220   :  { %10428 = vst [vmem:[#allocation412_spill] sm:$0xff] %v8418_v39  ;;  %10430 = vst [vmem:[#allocation413_spill] sm:$0xff] %v8422_v54  ;;  %v8434_v57 = vmul.f32 %v10435_v43, %v10435_v43  ;;  %v8438_v41 = vmul.f32 %v10437_v58, %v10437_v58  ;;  %v10439_v39 = vld [vmem:[#allocation421_spill] sm:$0xff]  ;;  %v10441_v54 = vld [vmem:[#allocation422_spill] sm:$0xff] }
 0x221   :  { %10432 = vst [vmem:[#allocation414_spill] sm:$0xff] %v8426_v27  ;;  %10434 = vst [vmem:[#allocation415_spill] sm:$0xff] %v8430_v14  ;;  %v8442_v52 = vmul.f32 %v10439_v39, %v10439_v39  ;;  %v8446_v48 = vmul.f32 %v10441_v54, %v10441_v54  ;;  %v10443_v27 = vld [vmem:[#allocation423_spill] sm:$0xff]  ;;  %v10445_v14 = vld [vmem:[#allocation424_spill] sm:$0xff] }
 0x222   :  { %10436 = vst [vmem:[#allocation416_spill] sm:$0xff] %v8434_v57  ;;  %10438 = vst [vmem:[#allocation417_spill] sm:$0xff] %v8438_v41  ;;  %v8450_v35 = vmul.f32 %v10443_v27, %v10443_v27  ;;  %v8454_v43 = vmul.f32 %v10445_v14, %v10445_v14  ;;  %v10447_v57 = vld [vmem:[#allocation425_spill] sm:$0xff]  ;;  %v10449_v41 = vld [vmem:[#allocation426_spill] sm:$0xff] }
 0x223   :  { %10440 = vst [vmem:[#allocation418_spill] sm:$0xff] %v8442_v52  ;;  %10442 = vst [vmem:[#allocation419_spill] sm:$0xff] %v8446_v48  ;;  %v8458_v58 = vmul.f32 %v10447_v57, %v10447_v57  ;;  %v8462_v39 = vmul.f32 %v10449_v41, %v10449_v41  ;;  %v10451_v52 = vld [vmem:[#allocation427_spill] sm:$0xff]  ;;  %v10453_v48 = vld [vmem:[#allocation428_spill] sm:$0xff] }
 0x224   :  { %10444 = vst [vmem:[#allocation421_spill] sm:$0xff] %v8450_v35  ;;  %10446 = vst [vmem:[#allocation422_spill] sm:$0xff] %v8454_v43  ;;  %v8466_v54 = vmul.f32 %v10451_v52, %v10451_v52  ;;  %v8470_v27 = vmul.f32 %v10453_v48, %v10453_v48  ;;  %v10455_v35 = vld [vmem:[#allocation429_spill] sm:$0xff]  ;;  %v10457_v43 = vld [vmem:[#allocation430_spill] sm:$0xff] }
 0x225   :  { %10448 = vst [vmem:[#allocation423_spill] sm:$0xff] %v8458_v58  ;;  %10450 = vst [vmem:[#allocation424_spill] sm:$0xff] %v8462_v39  ;;  %v8474_v14 = vmul.f32 %v10455_v35, %v10455_v35  ;;  %v8478_v57 = vmul.f32 %v10457_v43, %v10457_v43  ;;  %v10459_v58 = vld [vmem:[#allocation431_spill] sm:$0xff]  ;;  %v10461_v39 = vld [vmem:[#allocation432_spill] sm:$0xff] }
 0x226   :  { %10452 = vst [vmem:[#allocation425_spill] sm:$0xff] %v8466_v54  ;;  %10454 = vst [vmem:[#allocation426_spill] sm:$0xff] %v8470_v27  ;;  %v8482_v41 = vmul.f32 %v10459_v58, %v10459_v58  ;;  %v8486_v52 = vmul.f32 %v10461_v39, %v10461_v39  ;;  %v10463_v54 = vld [vmem:[#allocation433_spill] sm:$0xff]  ;;  %v10465_v27 = vld [vmem:[#allocation434_spill] sm:$0xff] }
 0x227   :  { %10456 = vst [vmem:[#allocation427_spill] sm:$0xff] %v8474_v14  ;;  %10458 = vst [vmem:[#allocation428_spill] sm:$0xff] %v8478_v57  ;;  %v8490_v48 = vmul.f32 %v10463_v54, %v10463_v54  ;;  %v8494_v35 = vmul.f32 %v10465_v27, %v10465_v27  ;;  %v10467_v14 = vld [vmem:[#allocation435_spill] sm:$0xff]  ;;  %v10469_v57 = vld [vmem:[#allocation436_spill] sm:$0xff]  ;;  %v8510_v54 = vmul.f32 %v7178_v1, %v7178_v1 }
 0x228   :  { %10460 = vst [vmem:[#allocation429_spill] sm:$0xff] %v8482_v41  ;;  %10462 = vst [vmem:[#allocation430_spill] sm:$0xff] %v8486_v52  ;;  %v8498_v43 = vmul.f32 %v10467_v14, %v10467_v14  ;;  %v8502_v58 = vmul.f32 %v10469_v57, %v10469_v57  ;;  %v10471_v41 = vld [vmem:[#allocation437_spill] sm:$0xff] }
 0x229   :  { %10464 = vst [vmem:[#allocation431_spill] sm:$0xff] %v8490_v48  ;;  %10466 = vst [vmem:[#allocation432_spill] sm:$0xff] %v8494_v35  ;;  %v8506_v39 = vmul.f32 %v10471_v41, %v10471_v41  ;;  %v10474_v48 = vld [vmem:[#allocation438_spill] sm:$0xff]  ;;  %v10476_v35 = vld [vmem:[#allocation439_spill] sm:$0xff] }
 0x22a   :  { %10468 = vst [vmem:[#allocation433_spill] sm:$0xff] %v8498_v43  ;;  %10470 = vst [vmem:[#allocation434_spill] sm:$0xff] %v8502_v58  ;;  %v8514_v27 = vmul.f32 %v10474_v48, %v10474_v48  ;;  %v8518_v14 = vmul.f32 %v10476_v35, %v10476_v35  ;;  %v10478_v43 = vld [vmem:[#allocation440_spill] sm:$0xff]  ;;  %v10480_v58 = vld [vmem:[#allocation441_spill] sm:$0xff] }
 0x22b   :  { %10472 = vst [vmem:[#allocation435_spill] sm:$0xff] %v8506_v39  ;;  %10473 = vst [vmem:[#allocation436_spill] sm:$0xff] %v8510_v54  ;;  %v8522_v57 = vmul.f32 %v10478_v43, %v10478_v43  ;;  %v8526_v41 = vmul.f32 %v10480_v58, %v10480_v58  ;;  %v10482_v39 = vld [vmem:[#allocation442_spill] sm:$0xff]  ;;  %v10484_v54 = vld [vmem:[#allocation444_spill] sm:$0xff]  ;;  %v8546_v58 = vmul.f32 %v7262_v25, %v7262_v25 }
 0x22c   :  { %10475 = vst [vmem:[#allocation437_spill] sm:$0xff] %v8514_v27  ;;  %10477 = vst [vmem:[#allocation438_spill] sm:$0xff] %v8518_v14  ;;  %v8530_v1 = vmul.f32 %v10482_v39, %v10482_v39  ;;  %v8534_v48 = vmul.f32 %v10484_v54, %v10484_v54  ;;  %v10486_v27 = vld [vmem:[#allocation445_spill] sm:$0xff]  ;;  %v10488_v14 = vld [vmem:[#allocation446_spill] sm:$0xff]  ;;  %v8550_v39 = vmul.f32 %v7264_v0, %v7264_v0 }
 0x22d   :  { %10479 = vst [vmem:[#allocation439_spill] sm:$0xff] %v8522_v57  ;;  %10481 = vst [vmem:[#allocation440_spill] sm:$0xff] %v8526_v41  ;;  %v8538_v35 = vmul.f32 %v10486_v27, %v10486_v27  ;;  %v8542_v43 = vmul.f32 %v10488_v14, %v10488_v14  ;;  %v10493_v41 = vld [vmem:[#allocation14_spill] sm:$0xff]  ;;  %v10495_v57 = vld [vmem:[#allocation16_spill] sm:$0xff]  ;;  %v2383_v25 = vadd.f32 %v10501_v51, %v10500_v32 }
 0x22e   :  { %10483 = vst [vmem:[#allocation441_spill] sm:$0xff] %v8530_v1  ;;  %10485 = vst [vmem:[#allocation442_spill] sm:$0xff] %v8534_v48  ;;  %v10492_v1 = vld [vmem:[#allocation6_spill] sm:$0xff]  ;;  %v10494_v48 = vld [vmem:[#allocation7_spill] sm:$0xff] }
 0x22f   :  { %10487 = vst [vmem:[#allocation444_spill] sm:$0xff] %v8538_v35  ;;  %10489 = vst [vmem:[#allocation445_spill] sm:$0xff] %v8542_v43  ;;  %v2131_v54 = vadd.f32 %v10493_v41, %v10492_v1  ;;  %v2194_v52 = vadd.f32 %v10495_v57, %v10494_v48  ;;  %v10496_v27 = vld [vmem:[#allocation8_spill] sm:$0xff]  ;;  %v10497_v35 = vld [vmem:[#allocation19_spill] sm:$0xff] }
 0x230   :  { %10490 = vst [vmem:[#allocation446_spill] sm:$0xff] %v8546_v58  ;;  %10491 = vst [vmem:[#allocation458_spill] sm:$0xff] %v8550_v39  ;;  %v2257_v55 = vadd.f32 %v10497_v35, %v10496_v27  ;;  %v10499_v14 = vld [vmem:[#allocation22_spill] sm:$0xff]  ;;  %v10502_v58 = vld [vmem:[#allocation11_spill] sm:$0xff] }
 0x231   :  { %v2320_v43 = vadd.f32 %v10499_v14, %v10498_v47  ;;  %v2446_v26 = vadd.f32 %v10503_v60, %v10502_v58  ;;  %v10504_v0 = vld [vmem:[#allocation37_spill] sm:$0xff]  ;;  %v2195_v5 = vadd.f32 %v2194_v52, %v10505_v37  ;;  %v10506_v41 = vld [vmem:[#allocation12_spill] sm:$0xff]  ;;  %v10507_v1 = vld [vmem:[#allocation31_spill] sm:$0xff] }
 0x232   :  { %v2132_v39 = vadd.f32 %v2131_v54, %v10504_v0  ;;  %v2509_v59 = vadd.f32 %v10507_v1, %v10506_v41  ;;  %v10508_v57 = vld [vmem:[#allocation13_spill] sm:$0xff]  ;;  %v10509_v35 = vld [vmem:[#allocation43_spill] sm:$0xff]  ;;  %v10512_v51 = vld [vmem:[#allocation52_spill] sm:$0xff] }
 0x233   :  { %v2573_v48 = vsel %vm73_vm0, %v10508_v57, 0.0  ;;  %v2258_v27 = vadd.f32 %v2257_v55, %v10509_v35  ;;  %v2321_v47 = vadd.f32 %v2320_v43, %v10510_v12  ;;  %v10511_v14 = vld [vmem:[#allocation49_spill] sm:$0xff]  ;;  %v2447_v32 = vadd.f32 %v2446_v26, %v10512_v51  ;;  %v10514_v58 = vld [vmem:[#allocation64_spill] sm:$0xff]  ;;  %v10515_v0 = vld [vmem:[#allocation55_spill] sm:$0xff] }
 0x234   :  { %v2384_v49 = vadd.f32 %v2383_v25, %v10511_v14  ;;  %v2133_v60 = vadd.f32 %v2132_v39, %v10513_v36  ;;  %v2196_v54 = vadd.f32 %v2195_v5, %v10514_v58  ;;  %v2510_v37 = vadd.f32 %v2509_v59, %v10515_v0  ;;  %v10516_v52 = vld [vmem:[#allocation34_spill] sm:$0xff]  ;;  %v10517_v1 = vld [vmem:[#allocation67_spill] sm:$0xff]  ;;  %v10519_v55 = vld [vmem:[#allocation73_spill] sm:$0xff] }
 0x235   :  { %v2574_v41 = vsel %vm73_vm0, %v10516_v52, 0.0  ;;  %v2259_v23 = vadd.f32 %v2258_v27, %v10517_v1  ;;  %v10518_v57 = vld [vmem:[#allocation70_spill] sm:$0xff]  ;;  %v10520_v12 = vld [vmem:[#allocation76_spill] sm:$0xff]  ;;  %v10521_v25 = vld [vmem:[#allocation85_spill] sm:$0xff] }
 0x236   :  { %v2322_v50 = vadd.f32 %v2321_v47, %v10518_v57  ;;  %v2385_v35 = vadd.f32 %v2384_v49, %v10519_v55  ;;  %v2448_v43 = vadd.f32 %v2447_v32, %v10520_v12  ;;  %v2134_v14 = vadd.f32 %v2133_v60, %v10521_v25  ;;  %v10522_v26 = vld [vmem:[#allocation88_spill] sm:$0xff]  ;;  %v10523_v36 = vld [vmem:[#allocation79_spill] sm:$0xff]  ;;  %v10525_v0 = vld [vmem:[#allocation94_spill] sm:$0xff] }
 0x237   :  { %v2197_v51 = vadd.f32 %v2196_v54, %v10522_v26  ;;  %v2511_v39 = vadd.f32 %v2510_v37, %v10523_v36  ;;  %v2575_v5 = vadd.f32 %v2574_v41, %v2573_v48  ;;  %v10524_v58 = vld [vmem:[#allocation91_spill] sm:$0xff]  ;;  %v10526_v52 = vld [vmem:[#allocation97_spill] sm:$0xff]  ;;  %v10529_v49 = vld [vmem:[#allocation18_spill] sm:$0xff] }
 0x238   :  { %v2260_v59 = vadd.f32 %v2259_v23, %v10524_v58  ;;  %v2323_v31 = vadd.f32 %v2322_v50, %v10525_v0  ;;  %v2386_v53 = vadd.f32 %v2385_v35, %v10526_v52  ;;  %v10527_v27 = vld [vmem:[#allocation101_spill] sm:$0xff]  ;;  %v10530_v32 = vld [vmem:[#allocation15_spill] sm:$0xff]  ;;  %v10531_v60 = vld [vmem:[#allocation58_spill] sm:$0xff] }
 0x239   :  { %v2449_v1 = vadd.f32 %v2448_v43, %v10527_v27  ;;  %v10528_v47 = vld [vmem:[#allocation17_spill] sm:$0xff]  ;;  %v2198_v55 = vadd.f32 %v2197_v51, %v10529_v49  ;;  %v2512_v12 = vadd.f32 %v2511_v39, %v10530_v32  ;;  %v2576_v54 = vsel %vm73_vm0, %v10531_v60, 0.0  ;;  %v10532_v25 = vld [vmem:[#allocation116_spill] sm:$0xff]  ;;  %v10536_v35 = vld [vmem:[#allocation134_spill] sm:$0xff] }
 0x23a   :  { %v2135_v57 = vadd.f32 %v2134_v14, %v10528_v47  ;;  %v2261_v37 = vadd.f32 %v2260_v59, %v10532_v25  ;;  %v10533_v48 = vld [vmem:[#allocation20_spill] sm:$0xff]  ;;  %v10534_v23 = vld [vmem:[#allocation21_spill] sm:$0xff]  ;;  %v10537_v43 = vld [vmem:[#allocation26_spill] sm:$0xff]  ;;  %v2577_v51 = vadd.f32 %v2576_v54, %v2575_v5 }
 0x23b   :  { %v2324_v41 = vadd.f32 %v2323_v31, %v10533_v48  ;;  %v2387_v26 = vadd.f32 %v2386_v53, %v10534_v23  ;;  %v10535_v50 = vld [vmem:[#allocation125_spill] sm:$0xff]  ;;  %v2199_v0 = vadd.f32 %v2198_v55, %v10537_v43  ;;  %v10538_v14 = vld [vmem:[#allocation23_spill] sm:$0xff]  ;;  %v10542_v59 = vld [vmem:[#allocation30_spill] sm:$0xff] }
 0x23c   :  { %v2450_v36 = vadd.f32 %v2449_v1, %v10535_v50  ;;  %v2136_v58 = vadd.f32 %v2135_v57, %v10536_v35  ;;  %v2513_v52 = vadd.f32 %v2512_v12, %v10538_v14  ;;  %v10539_v27 = vld [vmem:[#allocation27_spill] sm:$0xff]  ;;  %v10541_v32 = vld [vmem:[#allocation29_spill] sm:$0xff]  ;;  %v10545_v1 = vld [vmem:[#allocation152_spill] sm:$0xff] }
 0x23d   :  { %v2262_v39 = vadd.f32 %v2261_v37, %v10539_v27  ;;  %v10540_v47 = vld [vmem:[#allocation143_spill] sm:$0xff]  ;;  %v2388_v60 = vadd.f32 %v2387_v26, %v10541_v32  ;;  %v10543_v31 = vld [vmem:[#allocation33_spill] sm:$0xff]  ;;  %v10546_v57 = vld [vmem:[#allocation82_spill] sm:$0xff] }
 0x23e   :  { %v2325_v49 = vadd.f32 %v2324_v41, %v10540_v47  ;;  %v2451_v25 = vadd.f32 %v2450_v36, %v10542_v59  ;;  %v2137_v48 = vadd.f32 %v2136_v58, %v10543_v31  ;;  %v10544_v53 = vld [vmem:[#allocation161_spill] sm:$0xff]  ;;  %v2514_v50 = vadd.f32 %v2513_v52, %v10545_v1  ;;  %v10547_v35 = vld [vmem:[#allocation35_spill] sm:$0xff]  ;;  %v10548_v5 = vld [vmem:[#allocation36_spill] sm:$0xff] }
 0x23f   :  { %v2200_v23 = vadd.f32 %v2199_v0, %v10544_v53  ;;  %v2578_v55 = vsel %vm73_vm0, %v10546_v57, 0.0  ;;  %v2263_v12 = vadd.f32 %v2262_v39, %v10547_v35  ;;  %v10549_v37 = vld [vmem:[#allocation170_spill] sm:$0xff]  ;;  %v10551_v26 = vld [vmem:[#allocation41_spill] sm:$0xff]  ;;  %v10553_v58 = vld [vmem:[#allocation39_spill] sm:$0xff] }
 0x240   :  { %v2326_v54 = vadd.f32 %v2325_v49, %v10548_v5  ;;  %v2389_v43 = vadd.f32 %v2388_v60, %v10549_v37  ;;  %v10550_v41 = vld [vmem:[#allocation38_spill] sm:$0xff]  ;;  %v2138_v27 = vadd.f32 %v2137_v48, %v10551_v26  ;;  %v2515_v32 = vadd.f32 %v2514_v50, %v10553_v58  ;;  %v10554_v59 = vld [vmem:[#allocation188_spill] sm:$0xff]  ;;  %v10556_v1 = vld [vmem:[#allocation45_spill] sm:$0xff] }
 0x241   :  { %v2452_v14 = vadd.f32 %v2451_v25, %v10550_v41  ;;  %v10552_v36 = vld [vmem:[#allocation42_spill] sm:$0xff]  ;;  %v2579_v0 = vadd.f32 %v2578_v55, %v2577_v51  ;;  %v2264_v52 = vadd.f32 %v2263_v12, %v10554_v59  ;;  %v10555_v31 = vld [vmem:[#allocation44_spill] sm:$0xff]  ;;  %v10557_v39 = vld [vmem:[#allocation197_spill] sm:$0xff] }
 0x242   :  { %v2201_v47 = vadd.f32 %v2200_v23, %v10552_v36  ;;  %v2327_v53 = vadd.f32 %v2326_v54, %v10555_v31  ;;  %v2390_v57 = vadd.f32 %v2389_v43, %v10556_v1  ;;  %v10558_v49 = vld [vmem:[#allocation206_spill] sm:$0xff]  ;;  %v10560_v25 = vld [vmem:[#allocation47_spill] sm:$0xff]  ;;  %v10564_v12 = vld [vmem:[#allocation53_spill] sm:$0xff] }
 0x243   :  { %v2453_v35 = vadd.f32 %v2452_v14, %v10557_v39  ;;  %v2139_v5 = vadd.f32 %v2138_v27, %v10558_v49  ;;  %v10559_v60 = vld [vmem:[#allocation50_spill] sm:$0xff]  ;;  %v2516_v41 = vadd.f32 %v2515_v32, %v10560_v25  ;;  %v10561_v48 = vld [vmem:[#allocation107_spill] sm:$0xff]  ;;  %v10566_v43 = vld [vmem:[#allocation57_spill] sm:$0xff] }
 0x244   :  { %v2202_v37 = vadd.f32 %v2201_v47, %v10559_v60  ;;  %v2580_v23 = vsel %vm73_vm0, %v10561_v48, 0.0  ;;  %v10562_v26 = vld [vmem:[#allocation51_spill] sm:$0xff]  ;;  %v2391_v36 = vadd.f32 %v2390_v57, %v10564_v12  ;;  %v10565_v54 = vld [vmem:[#allocation54_spill] sm:$0xff]  ;;  %v10567_v14 = vld [vmem:[#allocation233_spill] sm:$0xff] }
 0x245   :  { %v2265_v50 = vadd.f32 %v2264_v52, %v10562_v26  ;;  %v10563_v51 = vld [vmem:[#allocation215_spill] sm:$0xff]  ;;  %v2454_v58 = vadd.f32 %v2453_v35, %v10565_v54  ;;  %v2140_v59 = vadd.f32 %v2139_v5, %v10566_v43  ;;  %v10568_v27 = vld [vmem:[#allocation224_spill] sm:$0xff]  ;;  %v2581_v47 = vadd.f32 %v2580_v23, %v2579_v0  ;;  %v10571_v25 = vld [vmem:[#allocation242_spill] sm:$0xff] }
 0x246   :  { %v2328_v55 = vadd.f32 %v2327_v53, %v10563_v51  ;;  %v2203_v31 = vadd.f32 %v2202_v37, %v10567_v14  ;;  %v2517_v1 = vadd.f32 %v2516_v41, %v10568_v27  ;;  %v10569_v39 = vld [vmem:[#allocation59_spill] sm:$0xff]  ;;  %v10570_v49 = vld [vmem:[#allocation60_spill] sm:$0xff]  ;;  %v2392_v48 = vadd.f32 %v2391_v36, %v10571_v25  ;;  %v10572_v52 = vld [vmem:[#allocation62_spill] sm:$0xff] }
 0x247   :  { %v2266_v32 = vadd.f32 %v2265_v50, %v10569_v39  ;;  %v2455_v26 = vadd.f32 %v2454_v58, %v10572_v52  ;;  %v10573_v53 = vld [vmem:[#allocation65_spill] sm:$0xff]  ;;  %v10574_v57 = vld [vmem:[#allocation66_spill] sm:$0xff]  ;;  %v10575_v35 = vld [vmem:[#allocation63_spill] sm:$0xff] }
 0x248   :  { %v2329_v60 = vadd.f32 %v2328_v55, %v10570_v49  ;;  %v2141_v51 = vadd.f32 %v2140_v59, %v10573_v53  ;;  %v2204_v12 = vadd.f32 %v2203_v31, %v10574_v57  ;;  %v2518_v54 = vadd.f32 %v2517_v1, %v10575_v35  ;;  %v10576_v5 = vld [vmem:[#allocation24_spill] sm:$0xff]  ;;  %v10579_v50 = vld [vmem:[#allocation69_spill] sm:$0xff]  ;;  %v10581_v36 = vld [vmem:[#allocation278_spill] sm:$0xff] }
 0x249   :  { %v2582_v37 = vsel %vm73_vm0, %v10576_v5, 0.0  ;;  %v10577_v43 = vld [vmem:[#allocation260_spill] sm:$0xff]  ;;  %v2393_v14 = vadd.f32 %v2392_v48, %v10579_v50  ;;  %v10580_v55 = vld [vmem:[#allocation269_spill] sm:$0xff]  ;;  %v10582_v58 = vld [vmem:[#allocation74_spill] sm:$0xff] }
 0x24a   :  { %v2267_v41 = vadd.f32 %v2266_v32, %v10577_v43  ;;  %v10578_v0 = vld [vmem:[#allocation68_spill] sm:$0xff]  ;;  %v2456_v27 = vadd.f32 %v2455_v26, %v10580_v55  ;;  %v2142_v39 = vadd.f32 %v2141_v51, %v10581_v36  ;;  %v2205_v49 = vadd.f32 %v2204_v12, %v10582_v58  ;;  %v10583_v59 = vld [vmem:[#allocation71_spill] sm:$0xff]  ;;  %v10585_v53 = vld [vmem:[#allocation285_spill] sm:$0xff] }
 0x24b   :  { %v2330_v23 = vadd.f32 %v2329_v60, %v10578_v0  ;;  %v2519_v25 = vadd.f32 %v2518_v54, %v10583_v59  ;;  %v2583_v31 = vadd.f32 %v2582_v37, %v2581_v47  ;;  %v10584_v52 = vld [vmem:[#allocation75_spill] sm:$0xff]  ;;  %v10586_v35 = vld [vmem:[#allocation77_spill] sm:$0xff]  ;;  %v10587_v32 = vld [vmem:[#allocation78_spill] sm:$0xff] }
 0x24c   :  { %v2268_v1 = vadd.f32 %v2267_v41, %v10584_v52  ;;  %v2394_v5 = vadd.f32 %v2393_v14, %v10586_v35  ;;  %v2457_v43 = vadd.f32 %v2456_v27, %v10587_v32  ;;  %v10588_v60 = vld [vmem:[#allocation81_spill] sm:$0xff]  ;;  %v10590_v26 = vld [vmem:[#allocation295_spill] sm:$0xff]  ;;  %v10591_v51 = vld [vmem:[#allocation32_spill] sm:$0xff] }
 0x24d   :  { %v2331_v57 = vadd.f32 %v2330_v23, %v10585_v53  ;;  %v2143_v0 = vadd.f32 %v2142_v39, %v10588_v60  ;;  %v10589_v48 = vld [vmem:[#allocation301_spill] sm:$0xff]  ;;  %v2520_v55 = vadd.f32 %v2519_v25, %v10590_v26  ;;  %v2584_v12 = vsel %vm73_vm0, %v10591_v51, 0.0  ;;  %v10592_v36 = vld [vmem:[#allocation83_spill] sm:$0xff]  ;;  %v10593_v47 = vld [vmem:[#allocation84_spill] sm:$0xff] }
 0x24e   :  { %v2206_v50 = vadd.f32 %v2205_v49, %v10589_v48  ;;  %v2269_v54 = vadd.f32 %v2268_v1, %v10592_v36  ;;  %v10594_v41 = vld [vmem:[#allocation309_spill] sm:$0xff]  ;;  %v10595_v23 = vld [vmem:[#allocation86_spill] sm:$0xff]  ;;  %v10598_v39 = vld [vmem:[#allocation87_spill] sm:$0xff]  ;;  %v2585_v49 = vadd.f32 %v2584_v12, %v2583_v31 }
 0x24f   :  { %v2332_v37 = vadd.f32 %v2331_v57, %v10593_v47  ;;  %v2395_v58 = vadd.f32 %v2394_v5, %v10594_v41  ;;  %v2458_v59 = vadd.f32 %v2457_v43, %v10595_v23  ;;  %v10596_v14 = vld [vmem:[#allocation89_spill] sm:$0xff]  ;;  %v10597_v27 = vld [vmem:[#allocation90_spill] sm:$0xff]  ;;  %v2521_v35 = vadd.f32 %v2520_v55, %v10598_v39  ;;  %v10599_v32 = vld [vmem:[#allocation327_spill] sm:$0xff] }
 0x250   :  { %v2144_v52 = vadd.f32 %v2143_v0, %v10596_v14  ;;  %v2207_v53 = vadd.f32 %v2206_v50, %v10597_v27  ;;  %v2270_v25 = vadd.f32 %v2269_v54, %v10599_v32  ;;  %v10600_v60 = vld [vmem:[#allocation92_spill] sm:$0xff]  ;;  %v10601_v26 = vld [vmem:[#allocation93_spill] sm:$0xff]  ;;  %v10603_v57 = vld [vmem:[#allocation98_spill] sm:$0xff] }
 0x251   :  { %v2333_v48 = vadd.f32 %v2332_v37, %v10600_v60  ;;  %v2396_v51 = vadd.f32 %v2395_v58, %v10601_v26  ;;  %v10602_v1 = vld [vmem:[#allocation333_spill] sm:$0xff]  ;;  %v10604_v5 = vld [vmem:[#allocation99_spill] sm:$0xff]  ;;  %v10607_v14 = vld [vmem:[#allocation100_spill] sm:$0xff] }
 0x252   :  { %v2459_v36 = vadd.f32 %v2458_v59, %v10602_v1  ;;  %v2145_v47 = vadd.f32 %v2144_v52, %v10603_v57  ;;  %v2208_v41 = vadd.f32 %v2207_v53, %v10604_v5  ;;  %v10605_v43 = vld [vmem:[#allocation95_spill] sm:$0xff]  ;;  %v2271_v55 = vadd.f32 %v2270_v25, %v10607_v14  ;;  %v10609_v54 = vld [vmem:[#allocation102_spill] sm:$0xff]  ;;  %v10612_v59 = vld [vmem:[#allocation108_spill] sm:$0xff] }
 0x253   :  { %v2522_v23 = vadd.f32 %v2521_v35, %v10605_v43  ;;  %v10606_v0 = vld [vmem:[#allocation179_spill] sm:$0xff]  ;;  %v2397_v27 = vadd.f32 %v2396_v51, %v10609_v54  ;;  %v10611_v58 = vld [vmem:[#allocation106_spill] sm:$0xff]  ;;  %v10613_v52 = vld [vmem:[#allocation104_spill] sm:$0xff] }
 0x254   :  { %v2586_v50 = vsel %vm73_vm0, %v10606_v0, 0.0  ;;  %v10608_v31 = vld [vmem:[#allocation351_spill] sm:$0xff]  ;;  %v2146_v32 = vadd.f32 %v2145_v47, %v10611_v58  ;;  %v2209_v60 = vadd.f32 %v2208_v41, %v10612_v59  ;;  %v10614_v1 = vld [vmem:[#allocation109_spill] sm:$0xff]  ;;  %v10615_v57 = vld [vmem:[#allocation110_spill] sm:$0xff] }
 0x255   :  { %v2334_v12 = vadd.f32 %v2333_v48, %v10608_v31  ;;  %v10610_v37 = vld [vmem:[#allocation103_spill] sm:$0xff]  ;;  %v2523_v26 = vadd.f32 %v2522_v23, %v10613_v52  ;;  %v2587_v53 = vadd.f32 %v2586_v50, %v2585_v49  ;;  %v2272_v35 = vadd.f32 %v2271_v55, %v10614_v1  ;;  %v10616_v43 = vld [vmem:[#allocation374_spill] sm:$0xff]  ;;  %v10621_v47 = vld [vmem:[#allocation48_spill] sm:$0xff] }
 0x256   :  { %v2460_v39 = vadd.f32 %v2459_v36, %v10610_v37  ;;  %v2398_v0 = vadd.f32 %v2397_v27, %v10616_v43  ;;  %v10617_v25 = vld [vmem:[#allocation111_spill] sm:$0xff]  ;;  %v10618_v48 = vld [vmem:[#allocation114_spill] sm:$0xff]  ;;  %v10620_v36 = vld [vmem:[#allocation112_spill] sm:$0xff]  ;;  %v2588_v41 = vsel %vm73_vm0, %v10621_v47, 0.0 }
 0x257   :  { %v2335_v5 = vadd.f32 %v2334_v12, %v10615_v57  ;;  %v2147_v31 = vadd.f32 %v2146_v32, %v10618_v48  ;;  %v10619_v51 = vld [vmem:[#allocation115_spill] sm:$0xff]  ;;  %v2524_v37 = vadd.f32 %v2523_v26, %v10620_v36  ;;  %v10622_v58 = vld [vmem:[#allocation117_spill] sm:$0xff]  ;;  %v10623_v49 = vld [vmem:[#allocation118_spill] sm:$0xff] }
 0x258   :  { %v2461_v14 = vadd.f32 %v2460_v39, %v10617_v25  ;;  %v2210_v54 = vadd.f32 %v2209_v60, %v10619_v51  ;;  %v2273_v23 = vadd.f32 %v2272_v35, %v10622_v58  ;;  %v10624_v55 = vld [vmem:[#allocation119_spill] sm:$0xff]  ;;  %v10625_v12 = vld [vmem:[#allocation397_spill] sm:$0xff]  ;;  %v10626_v27 = vld [vmem:[#allocation122_spill] sm:$0xff]  ;;  %v2589_v60 = vadd.f32 %v2588_v41, %v2587_v53 }
 0x259   :  { %v2336_v50 = vadd.f32 %v2335_v5, %v10623_v49  ;;  %v2399_v59 = vadd.f32 %v2398_v0, %v10624_v55  ;;  %v2148_v1 = vadd.f32 %v2147_v31, %v10626_v27  ;;  %v10627_v39 = vld [vmem:[#allocation123_spill] sm:$0xff]  ;;  %v10628_v32 = vld [vmem:[#allocation120_spill] sm:$0xff]  ;;  %v10630_v48 = vld [vmem:[#allocation126_spill] sm:$0xff] }
 0x25a   :  { %v2462_v52 = vadd.f32 %v2461_v14, %v10625_v12  ;;  %v2211_v57 = vadd.f32 %v2210_v54, %v10627_v39  ;;  %v2525_v43 = vadd.f32 %v2524_v37, %v10628_v32  ;;  %v10629_v25 = vld [vmem:[#allocation124_spill] sm:$0xff]  ;;  %v10631_v36 = vld [vmem:[#allocation127_spill] sm:$0xff]  ;;  %v10633_v5 = vld [vmem:[#allocation130_spill] sm:$0xff] }
 0x25b   :  { %v2274_v26 = vadd.f32 %v2273_v23, %v10629_v25  ;;  %v2337_v51 = vadd.f32 %v2336_v50, %v10630_v48  ;;  %v2400_v47 = vadd.f32 %v2399_v59, %v10631_v36  ;;  %v10632_v35 = vld [vmem:[#allocation128_spill] sm:$0xff]  ;;  %v2149_v49 = vadd.f32 %v2148_v1, %v10633_v5  ;;  %v10634_v0 = vld [vmem:[#allocation131_spill] sm:$0xff]  ;;  %v10638_v53 = vld [vmem:[#allocation133_spill] sm:$0xff] }
 0x25c   :  { %v2463_v58 = vadd.f32 %v2462_v52, %v10632_v35  ;;  %v2212_v55 = vadd.f32 %v2211_v57, %v10634_v0  ;;  %v10635_v14 = vld [vmem:[#allocation420_spill] sm:$0xff]  ;;  %v10639_v23 = vld [vmem:[#allocation135_spill] sm:$0xff]  ;;  %v10641_v59 = vld [vmem:[#allocation138_spill] sm:$0xff] }
 0x25d   :  { %v2526_v12 = vadd.f32 %v2525_v43, %v10635_v14  ;;  %v10636_v31 = vld [vmem:[#allocation56_spill] sm:$0xff]  ;;  %v2338_v41 = vadd.f32 %v2337_v51, %v10638_v53  ;;  %v2401_v39 = vadd.f32 %v2400_v47, %v10639_v23  ;;  %v2150_v25 = vadd.f32 %v2149_v49, %v10641_v59  ;;  %v10642_v1 = vld [vmem:[#allocation137_spill] sm:$0xff]  ;;  %v10643_v5 = vld [vmem:[#allocation251_spill] sm:$0xff] }
 0x25e   :  { %v2590_v54 = vsel %vm73_vm0, %v10636_v31, 0.0  ;;  %v10637_v27 = vld [vmem:[#allocation132_spill] sm:$0xff]  ;;  %v2213_v52 = vadd.f32 %v2212_v55, %v7270_v45  ;;  %v2592_v45 = vsel %vm73_vm0, %v10643_v5, 0.0  ;;  %v10646_v31 = vld [vmem:[#allocation151_spill] sm:$0xff] }
 0x25f   :  { %v2275_v37 = vadd.f32 %v2274_v26, %v10637_v27  ;;  %v10640_v50 = vld [vmem:[#allocation136_spill] sm:$0xff]  ;;  %v2527_v48 = vadd.f32 %v2526_v12, %v10642_v1  ;;  %v2591_v57 = vadd.f32 %v2590_v54, %v2589_v60  ;;  %v2339_v36 = vadd.f32 %v2338_v41, %v7308_v34  ;;  %v10647_v54 = vld [vmem:[#allocation153_spill] sm:$0xff] }
 0x260   :  { %v2464_v32 = vadd.f32 %v2463_v58, %v10640_v50  ;;  %v2402_v35 = vadd.f32 %v2401_v39, %v7324_v2  ;;  %v2151_v51 = vadd.f32 %v2150_v25, %v7354_v17  ;;  %v2214_v47 = vadd.f32 %v2213_v52, %v7358_v7  ;;  %v10653_v50 = vld [vmem:[#allocation159_spill] sm:$0xff]  ;;  %v10654_v59 = vld [vmem:[#allocation160_spill] sm:$0xff]  ;;  %v10655_v52 = vld [vmem:[#allocation162_spill] sm:$0xff] }
 0x261   :  { %v2276_v43 = vadd.f32 %v2275_v37, %v7289_v24  ;;  %v2528_v58 = vadd.f32 %v2527_v48, %v7344_v18  ;;  %v2340_v60 = vadd.f32 %v2339_v36, %v7366_v30  ;;  %v2593_v7 = vadd.f32 %v2592_v45, %v2591_v57  ;;  %v10648_v37 = vld [vmem:[#allocation154_spill] sm:$0xff]  ;;  %v10656_v48 = vld [vmem:[#allocation163_spill] sm:$0xff]  ;;  %v10660_v5 = vld [vmem:[#allocation168_spill] sm:$0xff] }
 0x262   :  { %v2465_v26 = vadd.f32 %v2464_v32, %v7334_v44  ;;  %v2403_v24 = vadd.f32 %v2402_v35, %v7370_v11  ;;  %v2152_v2 = vadd.f32 %v2151_v51, %v7386_v15  ;;  %v2215_v44 = vadd.f32 %v2214_v47, %v7390_v8  ;;  %v10644_v15 = vld [vmem:[#allocation72_spill] sm:$0xff]  ;;  %v10657_v36 = vld [vmem:[#allocation166_spill] sm:$0xff]  ;;  %v10659_v47 = vld [vmem:[#allocation167_spill] sm:$0xff] }
 0x263   :  { %v2277_v49 = vadd.f32 %v2276_v43, %v7362_v4  ;;  %v2529_v17 = vadd.f32 %v2528_v58, %v7378_v10  ;;  %v2341_v0 = vadd.f32 %v2340_v60, %v7398_v3  ;;  %v2594_v8 = vsel %vm73_vm0, %v10644_v15, 0.0 }
 0x264   :  { %v2466_v34 = vadd.f32 %v2465_v26, %v7374_v19  ;;  %v2404_v55 = vadd.f32 %v2403_v24, %v7402_v40  ;;  %v2153_v30 = vadd.f32 %v2152_v2, %v7418_v28  ;;  %v2216_v11 = vadd.f32 %v2215_v44, %v7422_v62  ;;  %v10645_v28 = vld [vmem:[#allocation149_spill] sm:$0xff]  ;;  %v10662_v24 = vld [vmem:[#allocation171_spill] sm:$0xff]  ;;  %v10663_v44 = vld [vmem:[#allocation174_spill] sm:$0xff] }
 0x265   :  { %v2278_v18 = vadd.f32 %v2277_v49, %v7394_v16  ;;  %v2530_v19 = vadd.f32 %v2529_v17, %v7410_v29  ;;  %v2342_v14 = vadd.f32 %v2341_v0, %v7430_v21  ;;  %v2595_v62 = vadd.f32 %v2594_v8, %v2593_v7  ;;  %v10661_v49 = vld [vmem:[#allocation169_spill] sm:$0xff]  ;;  %v10664_v7 = vld [vmem:[#allocation172_spill] sm:$0xff]  ;;  %v10669_v8 = vld [vmem:[#allocation178_spill] sm:$0xff] }
 0x266   :  { %v2467_v4 = vadd.f32 %v2466_v34, %v7406_v13  ;;  %v2405_v16 = vadd.f32 %v2404_v55, %v7434_v61  ;;  %v2154_v40 = vadd.f32 %v2153_v30, %v7450_v20  ;;  %v2217_v13 = vadd.f32 %v2216_v11, %v7454_v9  ;;  %v10650_v61 = vld [vmem:[#allocation158_spill] sm:$0xff]  ;;  %v10652_v20 = vld [vmem:[#allocation80_spill] sm:$0xff]  ;;  %v10666_v55 = vld [vmem:[#allocation175_spill] sm:$0xff] }
 0x267   :  { %v2279_v10 = vadd.f32 %v2278_v18, %v7426_v63  ;;  %v2531_v12 = vadd.f32 %v2530_v19, %v10645_v28  ;;  %v2343_v27 = vadd.f32 %v2342_v14, %v10647_v54  ;;  %v10649_v63 = vld [vmem:[#allocation155_spill] sm:$0xff]  ;;  %v2596_v9 = vsel %vm73_vm0, %v10652_v20, 0.0  ;;  %v10667_v30 = vld [vmem:[#allocation176_spill] sm:$0xff]  ;;  %v10668_v19 = vld [vmem:[#allocation177_spill] sm:$0xff] }
 0x268   :  { %v2468_v3 = vadd.f32 %v2467_v4, %v7438_v22  ;;  %v2406_v53 = vadd.f32 %v2405_v16, %v10648_v37  ;;  %v2155_v21 = vadd.f32 %v2154_v40, %v7482_v56  ;;  %v2218_v23 = vadd.f32 %v2217_v13, %v10650_v61  ;;  %v10651_v22 = vld [vmem:[#allocation156_spill] sm:$0xff]  ;;  %v10670_v14 = vld [vmem:[#allocation182_spill] sm:$0xff]  ;;  %v10672_v28 = vld [vmem:[#allocation183_spill] sm:$0xff] }
 0x269   :  { %v2280_v29 = vadd.f32 %v2279_v10, %v10646_v31  ;;  %v2532_v39 = vadd.f32 %v2531_v12, %v10651_v22  ;;  %v2344_v25 = vadd.f32 %v2343_v27, %v10654_v59  ;;  %v10658_v56 = vld [vmem:[#allocation164_spill] sm:$0xff]  ;;  %v2597_v51 = vadd.f32 %v2596_v9, %v2595_v62  ;;  %v10675_v27 = vld [vmem:[#allocation186_spill] sm:$0xff]  ;;  %v10678_v61 = vld [vmem:[#allocation187_spill] sm:$0xff] }
 0x26a   :  { %v2469_v41 = vadd.f32 %v2468_v3, %v10649_v63  ;;  %v2407_v1 = vadd.f32 %v2406_v53, %v10655_v52  ;;  %v2156_v43 = vadd.f32 %v2155_v21, %v7514_v6  ;;  %v2219_v35 = vadd.f32 %v2218_v23, %v10657_v36  ;;  %v10665_v6 = vld [vmem:[#allocation318_spill] sm:$0xff]  ;;  %v10673_v62 = vld [vmem:[#allocation184_spill] sm:$0xff] }
 0x26b   :  { %v2281_v32 = vadd.f32 %v2280_v29, %v10653_v50  ;;  %v2533_v26 = vadd.f32 %v2532_v39, %v10658_v56  ;;  %v2345_v45 = vadd.f32 %v2344_v25, %v10660_v5  ;;  %v2598_v0 = vsel %vm73_vm0, %v10665_v6, 0.0  ;;  %v10674_v29 = vld [vmem:[#allocation185_spill] sm:$0xff]  ;;  %v10676_v53 = vld [vmem:[#allocation190_spill] sm:$0xff]  ;;  %v10679_v22 = vld [vmem:[#allocation96_spill] sm:$0xff] }
 0x26c   :  { %v2470_v57 = vadd.f32 %v2469_v41, %v10656_v48  ;;  %v2408_v60 = vadd.f32 %v2407_v1, %v10661_v49  ;;  %v2157_v2 = vadd.f32 %v2156_v43, %v7546_v46  ;;  %v2220_v17 = vadd.f32 %v2219_v35, %v10663_v44  ;;  %v10671_v46 = vld [vmem:[#allocation180_spill] sm:$0xff]  ;;  %v10677_v41 = vld [vmem:[#allocation191_spill] sm:$0xff]  ;;  %v10681_v50 = vld [vmem:[#allocation193_spill] sm:$0xff] }
 0x26d   :  { %v2282_v58 = vadd.f32 %v2281_v32, %v10659_v47  ;;  %v2534_v18 = vadd.f32 %v2533_v26, %v10664_v7  ;;  %v2346_v11 = vadd.f32 %v2345_v45, %v10667_v30  ;;  %v2599_v13 = vadd.f32 %v2598_v0, %v2597_v51  ;;  %v10680_v20 = vld [vmem:[#allocation192_spill] sm:$0xff]  ;;  %v10682_v59 = vld [vmem:[#allocation194_spill] sm:$0xff]  ;;  %v10684_v48 = vld [vmem:[#allocation199_spill] sm:$0xff] }
 0x26e   :  { %v2471_v34 = vadd.f32 %v2470_v57, %v10662_v24  ;;  %v2409_v15 = vadd.f32 %v2408_v60, %v10668_v19  ;;  %v2158_v16 = vadd.f32 %v2157_v2, %v10670_v14  ;;  %v2221_v3 = vadd.f32 %v2220_v17, %v7582_v42  ;;  %v10683_v52 = vld [vmem:[#allocation198_spill] sm:$0xff]  ;;  %v10685_v43 = vld [vmem:[#allocation195_spill] sm:$0xff]  ;;  %v10686_v56 = vld [vmem:[#allocation200_spill] sm:$0xff] }
 0x26f   :  { %v2283_v4 = vadd.f32 %v2282_v58, %v10666_v55  ;;  %v2535_v40 = vadd.f32 %v2534_v18, %v10671_v46  ;;  %v2347_v31 = vadd.f32 %v2346_v11, %v10673_v62  ;;  %v2600_v42 = vsel %vm73_vm0, %v10679_v22, 0.0  ;;  %v10687_v47 = vld [vmem:[#allocation201_spill] sm:$0xff]  ;;  %v10690_v60 = vld [vmem:[#allocation207_spill] sm:$0xff]  ;;  %v10693_v7 = vld [vmem:[#allocation208_spill] sm:$0xff] }
 0x270   :  { %v2472_v10 = vadd.f32 %v2471_v34, %v10669_v8  ;;  %v2410_v54 = vadd.f32 %v2409_v15, %v10674_v29  ;;  %v2159_v63 = vadd.f32 %v2158_v16, %v10676_v53  ;;  %v2222_v21 = vadd.f32 %v2221_v3, %v10677_v41  ;;  %v10689_v45 = vld [vmem:[#allocation205_spill] sm:$0xff]  ;;  %v10691_v34 = vld [vmem:[#allocation203_spill] sm:$0xff]  ;;  %v10695_v55 = vld [vmem:[#allocation210_spill] sm:$0xff] }
 0x271   :  { %v2284_v12 = vadd.f32 %v2283_v4, %v10672_v28  ;;  %v2536_v23 = vadd.f32 %v2535_v40, %v10678_v61  ;;  %v2348_v9 = vadd.f32 %v2347_v31, %v10680_v20  ;;  %v2601_v35 = vadd.f32 %v2600_v42, %v2599_v13  ;;  %v10692_v44 = vld [vmem:[#allocation105_spill] sm:$0xff]  ;;  %v10697_v11 = vld [vmem:[#allocation214_spill] sm:$0xff]  ;;  %v10698_v15 = vld [vmem:[#allocation216_spill] sm:$0xff] }
 0x272   :  { %v2473_v37 = vadd.f32 %v2472_v10, %v10675_v27  ;;  %v2411_v32 = vadd.f32 %v2410_v54, %v10681_v50  ;;  %v2160_v1 = vadd.f32 %v2159_v63, %v10683_v52  ;;  %v2223_v57 = vadd.f32 %v2222_v21, %v10684_v48  ;;  %v10694_v6 = vld [vmem:[#allocation209_spill] sm:$0xff]  ;;  %v10699_v10 = vld [vmem:[#allocation212_spill] sm:$0xff]  ;;  %v10701_v40 = vld [vmem:[#allocation218_spill] sm:$0xff] }
 0x273   :  { %v2285_v39 = vadd.f32 %v2284_v12, %v7618_v33  ;;  %v2537_v36 = vadd.f32 %v2536_v23, %v10685_v43  ;;  %v2349_v51 = vadd.f32 %v2348_v9, %v7654_v38  ;;  %v10688_v33 = vld [vmem:[#allocation202_spill] sm:$0xff]  ;;  %v2602_v17 = vsel %vm73_vm0, %v10692_v44, 0.0  ;;  %v10696_v38 = vld [vmem:[#allocation211_spill] sm:$0xff]  ;;  %v10700_v3 = vld [vmem:[#allocation217_spill] sm:$0xff] }
 0x274   :  { %v2474_v25 = vadd.f32 %v2473_v37, %v10682_v59  ;;  %v2412_v58 = vadd.f32 %v2411_v32, %v10687_v47  ;;  %v2161_v49 = vadd.f32 %v2160_v1, %v10689_v45  ;;  %v2224_v24 = vadd.f32 %v2223_v57, %v10690_v60  ;;  %v10702_v28 = vld [vmem:[#allocation219_spill] sm:$0xff]  ;;  %v10703_v62 = vld [vmem:[#allocation220_spill] sm:$0xff]  ;;  %v10705_v27 = vld [vmem:[#allocation225_spill] sm:$0xff] }
 0x275   :  { %v2286_v26 = vadd.f32 %v2285_v39, %v10686_v56  ;;  %v2538_v2 = vadd.f32 %v2537_v36, %v10691_v34  ;;  %v2350_v0 = vadd.f32 %v2349_v51, %v10694_v6  ;;  %v2603_v16 = vadd.f32 %v2602_v17, %v2601_v35  ;;  %v10704_v29 = vld [vmem:[#allocation223_spill] sm:$0xff]  ;;  %v10706_v53 = vld [vmem:[#allocation221_spill] sm:$0xff]  ;;  %v10708_v61 = vld [vmem:[#allocation226_spill] sm:$0xff] }
 0x276   :  { %v2475_v5 = vadd.f32 %v2474_v25, %v10688_v33  ;;  %v2413_v4 = vadd.f32 %v2412_v58, %v10695_v55  ;;  %v2162_v19 = vadd.f32 %v2161_v49, %v10697_v11  ;;  %v2225_v8 = vadd.f32 %v2224_v24, %v10698_v15  ;;  %v10707_v41 = vld [vmem:[#allocation113_spill] sm:$0xff]  ;;  %v10709_v22 = vld [vmem:[#allocation227_spill] sm:$0xff]  ;;  %v10710_v39 = vld [vmem:[#allocation228_spill] sm:$0xff] }
 0x277   :  { %v2287_v18 = vadd.f32 %v2286_v26, %v10693_v7  ;;  %v2539_v14 = vadd.f32 %v2538_v2, %v10699_v10  ;;  %v2351_v13 = vadd.f32 %v2350_v0, %v10701_v40  ;;  %v2604_v21 = vsel %vm73_vm0, %v10707_v41, 0.0  ;;  %v10711_v9 = vld [vmem:[#allocation229_spill] sm:$0xff]  ;;  %v10712_v32 = vld [vmem:[#allocation232_spill] sm:$0xff]  ;;  %v10713_v25 = vld [vmem:[#allocation234_spill] sm:$0xff] }
 0x278   :  { %v2476_v30 = vadd.f32 %v2475_v5, %v10696_v38  ;;  %v2414_v12 = vadd.f32 %v2413_v4, %v10702_v28  ;;  %v2163_v54 = vadd.f32 %v2162_v19, %v10704_v29  ;;  %v2226_v37 = vadd.f32 %v2225_v8, %v10705_v27  ;;  %v10714_v1 = vld [vmem:[#allocation230_spill] sm:$0xff]  ;;  %v10715_v43 = vld [vmem:[#allocation235_spill] sm:$0xff]  ;;  %v10716_v35 = vld [vmem:[#allocation236_spill] sm:$0xff] }
 0x279   :  { %v2288_v46 = vadd.f32 %v2287_v18, %v10700_v3  ;;  %v2540_v63 = vadd.f32 %v2539_v14, %v10706_v53  ;;  %v2352_v42 = vadd.f32 %v2351_v13, %v10709_v22  ;;  %v2605_v57 = vadd.f32 %v2604_v21, %v2603_v16  ;;  %v10717_v26 = vld [vmem:[#allocation237_spill] sm:$0xff]  ;;  %v10718_v47 = vld [vmem:[#allocation238_spill] sm:$0xff]  ;;  %v10720_v45 = vld [vmem:[#allocation243_spill] sm:$0xff] }
 0x27a   :  { %v2477_v31 = vadd.f32 %v2476_v30, %v10703_v62  ;;  %v2415_v20 = vadd.f32 %v2414_v12, %v10710_v39  ;;  %v2164_v59 = vadd.f32 %v2163_v54, %v10712_v32  ;;  %v2227_v52 = vadd.f32 %v2226_v37, %v10713_v25  ;;  %v10719_v33 = vld [vmem:[#allocation241_spill] sm:$0xff]  ;;  %v10721_v60 = vld [vmem:[#allocation239_spill] sm:$0xff]  ;;  %v10723_v44 = vld [vmem:[#allocation244_spill] sm:$0xff] }
 0x27b   :  { %v2289_v23 = vadd.f32 %v2288_v46, %v10708_v61  ;;  %v2541_v48 = vadd.f32 %v2540_v63, %v10714_v1  ;;  %v2353_v56 = vadd.f32 %v2352_v42, %v10716_v35  ;;  %v10722_v34 = vld [vmem:[#allocation121_spill] sm:$0xff]  ;;  %v10725_v6 = vld [vmem:[#allocation246_spill] sm:$0xff]  ;;  %v10726_v55 = vld [vmem:[#allocation247_spill] sm:$0xff] }
 0x27c   :  { %v2478_v50 = vadd.f32 %v2477_v31, %v10711_v9  ;;  %v2416_v51 = vadd.f32 %v2415_v20, %v10717_v26  ;;  %v2165_v5 = vadd.f32 %v2164_v59, %v10719_v33  ;;  %v2228_v49 = vadd.f32 %v2227_v52, %v10720_v45  ;;  %v10724_v7 = vld [vmem:[#allocation245_spill] sm:$0xff]  ;;  %v10727_v38 = vld [vmem:[#allocation250_spill] sm:$0xff]  ;;  %v10728_v11 = vld [vmem:[#allocation252_spill] sm:$0xff] }
 0x27d   :  { %v2290_v36 = vadd.f32 %v2289_v23, %v10715_v43  ;;  %v2542_v24 = vadd.f32 %v2541_v48, %v10721_v60  ;;  %v2606_v2 = vsel %vm73_vm0, %v10722_v34, 0.0  ;;  %v2354_v18 = vadd.f32 %v2353_v56, %v10724_v7  ;;  %v10729_v15 = vld [vmem:[#allocation248_spill] sm:$0xff]  ;;  %v10730_v14 = vld [vmem:[#allocation253_spill] sm:$0xff]  ;;  %v10731_v3 = vld [vmem:[#allocation254_spill] sm:$0xff] }
 0x27e   :  { %v2479_v58 = vadd.f32 %v2478_v50, %v10718_v47  ;;  %v2417_v0 = vadd.f32 %v2416_v51, %v10725_v6  ;;  %v2166_v30 = vadd.f32 %v2165_v5, %v10727_v38  ;;  %v2229_v19 = vadd.f32 %v2228_v49, %v10728_v11  ;;  %v10732_v40 = vld [vmem:[#allocation255_spill] sm:$0xff]  ;;  %v10733_v28 = vld [vmem:[#allocation256_spill] sm:$0xff]  ;;  %v10735_v29 = vld [vmem:[#allocation261_spill] sm:$0xff] }
 0x27f   :  { %v2291_v17 = vadd.f32 %v2290_v36, %v10723_v44  ;;  %v2543_v8 = vadd.f32 %v2542_v24, %v10729_v15  ;;  %v2607_v10 = vadd.f32 %v2606_v2, %v2605_v57  ;;  %v2355_v46 = vadd.f32 %v2354_v18, %v10731_v3  ;;  %v10734_v62 = vld [vmem:[#allocation259_spill] sm:$0xff]  ;;  %v10736_v27 = vld [vmem:[#allocation257_spill] sm:$0xff]  ;;  %v10738_v41 = vld [vmem:[#allocation262_spill] sm:$0xff] }
 0x280   :  { %v2480_v4 = vadd.f32 %v2479_v58, %v10726_v55  ;;  %v2418_v13 = vadd.f32 %v2417_v0, %v10732_v40  ;;  %v2167_v31 = vadd.f32 %v2166_v30, %v10734_v62  ;;  %v2230_v54 = vadd.f32 %v2229_v19, %v10735_v29  ;;  %v10737_v53 = vld [vmem:[#allocation129_spill] sm:$0xff]  ;;  %v10739_v61 = vld [vmem:[#allocation263_spill] sm:$0xff]  ;;  %v10740_v22 = vld [vmem:[#allocation264_spill] sm:$0xff] }
 0x281   :  { %v2292_v16 = vadd.f32 %v2291_v17, %v10730_v14  ;;  %v2544_v37 = vadd.f32 %v2543_v8, %v10736_v27  ;;  %v2608_v63 = vsel %vm73_vm0, %v10737_v53, 0.0  ;;  %v2356_v23 = vadd.f32 %v2355_v46, %v10739_v61  ;;  %v10741_v39 = vld [vmem:[#allocation265_spill] sm:$0xff]  ;;  %v10742_v9 = vld [vmem:[#allocation267_spill] sm:$0xff]  ;;  %v10743_v32 = vld [vmem:[#allocation268_spill] sm:$0xff] }
 0x282   :  { %v2481_v12 = vadd.f32 %v2480_v4, %v10733_v28  ;;  %v2419_v42 = vadd.f32 %v2418_v13, %v10740_v22  ;;  %v2168_v50 = vadd.f32 %v2167_v31, %v10742_v9  ;;  %v2231_v59 = vadd.f32 %v2230_v54, %v10743_v32  ;;  %v10744_v25 = vld [vmem:[#allocation266_spill] sm:$0xff]  ;;  %v10746_v43 = vld [vmem:[#allocation271_spill] sm:$0xff]  ;;  %v10747_v35 = vld [vmem:[#allocation272_spill] sm:$0xff] }
 0x283   :  { %v2293_v21 = vadd.f32 %v2292_v16, %v10738_v41  ;;  %v2545_v52 = vadd.f32 %v2544_v37, %v10744_v25  ;;  %v2609_v1 = vadd.f32 %v2608_v63, %v2607_v10  ;;  %v10745_v48 = vld [vmem:[#allocation270_spill] sm:$0xff]  ;;  %v2357_v36 = vadd.f32 %v2356_v23, %v10746_v43  ;;  %v10748_v26 = vld [vmem:[#allocation273_spill] sm:$0xff]  ;;  %v10749_v47 = vld [vmem:[#allocation275_spill] sm:$0xff] }
 0x284   :  { %v2482_v20 = vadd.f32 %v2481_v12, %v10741_v39  ;;  %v2420_v56 = vadd.f32 %v2419_v42, %v10747_v35  ;;  %v2169_v58 = vadd.f32 %v2168_v50, %v10749_v47  ;;  %v10750_v33 = vld [vmem:[#allocation276_spill] sm:$0xff]  ;;  %v10751_v45 = vld [vmem:[#allocation274_spill] sm:$0xff]  ;;  %v10752_v60 = vld [vmem:[#allocation443_spill] sm:$0xff] }
 0x285   :  { %v2294_v57 = vadd.f32 %v2293_v21, %v10745_v48  ;;  %v2232_v5 = vadd.f32 %v2231_v59, %v10750_v33  ;;  %v2546_v49 = vadd.f32 %v2545_v52, %v10751_v45  ;;  %v2610_v24 = vsel %vm73_vm0, %v10752_v60, 0.0  ;;  %v10753_v34 = vld [vmem:[#allocation277_spill] sm:$0xff]  ;;  %v10754_v44 = vld [vmem:[#allocation279_spill] sm:$0xff]  ;;  %v10755_v7 = vld [vmem:[#allocation280_spill] sm:$0xff] }
 0x286   :  { %v2483_v51 = vadd.f32 %v2482_v20, %v10748_v26  ;;  %v2358_v17 = vadd.f32 %v2357_v36, %v10754_v44  ;;  %v2421_v18 = vadd.f32 %v2420_v56, %v10755_v7  ;;  %v10756_v6 = vld [vmem:[#allocation282_spill] sm:$0xff]  ;;  %v10757_v55 = vld [vmem:[#allocation284_spill] sm:$0xff]  ;;  %v10759_v11 = vld [vmem:[#allocation283_spill] sm:$0xff]  ;;  %v2611_v15 = vadd.f32 %v2610_v24, %v2609_v1 }
 0x287   :  { %v2295_v2 = vadd.f32 %v2294_v57, %v10753_v34  ;;  %v2170_v4 = vadd.f32 %v2169_v58, %v10757_v55  ;;  %v10758_v38 = vld [vmem:[#allocation286_spill] sm:$0xff]  ;;  %v2547_v19 = vadd.f32 %v2546_v49, %v10759_v11  ;;  %v10760_v8 = vld [vmem:[#allocation287_spill] sm:$0xff]  ;;  %v10761_v14 = vld [vmem:[#allocation289_spill] sm:$0xff] }
 0x288   :  { %v2484_v0 = vadd.f32 %v2483_v51, %v10756_v6  ;;  %v2233_v30 = vadd.f32 %v2232_v5, %v10758_v38  ;;  %v2359_v16 = vadd.f32 %v2358_v17, %v10761_v14  ;;  %v10762_v3 = vld [vmem:[#allocation290_spill] sm:$0xff]  ;;  %v10763_v40 = vld [vmem:[#allocation291_spill] sm:$0xff]  ;;  %v10764_v28 = vld [vmem:[#allocation293_spill] sm:$0xff] }
 0x289   :  { %v2296_v10 = vadd.f32 %v2295_v2, %v10760_v8  ;;  %v2422_v46 = vadd.f32 %v2421_v18, %v10762_v3  ;;  %v2171_v12 = vadd.f32 %v2170_v4, %v10764_v28  ;;  %v10765_v62 = vld [vmem:[#allocation294_spill] sm:$0xff]  ;;  %v10766_v29 = vld [vmem:[#allocation292_spill] sm:$0xff]  ;;  %v10769_v41 = vld [vmem:[#allocation297_spill] sm:$0xff] }
 0x28a   :  { %v2485_v13 = vadd.f32 %v2484_v0, %v10763_v40  ;;  %v2234_v31 = vadd.f32 %v2233_v30, %v10765_v62  ;;  %v2548_v54 = vadd.f32 %v2547_v19, %v10766_v29  ;;  %v10767_v27 = vld [vmem:[#allocation146_spill] sm:$0xff]  ;;  %v10768_v53 = vld [vmem:[#allocation296_spill] sm:$0xff]  ;;  %v2360_v21 = vadd.f32 %v2359_v16, %v10769_v41  ;;  %v10771_v22 = vld [vmem:[#allocation299_spill] sm:$0xff] }
 0x28b   :  { %v2612_v37 = vsel %vm73_vm0, %v10767_v27, 0.0  ;;  %v2297_v63 = vadd.f32 %v2296_v10, %v10768_v53  ;;  %v10770_v61 = vld [vmem:[#allocation298_spill] sm:$0xff]  ;;  %v10773_v9 = vld [vmem:[#allocation303_spill] sm:$0xff]  ;;  %v10774_v32 = vld [vmem:[#allocation300_spill] sm:$0xff] }
 0x28c   :  { %v2423_v23 = vadd.f32 %v2422_v46, %v10770_v61  ;;  %v2486_v42 = vadd.f32 %v2485_v13, %v10771_v22  ;;  %v10772_v39 = vld [vmem:[#allocation302_spill] sm:$0xff]  ;;  %v2235_v50 = vadd.f32 %v2234_v31, %v10773_v9  ;;  %v2549_v59 = vadd.f32 %v2548_v54, %v10774_v32  ;;  %v10775_v52 = vld [vmem:[#allocation304_spill] sm:$0xff]  ;;  %v10776_v48 = vld [vmem:[#allocation305_spill] sm:$0xff] }
 0x28d   :  { %v2172_v20 = vadd.f32 %v2171_v12, %v10772_v39  ;;  %v2613_v25 = vadd.f32 %v2612_v37, %v2611_v15  ;;  %v2298_v1 = vadd.f32 %v2297_v63, %v10775_v52  ;;  %v2361_v57 = vadd.f32 %v2360_v21, %v10776_v48  ;;  %v10777_v43 = vld [vmem:[#allocation306_spill] sm:$0xff]  ;;  %v10778_v35 = vld [vmem:[#allocation307_spill] sm:$0xff]  ;;  %v10781_v33 = vld [vmem:[#allocation308_spill] sm:$0xff] }
 0x28e   :  { %v2424_v36 = vadd.f32 %v2423_v23, %v10777_v43  ;;  %v2487_v56 = vadd.f32 %v2486_v42, %v10778_v35  ;;  %v10779_v26 = vld [vmem:[#allocation310_spill] sm:$0xff]  ;;  %v10780_v47 = vld [vmem:[#allocation311_spill] sm:$0xff]  ;;  %v2550_v5 = vadd.f32 %v2549_v59, %v10781_v33  ;;  %v10783_v60 = vld [vmem:[#allocation312_spill] sm:$0xff] }
 0x28f   :  { %v2173_v51 = vadd.f32 %v2172_v20, %v10779_v26  ;;  %v2236_v58 = vadd.f32 %v2235_v50, %v10780_v47  ;;  %v10782_v45 = vld [vmem:[#allocation147_spill] sm:$0xff]  ;;  %v2299_v24 = vadd.f32 %v2298_v1, %v10783_v60  ;;  %v10784_v34 = vld [vmem:[#allocation313_spill] sm:$0xff]  ;;  %v10785_v44 = vld [vmem:[#allocation314_spill] sm:$0xff] }
 0x290   :  { %v2614_v49 = vsel %vm73_vm0, %v10782_v45, 0.0  ;;  %v2362_v2 = vadd.f32 %v2361_v57, %v10784_v34  ;;  %v2425_v17 = vadd.f32 %v2424_v36, %v10785_v44  ;;  %v10786_v7 = vld [vmem:[#allocation315_spill] sm:$0xff]  ;;  %v10787_v6 = vld [vmem:[#allocation317_spill] sm:$0xff]  ;;  %v10789_v38 = vld [vmem:[#allocation316_spill] sm:$0xff] }
 0x291   :  { %v2488_v18 = vadd.f32 %v2487_v56, %v10786_v7  ;;  %v2174_v0 = vadd.f32 %v2173_v51, %v10787_v6  ;;  %v10788_v55 = vld [vmem:[#allocation319_spill] sm:$0xff]  ;;  %v2551_v30 = vadd.f32 %v2550_v5, %v10789_v38  ;;  %v2615_v11 = vadd.f32 %v2614_v49, %v2613_v25  ;;  %v10790_v19 = vld [vmem:[#allocation320_spill] sm:$0xff]  ;;  %v10791_v8 = vld [vmem:[#allocation321_spill] sm:$0xff] }
 0x292   :  { %v2237_v4 = vadd.f32 %v2236_v58, %v10788_v55  ;;  %v2300_v15 = vadd.f32 %v2299_v24, %v10790_v19  ;;  %v2363_v10 = vadd.f32 %v2362_v2, %v10791_v8  ;;  %v10792_v14 = vld [vmem:[#allocation322_spill] sm:$0xff]  ;;  %v10793_v3 = vld [vmem:[#allocation323_spill] sm:$0xff]  ;;  %v10794_v40 = vld [vmem:[#allocation325_spill] sm:$0xff] }
 0x293   :  { %v2426_v16 = vadd.f32 %v2425_v17, %v10792_v14  ;;  %v2489_v46 = vadd.f32 %v2488_v18, %v10793_v3  ;;  %v2175_v13 = vadd.f32 %v2174_v0, %v10794_v40  ;;  %v10795_v28 = vld [vmem:[#allocation326_spill] sm:$0xff]  ;;  %v10796_v62 = vld [vmem:[#allocation324_spill] sm:$0xff]  ;;  %v10799_v53 = vld [vmem:[#allocation329_spill] sm:$0xff] }
 0x294   :  { %v2238_v12 = vadd.f32 %v2237_v4, %v10795_v28  ;;  %v2552_v31 = vadd.f32 %v2551_v30, %v10796_v62  ;;  %v10797_v29 = vld [vmem:[#allocation148_spill] sm:$0xff]  ;;  %v2364_v63 = vadd.f32 %v2363_v10, %v10799_v53  ;;  %v10800_v41 = vld [vmem:[#allocation330_spill] sm:$0xff]  ;;  %v10801_v61 = vld [vmem:[#allocation331_spill] sm:$0xff] }
 0x295   :  { %v2616_v54 = vsel %vm73_vm0, %v10797_v29, 0.0  ;;  %v10798_v27 = vld [vmem:[#allocation328_spill] sm:$0xff]  ;;  %v2427_v21 = vadd.f32 %v2426_v16, %v10800_v41  ;;  %v2490_v23 = vadd.f32 %v2489_v46, %v10801_v61  ;;  %v10802_v22 = vld [vmem:[#allocation334_spill] sm:$0xff]  ;;  %v10803_v39 = vld [vmem:[#allocation335_spill] sm:$0xff] }
 0x296   :  { %v2301_v37 = vadd.f32 %v2300_v15, %v10798_v27  ;;  %v2176_v42 = vadd.f32 %v2175_v13, %v10802_v22  ;;  %v2239_v20 = vadd.f32 %v2238_v12, %v10803_v39  ;;  %v10804_v9 = vld [vmem:[#allocation332_spill] sm:$0xff]  ;;  %v2617_v32 = vadd.f32 %v2616_v54, %v2615_v11  ;;  %v10806_v52 = vld [vmem:[#allocation337_spill] sm:$0xff]  ;;  %v10807_v48 = vld [vmem:[#allocation338_spill] sm:$0xff] }
 0x297   :  { %v2553_v50 = vadd.f32 %v2552_v31, %v10804_v9  ;;  %v10805_v59 = vld [vmem:[#allocation336_spill] sm:$0xff]  ;;  %v2365_v1 = vadd.f32 %v2364_v63, %v10806_v52  ;;  %v2428_v57 = vadd.f32 %v2427_v21, %v10807_v48  ;;  %v10808_v43 = vld [vmem:[#allocation339_spill] sm:$0xff]  ;;  %v10809_v35 = vld [vmem:[#allocation341_spill] sm:$0xff] }
 0x298   :  { %v2302_v25 = vadd.f32 %v2301_v37, %v10805_v59  ;;  %v2491_v36 = vadd.f32 %v2490_v23, %v10808_v43  ;;  %v2177_v56 = vadd.f32 %v2176_v42, %v10809_v35  ;;  %v10810_v26 = vld [vmem:[#allocation342_spill] sm:$0xff]  ;;  %v10811_v47 = vld [vmem:[#allocation340_spill] sm:$0xff]  ;;  %v10813_v45 = vld [vmem:[#allocation343_spill] sm:$0xff] }
 0x299   :  { %v2240_v51 = vadd.f32 %v2239_v20, %v10810_v26  ;;  %v2554_v58 = vadd.f32 %v2553_v50, %v10811_v47  ;;  %v10812_v33 = vld [vmem:[#allocation150_spill] sm:$0xff]  ;;  %v10814_v60 = vld [vmem:[#allocation344_spill] sm:$0xff]  ;;  %v10815_v34 = vld [vmem:[#allocation345_spill] sm:$0xff] }
 0x29a   :  { %v2618_v5 = vsel %vm73_vm0, %v10812_v33, 0.0  ;;  %v2303_v49 = vadd.f32 %v2302_v25, %v10813_v45  ;;  %v2366_v24 = vadd.f32 %v2365_v1, %v10814_v60  ;;  %v2429_v2 = vadd.f32 %v2428_v57, %v10815_v34  ;;  %v10816_v44 = vld [vmem:[#allocation346_spill] sm:$0xff]  ;;  %v10817_v7 = vld [vmem:[#allocation348_spill] sm:$0xff]  ;;  %v10818_v6 = vld [vmem:[#allocation349_spill] sm:$0xff] }
 0x29b   :  { %v2492_v17 = vadd.f32 %v2491_v36, %v10816_v44  ;;  %v2178_v18 = vadd.f32 %v2177_v56, %v10817_v7  ;;  %v2241_v0 = vadd.f32 %v2240_v51, %v10818_v6  ;;  %v10819_v55 = vld [vmem:[#allocation347_spill] sm:$0xff]  ;;  %v2619_v38 = vadd.f32 %v2618_v5, %v2617_v32  ;;  %v10820_v30 = vld [vmem:[#allocation350_spill] sm:$0xff]  ;;  %v10821_v19 = vld [vmem:[#allocation352_spill] sm:$0xff] }
 0x29c   :  { %v2555_v4 = vadd.f32 %v2554_v58, %v10819_v55  ;;  %v2304_v11 = vadd.f32 %v2303_v49, %v10820_v30  ;;  %v2367_v15 = vadd.f32 %v2366_v24, %v10821_v19  ;;  %v10822_v8 = vld [vmem:[#allocation353_spill] sm:$0xff]  ;;  %v10823_v14 = vld [vmem:[#allocation354_spill] sm:$0xff]  ;;  %v10824_v3 = vld [vmem:[#allocation356_spill] sm:$0xff] }
 0x29d   :  { %v2430_v10 = vadd.f32 %v2429_v2, %v10822_v8  ;;  %v2493_v16 = vadd.f32 %v2492_v17, %v10823_v14  ;;  %v2179_v46 = vadd.f32 %v2178_v18, %v10824_v3  ;;  %v10825_v40 = vld [vmem:[#allocation357_spill] sm:$0xff]  ;;  %v10826_v28 = vld [vmem:[#allocation355_spill] sm:$0xff]  ;;  %v10828_v29 = vld [vmem:[#allocation358_spill] sm:$0xff] }
 0x29e   :  { %v2242_v13 = vadd.f32 %v2241_v0, %v10825_v40  ;;  %v2556_v12 = vadd.f32 %v2555_v4, %v10826_v28  ;;  %v10827_v62 = vld [vmem:[#allocation157_spill] sm:$0xff]  ;;  %v2305_v54 = vadd.f32 %v2304_v11, %v10828_v29  ;;  %v10829_v27 = vld [vmem:[#allocation359_spill] sm:$0xff]  ;;  %v10830_v53 = vld [vmem:[#allocation360_spill] sm:$0xff] }
 0x29f   :  { %v2620_v31 = vsel %vm73_vm0, %v10827_v62, 0.0  ;;  %v2368_v37 = vadd.f32 %v2367_v15, %v10829_v27  ;;  %v2431_v63 = vadd.f32 %v2430_v10, %v10830_v53  ;;  %v10831_v41 = vld [vmem:[#allocation361_spill] sm:$0xff]  ;;  %v10832_v61 = vld [vmem:[#allocation363_spill] sm:$0xff]  ;;  %v10833_v22 = vld [vmem:[#allocation364_spill] sm:$0xff] }
 0x2a0   :  { %v2494_v21 = vadd.f32 %v2493_v16, %v10831_v41  ;;  %v2180_v23 = vadd.f32 %v2179_v46, %v10832_v61  ;;  %v2243_v42 = vadd.f32 %v2242_v13, %v10833_v22  ;;  %v10834_v39 = vld [vmem:[#allocation362_spill] sm:$0xff]  ;;  %v2621_v9 = vadd.f32 %v2620_v31, %v2619_v38  ;;  %v10835_v50 = vld [vmem:[#allocation365_spill] sm:$0xff]  ;;  %v10837_v52 = vld [vmem:[#allocation367_spill] sm:$0xff] }
 0x2a1   :  { %v2557_v20 = vadd.f32 %v2556_v12, %v10834_v39  ;;  %v2306_v32 = vadd.f32 %v2305_v54, %v10835_v50  ;;  %v10836_v59 = vld [vmem:[#allocation366_spill] sm:$0xff]  ;;  %v2432_v1 = vadd.f32 %v2431_v63, %v10837_v52  ;;  %v10838_v48 = vld [vmem:[#allocation368_spill] sm:$0xff]  ;;  %v10840_v35 = vld [vmem:[#allocation371_spill] sm:$0xff] }
 0x2a2   :  { %v2369_v25 = vadd.f32 %v2368_v37, %v10836_v59  ;;  %v2495_v57 = vadd.f32 %v2494_v21, %v10838_v48  ;;  %v10839_v43 = vld [vmem:[#allocation370_spill] sm:$0xff]  ;;  %v2244_v56 = vadd.f32 %v2243_v42, %v10840_v35  ;;  %v10841_v26 = vld [vmem:[#allocation369_spill] sm:$0xff]  ;;  %v10843_v33 = vld [vmem:[#allocation372_spill] sm:$0xff] }
 0x2a3   :  { %v2181_v36 = vadd.f32 %v2180_v23, %v10839_v43  ;;  %v2558_v51 = vadd.f32 %v2557_v20, %v10841_v26  ;;  %v10842_v47 = vld [vmem:[#allocation165_spill] sm:$0xff]  ;;  %v2307_v5 = vadd.f32 %v2306_v32, %v10843_v33  ;;  %v10845_v60 = vld [vmem:[#allocation375_spill] sm:$0xff]  ;;  %v10846_v34 = vld [vmem:[#allocation376_spill] sm:$0xff] }
 0x2a4   :  { %v2622_v58 = vsel %vm73_vm0, %v10842_v47, 0.0  ;;  %v10844_v45 = vld [vmem:[#allocation373_spill] sm:$0xff]  ;;  %v2433_v24 = vadd.f32 %v2432_v1, %v10845_v60  ;;  %v2496_v2 = vadd.f32 %v2495_v57, %v10846_v34  ;;  %v10847_v44 = vld [vmem:[#allocation378_spill] sm:$0xff]  ;;  %v10848_v7 = vld [vmem:[#allocation379_spill] sm:$0xff] }
 0x2a5   :  { %v2370_v49 = vadd.f32 %v2369_v25, %v10844_v45  ;;  %v2182_v17 = vadd.f32 %v2181_v36, %v10847_v44  ;;  %v2245_v18 = vadd.f32 %v2244_v56, %v10848_v7  ;;  %v10849_v6 = vld [vmem:[#allocation377_spill] sm:$0xff]  ;;  %v2623_v55 = vadd.f32 %v2622_v58, %v2621_v9  ;;  %v10850_v4 = vld [vmem:[#allocation380_spill] sm:$0xff]  ;;  %v10852_v19 = vld [vmem:[#allocation382_spill] sm:$0xff] }
 0x2a6   :  { %v2559_v0 = vadd.f32 %v2558_v51, %v10849_v6  ;;  %v2308_v38 = vadd.f32 %v2307_v5, %v10850_v4  ;;  %v10851_v30 = vld [vmem:[#allocation381_spill] sm:$0xff]  ;;  %v2434_v15 = vadd.f32 %v2433_v24, %v10852_v19  ;;  %v10853_v8 = vld [vmem:[#allocation383_spill] sm:$0xff]  ;;  %v10855_v3 = vld [vmem:[#allocation386_spill] sm:$0xff] }
 0x2a7   :  { %v2371_v11 = vadd.f32 %v2370_v49, %v10851_v30  ;;  %v2497_v10 = vadd.f32 %v2496_v2, %v10853_v8  ;;  %v10854_v14 = vld [vmem:[#allocation385_spill] sm:$0xff]  ;;  %v2246_v46 = vadd.f32 %v2245_v18, %v10855_v3  ;;  %v10856_v40 = vld [vmem:[#allocation384_spill] sm:$0xff]  ;;  %v10858_v62 = vld [vmem:[#allocation387_spill] sm:$0xff] }
 0x2a8   :  { %v2183_v16 = vadd.f32 %v2182_v17, %v10854_v14  ;;  %v2560_v13 = vadd.f32 %v2559_v0, %v10856_v40  ;;  %v10857_v28 = vld [vmem:[#allocation173_spill] sm:$0xff]  ;;  %v2309_v31 = vadd.f32 %v2308_v38, %v10858_v62  ;;  %v10859_v29 = vld [vmem:[#allocation388_spill] sm:$0xff]  ;;  %v10861_v53 = vld [vmem:[#allocation390_spill] sm:$0xff] }
 0x2a9   :  { %v2624_v12 = vsel %vm73_vm0, %v10857_v28, 0.0  ;;  %v2372_v54 = vadd.f32 %v2371_v11, %v10859_v29  ;;  %v10860_v27 = vld [vmem:[#allocation389_spill] sm:$0xff]  ;;  %v2498_v63 = vadd.f32 %v2497_v10, %v10861_v53  ;;  %v10862_v41 = vld [vmem:[#allocation392_spill] sm:$0xff]  ;;  %v10864_v22 = vld [vmem:[#allocation391_spill] sm:$0xff] }
 0x2aa   :  { %v2435_v37 = vadd.f32 %v2434_v15, %v10860_v27  ;;  %v2184_v21 = vadd.f32 %v2183_v16, %v10862_v41  ;;  %v10863_v61 = vld [vmem:[#allocation393_spill] sm:$0xff]  ;;  %v2561_v42 = vadd.f32 %v2560_v13, %v10864_v22  ;;  %v2625_v39 = vadd.f32 %v2624_v12, %v2623_v55  ;;  %v10865_v20 = vld [vmem:[#allocation394_spill] sm:$0xff]  ;;  %v10866_v50 = vld [vmem:[#allocation395_spill] sm:$0xff] }
 0x2ab   :  { %v2247_v23 = vadd.f32 %v2246_v46, %v10863_v61  ;;  %v2310_v9 = vadd.f32 %v2309_v31, %v10865_v20  ;;  %v2373_v32 = vadd.f32 %v2372_v54, %v10866_v50  ;;  %v10867_v59 = vld [vmem:[#allocation396_spill] sm:$0xff]  ;;  %v10868_v52 = vld [vmem:[#allocation398_spill] sm:$0xff]  ;;  %v10870_v43 = vld [vmem:[#allocation401_spill] sm:$0xff] }
 0x2ac   :  { %v2436_v25 = vadd.f32 %v2435_v37, %v10867_v59  ;;  %v2499_v1 = vadd.f32 %v2498_v63, %v10868_v52  ;;  %v10869_v48 = vld [vmem:[#allocation400_spill] sm:$0xff]  ;;  %v10871_v35 = vld [vmem:[#allocation399_spill] sm:$0xff]  ;;  %v10872_v26 = vld [vmem:[#allocation181_spill] sm:$0xff] }
 0x2ad   :  { %v2185_v57 = vadd.f32 %v2184_v21, %v10869_v48  ;;  %v2248_v36 = vadd.f32 %v2247_v23, %v10870_v43  ;;  %v2562_v56 = vadd.f32 %v2561_v42, %v10871_v35  ;;  %v2626_v51 = vsel %vm73_vm0, %v10872_v26, 0.0  ;;  %v10873_v47 = vld [vmem:[#allocation402_spill] sm:$0xff]  ;;  %v10874_v33 = vld [vmem:[#allocation403_spill] sm:$0xff]  ;;  %v10875_v45 = vld [vmem:[#allocation404_spill] sm:$0xff] }
 0x2ae   :  { %v2311_v58 = vadd.f32 %v2310_v9, %v10873_v47  ;;  %v2374_v5 = vadd.f32 %v2373_v32, %v10874_v33  ;;  %v2437_v49 = vadd.f32 %v2436_v25, %v10875_v45  ;;  %v10876_v60 = vld [vmem:[#allocation405_spill] sm:$0xff]  ;;  %v10877_v34 = vld [vmem:[#allocation407_spill] sm:$0xff]  ;;  %v10878_v44 = vld [vmem:[#allocation408_spill] sm:$0xff]  ;;  %v2627_v6 = vadd.f32 %v2626_v51, %v2625_v39 }
 0x2af   :  { %v2500_v24 = vadd.f32 %v2499_v1, %v10876_v60  ;;  %v2186_v2 = vadd.f32 %v2185_v57, %v10877_v34  ;;  %v2249_v17 = vadd.f32 %v2248_v36, %v10878_v44  ;;  %v10879_v7 = vld [vmem:[#allocation406_spill] sm:$0xff]  ;;  %v10880_v0 = vld [vmem:[#allocation409_spill] sm:$0xff]  ;;  %v10882_v30 = vld [vmem:[#allocation411_spill] sm:$0xff] }
 0x2b0   :  { %v2563_v18 = vadd.f32 %v2562_v56, %v10879_v7  ;;  %v2312_v55 = vadd.f32 %v2311_v58, %v10880_v0  ;;  %v10881_v4 = vld [vmem:[#allocation410_spill] sm:$0xff]  ;;  %v2438_v11 = vadd.f32 %v2437_v49, %v10882_v30  ;;  %v10883_v19 = vld [vmem:[#allocation412_spill] sm:$0xff]  ;;  %v10885_v14 = vld [vmem:[#allocation415_spill] sm:$0xff] }
 0x2b1   :  { %v2375_v38 = vadd.f32 %v2374_v5, %v10881_v4  ;;  %v2501_v15 = vadd.f32 %v2500_v24, %v10883_v19  ;;  %v10884_v8 = vld [vmem:[#allocation414_spill] sm:$0xff]  ;;  %v2250_v16 = vadd.f32 %v2249_v17, %v10885_v14  ;;  %v10886_v3 = vld [vmem:[#allocation413_spill] sm:$0xff]  ;;  %v10888_v28 = vld [vmem:[#allocation416_spill] sm:$0xff] }
 0x2b2   :  { %v2187_v10 = vadd.f32 %v2186_v2, %v10884_v8  ;;  %v2564_v46 = vadd.f32 %v2563_v18, %v10886_v3  ;;  %v10887_v40 = vld [vmem:[#allocation189_spill] sm:$0xff]  ;;  %v2313_v12 = vadd.f32 %v2312_v55, %v10888_v28  ;;  %v10890_v29 = vld [vmem:[#allocation418_spill] sm:$0xff]  ;;  %v10891_v27 = vld [vmem:[#allocation419_spill] sm:$0xff] }
 0x2b3   :  { %v2628_v13 = vsel %vm73_vm0, %v10887_v40, 0.0  ;;  %v10889_v62 = vld [vmem:[#allocation417_spill] sm:$0xff]  ;;  %v2439_v54 = vadd.f32 %v2438_v11, %v10890_v29  ;;  %v2502_v37 = vadd.f32 %v2501_v15, %v10891_v27  ;;  %v10892_v53 = vld [vmem:[#allocation422_spill] sm:$0xff]  ;;  %v10893_v41 = vld [vmem:[#allocation423_spill] sm:$0xff] }
 0x2b4   :  { %v2376_v31 = vadd.f32 %v2375_v38, %v10889_v62  ;;  %v2188_v63 = vadd.f32 %v2187_v10, %v10892_v53  ;;  %v2251_v21 = vadd.f32 %v2250_v16, %v10893_v41  ;;  %v10894_v61 = vld [vmem:[#allocation421_spill] sm:$0xff]  ;;  %v2629_v22 = vadd.f32 %v2628_v13, %v2627_v6  ;;  %v10895_v42 = vld [vmem:[#allocation424_spill] sm:$0xff]  ;;  %v10897_v50 = vld [vmem:[#allocation426_spill] sm:$0xff] }
 0x2b5   :  { %v2565_v23 = vadd.f32 %v2564_v46, %v10894_v61  ;;  %v2314_v39 = vadd.f32 %v2313_v12, %v10895_v42  ;;  %v10896_v20 = vld [vmem:[#allocation425_spill] sm:$0xff]  ;;  %v2440_v32 = vadd.f32 %v2439_v54, %v10897_v50  ;;  %v10898_v59 = vld [vmem:[#allocation427_spill] sm:$0xff]  ;;  %v10900_v48 = vld [vmem:[#allocation430_spill] sm:$0xff] }
 0x2b6   :  { %v2377_v9 = vadd.f32 %v2376_v31, %v10896_v20  ;;  %v2503_v25 = vadd.f32 %v2502_v37, %v10898_v59  ;;  %v10899_v52 = vld [vmem:[#allocation429_spill] sm:$0xff]  ;;  %v2252_v57 = vadd.f32 %v2251_v21, %v10900_v48  ;;  %v10901_v43 = vld [vmem:[#allocation428_spill] sm:$0xff]  ;;  %v10903_v26 = vld [vmem:[#allocation431_spill] sm:$0xff] }
 0x2b7   :  { %v2189_v1 = vadd.f32 %v2188_v63, %v10899_v52  ;;  %v2566_v36 = vadd.f32 %v2565_v23, %v10901_v43  ;;  %v10902_v35 = vld [vmem:[#allocation196_spill] sm:$0xff]  ;;  %v2315_v51 = vadd.f32 %v2314_v39, %v10903_v26  ;;  %v10905_v33 = vld [vmem:[#allocation433_spill] sm:$0xff]  ;;  %v10906_v45 = vld [vmem:[#allocation434_spill] sm:$0xff] }
 0x2b8   :  { %v2630_v56 = vsel %vm73_vm0, %v10902_v35, 0.0  ;;  %v10904_v47 = vld [vmem:[#allocation432_spill] sm:$0xff]  ;;  %v2441_v5 = vadd.f32 %v2440_v32, %v10905_v33  ;;  %v2504_v49 = vadd.f32 %v2503_v25, %v10906_v45  ;;  %v10907_v60 = vld [vmem:[#allocation447_spill] sm:$0xff]  ;;  %v10911_v0 = vld [vmem:[#allocation449_spill] sm:$0xff] }
 0x2b9   :  { %v2378_v58 = vadd.f32 %v2377_v9, %v10904_v47  ;;  %v2103_v24 = vmul.f32 %v10907_v60, %v10907_v60  ;;  %v10908_v34 = vld [vmem:[#allocation139_spill] sm:$0xff]  ;;  %v2631_v7 = vadd.f32 %v2630_v56, %v2629_v22  ;;  %v10910_v18 = vld [vmem:[#allocation448_spill] sm:$0xff]  ;;  %v2107_v55 = vmul.f32 %v10911_v0, %v10911_v0  ;;  %v10913_v30 = vld [vmem:[#allocation437_spill] sm:$0xff] }
 0x2ba   :  { %v2104_v2 = vmul.f32 %v10908_v34, %v10908_v34  ;;  %v10909_v44 = vld [vmem:[#allocation435_spill] sm:$0xff]  ;;  %v2105_v6 = vmul.f32 %v10910_v18, %v10910_v18  ;;  %v10912_v4 = vld [vmem:[#allocation436_spill] sm:$0xff]  ;;  %v2253_v11 = vadd.f32 %v2252_v57, %v10913_v30  ;;  %v10914_v19 = vld [vmem:[#allocation438_spill] sm:$0xff] }
 0x2bb   :  { %v2567_v17 = vadd.f32 %v2566_v36, %v10909_v44  ;;  %v2190_v38 = vadd.f32 %v2189_v1, %v10912_v4  ;;  %v2316_v15 = vadd.f32 %v2315_v51, %v10914_v19  ;;  %v10915_v8 = vld [vmem:[#allocation439_spill] sm:$0xff]  ;;  %v10916_v14 = vld [vmem:[#allocation440_spill] sm:$0xff]  ;;  %v10919_v28 = vld [vmem:[#allocation450_spill] sm:$0xff] }
 0x2bc   :  { %v2379_v10 = vadd.f32 %v2378_v58, %v10915_v8  ;;  %v2442_v16 = vadd.f32 %v2441_v5, %v10916_v14  ;;  %v10917_v3 = vld [vmem:[#allocation204_spill] sm:$0xff]  ;;  %v2109_v12 = vmul.f32 %v10919_v28, %v10919_v28  ;;  %v10920_v62 = vld [vmem:[#allocation441_spill] sm:$0xff]  ;;  %v10921_v29 = vld [vmem:[#allocation442_spill] sm:$0xff] }
 0x2bd   :  { %v2632_v46 = vsel %vm73_vm0, %v10917_v3, 0.0  ;;  %v10918_v40 = vld [vmem:[#allocation140_spill] sm:$0xff]  ;;  %v2505_v31 = vadd.f32 %v2504_v49, %v10920_v62  ;;  %v2568_v54 = vadd.f32 %v2567_v17, %v10921_v29  ;;  %v10922_v27 = vld [vmem:[#allocation451_spill] sm:$0xff]  ;;  %v10923_v53 = vld [vmem:[#allocation141_spill] sm:$0xff] }
 0x2be   :  { %v2108_v13 = vmul.f32 %v10918_v40, %v10918_v40  ;;  %v2110_v37 = vmul.f32 %v10922_v27, %v10922_v27  ;;  %v2111_v63 = vmul.f32 %v10923_v53, %v10923_v53  ;;  %v10924_v41 = vld [vmem:[#allocation452_spill] sm:$0xff]  ;;  %v2633_v61 = vadd.f32 %v2632_v46, %v2631_v7  ;;  %v10925_v23 = vld [vmem:[#allocation453_spill] sm:$0xff]  ;;  %v10926_v42 = vld [vmem:[#allocation142_spill] sm:$0xff] }
 0x2bf   :  { %v2112_v21 = vmul.f32 %v10924_v41, %v10924_v41  ;;  %v2113_v22 = vmul.f32 %v10925_v23, %v10925_v23  ;;  %v2115_v39 = vmul.f32 %v10926_v42, %v10926_v42  ;;  %v10927_v20 = vld [vmem:[#allocation444_spill] sm:$0xff]  ;;  %v10928_v50 = vld [vmem:[#allocation445_spill] sm:$0xff]  ;;  %v10929_v59 = vld [vmem:[#allocation446_spill] sm:$0xff]  ;;  %v2443_v48 = vadd.f32 %v2442_v16, %v2103_v24 }
 0x2c0   :  { %v2191_v9 = vadd.f32 %v2190_v38, %v10927_v20  ;;  %v2254_v32 = vadd.f32 %v2253_v11, %v10928_v50  ;;  %v2317_v25 = vadd.f32 %v2316_v15, %v10929_v59  ;;  %v10930_v52 = vld [vmem:[#allocation458_spill] sm:$0xff]  ;;  %v10931_v57 = vld [vmem:[#allocation213_spill] sm:$0xff]  ;;  %v10933_v56 = vld [vmem:[#allocation455_spill] sm:$0xff]  ;;  %v2506_v51 = vadd.f32 %v2505_v31, %v2104_v2 }
 0x2c1   :  { %v2380_v1 = vadd.f32 %v2379_v10, %v10930_v52  ;;  %v2634_v43 = vsel %vm73_vm0, %v10931_v57, 0.0  ;;  %v10932_v36 = vld [vmem:[#allocation454_spill] sm:$0xff]  ;;  %v2117_v26 = vmul.f32 %v10933_v56, %v10933_v56  ;;  %v2569_v47 = vadd.f32 %v2568_v54, %v2105_v6  ;;  %v394_v58 = vld [vmem:[%s9298_s0 + $0x9f8] sm:$0xff]  ;;  %v10934_v33 = vld [vmem:[#allocation144_spill] sm:$0xff] }
 0x2c2   :  { %v2116_v35 = vmul.f32 %v10932_v36, %v10932_v36  ;;  %v2118_v5 = vmul.f32 %v10934_v33, %v10934_v33  ;;  %v10935_v45 = vld [vmem:[#allocation456_spill] sm:$0xff]  ;;  %v2635_v60 = vadd.f32 %v2634_v43, %v2633_v61  ;;  %v10936_v24 = vld [vmem:[#allocation222_spill] sm:$0xff]  ;;  %v402_v44 = vld [vmem:[%s9298_s0 + $0xa38] sm:$0xff]  ;;  %v2192_v6 = vadd.f32 %v2191_v9, %v2107_v55 }
 0x2c3   :  { %v2119_v49 = vmul.f32 %v10935_v45, %v10935_v45  ;;  %v2636_v34 = vsel %vm73_vm0, %v10936_v24, 0.0  ;;  %v906_v2 = vld [vmem:[%s9299_s1 + $0x9f8] sm:$0xff]  ;;  %v2255_v0 = vadd.f32 %v2254_v32, %v2108_v13  ;;  %v10938_v4 = vld [vmem:[#allocation231_spill] sm:$0xff]  ;;  %v2318_v30 = vadd.f32 %v2317_v25, %v2109_v12  ;;  %v10940_v3 = vld [vmem:[#allocation240_spill] sm:$0xff] }
 0x2c4   :  { %v914_v17 = vld [vmem:[%s9299_s1 + $0xa38] sm:$0xff]  ;;  %v2638_v38 = vsel %vm73_vm0, %v10938_v4, 0.0  ;;  %v2381_v11 = vadd.f32 %v2380_v1, %v2110_v37  ;;  %v2444_v19 = vadd.f32 %v2443_v48, %v2111_v63  ;;  %v2637_v15 = vadd.f32 %v2636_v34, %v2635_v60 }
 0x2c5   :  { %v10937_v7 = vld [vmem:[#allocation457_spill] sm:$0xff]  ;;  %v2507_v14 = vadd.f32 %v2506_v51, %v2112_v21  ;;  %v2570_v16 = vadd.f32 %v2569_v47, %v2113_v22  ;;  %v2640_v46 = vsel %vm73_vm0, %v10940_v3, 0.0  ;;  %v1418_v40 = vsub.f32 %v394_v58, %v906_v2  ;;  %v10943_v22 = vld [vmem:[#allocation288_spill] sm:$0xff] }
 0x2c6   :  { %v2120_v18 = vmul.f32 %v10937_v7, %v10937_v7  ;;  %v10939_v8 = vld [vmem:[#allocation145_spill] sm:$0xff]  ;;  %v1426_v13 = vsub.f32 %v402_v44, %v914_v17  ;;  %v2639_v28 = vadd.f32 %v2638_v38, %v2637_v15  ;;  %v9113_v27 = vadd.f32 %v2192_v6, %v2115_v39  ;;  %v10944_v39 = vld [vmem:[#allocation258_spill] sm:$0xff] }
 0x2c7   :  { %v2121_v10 = vmul.f32 %v10939_v8, %v10939_v8  ;;  %v410_v55 = vld [vmem:[%s9298_s0 + $0xa78] sm:$0xff]  ;;  %v9115_v37 = vadd.f32 %v2255_v0, %v2116_v35  ;;  %v9119_v41 = vadd.f32 %v2318_v30, %v2117_v26  ;;  %v9121_v21 = vadd.f32 %v2381_v11, %v2118_v5 }
 0x2c8   :  { %v418_v12 = vld [vmem:[%s9298_s0 + $0xab8] sm:$0xff]  ;;  %v9123_v61 = vadd.f32 %v2444_v19, %v2119_v49  ;;  %v2641_v23 = vadd.f32 %v2640_v46, %v2639_v28  ;;  %v1922_v42 = vmul.f32 %v10943_v22, %v10943_v22  ;;  %v9127_v20 = vadd.f32 %v2507_v14, %v2120_v18 }
 0x2c9   :  { %v922_v62 = vld [vmem:[%s9299_s1 + $0xa78] sm:$0xff]  ;;  %v9129_v9 = vadd.f32 %v2570_v16, %v2121_v10  ;;  %v2644_v50 = vsel %vm73_vm0, %v10944_v39, 0.0  ;;  %v1930_v52 = vmul.f32 %v1418_v40, %v1418_v40  ;;  %v1938_v36 = vmul.f32 %v1426_v13, %v1426_v13 }
 0x2ca   :  { %v930_v31 = vld [vmem:[%s9299_s1 + $0xab8] sm:$0xff]  ;;  %v1434_v32 = vsub.f32 %v410_v55, %v922_v62  ;;  %v2648_v35 = vsel %vm73_vm0, %v1922_v42, 0.0 }
 0x2cb   :  { %v10941_v29 = vld [vmem:[#allocation281_spill] sm:$0xff]  ;;  %v1442_v59 = vsub.f32 %v418_v12, %v930_v31  ;;  %v2650_v33 = vsel %vm73_vm0, %v1930_v52, 0.0  ;;  %v2652_v34 = vsel %vm73_vm0, %v1938_v36, 0.0 }
 0x2cc   :  { %v1914_v54 = vmul.f32 %v10941_v29, %v10941_v29  ;;  %v10942_v53 = vld [vmem:[#allocation249_spill] sm:$0xff]  ;;  %v1946_v58 = vmul.f32 %v1434_v32, %v1434_v32 }
 0x2cd   :  { %v2642_v63 = vsel %vm73_vm0, %v10942_v53, 0.0  ;;  %v426_v48 = vld [vmem:[%s9298_s0 + $0xaf8] sm:$0xff]  ;;  %v1954_v24 = vmul.f32 %v1442_v59, %v1442_v59 }
 0x2ce   :  { %v2643_v25 = vadd.f32 %v2642_v63, %v2641_v23  ;;  %v2646_v1 = vsel %vm73_vm0, %v1914_v54, 0.0  ;;  %v938_v57 = vld [vmem:[%s9299_s1 + $0xaf8] sm:$0xff]  ;;  %v2654_v6 = vsel %vm73_vm0, %v1946_v58, 0.0 }
 0x2cf   :  { %v434_v56 = vld [vmem:[%s9298_s0 + $0xb38] sm:$0xff]  ;;  %v1450_v47 = vsub.f32 %v426_v48, %v938_v57  ;;  %v2656_v19 = vsel %vm73_vm0, %v1954_v24, 0.0 }
 0x2d0   :  { %v2645_v43 = vadd.f32 %v2644_v50, %v2643_v25  ;;  %v946_v26 = vld [vmem:[%s9299_s1 + $0xb38] sm:$0xff] }
 0x2d1   :  { %v442_v5 = vld [vmem:[%s9298_s0 + $0xb78] sm:$0xff]  ;;  %v1458_v60 = vsub.f32 %v434_v56, %v946_v26  ;;  %v1962_v18 = vmul.f32 %v1450_v47, %v1450_v47 }
 0x2d2   :  { %v2647_v51 = vadd.f32 %v2646_v1, %v2645_v43  ;;  %v954_v45 = vld [vmem:[%s9299_s1 + $0xb78] sm:$0xff] }
 0x2d3   :  { %v450_v44 = vld [vmem:[%s9298_s0 + $0xbb8] sm:$0xff]  ;;  %v1466_v7 = vsub.f32 %v442_v5, %v954_v45  ;;  %v1970_v11 = vmul.f32 %v1458_v60, %v1458_v60  ;;  %v2658_v3 = vsel %vm73_vm0, %v1962_v18, 0.0 }
 0x2d4   :  { %v2649_v49 = vadd.f32 %v2648_v35, %v2647_v51  ;;  %v962_v2 = vld [vmem:[%s9299_s1 + $0xbb8] sm:$0xff] }
 0x2d5   :  { %v458_v0 = vld [vmem:[%s9298_s0 + $0xbf8] sm:$0xff]  ;;  %v1474_v30 = vsub.f32 %v450_v44, %v962_v2  ;;  %v1978_v16 = vmul.f32 %v1466_v7, %v1466_v7  ;;  %v2660_v12 = vsel %vm73_vm0, %v1970_v11, 0.0 }
 0x2d6   :  { %v2651_v17 = vadd.f32 %v2650_v33, %v2649_v49  ;;  %v970_v4 = vld [vmem:[%s9299_s1 + $0xbf8] sm:$0xff] }
 0x2d7   :  { %v466_v15 = vld [vmem:[%s9298_s0 + $0xc38] sm:$0xff]  ;;  %v1482_v14 = vsub.f32 %v458_v0, %v970_v4  ;;  %v1986_v28 = vmul.f32 %v1474_v30, %v1474_v30  ;;  %v2662_v63 = vsel %vm73_vm0, %v1978_v16, 0.0 }
 0x2d8   :  { %v2653_v38 = vadd.f32 %v2652_v34, %v2651_v17  ;;  %v978_v8 = vld [vmem:[%s9299_s1 + $0xc38] sm:$0xff] }
 0x2d9   :  { %v474_v46 = vld [vmem:[%s9298_s0 + $0xc78] sm:$0xff]  ;;  %v1490_v13 = vsub.f32 %v466_v15, %v978_v8  ;;  %v1994_v53 = vmul.f32 %v1482_v14, %v1482_v14  ;;  %v2664_v32 = vsel %vm73_vm0, %v1986_v28, 0.0 }
 0x2da   :  { %v2655_v10 = vadd.f32 %v2654_v6, %v2653_v38  ;;  %v986_v55 = vld [vmem:[%s9299_s1 + $0xc78] sm:$0xff] }
 0x2db   :  { %v482_v62 = vld [vmem:[%s9298_s0 + $0xcb8] sm:$0xff]  ;;  %v1498_v54 = vsub.f32 %v474_v46, %v986_v55  ;;  %v2002_v50 = vmul.f32 %v1490_v13, %v1490_v13  ;;  %v2666_v57 = vsel %vm73_vm0, %v1994_v53, 0.0 }
 0x2dc   :  { %v2657_v40 = vadd.f32 %v2656_v19, %v2655_v10  ;;  %v994_v31 = vld [vmem:[%s9299_s1 + $0xcb8] sm:$0xff] }
 0x2dd   :  { %v490_v23 = vld [vmem:[%s9298_s0 + $0xcf8] sm:$0xff]  ;;  %v1506_v39 = vsub.f32 %v482_v62, %v994_v31  ;;  %v2010_v48 = vmul.f32 %v1498_v54, %v1498_v54  ;;  %v2668_v51 = vsel %vm73_vm0, %v2002_v50, 0.0 }
 0x2de   :  { %v2659_v29 = vadd.f32 %v2658_v3, %v2657_v40  ;;  %v1002_v22 = vld [vmem:[%s9299_s1 + $0xcf8] sm:$0xff] }
 0x2df   :  { %v498_v59 = vld [vmem:[%s9298_s0 + $0xd38] sm:$0xff]  ;;  %v1514_v1 = vsub.f32 %v490_v23, %v1002_v22  ;;  %v2018_v26 = vmul.f32 %v1506_v39, %v1506_v39  ;;  %v2670_v49 = vsel %vm73_vm0, %v2010_v48, 0.0 }
 0x2e0   :  { %v2661_v42 = vadd.f32 %v2660_v12, %v2659_v29  ;;  %v1010_v25 = vld [vmem:[%s9299_s1 + $0xd38] sm:$0xff] }
 0x2e1   :  { %v506_v43 = vld [vmem:[%s9298_s0 + $0xd78] sm:$0xff]  ;;  %v1522_v56 = vsub.f32 %v498_v59, %v1010_v25  ;;  %v2026_v45 = vmul.f32 %v1514_v1, %v1514_v1  ;;  %v2672_v17 = vsel %vm73_vm0, %v2018_v26, 0.0 }
 0x2e2   :  { %v2663_v52 = vadd.f32 %v2662_v63, %v2661_v42  ;;  %v1018_v36 = vld [vmem:[%s9299_s1 + $0xd78] sm:$0xff] }
 0x2e3   :  { %v514_v47 = vld [vmem:[%s9298_s0 + $0xdb8] sm:$0xff]  ;;  %v1530_v5 = vsub.f32 %v506_v43, %v1018_v36  ;;  %v2034_v2 = vmul.f32 %v1522_v56, %v1522_v56  ;;  %v2674_v38 = vsel %vm73_vm0, %v2026_v45, 0.0 }
 0x2e4   :  { %v2665_v35 = vadd.f32 %v2664_v32, %v2663_v52  ;;  %v1026_v58 = vld [vmem:[%s9299_s1 + $0xdb8] sm:$0xff] }
 0x2e5   :  { %v522_v60 = vld [vmem:[%s9298_s0 + $0xdf8] sm:$0xff]  ;;  %v1538_v44 = vsub.f32 %v514_v47, %v1026_v58  ;;  %v2042_v4 = vmul.f32 %v1530_v5, %v1530_v5  ;;  %v2676_v10 = vsel %vm73_vm0, %v2034_v2, 0.0 }
 0x2e6   :  { %v2667_v33 = vadd.f32 %v2666_v57, %v2665_v35  ;;  %v1034_v24 = vld [vmem:[%s9299_s1 + $0xdf8] sm:$0xff] }
 0x2e7   :  { %v530_v7 = vld [vmem:[%s9298_s0 + $0xe38] sm:$0xff]  ;;  %v1546_v0 = vsub.f32 %v522_v60, %v1034_v24  ;;  %v2050_v8 = vmul.f32 %v1538_v44, %v1538_v44  ;;  %v2678_v40 = vsel %vm73_vm0, %v2042_v4, 0.0  ;;  %v2727_v24 = vadd.f32 %v9115_v37, %v9113_v27 }
 0x2e8   :  { %v2669_v34 = vadd.f32 %v2668_v51, %v2667_v33  ;;  %v1042_v18 = vld [vmem:[%s9299_s1 + $0xe38] sm:$0xff] }
 0x2e9   :  { %v538_v30 = vld [vmem:[%s9298_s0 + $0xe78] sm:$0xff]  ;;  %v1554_v15 = vsub.f32 %v530_v7, %v1042_v18  ;;  %v2058_v55 = vmul.f32 %v1546_v0, %v1546_v0  ;;  %v2680_v29 = vsel %vm73_vm0, %v2050_v8, 0.0 }
 0x2ea   :  { %v2671_v6 = vadd.f32 %v2670_v49, %v2669_v34  ;;  %v1050_v11 = vld [vmem:[%s9299_s1 + $0xe78] sm:$0xff] }
 0x2eb   :  { %v546_v14 = vld [vmem:[%s9298_s0 + $0xeb8] sm:$0xff]  ;;  %v1562_v46 = vsub.f32 %v538_v30, %v1050_v11  ;;  %v2066_v31 = vmul.f32 %v1554_v15, %v1554_v15  ;;  %v2682_v42 = vsel %vm73_vm0, %v2058_v55, 0.0 }
 0x2ec   :  { %v2673_v19 = vadd.f32 %v2672_v17, %v2671_v6  ;;  %v1058_v16 = vld [vmem:[%s9299_s1 + $0xeb8] sm:$0xff]  ;;  %v2728_v6 = vadd.f32 %v2727_v24, %v9119_v41 }
 0x2ed   :  { %v554_v13 = vld [vmem:[%s9298_s0 + $0xef8] sm:$0xff]  ;;  %v1570_v62 = vsub.f32 %v546_v14, %v1058_v16  ;;  %v2074_v22 = vmul.f32 %v1562_v46, %v1562_v46  ;;  %v2684_v52 = vsel %vm73_vm0, %v2066_v31, 0.0 }
 0x2ee   :  { %v2675_v3 = vadd.f32 %v2674_v38, %v2673_v19  ;;  %v1066_v28 = vld [vmem:[%s9299_s1 + $0xef8] sm:$0xff]  ;;  %v2729_v11 = vadd.f32 %v2728_v6, %v9121_v21 }
 0x2ef   :  { %v562_v54 = vld [vmem:[%s9298_s0 + $0xf38] sm:$0xff]  ;;  %v1578_v23 = vsub.f32 %v554_v13, %v1066_v28  ;;  %v2082_v25 = vmul.f32 %v1570_v62, %v1570_v62  ;;  %v2686_v35 = vsel %vm73_vm0, %v2074_v22, 0.0 }
 0x2f0   :  { %v2677_v12 = vadd.f32 %v2676_v10, %v2675_v3  ;;  %v1074_v53 = vld [vmem:[%s9299_s1 + $0xf38] sm:$0xff]  ;;  %v2730_v15 = vadd.f32 %v2729_v11, %v9123_v61 }
 0x2f1   :  { %v570_v39 = vld [vmem:[%s9298_s0 + $0xf78] sm:$0xff]  ;;  %v1586_v59 = vsub.f32 %v562_v54, %v1074_v53  ;;  %v2090_v36 = vmul.f32 %v1578_v23, %v1578_v23  ;;  %v2688_v33 = vsel %vm73_vm0, %v2082_v25, 0.0 }
 0x2f2   :  { %v2679_v63 = vadd.f32 %v2678_v40, %v2677_v12  ;;  %v1082_v50 = vld [vmem:[%s9299_s1 + $0xf78] sm:$0xff]  ;;  %v2731_v10 = vadd.f32 %v2730_v15, %v9127_v20 }
 0x2f3   :  { %v578_v1 = vld [vmem:[%s9298_s0 + $0xfb8] sm:$0xff]  ;;  %v1594_v43 = vsub.f32 %v570_v39, %v1082_v50  ;;  %v2098_v58 = vmul.f32 %v1586_v59, %v1586_v59  ;;  %v2690_v60 = vsel %vm73_vm0, %v2090_v36, 0.0 }
 0x2f4   :  { %v2681_v32 = vadd.f32 %v2680_v29, %v2679_v63  ;;  %v1090_v48 = vld [vmem:[%s9299_s1 + $0xfb8] sm:$0xff]  ;;  %v2732_v41 = vadd.f32 %v2731_v10, %v9129_v9 }
 0x2f5   :  { %v586_v56 = vld [vmem:[%s9298_s0 + $0xff8] sm:$0xff]  ;;  %v1602_v47 = vsub.f32 %v578_v1, %v1090_v48  ;;  %v2106_v49 = vmul.f32 %v1594_v43, %v1594_v43  ;;  %v2692_v2 = vsel %vm73_vm0, %v2098_v58, 0.0 }
 0x2f6   :  { %v2683_v57 = vadd.f32 %v2682_v42, %v2681_v32  ;;  %v1098_v26 = vld [vmem:[%s9299_s1 + $0xff8] sm:$0xff] }
 0x2f7   :  { %v1610_v45 = vsub.f32 %v586_v56, %v1098_v26  ;;  %v2114_v44 = vmul.f32 %v1602_v47, %v1602_v47  ;;  %v2694_v18 = vsel %vm73_vm0, %v2106_v49, 0.0  ;;  %v2130_v27 = vld [vmem:[#allocation2 + $0x38] sm:$0xff] }
 0x2f8   :  { %v2685_v51 = vadd.f32 %v2684_v52, %v2683_v57 }
 0x2f9   :  { %v2122_v7 = vmul.f32 %v1610_v45, %v1610_v45  ;;  %v2696_v4 = vsel %vm73_vm0, %v2114_v44, 0.0 }
 0x2fa   :  { %v2687_v5 = vadd.f32 %v2686_v35, %v2685_v51 }
 0x2fb   :  { %v2698_v30 = vsel %vm73_vm0, %v2122_v7, 0.0 }
 0x2fc   :  { %v2689_v34 = vadd.f32 %v2688_v33, %v2687_v5 }
 0x2fe   :  { %v2691_v17 = vadd.f32 %v2690_v60, %v2689_v34 }
 0x300   :  { %v2693_v0 = vadd.f32 %v2692_v2, %v2691_v17 }
 0x302   :  { %v2695_v38 = vadd.f32 %v2694_v18, %v2693_v0 }
 0x304   :  { %v2697_v19 = vadd.f32 %v2696_v4, %v2695_v38 }
 0x306   :  { %v2699_v37 = vadd.f32 %v2698_v30, %v2697_v19 }
 0x308   :  { %v2707_v8 = vadd.f32 %v2699_v37, %v2130_v27 }
 0x30a   :  { %2715 = vst.msk [vmem:[#allocation2 + $0x38] sm:$0xff] %vm73_vm0, %v2707_v8 }
 0x311   :  { %v2726_v14 = vld [vmem:[#allocation2 + $0x38] sm:$0xff] }
 0x312   :  { %v2733_v16 = vsel %vm73_vm0, %v2726_v14, 0.0 }
 0x313   :  { %v2734_v3 = vadd.f32 %v2733_v16, %v2732_v41 }
 0x315   :  { %2735 = vadd.xlane.f32.xlu0 %v2734_v3 }
 0x39e   :  { %v2736_v46 = vpop.xlane.xlu0 %2735 }
 0x39f   :  { %v2737_v55 = vrot.slane %v2736_v46, 4 }
 0x3a1   :  { %v2738_v21 = vadd.f32 %v2737_v55, %v2736_v46 }
 0x3a3   :  { %v2739_v40 = vrot.slane %v2738_v21, 2 }
 0x3a5   :  { %v2740_v13 = vadd.f32 %v2739_v40, %v2738_v21 }
 0x3a7   :  { %v2741_v28 = vrot.slane %v2740_v13, 1 }
 0x3a9   :  { %v2742_v12 = vadd.f32 %v2741_v28, %v2740_v13 }
 0x3ab   :  { %2772 = vpush %v2742_v12 }
 0x3dc   :  { %s2773_s0 = spop %2772 }
 0x3dd   :  { %s2744_s1 = smul.f32 1.2207032e-07, %s2773_s0 }
 0x3df   :  { %2746 = sst [smem:[#allocation3]] %s2744_s1 }
 0x3e0   :  { %2754 = dma.smem_to_hbm %s2787_s13, 16, %s9300_s2, [#allocation4]  }
 0x3e1   :  { %2784 = dma.done.wait [#allocation4], 16  }
 0x3e2   :  { %2785 = vsyncadd [#allocation4], 4294967280 }
 0x3e3   :  { %2758 = sfence }
 0x3e4   :  { %2759 = vsyncpa [#allocation4], 1 }

</bundles_post_ra>
